<compile_context>
chip_gen: v5e
topology: v5e:2x2
jax: 0.10.0
libtpu: 0.0.40
codegen_flags: <defaults>
</compile_context>

<pallas_src>
import functools
import math

import jax
import jax.numpy as jnp
from jax.experimental import pallas as pl
from jax.experimental.pallas import tpu as pltpu


# ------------------------------ fused kernel --------------------------------

def _fused_forward_kernel(xf_ref, pe_ref, enc_w_ref, enc_b_ref,
                          in_w_ref, in_b_ref, out_w_ref, out_b_ref,
                          ln1_g_ref, ln1_b_ref,
                          ffn_w1_ref, ffn_b1_ref, ffn_w2_ref, ffn_b2_ref,
                          ln2_g_ref, ln2_b_ref,
                          fus_w_ref, fus_b_ref, fc_w_ref, fc_b_ref,
                          out_ref, *, num_layers, nhead, batch, seq):
    f32 = jnp.float32
    bf16 = jnp.bfloat16
    D = pe_ref.shape[-1]
    Dh = D // nhead
    M = batch * seq
    scale = 1.0 / math.sqrt(Dh)

    def mm(a, w, b=None):
        # bf16 MXU operands, f32 accumulation.
        y = jnp.dot(a.astype(bf16), w.astype(bf16), preferred_element_type=f32)
        return y if b is None else y + b

    def layernorm(y, g, b):
        mu = jnp.mean(y, axis=-1, keepdims=True)
        var = jnp.mean(jnp.square(y - mu), axis=-1, keepdims=True)
        return (y - mu) * jax.lax.rsqrt(var + 1e-5) * g + b

    # --- view encoder stand-in (linear + ReLU) + positional encoding ---
    # TODO(synk): encoders.ViewEncoder (external EfficientNet backbone) is unavailable;
    # stand-in is a deterministic linear+ReLU projection to view_enc_size.
    h0 = jnp.maximum(mm(xf_ref[...], enc_w_ref[...], enc_b_ref[...]), 0.0)     # (M, D)
    x = (h0.reshape(batch, seq, D) + pe_ref[...][None, :, :]).reshape(M, D)

    # --- TransformerEncoder layers (post-norm, ReLU FFN, dropout = identity) ---
    for l in range(num_layers):
        qkv = mm(x, in_w_ref[l], in_b_ref[l])                                  # (M, 3D)
        q = qkv[:, :D].reshape(batch, seq, D)
        k = qkv[:, D:2 * D].reshape(batch, seq, D)
        v = qkv[:, 2 * D:].reshape(batch, seq, D)

        heads = []
        for h in range(nhead):
            sl = slice(h * Dh, (h + 1) * Dh)
            qh, kh, vh = q[:, :, sl], k[:, :, sl], v[:, :, sl]                 # (B, S, Dh)
            s = jax.lax.dot_general(qh, kh, (((2,), (2,)), ((0,), (0,))),
                                    preferred_element_type=f32) * scale        # (B, S, S)
            s = s - jnp.max(s, axis=-1, keepdims=True)
            p = jnp.exp(s)
            p = p * pl.reciprocal(jnp.sum(p, axis=-1, keepdims=True), approx=True)
            heads.append(jax.lax.dot_general(p, vh, (((2,), (1,)), ((0,), (0,))),
                                             preferred_element_type=f32))      # (B, S, Dh)
        # heads concatenated along lanes -> lane-dense (M, D) without any XLA transpose
        attn = jnp.concatenate(heads, axis=-1).reshape(M, D)
        attn = mm(attn, out_w_ref[l], out_b_ref[l])
        x = layernorm(x + attn, ln1_g_ref[l], ln1_b_ref[l])

        ff = jnp.maximum(mm(x, ffn_w1_ref[l], ffn_b1_ref[l]), 0.0)             # (M, FF)
        ff = mm(ff, ffn_w2_ref[l], ffn_b2_ref[l])                              # (M, D)
        x = layernorm(x + ff, ln2_g_ref[l], ln2_b_ref[l])

    # --- AttentionFusion: softmax over seq (per batch), weighted sum ---
    scores = jnp.dot(x, fus_w_ref[...], preferred_element_type=f32) + fus_b_ref[...]  # (M, 1)
    s3 = scores.reshape(batch, seq, 1)
    s3 = s3 - jnp.max(s3, axis=1, keepdims=True)
    p3 = jnp.exp(s3)
    p3 = p3 * pl.reciprocal(jnp.sum(p3, axis=1, keepdims=True), approx=True)
    fused = jnp.sum(x.reshape(batch, seq, D) * p3, axis=1)                     # (B, D)

    # --- final fc (lane-dense (B, OUT) store) ---
    out_ref[...] = mm(fused, fc_w_ref[...], fc_b_ref[...])


# ------------------------------ wrapper / glue -------------------------------

@functools.partial(jax.jit, static_argnames=("nhead", "num_layers"))
def forward(params, x, pe, *, nhead, num_layers):
    B, S = x.shape[0], x.shape[1]
    xf = x.reshape(B * S, -1)                      # row r = b*S + s
    D = pe.shape[-1]
    FF = params["ffn_w1"].shape[-1]
    OUT = params["fc_w"].shape[-1]
    IN = xf.shape[-1]
    M = B * S

    kernel = functools.partial(_fused_forward_kernel,
                               num_layers=num_layers, nhead=nhead,
                               batch=B, seq=S)

    def fs(a):  # whole array as one VMEM block (gridless call)
        return pl.BlockSpec(a.shape, lambda *_: (0,) * a.ndim)

    inputs = (xf, pe, params["enc_w"], params["enc_b"],
              params["in_w"], params["in_b"], params["out_w"], params["out_b"],
              params["ln1_g"], params["ln1_b"],
              params["ffn_w1"], params["ffn_b1"], params["ffn_w2"], params["ffn_b2"],
              params["ln2_g"], params["ln2_b"],
              params["fus_w"], params["fus_b"], params["fc_w"], params["fc_b"])

    per_layer_flops = (2 * M * D * 3 * D + 2 * M * D * D + 4 * M * D * FF
                       + 4 * B * nhead * S * S * (D // nhead))
    flops = 2 * M * IN * D + num_layers * per_layer_flops + 2 * M * D + 2 * B * D * OUT
    transcendentals = num_layers * (B * nhead * S * S + 2 * M) + M
    bytes_accessed = sum(int(a.size) * a.dtype.itemsize for a in inputs) + B * OUT * 4

    return pl.pallas_call(
        kernel,
        out_shape=jax.ShapeDtypeStruct((B, OUT), jnp.float32),
        in_specs=[fs(a) for a in inputs],
        out_specs=pl.BlockSpec((B, OUT), lambda *_: (0, 0)),
        compiler_params=pltpu.CompilerParams(vmem_limit_bytes=32 * 1024 * 1024),
        cost_estimate=pl.CostEstimate(flops=flops,
                                      transcendentals=transcendentals,
                                      bytes_accessed=bytes_accessed),
    )(*inputs)


def positional_encoding(S, D):
    """Same formula as generate_positional_encodings(); built once, outside the kernel."""
    pos = jnp.arange(S, dtype=jnp.float32)[:, None]
    div_term = jnp.exp(jnp.arange(0, D, 2, dtype=jnp.float32) * (-jnp.log(10000.0) / D))
    pe = jnp.zeros((S, D), dtype=jnp.float32)
    pe = pe.at[:, 0::2].set(jnp.sin(pos * div_term))
    pe = pe.at[:, 1::2].set(jnp.cos(pos * div_term))
    return pe


# ------------------------------ init & driver -------------------------------

def init_params(key, in_feats, D, FF, num_layers, out_feats):
    wdt = jnp.bfloat16   # matmul weights in bf16 (halves HBM->VMEM bytes, feeds bf16 MXU)

    def lin(k, fan_in, shape, dtype=wdt):
        return (jax.random.normal(k, shape, dtype=jnp.float32) / math.sqrt(fan_in)).astype(dtype)

    keys = jax.random.split(key, 8)
    L = num_layers
    return {
        "enc_w": lin(keys[0], in_feats, (in_feats, D)),
        "enc_b": jnp.zeros((1, D), jnp.float32),
        "in_w": lin(keys[1], D, (L, D, 3 * D)),         # stored as (K, N) = W^T, q|k|v chunks
        "in_b": jnp.zeros((L, 1, 3 * D), jnp.float32),
        "out_w": lin(keys[2], D, (L, D, D)),
        "out_b": jnp.zeros((L, 1, D), jnp.float32),
        "ln1_g": jnp.ones((L, 1, D), jnp.float32),
        "ln1_b": jnp.zeros((L, 1, D), jnp.float32),
        "ffn_w1": lin(keys[3], D, (L, D, FF)),
        "ffn_b1": jnp.zeros((L, 1, FF), jnp.float32),
        "ffn_w2": lin(keys[4], FF, (L, FF, D)),
        "ffn_b2": jnp.zeros((L, 1, D), jnp.float32),
        "ln2_g": jnp.ones((L, 1, D), jnp.float32),
        "ln2_b": jnp.zeros((L, 1, D), jnp.float32),
        "fus_w": lin(keys[5], D, (D, 1), jnp.float32),
        "fus_b": jnp.zeros((1, 1), jnp.float32),
        "fc_w": lin(keys[6], D, (D, out_feats)),
        "fc_b": jnp.zeros((1, out_feats), jnp.float32),
    }


if __name__ == "__main__":
    # small shapes consistent with the module defaults
    B, S, C, H, W = 2, 8, 3, 16, 16        # batch, num_views, RGB, 16x16 views
    D = 128                                # view_enc_size == final_view_enc_size
    FF = 2048                              # PyTorch TransformerEncoderLayer default
    NHEAD = 8
    NUM_LAYERS = 3
    OUT = 1024                             # angular_feat_size

    key = jax.random.PRNGKey(0)
    kp, kx = jax.random.split(key)
    params = init_params(kp, C * H * W, D, FF, NUM_LAYERS, OUT)
    x = jax.random.normal(kx, (B, S, C, H, W), dtype=jnp.float32)
    pe = positional_encoding(S, D)

    out = forward(params, x, pe, nhead=NHEAD, num_layers=NUM_LAYERS)
    out = jax.block_until_ready(out)
    assert out.shape == (B, OUT) and out.dtype == jnp.float32
    assert bool(jnp.all(jnp.isfinite(out)))
    print("KERNEL_OK")
</pallas_src>

<mosaic_0001>
module attributes {stable_mosaic.version = 11 : i64} {
  func.func @_fused_forward_kernel(%arg0: memref<16x768xf32, #tpu.memory_space<vmem>>, %arg1: memref<8x128xf32, #tpu.memory_space<vmem>>, %arg2: memref<768x128xbf16, #tpu.memory_space<vmem>>, %arg3: memref<1x128xf32, #tpu.memory_space<vmem>>, %arg4: memref<3x128x384xbf16, #tpu.memory_space<vmem>>, %arg5: memref<3x1x384xf32, #tpu.memory_space<vmem>>, %arg6: memref<3x128x128xbf16, #tpu.memory_space<vmem>>, %arg7: memref<3x1x128xf32, #tpu.memory_space<vmem>>, %arg8: memref<3x1x128xf32, #tpu.memory_space<vmem>>, %arg9: memref<3x1x128xf32, #tpu.memory_space<vmem>>, %arg10: memref<3x128x2048xbf16, #tpu.memory_space<vmem>>, %arg11: memref<3x1x2048xf32, #tpu.memory_space<vmem>>, %arg12: memref<3x2048x128xbf16, #tpu.memory_space<vmem>>, %arg13: memref<3x1x128xf32, #tpu.memory_space<vmem>>, %arg14: memref<3x1x128xf32, #tpu.memory_space<vmem>>, %arg15: memref<3x1x128xf32, #tpu.memory_space<vmem>>, %arg16: memref<128x1xf32, #tpu.memory_space<vmem>>, %arg17: memref<1x1xf32, #tpu.memory_space<vmem>>, %arg18: memref<128x1024xbf16, #tpu.memory_space<vmem>>, %arg19: memref<1x1024xf32, #tpu.memory_space<vmem>>, %arg20: memref<2x1024xf32, #tpu.memory_space<vmem>>) attributes {dimension_semantics = [], scalar_prefetch = 0 : i64, scratch_operands = 0 : i64, tpu.core_type = #tpu.core_type<tc>} {
    %c0 = arith.constant 0 : index
    %c0_0 = arith.constant 0 : index
    %0 = vector.load %arg0[%c0, %c0_0] : memref<16x768xf32, #tpu.memory_space<vmem>>, vector<16x768xf32>
    %c0_1 = arith.constant 0 : index
    %c0_2 = arith.constant 0 : index
    %1 = vector.load %arg2[%c0_1, %c0_2] : memref<768x128xbf16, #tpu.memory_space<vmem>>, vector<768x128xbf16>
    %c0_3 = arith.constant 0 : index
    %c0_4 = arith.constant 0 : index
    %2 = vector.load %arg3[%c0_3, %c0_4] : memref<1x128xf32, #tpu.memory_space<vmem>>, vector<1x128xf32>
    %3 = arith.truncf %0 : vector<16x768xf32> to vector<16x768xbf16>
    %cst = arith.constant dense<0.000000e+00> : vector<16x128xf32>
    %4 = tpu.matmul %3, %1, %cst {dimension_numbers = #tpu.dot_dimension_numbers<[1], [0], [0], [1], [0, 0, 1, 1], [], []>} : vector<16x768xbf16>, vector<768x128xbf16>, vector<16x128xf32> -> vector<16x128xf32>
    %5 = vector.broadcast %2 : vector<1x128xf32> to vector<16x128xf32>
    %6 = arith.addf %4, %5 : vector<16x128xf32>
    %cst_5 = arith.constant 0.000000e+00 : f32
    %7 = vector.broadcast %cst_5 : f32 to vector<16x128xf32>
    %8 = arith.maximumf %6, %7 : vector<16x128xf32>
    %9 = vector.shape_cast %8 : vector<16x128xf32> to vector<2x8x128xf32>
    %c0_6 = arith.constant 0 : index
    %c0_7 = arith.constant 0 : index
    %10 = vector.load %arg1[%c0_6, %c0_7] : memref<8x128xf32, #tpu.memory_space<vmem>>, vector<8x128xf32>
    %11 = vector.shape_cast %10 : vector<8x128xf32> to vector<1x8x128xf32>
    %12 = vector.broadcast %11 : vector<1x8x128xf32> to vector<2x8x128xf32>
    %13 = arith.addf %9, %12 : vector<2x8x128xf32>
    %14 = vector.shape_cast %13 : vector<2x8x128xf32> to vector<16x128xf32>
    %c0_8 = arith.constant 0 : index
    %c0_9 = arith.constant 0 : index
    %c0_10 = arith.constant 0 : index
    %15 = vector.load %arg4[%c0_8, %c0_9, %c0_10] : memref<3x128x384xbf16, #tpu.memory_space<vmem>>, vector<1x128x384xbf16>
    %16 = vector.shape_cast %15 : vector<1x128x384xbf16> to vector<128x384xbf16>
    %c0_11 = arith.constant 0 : index
    %c0_12 = arith.constant 0 : index
    %c0_13 = arith.constant 0 : index
    %17 = vector.load %arg5[%c0_11, %c0_12, %c0_13] : memref<3x1x384xf32, #tpu.memory_space<vmem>>, vector<1x1x384xf32>
    %18 = vector.shape_cast %17 : vector<1x1x384xf32> to vector<1x384xf32>
    %19 = arith.truncf %14 : vector<16x128xf32> to vector<16x128xbf16>
    %cst_14 = arith.constant dense<0.000000e+00> : vector<16x384xf32>
    %20 = tpu.matmul %19, %16, %cst_14 {dimension_numbers = #tpu.dot_dimension_numbers<[1], [0], [0], [1], [0, 0, 1, 1], [], []>} : vector<16x128xbf16>, vector<128x384xbf16>, vector<16x384xf32> -> vector<16x384xf32>
    %21 = vector.broadcast %18 : vector<1x384xf32> to vector<16x384xf32>
    %22 = arith.addf %20, %21 : vector<16x384xf32>
    %23 = vector.extract_strided_slice %22 {offsets = [0, 0], sizes = [16, 128], strides = [1, 1]} : vector<16x384xf32> to vector<16x128xf32>
    %24 = vector.shape_cast %23 : vector<16x128xf32> to vector<2x8x128xf32>
    %25 = vector.extract_strided_slice %22 {offsets = [0, 128], sizes = [16, 128], strides = [1, 1]} : vector<16x384xf32> to vector<16x128xf32>
    %26 = vector.shape_cast %25 : vector<16x128xf32> to vector<2x8x128xf32>
    %27 = vector.extract_strided_slice %22 {offsets = [0, 256], sizes = [16, 128], strides = [1, 1]} : vector<16x384xf32> to vector<16x128xf32>
    %28 = vector.shape_cast %27 : vector<16x128xf32> to vector<2x8x128xf32>
    %29 = vector.extract_strided_slice %24 {offsets = [0, 0, 0], sizes = [2, 8, 16], strides = [1, 1, 1]} : vector<2x8x128xf32> to vector<2x8x16xf32>
    %30 = vector.extract_strided_slice %26 {offsets = [0, 0, 0], sizes = [2, 8, 16], strides = [1, 1, 1]} : vector<2x8x128xf32> to vector<2x8x16xf32>
    %31 = vector.extract_strided_slice %28 {offsets = [0, 0, 0], sizes = [2, 8, 16], strides = [1, 1, 1]} : vector<2x8x128xf32> to vector<2x8x16xf32>
    %cst_15 = arith.constant dense<0.000000e+00> : vector<2x8x8xf32>
    %32 = tpu.matmul %29, %30, %cst_15 {dimension_numbers = #tpu.dot_dimension_numbers<[2], [2], [1], [1], [0, 0, 0, 1, 1, 1], [0], [0]>} : vector<2x8x16xf32>, vector<2x8x16xf32>, vector<2x8x8xf32> -> vector<2x8x8xf32>
    %cst_16 = arith.constant 2.500000e-01 : f32
    %33 = vector.broadcast %cst_16 : f32 to vector<2x8x8xf32>
    %34 = arith.mulf %32, %33 : vector<2x8x8xf32>
    %cst_17 = arith.constant dense<0xFF800000> : vector<2x8xf32>
    %35 = vector.multi_reduction <maximumf>, %34, %cst_17 [2] : vector<2x8x8xf32> to vector<2x8xf32>
    %36 = vector.shape_cast %35 : vector<2x8xf32> to vector<2x8x1xf32>
    %37 = vector.broadcast %36 : vector<2x8x1xf32> to vector<2x8x8xf32>
    %38 = arith.subf %34, %37 : vector<2x8x8xf32>
    %39 = math.exp %38 : vector<2x8x8xf32>
    %cst_18 = arith.constant dense<0.000000e+00> : vector<2x8xf32>
    %40 = vector.multi_reduction <add>, %39, %cst_18 [2] : vector<2x8x8xf32> to vector<2x8xf32>
    %41 = vector.shape_cast %40 : vector<2x8xf32> to vector<2x8x1xf32>
    %42 = tpu.reciprocal %41 {approx = true} : vector<2x8x1xf32> -> vector<2x8x1xf32>
    %43 = vector.broadcast %42 : vector<2x8x1xf32> to vector<2x8x8xf32>
    %44 = arith.mulf %39, %43 : vector<2x8x8xf32>
    %cst_19 = arith.constant dense<0.000000e+00> : vector<2x8x16xf32>
    %45 = tpu.matmul %44, %31, %cst_19 {dimension_numbers = #tpu.dot_dimension_numbers<[2], [1], [1], [2], [0, 0, 0, 1, 1, 2], [0], [0]>} : vector<2x8x8xf32>, vector<2x8x16xf32>, vector<2x8x16xf32> -> vector<2x8x16xf32>
    %46 = vector.extract_strided_slice %24 {offsets = [0, 0, 16], sizes = [2, 8, 16], strides = [1, 1, 1]} : vector<2x8x128xf32> to vector<2x8x16xf32>
    %47 = vector.extract_strided_slice %26 {offsets = [0, 0, 16], sizes = [2, 8, 16], strides = [1, 1, 1]} : vector<2x8x128xf32> to vector<2x8x16xf32>
    %48 = vector.extract_strided_slice %28 {offsets = [0, 0, 16], sizes = [2, 8, 16], strides = [1, 1, 1]} : vector<2x8x128xf32> to vector<2x8x16xf32>
    %cst_20 = arith.constant dense<0.000000e+00> : vector<2x8x8xf32>
    %49 = tpu.matmul %46, %47, %cst_20 {dimension_numbers = #tpu.dot_dimension_numbers<[2], [2], [1], [1], [0, 0, 0, 1, 1, 1], [0], [0]>} : vector<2x8x16xf32>, vector<2x8x16xf32>, vector<2x8x8xf32> -> vector<2x8x8xf32>
    %cst_21 = arith.constant 2.500000e-01 : f32
    %50 = vector.broadcast %cst_21 : f32 to vector<2x8x8xf32>
    %51 = arith.mulf %49, %50 : vector<2x8x8xf32>
    %cst_22 = arith.constant dense<0xFF800000> : vector<2x8xf32>
    %52 = vector.multi_reduction <maximumf>, %51, %cst_22 [2] : vector<2x8x8xf32> to vector<2x8xf32>
    %53 = vector.shape_cast %52 : vector<2x8xf32> to vector<2x8x1xf32>
    %54 = vector.broadcast %53 : vector<2x8x1xf32> to vector<2x8x8xf32>
    %55 = arith.subf %51, %54 : vector<2x8x8xf32>
    %56 = math.exp %55 : vector<2x8x8xf32>
    %cst_23 = arith.constant dense<0.000000e+00> : vector<2x8xf32>
    %57 = vector.multi_reduction <add>, %56, %cst_23 [2] : vector<2x8x8xf32> to vector<2x8xf32>
    %58 = vector.shape_cast %57 : vector<2x8xf32> to vector<2x8x1xf32>
    %59 = tpu.reciprocal %58 {approx = true} : vector<2x8x1xf32> -> vector<2x8x1xf32>
    %60 = vector.broadcast %59 : vector<2x8x1xf32> to vector<2x8x8xf32>
    %61 = arith.mulf %56, %60 : vector<2x8x8xf32>
    %cst_24 = arith.constant dense<0.000000e+00> : vector<2x8x16xf32>
    %62 = tpu.matmul %61, %48, %cst_24 {dimension_numbers = #tpu.dot_dimension_numbers<[2], [1], [1], [2], [0, 0, 0, 1, 1, 2], [0], [0]>} : vector<2x8x8xf32>, vector<2x8x16xf32>, vector<2x8x16xf32> -> vector<2x8x16xf32>
    %63 = vector.extract_strided_slice %24 {offsets = [0, 0, 32], sizes = [2, 8, 16], strides = [1, 1, 1]} : vector<2x8x128xf32> to vector<2x8x16xf32>
    %64 = vector.extract_strided_slice %26 {offsets = [0, 0, 32], sizes = [2, 8, 16], strides = [1, 1, 1]} : vector<2x8x128xf32> to vector<2x8x16xf32>
    %65 = vector.extract_strided_slice %28 {offsets = [0, 0, 32], sizes = [2, 8, 16], strides = [1, 1, 1]} : vector<2x8x128xf32> to vector<2x8x16xf32>
    %cst_25 = arith.constant dense<0.000000e+00> : vector<2x8x8xf32>
    %66 = tpu.matmul %63, %64, %cst_25 {dimension_numbers = #tpu.dot_dimension_numbers<[2], [2], [1], [1], [0, 0, 0, 1, 1, 1], [0], [0]>} : vector<2x8x16xf32>, vector<2x8x16xf32>, vector<2x8x8xf32> -> vector<2x8x8xf32>
    %cst_26 = arith.constant 2.500000e-01 : f32
    %67 = vector.broadcast %cst_26 : f32 to vector<2x8x8xf32>
    %68 = arith.mulf %66, %67 : vector<2x8x8xf32>
    %cst_27 = arith.constant dense<0xFF800000> : vector<2x8xf32>
    %69 = vector.multi_reduction <maximumf>, %68, %cst_27 [2] : vector<2x8x8xf32> to vector<2x8xf32>
    %70 = vector.shape_cast %69 : vector<2x8xf32> to vector<2x8x1xf32>
    %71 = vector.broadcast %70 : vector<2x8x1xf32> to vector<2x8x8xf32>
    %72 = arith.subf %68, %71 : vector<2x8x8xf32>
    %73 = math.exp %72 : vector<2x8x8xf32>
    %cst_28 = arith.constant dense<0.000000e+00> : vector<2x8xf32>
    %74 = vector.multi_reduction <add>, %73, %cst_28 [2] : vector<2x8x8xf32> to vector<2x8xf32>
    %75 = vector.shape_cast %74 : vector<2x8xf32> to vector<2x8x1xf32>
    %76 = tpu.reciprocal %75 {approx = true} : vector<2x8x1xf32> -> vector<2x8x1xf32>
    %77 = vector.broadcast %76 : vector<2x8x1xf32> to vector<2x8x8xf32>
    %78 = arith.mulf %73, %77 : vector<2x8x8xf32>
    %cst_29 = arith.constant dense<0.000000e+00> : vector<2x8x16xf32>
    %79 = tpu.matmul %78, %65, %cst_29 {dimension_numbers = #tpu.dot_dimension_numbers<[2], [1], [1], [2], [0, 0, 0, 1, 1, 2], [0], [0]>} : vector<2x8x8xf32>, vector<2x8x16xf32>, vector<2x8x16xf32> -> vector<2x8x16xf32>
    %80 = vector.extract_strided_slice %24 {offsets = [0, 0, 48], sizes = [2, 8, 16], strides = [1, 1, 1]} : vector<2x8x128xf32> to vector<2x8x16xf32>
    %81 = vector.extract_strided_slice %26 {offsets = [0, 0, 48], sizes = [2, 8, 16], strides = [1, 1, 1]} : vector<2x8x128xf32> to vector<2x8x16xf32>
    %82 = vector.extract_strided_slice %28 {offsets = [0, 0, 48], sizes = [2, 8, 16], strides = [1, 1, 1]} : vector<2x8x128xf32> to vector<2x8x16xf32>
    %cst_30 = arith.constant dense<0.000000e+00> : vector<2x8x8xf32>
    %83 = tpu.matmul %80, %81, %cst_30 {dimension_numbers = #tpu.dot_dimension_numbers<[2], [2], [1], [1], [0, 0, 0, 1, 1, 1], [0], [0]>} : vector<2x8x16xf32>, vector<2x8x16xf32>, vector<2x8x8xf32> -> vector<2x8x8xf32>
    %cst_31 = arith.constant 2.500000e-01 : f32
    %84 = vector.broadcast %cst_31 : f32 to vector<2x8x8xf32>
    %85 = arith.mulf %83, %84 : vector<2x8x8xf32>
    %cst_32 = arith.constant dense<0xFF800000> : vector<2x8xf32>
    %86 = vector.multi_reduction <maximumf>, %85, %cst_32 [2] : vector<2x8x8xf32> to vector<2x8xf32>
    %87 = vector.shape_cast %86 : vector<2x8xf32> to vector<2x8x1xf32>
    %88 = vector.broadcast %87 : vector<2x8x1xf32> to vector<2x8x8xf32>
    %89 = arith.subf %85, %88 : vector<2x8x8xf32>
    %90 = math.exp %89 : vector<2x8x8xf32>
    %cst_33 = arith.constant dense<0.000000e+00> : vector<2x8xf32>
    %91 = vector.multi_reduction <add>, %90, %cst_33 [2] : vector<2x8x8xf32> to vector<2x8xf32>
    %92 = vector.shape_cast %91 : vector<2x8xf32> to vector<2x8x1xf32>
    %93 = tpu.reciprocal %92 {approx = true} : vector<2x8x1xf32> -> vector<2x8x1xf32>
    %94 = vector.broadcast %93 : vector<2x8x1xf32> to vector<2x8x8xf32>
    %95 = arith.mulf %90, %94 : vector<2x8x8xf32>
    %cst_34 = arith.constant dense<0.000000e+00> : vector<2x8x16xf32>
    %96 = tpu.matmul %95, %82, %cst_34 {dimension_numbers = #tpu.dot_dimension_numbers<[2], [1], [1], [2], [0, 0, 0, 1, 1, 2], [0], [0]>} : vector<2x8x8xf32>, vector<2x8x16xf32>, vector<2x8x16xf32> -> vector<2x8x16xf32>
    %97 = vector.extract_strided_slice %24 {offsets = [0, 0, 64], sizes = [2, 8, 16], strides = [1, 1, 1]} : vector<2x8x128xf32> to vector<2x8x16xf32>
    %98 = vector.extract_strided_slice %26 {offsets = [0, 0, 64], sizes = [2, 8, 16], strides = [1, 1, 1]} : vector<2x8x128xf32> to vector<2x8x16xf32>
    %99 = vector.extract_strided_slice %28 {offsets = [0, 0, 64], sizes = [2, 8, 16], strides = [1, 1, 1]} : vector<2x8x128xf32> to vector<2x8x16xf32>
    %cst_35 = arith.constant dense<0.000000e+00> : vector<2x8x8xf32>
    %100 = tpu.matmul %97, %98, %cst_35 {dimension_numbers = #tpu.dot_dimension_numbers<[2], [2], [1], [1], [0, 0, 0, 1, 1, 1], [0], [0]>} : vector<2x8x16xf32>, vector<2x8x16xf32>, vector<2x8x8xf32> -> vector<2x8x8xf32>
    %cst_36 = arith.constant 2.500000e-01 : f32
    %101 = vector.broadcast %cst_36 : f32 to vector<2x8x8xf32>
    %102 = arith.mulf %100, %101 : vector<2x8x8xf32>
    %cst_37 = arith.constant dense<0xFF800000> : vector<2x8xf32>
    %103 = vector.multi_reduction <maximumf>, %102, %cst_37 [2] : vector<2x8x8xf32> to vector<2x8xf32>
    %104 = vector.shape_cast %103 : vector<2x8xf32> to vector<2x8x1xf32>
    %105 = vector.broadcast %104 : vector<2x8x1xf32> to vector<2x8x8xf32>
    %106 = arith.subf %102, %105 : vector<2x8x8xf32>
    %107 = math.exp %106 : vector<2x8x8xf32>
    %cst_38 = arith.constant dense<0.000000e+00> : vector<2x8xf32>
    %108 = vector.multi_reduction <add>, %107, %cst_38 [2] : vector<2x8x8xf32> to vector<2x8xf32>
    %109 = vector.shape_cast %108 : vector<2x8xf32> to vector<2x8x1xf32>
    %110 = tpu.reciprocal %109 {approx = true} : vector<2x8x1xf32> -> vector<2x8x1xf32>
    %111 = vector.broadcast %110 : vector<2x8x1xf32> to vector<2x8x8xf32>
    %112 = arith.mulf %107, %111 : vector<2x8x8xf32>
    %cst_39 = arith.constant dense<0.000000e+00> : vector<2x8x16xf32>
    %113 = tpu.matmul %112, %99, %cst_39 {dimension_numbers = #tpu.dot_dimension_numbers<[2], [1], [1], [2], [0, 0, 0, 1, 1, 2], [0], [0]>} : vector<2x8x8xf32>, vector<2x8x16xf32>, vector<2x8x16xf32> -> vector<2x8x16xf32>
    %114 = vector.extract_strided_slice %24 {offsets = [0, 0, 80], sizes = [2, 8, 16], strides = [1, 1, 1]} : vector<2x8x128xf32> to vector<2x8x16xf32>
    %115 = vector.extract_strided_slice %26 {offsets = [0, 0, 80], sizes = [2, 8, 16], strides = [1, 1, 1]} : vector<2x8x128xf32> to vector<2x8x16xf32>
    %116 = vector.extract_strided_slice %28 {offsets = [0, 0, 80], sizes = [2, 8, 16], strides = [1, 1, 1]} : vector<2x8x128xf32> to vector<2x8x16xf32>
    %cst_40 = arith.constant dense<0.000000e+00> : vector<2x8x8xf32>
    %117 = tpu.matmul %114, %115, %cst_40 {dimension_numbers = #tpu.dot_dimension_numbers<[2], [2], [1], [1], [0, 0, 0, 1, 1, 1], [0], [0]>} : vector<2x8x16xf32>, vector<2x8x16xf32>, vector<2x8x8xf32> -> vector<2x8x8xf32>
    %cst_41 = arith.constant 2.500000e-01 : f32
    %118 = vector.broadcast %cst_41 : f32 to vector<2x8x8xf32>
    %119 = arith.mulf %117, %118 : vector<2x8x8xf32>
    %cst_42 = arith.constant dense<0xFF800000> : vector<2x8xf32>
    %120 = vector.multi_reduction <maximumf>, %119, %cst_42 [2] : vector<2x8x8xf32> to vector<2x8xf32>
    %121 = vector.shape_cast %120 : vector<2x8xf32> to vector<2x8x1xf32>
    %122 = vector.broadcast %121 : vector<2x8x1xf32> to vector<2x8x8xf32>
    %123 = arith.subf %119, %122 : vector<2x8x8xf32>
    %124 = math.exp %123 : vector<2x8x8xf32>
    %cst_43 = arith.constant dense<0.000000e+00> : vector<2x8xf32>
    %125 = vector.multi_reduction <add>, %124, %cst_43 [2] : vector<2x8x8xf32> to vector<2x8xf32>
    %126 = vector.shape_cast %125 : vector<2x8xf32> to vector<2x8x1xf32>
    %127 = tpu.reciprocal %126 {approx = true} : vector<2x8x1xf32> -> vector<2x8x1xf32>
    %128 = vector.broadcast %127 : vector<2x8x1xf32> to vector<2x8x8xf32>
    %129 = arith.mulf %124, %128 : vector<2x8x8xf32>
    %cst_44 = arith.constant dense<0.000000e+00> : vector<2x8x16xf32>
    %130 = tpu.matmul %129, %116, %cst_44 {dimension_numbers = #tpu.dot_dimension_numbers<[2], [1], [1], [2], [0, 0, 0, 1, 1, 2], [0], [0]>} : vector<2x8x8xf32>, vector<2x8x16xf32>, vector<2x8x16xf32> -> vector<2x8x16xf32>
    %131 = vector.extract_strided_slice %24 {offsets = [0, 0, 96], sizes = [2, 8, 16], strides = [1, 1, 1]} : vector<2x8x128xf32> to vector<2x8x16xf32>
    %132 = vector.extract_strided_slice %26 {offsets = [0, 0, 96], sizes = [2, 8, 16], strides = [1, 1, 1]} : vector<2x8x128xf32> to vector<2x8x16xf32>
    %133 = vector.extract_strided_slice %28 {offsets = [0, 0, 96], sizes = [2, 8, 16], strides = [1, 1, 1]} : vector<2x8x128xf32> to vector<2x8x16xf32>
    %cst_45 = arith.constant dense<0.000000e+00> : vector<2x8x8xf32>
    %134 = tpu.matmul %131, %132, %cst_45 {dimension_numbers = #tpu.dot_dimension_numbers<[2], [2], [1], [1], [0, 0, 0, 1, 1, 1], [0], [0]>} : vector<2x8x16xf32>, vector<2x8x16xf32>, vector<2x8x8xf32> -> vector<2x8x8xf32>
    %cst_46 = arith.constant 2.500000e-01 : f32
    %135 = vector.broadcast %cst_46 : f32 to vector<2x8x8xf32>
    %136 = arith.mulf %134, %135 : vector<2x8x8xf32>
    %cst_47 = arith.constant dense<0xFF800000> : vector<2x8xf32>
    %137 = vector.multi_reduction <maximumf>, %136, %cst_47 [2] : vector<2x8x8xf32> to vector<2x8xf32>
    %138 = vector.shape_cast %137 : vector<2x8xf32> to vector<2x8x1xf32>
    %139 = vector.broadcast %138 : vector<2x8x1xf32> to vector<2x8x8xf32>
    %140 = arith.subf %136, %139 : vector<2x8x8xf32>
    %141 = math.exp %140 : vector<2x8x8xf32>
    %cst_48 = arith.constant dense<0.000000e+00> : vector<2x8xf32>
    %142 = vector.multi_reduction <add>, %141, %cst_48 [2] : vector<2x8x8xf32> to vector<2x8xf32>
    %143 = vector.shape_cast %142 : vector<2x8xf32> to vector<2x8x1xf32>
    %144 = tpu.reciprocal %143 {approx = true} : vector<2x8x1xf32> -> vector<2x8x1xf32>
    %145 = vector.broadcast %144 : vector<2x8x1xf32> to vector<2x8x8xf32>
    %146 = arith.mulf %141, %145 : vector<2x8x8xf32>
    %cst_49 = arith.constant dense<0.000000e+00> : vector<2x8x16xf32>
    %147 = tpu.matmul %146, %133, %cst_49 {dimension_numbers = #tpu.dot_dimension_numbers<[2], [1], [1], [2], [0, 0, 0, 1, 1, 2], [0], [0]>} : vector<2x8x8xf32>, vector<2x8x16xf32>, vector<2x8x16xf32> -> vector<2x8x16xf32>
    %148 = vector.extract_strided_slice %24 {offsets = [0, 0, 112], sizes = [2, 8, 16], strides = [1, 1, 1]} : vector<2x8x128xf32> to vector<2x8x16xf32>
    %149 = vector.extract_strided_slice %26 {offsets = [0, 0, 112], sizes = [2, 8, 16], strides = [1, 1, 1]} : vector<2x8x128xf32> to vector<2x8x16xf32>
    %150 = vector.extract_strided_slice %28 {offsets = [0, 0, 112], sizes = [2, 8, 16], strides = [1, 1, 1]} : vector<2x8x128xf32> to vector<2x8x16xf32>
    %cst_50 = arith.constant dense<0.000000e+00> : vector<2x8x8xf32>
    %151 = tpu.matmul %148, %149, %cst_50 {dimension_numbers = #tpu.dot_dimension_numbers<[2], [2], [1], [1], [0, 0, 0, 1, 1, 1], [0], [0]>} : vector<2x8x16xf32>, vector<2x8x16xf32>, vector<2x8x8xf32> -> vector<2x8x8xf32>
    %cst_51 = arith.constant 2.500000e-01 : f32
    %152 = vector.broadcast %cst_51 : f32 to vector<2x8x8xf32>
    %153 = arith.mulf %151, %152 : vector<2x8x8xf32>
    %cst_52 = arith.constant dense<0xFF800000> : vector<2x8xf32>
    %154 = vector.multi_reduction <maximumf>, %153, %cst_52 [2] : vector<2x8x8xf32> to vector<2x8xf32>
    %155 = vector.shape_cast %154 : vector<2x8xf32> to vector<2x8x1xf32>
    %156 = vector.broadcast %155 : vector<2x8x1xf32> to vector<2x8x8xf32>
    %157 = arith.subf %153, %156 : vector<2x8x8xf32>
    %158 = math.exp %157 : vector<2x8x8xf32>
    %cst_53 = arith.constant dense<0.000000e+00> : vector<2x8xf32>
    %159 = vector.multi_reduction <add>, %158, %cst_53 [2] : vector<2x8x8xf32> to vector<2x8xf32>
    %160 = vector.shape_cast %159 : vector<2x8xf32> to vector<2x8x1xf32>
    %161 = tpu.reciprocal %160 {approx = true} : vector<2x8x1xf32> -> vector<2x8x1xf32>
    %162 = vector.broadcast %161 : vector<2x8x1xf32> to vector<2x8x8xf32>
    %163 = arith.mulf %158, %162 : vector<2x8x8xf32>
    %cst_54 = arith.constant dense<0.000000e+00> : vector<2x8x16xf32>
    %164 = tpu.matmul %163, %150, %cst_54 {dimension_numbers = #tpu.dot_dimension_numbers<[2], [1], [1], [2], [0, 0, 0, 1, 1, 2], [0], [0]>} : vector<2x8x8xf32>, vector<2x8x16xf32>, vector<2x8x16xf32> -> vector<2x8x16xf32>
    %165 = tpu.concatenate %45, %62, %79, %96, %113, %130, %147, %164 in 2 : vector<2x8x16xf32>, vector<2x8x16xf32>, vector<2x8x16xf32>, vector<2x8x16xf32>, vector<2x8x16xf32>, vector<2x8x16xf32>, vector<2x8x16xf32>, vector<2x8x16xf32> -> vector<2x8x128xf32>
    %166 = vector.shape_cast %165 : vector<2x8x128xf32> to vector<16x128xf32>
    %c0_55 = arith.constant 0 : index
    %c0_56 = arith.constant 0 : index
    %c0_57 = arith.constant 0 : index
    %167 = vector.load %arg6[%c0_55, %c0_56, %c0_57] : memref<3x128x128xbf16, #tpu.memory_space<vmem>>, vector<1x128x128xbf16>
    %168 = vector.shape_cast %167 : vector<1x128x128xbf16> to vector<128x128xbf16>
    %c0_58 = arith.constant 0 : index
    %c0_59 = arith.constant 0 : index
    %c0_60 = arith.constant 0 : index
    %169 = vector.load %arg7[%c0_58, %c0_59, %c0_60] : memref<3x1x128xf32, #tpu.memory_space<vmem>>, vector<1x1x128xf32>
    %170 = vector.shape_cast %169 : vector<1x1x128xf32> to vector<1x128xf32>
    %171 = arith.truncf %166 : vector<16x128xf32> to vector<16x128xbf16>
    %cst_61 = arith.constant dense<0.000000e+00> : vector<16x128xf32>
    %172 = tpu.matmul %171, %168, %cst_61 {dimension_numbers = #tpu.dot_dimension_numbers<[1], [0], [0], [1], [0, 0, 1, 1], [], []>} : vector<16x128xbf16>, vector<128x128xbf16>, vector<16x128xf32> -> vector<16x128xf32>
    %173 = vector.broadcast %170 : vector<1x128xf32> to vector<16x128xf32>
    %174 = arith.addf %172, %173 : vector<16x128xf32>
    %175 = arith.addf %14, %174 : vector<16x128xf32>
    %c0_62 = arith.constant 0 : index
    %c0_63 = arith.constant 0 : index
    %c0_64 = arith.constant 0 : index
    %176 = vector.load %arg8[%c0_62, %c0_63, %c0_64] : memref<3x1x128xf32, #tpu.memory_space<vmem>>, vector<1x1x128xf32>
    %177 = vector.shape_cast %176 : vector<1x1x128xf32> to vector<1x128xf32>
    %c0_65 = arith.constant 0 : index
    %c0_66 = arith.constant 0 : index
    %c0_67 = arith.constant 0 : index
    %178 = vector.load %arg9[%c0_65, %c0_66, %c0_67] : memref<3x1x128xf32, #tpu.memory_space<vmem>>, vector<1x1x128xf32>
    %179 = vector.shape_cast %178 : vector<1x1x128xf32> to vector<1x128xf32>
    %cst_68 = arith.constant dense<0.000000e+00> : vector<16xf32>
    %180 = vector.multi_reduction <add>, %175, %cst_68 [1] : vector<16x128xf32> to vector<16xf32>
    %181 = vector.shape_cast %180 : vector<16xf32> to vector<16x1xf32>
    %cst_69 = arith.constant 1.280000e+02 : f32
    %182 = vector.broadcast %cst_69 : f32 to vector<16x1xf32>
    %183 = arith.divf %181, %182 : vector<16x1xf32>
    %184 = vector.broadcast %183 : vector<16x1xf32> to vector<16x128xf32>
    %185 = arith.subf %175, %184 : vector<16x128xf32>
    %186 = arith.mulf %185, %185 : vector<16x128xf32>
    %cst_70 = arith.constant dense<0.000000e+00> : vector<16xf32>
    %187 = vector.multi_reduction <add>, %186, %cst_70 [1] : vector<16x128xf32> to vector<16xf32>
    %188 = vector.shape_cast %187 : vector<16xf32> to vector<16x1xf32>
    %cst_71 = arith.constant 1.280000e+02 : f32
    %189 = vector.broadcast %cst_71 : f32 to vector<16x1xf32>
    %190 = arith.divf %188, %189 : vector<16x1xf32>
    %191 = vector.broadcast %183 : vector<16x1xf32> to vector<16x128xf32>
    %192 = arith.subf %175, %191 : vector<16x128xf32>
    %cst_72 = arith.constant 9.99999974E-6 : f32
    %193 = vector.broadcast %cst_72 : f32 to vector<16x1xf32>
    %194 = arith.addf %190, %193 : vector<16x1xf32>
    %195 = math.rsqrt %194 : vector<16x1xf32>
    %196 = vector.broadcast %195 : vector<16x1xf32> to vector<16x128xf32>
    %197 = arith.mulf %192, %196 : vector<16x128xf32>
    %198 = vector.broadcast %177 : vector<1x128xf32> to vector<16x128xf32>
    %199 = arith.mulf %197, %198 : vector<16x128xf32>
    %200 = vector.broadcast %179 : vector<1x128xf32> to vector<16x128xf32>
    %201 = arith.addf %199, %200 : vector<16x128xf32>
    %c0_73 = arith.constant 0 : index
    %c0_74 = arith.constant 0 : index
    %c0_75 = arith.constant 0 : index
    %202 = vector.load %arg10[%c0_73, %c0_74, %c0_75] : memref<3x128x2048xbf16, #tpu.memory_space<vmem>>, vector<1x128x2048xbf16>
    %203 = vector.shape_cast %202 : vector<1x128x2048xbf16> to vector<128x2048xbf16>
    %c0_76 = arith.constant 0 : index
    %c0_77 = arith.constant 0 : index
    %c0_78 = arith.constant 0 : index
    %204 = vector.load %arg11[%c0_76, %c0_77, %c0_78] : memref<3x1x2048xf32, #tpu.memory_space<vmem>>, vector<1x1x2048xf32>
    %205 = vector.shape_cast %204 : vector<1x1x2048xf32> to vector<1x2048xf32>
    %206 = arith.truncf %201 : vector<16x128xf32> to vector<16x128xbf16>
    %cst_79 = arith.constant dense<0.000000e+00> : vector<16x2048xf32>
    %207 = tpu.matmul %206, %203, %cst_79 {dimension_numbers = #tpu.dot_dimension_numbers<[1], [0], [0], [1], [0, 0, 1, 1], [], []>} : vector<16x128xbf16>, vector<128x2048xbf16>, vector<16x2048xf32> -> vector<16x2048xf32>
    %208 = vector.broadcast %205 : vector<1x2048xf32> to vector<16x2048xf32>
    %209 = arith.addf %207, %208 : vector<16x2048xf32>
    %cst_80 = arith.constant 0.000000e+00 : f32
    %210 = vector.broadcast %cst_80 : f32 to vector<16x2048xf32>
    %211 = arith.maximumf %209, %210 : vector<16x2048xf32>
    %c0_81 = arith.constant 0 : index
    %c0_82 = arith.constant 0 : index
    %c0_83 = arith.constant 0 : index
    %212 = vector.load %arg12[%c0_81, %c0_82, %c0_83] : memref<3x2048x128xbf16, #tpu.memory_space<vmem>>, vector<1x2048x128xbf16>
    %213 = vector.shape_cast %212 : vector<1x2048x128xbf16> to vector<2048x128xbf16>
    %c0_84 = arith.constant 0 : index
    %c0_85 = arith.constant 0 : index
    %c0_86 = arith.constant 0 : index
    %214 = vector.load %arg13[%c0_84, %c0_85, %c0_86] : memref<3x1x128xf32, #tpu.memory_space<vmem>>, vector<1x1x128xf32>
    %215 = vector.shape_cast %214 : vector<1x1x128xf32> to vector<1x128xf32>
    %216 = arith.truncf %211 : vector<16x2048xf32> to vector<16x2048xbf16>
    %cst_87 = arith.constant dense<0.000000e+00> : vector<16x128xf32>
    %217 = tpu.matmul %216, %213, %cst_87 {dimension_numbers = #tpu.dot_dimension_numbers<[1], [0], [0], [1], [0, 0, 1, 1], [], []>} : vector<16x2048xbf16>, vector<2048x128xbf16>, vector<16x128xf32> -> vector<16x128xf32>
    %218 = vector.broadcast %215 : vector<1x128xf32> to vector<16x128xf32>
    %219 = arith.addf %217, %218 : vector<16x128xf32>
    %220 = arith.addf %201, %219 : vector<16x128xf32>
    %c0_88 = arith.constant 0 : index
    %c0_89 = arith.constant 0 : index
    %c0_90 = arith.constant 0 : index
    %221 = vector.load %arg14[%c0_88, %c0_89, %c0_90] : memref<3x1x128xf32, #tpu.memory_space<vmem>>, vector<1x1x128xf32>
    %222 = vector.shape_cast %221 : vector<1x1x128xf32> to vector<1x128xf32>
    %c0_91 = arith.constant 0 : index
    %c0_92 = arith.constant 0 : index
    %c0_93 = arith.constant 0 : index
    %223 = vector.load %arg15[%c0_91, %c0_92, %c0_93] : memref<3x1x128xf32, #tpu.memory_space<vmem>>, vector<1x1x128xf32>
    %224 = vector.shape_cast %223 : vector<1x1x128xf32> to vector<1x128xf32>
    %cst_94 = arith.constant dense<0.000000e+00> : vector<16xf32>
    %225 = vector.multi_reduction <add>, %220, %cst_94 [1] : vector<16x128xf32> to vector<16xf32>
    %226 = vector.shape_cast %225 : vector<16xf32> to vector<16x1xf32>
    %cst_95 = arith.constant 1.280000e+02 : f32
    %227 = vector.broadcast %cst_95 : f32 to vector<16x1xf32>
    %228 = arith.divf %226, %227 : vector<16x1xf32>
    %229 = vector.broadcast %228 : vector<16x1xf32> to vector<16x128xf32>
    %230 = arith.subf %220, %229 : vector<16x128xf32>
    %231 = arith.mulf %230, %230 : vector<16x128xf32>
    %cst_96 = arith.constant dense<0.000000e+00> : vector<16xf32>
    %232 = vector.multi_reduction <add>, %231, %cst_96 [1] : vector<16x128xf32> to vector<16xf32>
    %233 = vector.shape_cast %232 : vector<16xf32> to vector<16x1xf32>
    %cst_97 = arith.constant 1.280000e+02 : f32
    %234 = vector.broadcast %cst_97 : f32 to vector<16x1xf32>
    %235 = arith.divf %233, %234 : vector<16x1xf32>
    %236 = vector.broadcast %228 : vector<16x1xf32> to vector<16x128xf32>
    %237 = arith.subf %220, %236 : vector<16x128xf32>
    %cst_98 = arith.constant 9.99999974E-6 : f32
    %238 = vector.broadcast %cst_98 : f32 to vector<16x1xf32>
    %239 = arith.addf %235, %238 : vector<16x1xf32>
    %240 = math.rsqrt %239 : vector<16x1xf32>
    %241 = vector.broadcast %240 : vector<16x1xf32> to vector<16x128xf32>
    %242 = arith.mulf %237, %241 : vector<16x128xf32>
    %243 = vector.broadcast %222 : vector<1x128xf32> to vector<16x128xf32>
    %244 = arith.mulf %242, %243 : vector<16x128xf32>
    %245 = vector.broadcast %224 : vector<1x128xf32> to vector<16x128xf32>
    %246 = arith.addf %244, %245 : vector<16x128xf32>
    %c1 = arith.constant 1 : index
    %c0_99 = arith.constant 0 : index
    %c0_100 = arith.constant 0 : index
    %247 = vector.load %arg4[%c1, %c0_99, %c0_100] : memref<3x128x384xbf16, #tpu.memory_space<vmem>>, vector<1x128x384xbf16>
    %248 = vector.shape_cast %247 : vector<1x128x384xbf16> to vector<128x384xbf16>
    %c1_101 = arith.constant 1 : index
    %c0_102 = arith.constant 0 : index
    %c0_103 = arith.constant 0 : index
    %249 = vector.load %arg5[%c1_101, %c0_102, %c0_103] : memref<3x1x384xf32, #tpu.memory_space<vmem>>, vector<1x1x384xf32>
    %250 = vector.shape_cast %249 : vector<1x1x384xf32> to vector<1x384xf32>
    %251 = arith.truncf %246 : vector<16x128xf32> to vector<16x128xbf16>
    %cst_104 = arith.constant dense<0.000000e+00> : vector<16x384xf32>
    %252 = tpu.matmul %251, %248, %cst_104 {dimension_numbers = #tpu.dot_dimension_numbers<[1], [0], [0], [1], [0, 0, 1, 1], [], []>} : vector<16x128xbf16>, vector<128x384xbf16>, vector<16x384xf32> -> vector<16x384xf32>
    %253 = vector.broadcast %250 : vector<1x384xf32> to vector<16x384xf32>
    %254 = arith.addf %252, %253 : vector<16x384xf32>
    %255 = vector.extract_strided_slice %254 {offsets = [0, 0], sizes = [16, 128], strides = [1, 1]} : vector<16x384xf32> to vector<16x128xf32>
    %256 = vector.shape_cast %255 : vector<16x128xf32> to vector<2x8x128xf32>
    %257 = vector.extract_strided_slice %254 {offsets = [0, 128], sizes = [16, 128], strides = [1, 1]} : vector<16x384xf32> to vector<16x128xf32>
    %258 = vector.shape_cast %257 : vector<16x128xf32> to vector<2x8x128xf32>
    %259 = vector.extract_strided_slice %254 {offsets = [0, 256], sizes = [16, 128], strides = [1, 1]} : vector<16x384xf32> to vector<16x128xf32>
    %260 = vector.shape_cast %259 : vector<16x128xf32> to vector<2x8x128xf32>
    %261 = vector.extract_strided_slice %256 {offsets = [0, 0, 0], sizes = [2, 8, 16], strides = [1, 1, 1]} : vector<2x8x128xf32> to vector<2x8x16xf32>
    %262 = vector.extract_strided_slice %258 {offsets = [0, 0, 0], sizes = [2, 8, 16], strides = [1, 1, 1]} : vector<2x8x128xf32> to vector<2x8x16xf32>
    %263 = vector.extract_strided_slice %260 {offsets = [0, 0, 0], sizes = [2, 8, 16], strides = [1, 1, 1]} : vector<2x8x128xf32> to vector<2x8x16xf32>
    %cst_105 = arith.constant dense<0.000000e+00> : vector<2x8x8xf32>
    %264 = tpu.matmul %261, %262, %cst_105 {dimension_numbers = #tpu.dot_dimension_numbers<[2], [2], [1], [1], [0, 0, 0, 1, 1, 1], [0], [0]>} : vector<2x8x16xf32>, vector<2x8x16xf32>, vector<2x8x8xf32> -> vector<2x8x8xf32>
    %cst_106 = arith.constant 2.500000e-01 : f32
    %265 = vector.broadcast %cst_106 : f32 to vector<2x8x8xf32>
    %266 = arith.mulf %264, %265 : vector<2x8x8xf32>
    %cst_107 = arith.constant dense<0xFF800000> : vector<2x8xf32>
    %267 = vector.multi_reduction <maximumf>, %266, %cst_107 [2] : vector<2x8x8xf32> to vector<2x8xf32>
    %268 = vector.shape_cast %267 : vector<2x8xf32> to vector<2x8x1xf32>
    %269 = vector.broadcast %268 : vector<2x8x1xf32> to vector<2x8x8xf32>
    %270 = arith.subf %266, %269 : vector<2x8x8xf32>
    %271 = math.exp %270 : vector<2x8x8xf32>
    %cst_108 = arith.constant dense<0.000000e+00> : vector<2x8xf32>
    %272 = vector.multi_reduction <add>, %271, %cst_108 [2] : vector<2x8x8xf32> to vector<2x8xf32>
    %273 = vector.shape_cast %272 : vector<2x8xf32> to vector<2x8x1xf32>
    %274 = tpu.reciprocal %273 {approx = true} : vector<2x8x1xf32> -> vector<2x8x1xf32>
    %275 = vector.broadcast %274 : vector<2x8x1xf32> to vector<2x8x8xf32>
    %276 = arith.mulf %271, %275 : vector<2x8x8xf32>
    %cst_109 = arith.constant dense<0.000000e+00> : vector<2x8x16xf32>
    %277 = tpu.matmul %276, %263, %cst_109 {dimension_numbers = #tpu.dot_dimension_numbers<[2], [1], [1], [2], [0, 0, 0, 1, 1, 2], [0], [0]>} : vector<2x8x8xf32>, vector<2x8x16xf32>, vector<2x8x16xf32> -> vector<2x8x16xf32>
    %278 = vector.extract_strided_slice %256 {offsets = [0, 0, 16], sizes = [2, 8, 16], strides = [1, 1, 1]} : vector<2x8x128xf32> to vector<2x8x16xf32>
    %279 = vector.extract_strided_slice %258 {offsets = [0, 0, 16], sizes = [2, 8, 16], strides = [1, 1, 1]} : vector<2x8x128xf32> to vector<2x8x16xf32>
    %280 = vector.extract_strided_slice %260 {offsets = [0, 0, 16], sizes = [2, 8, 16], strides = [1, 1, 1]} : vector<2x8x128xf32> to vector<2x8x16xf32>
    %cst_110 = arith.constant dense<0.000000e+00> : vector<2x8x8xf32>
    %281 = tpu.matmul %278, %279, %cst_110 {dimension_numbers = #tpu.dot_dimension_numbers<[2], [2], [1], [1], [0, 0, 0, 1, 1, 1], [0], [0]>} : vector<2x8x16xf32>, vector<2x8x16xf32>, vector<2x8x8xf32> -> vector<2x8x8xf32>
    %cst_111 = arith.constant 2.500000e-01 : f32
    %282 = vector.broadcast %cst_111 : f32 to vector<2x8x8xf32>
    %283 = arith.mulf %281, %282 : vector<2x8x8xf32>
    %cst_112 = arith.constant dense<0xFF800000> : vector<2x8xf32>
    %284 = vector.multi_reduction <maximumf>, %283, %cst_112 [2] : vector<2x8x8xf32> to vector<2x8xf32>
    %285 = vector.shape_cast %284 : vector<2x8xf32> to vector<2x8x1xf32>
    %286 = vector.broadcast %285 : vector<2x8x1xf32> to vector<2x8x8xf32>
    %287 = arith.subf %283, %286 : vector<2x8x8xf32>
    %288 = math.exp %287 : vector<2x8x8xf32>
    %cst_113 = arith.constant dense<0.000000e+00> : vector<2x8xf32>
    %289 = vector.multi_reduction <add>, %288, %cst_113 [2] : vector<2x8x8xf32> to vector<2x8xf32>
    %290 = vector.shape_cast %289 : vector<2x8xf32> to vector<2x8x1xf32>
    %291 = tpu.reciprocal %290 {approx = true} : vector<2x8x1xf32> -> vector<2x8x1xf32>
    %292 = vector.broadcast %291 : vector<2x8x1xf32> to vector<2x8x8xf32>
    %293 = arith.mulf %288, %292 : vector<2x8x8xf32>
    %cst_114 = arith.constant dense<0.000000e+00> : vector<2x8x16xf32>
    %294 = tpu.matmul %293, %280, %cst_114 {dimension_numbers = #tpu.dot_dimension_numbers<[2], [1], [1], [2], [0, 0, 0, 1, 1, 2], [0], [0]>} : vector<2x8x8xf32>, vector<2x8x16xf32>, vector<2x8x16xf32> -> vector<2x8x16xf32>
    %295 = vector.extract_strided_slice %256 {offsets = [0, 0, 32], sizes = [2, 8, 16], strides = [1, 1, 1]} : vector<2x8x128xf32> to vector<2x8x16xf32>
    %296 = vector.extract_strided_slice %258 {offsets = [0, 0, 32], sizes = [2, 8, 16], strides = [1, 1, 1]} : vector<2x8x128xf32> to vector<2x8x16xf32>
    %297 = vector.extract_strided_slice %260 {offsets = [0, 0, 32], sizes = [2, 8, 16], strides = [1, 1, 1]} : vector<2x8x128xf32> to vector<2x8x16xf32>
    %cst_115 = arith.constant dense<0.000000e+00> : vector<2x8x8xf32>
    %298 = tpu.matmul %295, %296, %cst_115 {dimension_numbers = #tpu.dot_dimension_numbers<[2], [2], [1], [1], [0, 0, 0, 1, 1, 1], [0], [0]>} : vector<2x8x16xf32>, vector<2x8x16xf32>, vector<2x8x8xf32> -> vector<2x8x8xf32>
    %cst_116 = arith.constant 2.500000e-01 : f32
    %299 = vector.broadcast %cst_116 : f32 to vector<2x8x8xf32>
    %300 = arith.mulf %298, %299 : vector<2x8x8xf32>
    %cst_117 = arith.constant dense<0xFF800000> : vector<2x8xf32>
    %301 = vector.multi_reduction <maximumf>, %300, %cst_117 [2] : vector<2x8x8xf32> to vector<2x8xf32>
    %302 = vector.shape_cast %301 : vector<2x8xf32> to vector<2x8x1xf32>
    %303 = vector.broadcast %302 : vector<2x8x1xf32> to vector<2x8x8xf32>
    %304 = arith.subf %300, %303 : vector<2x8x8xf32>
    %305 = math.exp %304 : vector<2x8x8xf32>
    %cst_118 = arith.constant dense<0.000000e+00> : vector<2x8xf32>
    %306 = vector.multi_reduction <add>, %305, %cst_118 [2] : vector<2x8x8xf32> to vector<2x8xf32>
    %307 = vector.shape_cast %306 : vector<2x8xf32> to vector<2x8x1xf32>
    %308 = tpu.reciprocal %307 {approx = true} : vector<2x8x1xf32> -> vector<2x8x1xf32>
    %309 = vector.broadcast %308 : vector<2x8x1xf32> to vector<2x8x8xf32>
    %310 = arith.mulf %305, %309 : vector<2x8x8xf32>
    %cst_119 = arith.constant dense<0.000000e+00> : vector<2x8x16xf32>
    %311 = tpu.matmul %310, %297, %cst_119 {dimension_numbers = #tpu.dot_dimension_numbers<[2], [1], [1], [2], [0, 0, 0, 1, 1, 2], [0], [0]>} : vector<2x8x8xf32>, vector<2x8x16xf32>, vector<2x8x16xf32> -> vector<2x8x16xf32>
    %312 = vector.extract_strided_slice %256 {offsets = [0, 0, 48], sizes = [2, 8, 16], strides = [1, 1, 1]} : vector<2x8x128xf32> to vector<2x8x16xf32>
    %313 = vector.extract_strided_slice %258 {offsets = [0, 0, 48], sizes = [2, 8, 16], strides = [1, 1, 1]} : vector<2x8x128xf32> to vector<2x8x16xf32>
    %314 = vector.extract_strided_slice %260 {offsets = [0, 0, 48], sizes = [2, 8, 16], strides = [1, 1, 1]} : vector<2x8x128xf32> to vector<2x8x16xf32>
    %cst_120 = arith.constant dense<0.000000e+00> : vector<2x8x8xf32>
    %315 = tpu.matmul %312, %313, %cst_120 {dimension_numbers = #tpu.dot_dimension_numbers<[2], [2], [1], [1], [0, 0, 0, 1, 1, 1], [0], [0]>} : vector<2x8x16xf32>, vector<2x8x16xf32>, vector<2x8x8xf32> -> vector<2x8x8xf32>
    %cst_121 = arith.constant 2.500000e-01 : f32
    %316 = vector.broadcast %cst_121 : f32 to vector<2x8x8xf32>
    %317 = arith.mulf %315, %316 : vector<2x8x8xf32>
    %cst_122 = arith.constant dense<0xFF800000> : vector<2x8xf32>
    %318 = vector.multi_reduction <maximumf>, %317, %cst_122 [2] : vector<2x8x8xf32> to vector<2x8xf32>
    %319 = vector.shape_cast %318 : vector<2x8xf32> to vector<2x8x1xf32>
    %320 = vector.broadcast %319 : vector<2x8x1xf32> to vector<2x8x8xf32>
    %321 = arith.subf %317, %320 : vector<2x8x8xf32>
    %322 = math.exp %321 : vector<2x8x8xf32>
    %cst_123 = arith.constant dense<0.000000e+00> : vector<2x8xf32>
    %323 = vector.multi_reduction <add>, %322, %cst_123 [2] : vector<2x8x8xf32> to vector<2x8xf32>
    %324 = vector.shape_cast %323 : vector<2x8xf32> to vector<2x8x1xf32>
    %325 = tpu.reciprocal %324 {approx = true} : vector<2x8x1xf32> -> vector<2x8x1xf32>
    %326 = vector.broadcast %325 : vector<2x8x1xf32> to vector<2x8x8xf32>
    %327 = arith.mulf %322, %326 : vector<2x8x8xf32>
    %cst_124 = arith.constant dense<0.000000e+00> : vector<2x8x16xf32>
    %328 = tpu.matmul %327, %314, %cst_124 {dimension_numbers = #tpu.dot_dimension_numbers<[2], [1], [1], [2], [0, 0, 0, 1, 1, 2], [0], [0]>} : vector<2x8x8xf32>, vector<2x8x16xf32>, vector<2x8x16xf32> -> vector<2x8x16xf32>
    %329 = vector.extract_strided_slice %256 {offsets = [0, 0, 64], sizes = [2, 8, 16], strides = [1, 1, 1]} : vector<2x8x128xf32> to vector<2x8x16xf32>
    %330 = vector.extract_strided_slice %258 {offsets = [0, 0, 64], sizes = [2, 8, 16], strides = [1, 1, 1]} : vector<2x8x128xf32> to vector<2x8x16xf32>
    %331 = vector.extract_strided_slice %260 {offsets = [0, 0, 64], sizes = [2, 8, 16], strides = [1, 1, 1]} : vector<2x8x128xf32> to vector<2x8x16xf32>
    %cst_125 = arith.constant dense<0.000000e+00> : vector<2x8x8xf32>
    %332 = tpu.matmul %329, %330, %cst_125 {dimension_numbers = #tpu.dot_dimension_numbers<[2], [2], [1], [1], [0, 0, 0, 1, 1, 1], [0], [0]>} : vector<2x8x16xf32>, vector<2x8x16xf32>, vector<2x8x8xf32> -> vector<2x8x8xf32>
    %cst_126 = arith.constant 2.500000e-01 : f32
    %333 = vector.broadcast %cst_126 : f32 to vector<2x8x8xf32>
    %334 = arith.mulf %332, %333 : vector<2x8x8xf32>
    %cst_127 = arith.constant dense<0xFF800000> : vector<2x8xf32>
    %335 = vector.multi_reduction <maximumf>, %334, %cst_127 [2] : vector<2x8x8xf32> to vector<2x8xf32>
    %336 = vector.shape_cast %335 : vector<2x8xf32> to vector<2x8x1xf32>
    %337 = vector.broadcast %336 : vector<2x8x1xf32> to vector<2x8x8xf32>
    %338 = arith.subf %334, %337 : vector<2x8x8xf32>
    %339 = math.exp %338 : vector<2x8x8xf32>
    %cst_128 = arith.constant dense<0.000000e+00> : vector<2x8xf32>
    %340 = vector.multi_reduction <add>, %339, %cst_128 [2] : vector<2x8x8xf32> to vector<2x8xf32>
    %341 = vector.shape_cast %340 : vector<2x8xf32> to vector<2x8x1xf32>
    %342 = tpu.reciprocal %341 {approx = true} : vector<2x8x1xf32> -> vector<2x8x1xf32>
    %343 = vector.broadcast %342 : vector<2x8x1xf32> to vector<2x8x8xf32>
    %344 = arith.mulf %339, %343 : vector<2x8x8xf32>
    %cst_129 = arith.constant dense<0.000000e+00> : vector<2x8x16xf32>
    %345 = tpu.matmul %344, %331, %cst_129 {dimension_numbers = #tpu.dot_dimension_numbers<[2], [1], [1], [2], [0, 0, 0, 1, 1, 2], [0], [0]>} : vector<2x8x8xf32>, vector<2x8x16xf32>, vector<2x8x16xf32> -> vector<2x8x16xf32>
    %346 = vector.extract_strided_slice %256 {offsets = [0, 0, 80], sizes = [2, 8, 16], strides = [1, 1, 1]} : vector<2x8x128xf32> to vector<2x8x16xf32>
    %347 = vector.extract_strided_slice %258 {offsets = [0, 0, 80], sizes = [2, 8, 16], strides = [1, 1, 1]} : vector<2x8x128xf32> to vector<2x8x16xf32>
    %348 = vector.extract_strided_slice %260 {offsets = [0, 0, 80], sizes = [2, 8, 16], strides = [1, 1, 1]} : vector<2x8x128xf32> to vector<2x8x16xf32>
    %cst_130 = arith.constant dense<0.000000e+00> : vector<2x8x8xf32>
    %349 = tpu.matmul %346, %347, %cst_130 {dimension_numbers = #tpu.dot_dimension_numbers<[2], [2], [1], [1], [0, 0, 0, 1, 1, 1], [0], [0]>} : vector<2x8x16xf32>, vector<2x8x16xf32>, vector<2x8x8xf32> -> vector<2x8x8xf32>
    %cst_131 = arith.constant 2.500000e-01 : f32
    %350 = vector.broadcast %cst_131 : f32 to vector<2x8x8xf32>
    %351 = arith.mulf %349, %350 : vector<2x8x8xf32>
    %cst_132 = arith.constant dense<0xFF800000> : vector<2x8xf32>
    %352 = vector.multi_reduction <maximumf>, %351, %cst_132 [2] : vector<2x8x8xf32> to vector<2x8xf32>
    %353 = vector.shape_cast %352 : vector<2x8xf32> to vector<2x8x1xf32>
    %354 = vector.broadcast %353 : vector<2x8x1xf32> to vector<2x8x8xf32>
    %355 = arith.subf %351, %354 : vector<2x8x8xf32>
    %356 = math.exp %355 : vector<2x8x8xf32>
    %cst_133 = arith.constant dense<0.000000e+00> : vector<2x8xf32>
    %357 = vector.multi_reduction <add>, %356, %cst_133 [2] : vector<2x8x8xf32> to vector<2x8xf32>
    %358 = vector.shape_cast %357 : vector<2x8xf32> to vector<2x8x1xf32>
    %359 = tpu.reciprocal %358 {approx = true} : vector<2x8x1xf32> -> vector<2x8x1xf32>
    %360 = vector.broadcast %359 : vector<2x8x1xf32> to vector<2x8x8xf32>
    %361 = arith.mulf %356, %360 : vector<2x8x8xf32>
    %cst_134 = arith.constant dense<0.000000e+00> : vector<2x8x16xf32>
    %362 = tpu.matmul %361, %348, %cst_134 {dimension_numbers = #tpu.dot_dimension_numbers<[2], [1], [1], [2], [0, 0, 0, 1, 1, 2], [0], [0]>} : vector<2x8x8xf32>, vector<2x8x16xf32>, vector<2x8x16xf32> -> vector<2x8x16xf32>
    %363 = vector.extract_strided_slice %256 {offsets = [0, 0, 96], sizes = [2, 8, 16], strides = [1, 1, 1]} : vector<2x8x128xf32> to vector<2x8x16xf32>
    %364 = vector.extract_strided_slice %258 {offsets = [0, 0, 96], sizes = [2, 8, 16], strides = [1, 1, 1]} : vector<2x8x128xf32> to vector<2x8x16xf32>
    %365 = vector.extract_strided_slice %260 {offsets = [0, 0, 96], sizes = [2, 8, 16], strides = [1, 1, 1]} : vector<2x8x128xf32> to vector<2x8x16xf32>
    %cst_135 = arith.constant dense<0.000000e+00> : vector<2x8x8xf32>
    %366 = tpu.matmul %363, %364, %cst_135 {dimension_numbers = #tpu.dot_dimension_numbers<[2], [2], [1], [1], [0, 0, 0, 1, 1, 1], [0], [0]>} : vector<2x8x16xf32>, vector<2x8x16xf32>, vector<2x8x8xf32> -> vector<2x8x8xf32>
    %cst_136 = arith.constant 2.500000e-01 : f32
    %367 = vector.broadcast %cst_136 : f32 to vector<2x8x8xf32>
    %368 = arith.mulf %366, %367 : vector<2x8x8xf32>
    %cst_137 = arith.constant dense<0xFF800000> : vector<2x8xf32>
    %369 = vector.multi_reduction <maximumf>, %368, %cst_137 [2] : vector<2x8x8xf32> to vector<2x8xf32>
    %370 = vector.shape_cast %369 : vector<2x8xf32> to vector<2x8x1xf32>
    %371 = vector.broadcast %370 : vector<2x8x1xf32> to vector<2x8x8xf32>
    %372 = arith.subf %368, %371 : vector<2x8x8xf32>
    %373 = math.exp %372 : vector<2x8x8xf32>
    %cst_138 = arith.constant dense<0.000000e+00> : vector<2x8xf32>
    %374 = vector.multi_reduction <add>, %373, %cst_138 [2] : vector<2x8x8xf32> to vector<2x8xf32>
    %375 = vector.shape_cast %374 : vector<2x8xf32> to vector<2x8x1xf32>
    %376 = tpu.reciprocal %375 {approx = true} : vector<2x8x1xf32> -> vector<2x8x1xf32>
    %377 = vector.broadcast %376 : vector<2x8x1xf32> to vector<2x8x8xf32>
    %378 = arith.mulf %373, %377 : vector<2x8x8xf32>
    %cst_139 = arith.constant dense<0.000000e+00> : vector<2x8x16xf32>
    %379 = tpu.matmul %378, %365, %cst_139 {dimension_numbers = #tpu.dot_dimension_numbers<[2], [1], [1], [2], [0, 0, 0, 1, 1, 2], [0], [0]>} : vector<2x8x8xf32>, vector<2x8x16xf32>, vector<2x8x16xf32> -> vector<2x8x16xf32>
    %380 = vector.extract_strided_slice %256 {offsets = [0, 0, 112], sizes = [2, 8, 16], strides = [1, 1, 1]} : vector<2x8x128xf32> to vector<2x8x16xf32>
    %381 = vector.extract_strided_slice %258 {offsets = [0, 0, 112], sizes = [2, 8, 16], strides = [1, 1, 1]} : vector<2x8x128xf32> to vector<2x8x16xf32>
    %382 = vector.extract_strided_slice %260 {offsets = [0, 0, 112], sizes = [2, 8, 16], strides = [1, 1, 1]} : vector<2x8x128xf32> to vector<2x8x16xf32>
    %cst_140 = arith.constant dense<0.000000e+00> : vector<2x8x8xf32>
    %383 = tpu.matmul %380, %381, %cst_140 {dimension_numbers = #tpu.dot_dimension_numbers<[2], [2], [1], [1], [0, 0, 0, 1, 1, 1], [0], [0]>} : vector<2x8x16xf32>, vector<2x8x16xf32>, vector<2x8x8xf32> -> vector<2x8x8xf32>
    %cst_141 = arith.constant 2.500000e-01 : f32
    %384 = vector.broadcast %cst_141 : f32 to vector<2x8x8xf32>
    %385 = arith.mulf %383, %384 : vector<2x8x8xf32>
    %cst_142 = arith.constant dense<0xFF800000> : vector<2x8xf32>
    %386 = vector.multi_reduction <maximumf>, %385, %cst_142 [2] : vector<2x8x8xf32> to vector<2x8xf32>
    %387 = vector.shape_cast %386 : vector<2x8xf32> to vector<2x8x1xf32>
    %388 = vector.broadcast %387 : vector<2x8x1xf32> to vector<2x8x8xf32>
    %389 = arith.subf %385, %388 : vector<2x8x8xf32>
    %390 = math.exp %389 : vector<2x8x8xf32>
    %cst_143 = arith.constant dense<0.000000e+00> : vector<2x8xf32>
    %391 = vector.multi_reduction <add>, %390, %cst_143 [2] : vector<2x8x8xf32> to vector<2x8xf32>
    %392 = vector.shape_cast %391 : vector<2x8xf32> to vector<2x8x1xf32>
    %393 = tpu.reciprocal %392 {approx = true} : vector<2x8x1xf32> -> vector<2x8x1xf32>
    %394 = vector.broadcast %393 : vector<2x8x1xf32> to vector<2x8x8xf32>
    %395 = arith.mulf %390, %394 : vector<2x8x8xf32>
    %cst_144 = arith.constant dense<0.000000e+00> : vector<2x8x16xf32>
    %396 = tpu.matmul %395, %382, %cst_144 {dimension_numbers = #tpu.dot_dimension_numbers<[2], [1], [1], [2], [0, 0, 0, 1, 1, 2], [0], [0]>} : vector<2x8x8xf32>, vector<2x8x16xf32>, vector<2x8x16xf32> -> vector<2x8x16xf32>
    %397 = tpu.concatenate %277, %294, %311, %328, %345, %362, %379, %396 in 2 : vector<2x8x16xf32>, vector<2x8x16xf32>, vector<2x8x16xf32>, vector<2x8x16xf32>, vector<2x8x16xf32>, vector<2x8x16xf32>, vector<2x8x16xf32>, vector<2x8x16xf32> -> vector<2x8x128xf32>
    %398 = vector.shape_cast %397 : vector<2x8x128xf32> to vector<16x128xf32>
    %c1_145 = arith.constant 1 : index
    %c0_146 = arith.constant 0 : index
    %c0_147 = arith.constant 0 : index
    %399 = vector.load %arg6[%c1_145, %c0_146, %c0_147] : memref<3x128x128xbf16, #tpu.memory_space<vmem>>, vector<1x128x128xbf16>
    %400 = vector.shape_cast %399 : vector<1x128x128xbf16> to vector<128x128xbf16>
    %c1_148 = arith.constant 1 : index
    %c0_149 = arith.constant 0 : index
    %c0_150 = arith.constant 0 : index
    %401 = vector.load %arg7[%c1_148, %c0_149, %c0_150] : memref<3x1x128xf32, #tpu.memory_space<vmem>>, vector<1x1x128xf32>
    %402 = vector.shape_cast %401 : vector<1x1x128xf32> to vector<1x128xf32>
    %403 = arith.truncf %398 : vector<16x128xf32> to vector<16x128xbf16>
    %cst_151 = arith.constant dense<0.000000e+00> : vector<16x128xf32>
    %404 = tpu.matmul %403, %400, %cst_151 {dimension_numbers = #tpu.dot_dimension_numbers<[1], [0], [0], [1], [0, 0, 1, 1], [], []>} : vector<16x128xbf16>, vector<128x128xbf16>, vector<16x128xf32> -> vector<16x128xf32>
    %405 = vector.broadcast %402 : vector<1x128xf32> to vector<16x128xf32>
    %406 = arith.addf %404, %405 : vector<16x128xf32>
    %407 = arith.addf %246, %406 : vector<16x128xf32>
    %c1_152 = arith.constant 1 : index
    %c0_153 = arith.constant 0 : index
    %c0_154 = arith.constant 0 : index
    %408 = vector.load %arg8[%c1_152, %c0_153, %c0_154] : memref<3x1x128xf32, #tpu.memory_space<vmem>>, vector<1x1x128xf32>
    %409 = vector.shape_cast %408 : vector<1x1x128xf32> to vector<1x128xf32>
    %c1_155 = arith.constant 1 : index
    %c0_156 = arith.constant 0 : index
    %c0_157 = arith.constant 0 : index
    %410 = vector.load %arg9[%c1_155, %c0_156, %c0_157] : memref<3x1x128xf32, #tpu.memory_space<vmem>>, vector<1x1x128xf32>
    %411 = vector.shape_cast %410 : vector<1x1x128xf32> to vector<1x128xf32>
    %cst_158 = arith.constant dense<0.000000e+00> : vector<16xf32>
    %412 = vector.multi_reduction <add>, %407, %cst_158 [1] : vector<16x128xf32> to vector<16xf32>
    %413 = vector.shape_cast %412 : vector<16xf32> to vector<16x1xf32>
    %cst_159 = arith.constant 1.280000e+02 : f32
    %414 = vector.broadcast %cst_159 : f32 to vector<16x1xf32>
    %415 = arith.divf %413, %414 : vector<16x1xf32>
    %416 = vector.broadcast %415 : vector<16x1xf32> to vector<16x128xf32>
    %417 = arith.subf %407, %416 : vector<16x128xf32>
    %418 = arith.mulf %417, %417 : vector<16x128xf32>
    %cst_160 = arith.constant dense<0.000000e+00> : vector<16xf32>
    %419 = vector.multi_reduction <add>, %418, %cst_160 [1] : vector<16x128xf32> to vector<16xf32>
    %420 = vector.shape_cast %419 : vector<16xf32> to vector<16x1xf32>
    %cst_161 = arith.constant 1.280000e+02 : f32
    %421 = vector.broadcast %cst_161 : f32 to vector<16x1xf32>
    %422 = arith.divf %420, %421 : vector<16x1xf32>
    %423 = vector.broadcast %415 : vector<16x1xf32> to vector<16x128xf32>
    %424 = arith.subf %407, %423 : vector<16x128xf32>
    %cst_162 = arith.constant 9.99999974E-6 : f32
    %425 = vector.broadcast %cst_162 : f32 to vector<16x1xf32>
    %426 = arith.addf %422, %425 : vector<16x1xf32>
    %427 = math.rsqrt %426 : vector<16x1xf32>
    %428 = vector.broadcast %427 : vector<16x1xf32> to vector<16x128xf32>
    %429 = arith.mulf %424, %428 : vector<16x128xf32>
    %430 = vector.broadcast %409 : vector<1x128xf32> to vector<16x128xf32>
    %431 = arith.mulf %429, %430 : vector<16x128xf32>
    %432 = vector.broadcast %411 : vector<1x128xf32> to vector<16x128xf32>
    %433 = arith.addf %431, %432 : vector<16x128xf32>
    %c1_163 = arith.constant 1 : index
    %c0_164 = arith.constant 0 : index
    %c0_165 = arith.constant 0 : index
    %434 = vector.load %arg10[%c1_163, %c0_164, %c0_165] : memref<3x128x2048xbf16, #tpu.memory_space<vmem>>, vector<1x128x2048xbf16>
    %435 = vector.shape_cast %434 : vector<1x128x2048xbf16> to vector<128x2048xbf16>
    %c1_166 = arith.constant 1 : index
    %c0_167 = arith.constant 0 : index
    %c0_168 = arith.constant 0 : index
    %436 = vector.load %arg11[%c1_166, %c0_167, %c0_168] : memref<3x1x2048xf32, #tpu.memory_space<vmem>>, vector<1x1x2048xf32>
    %437 = vector.shape_cast %436 : vector<1x1x2048xf32> to vector<1x2048xf32>
    %438 = arith.truncf %433 : vector<16x128xf32> to vector<16x128xbf16>
    %cst_169 = arith.constant dense<0.000000e+00> : vector<16x2048xf32>
    %439 = tpu.matmul %438, %435, %cst_169 {dimension_numbers = #tpu.dot_dimension_numbers<[1], [0], [0], [1], [0, 0, 1, 1], [], []>} : vector<16x128xbf16>, vector<128x2048xbf16>, vector<16x2048xf32> -> vector<16x2048xf32>
    %440 = vector.broadcast %437 : vector<1x2048xf32> to vector<16x2048xf32>
    %441 = arith.addf %439, %440 : vector<16x2048xf32>
    %cst_170 = arith.constant 0.000000e+00 : f32
    %442 = vector.broadcast %cst_170 : f32 to vector<16x2048xf32>
    %443 = arith.maximumf %441, %442 : vector<16x2048xf32>
    %c1_171 = arith.constant 1 : index
    %c0_172 = arith.constant 0 : index
    %c0_173 = arith.constant 0 : index
    %444 = vector.load %arg12[%c1_171, %c0_172, %c0_173] : memref<3x2048x128xbf16, #tpu.memory_space<vmem>>, vector<1x2048x128xbf16>
    %445 = vector.shape_cast %444 : vector<1x2048x128xbf16> to vector<2048x128xbf16>
    %c1_174 = arith.constant 1 : index
    %c0_175 = arith.constant 0 : index
    %c0_176 = arith.constant 0 : index
    %446 = vector.load %arg13[%c1_174, %c0_175, %c0_176] : memref<3x1x128xf32, #tpu.memory_space<vmem>>, vector<1x1x128xf32>
    %447 = vector.shape_cast %446 : vector<1x1x128xf32> to vector<1x128xf32>
    %448 = arith.truncf %443 : vector<16x2048xf32> to vector<16x2048xbf16>
    %cst_177 = arith.constant dense<0.000000e+00> : vector<16x128xf32>
    %449 = tpu.matmul %448, %445, %cst_177 {dimension_numbers = #tpu.dot_dimension_numbers<[1], [0], [0], [1], [0, 0, 1, 1], [], []>} : vector<16x2048xbf16>, vector<2048x128xbf16>, vector<16x128xf32> -> vector<16x128xf32>
    %450 = vector.broadcast %447 : vector<1x128xf32> to vector<16x128xf32>
    %451 = arith.addf %449, %450 : vector<16x128xf32>
    %452 = arith.addf %433, %451 : vector<16x128xf32>
    %c1_178 = arith.constant 1 : index
    %c0_179 = arith.constant 0 : index
    %c0_180 = arith.constant 0 : index
    %453 = vector.load %arg14[%c1_178, %c0_179, %c0_180] : memref<3x1x128xf32, #tpu.memory_space<vmem>>, vector<1x1x128xf32>
    %454 = vector.shape_cast %453 : vector<1x1x128xf32> to vector<1x128xf32>
    %c1_181 = arith.constant 1 : index
    %c0_182 = arith.constant 0 : index
    %c0_183 = arith.constant 0 : index
    %455 = vector.load %arg15[%c1_181, %c0_182, %c0_183] : memref<3x1x128xf32, #tpu.memory_space<vmem>>, vector<1x1x128xf32>
    %456 = vector.shape_cast %455 : vector<1x1x128xf32> to vector<1x128xf32>
    %cst_184 = arith.constant dense<0.000000e+00> : vector<16xf32>
    %457 = vector.multi_reduction <add>, %452, %cst_184 [1] : vector<16x128xf32> to vector<16xf32>
    %458 = vector.shape_cast %457 : vector<16xf32> to vector<16x1xf32>
    %cst_185 = arith.constant 1.280000e+02 : f32
    %459 = vector.broadcast %cst_185 : f32 to vector<16x1xf32>
    %460 = arith.divf %458, %459 : vector<16x1xf32>
    %461 = vector.broadcast %460 : vector<16x1xf32> to vector<16x128xf32>
    %462 = arith.subf %452, %461 : vector<16x128xf32>
    %463 = arith.mulf %462, %462 : vector<16x128xf32>
    %cst_186 = arith.constant dense<0.000000e+00> : vector<16xf32>
    %464 = vector.multi_reduction <add>, %463, %cst_186 [1] : vector<16x128xf32> to vector<16xf32>
    %465 = vector.shape_cast %464 : vector<16xf32> to vector<16x1xf32>
    %cst_187 = arith.constant 1.280000e+02 : f32
    %466 = vector.broadcast %cst_187 : f32 to vector<16x1xf32>
    %467 = arith.divf %465, %466 : vector<16x1xf32>
    %468 = vector.broadcast %460 : vector<16x1xf32> to vector<16x128xf32>
    %469 = arith.subf %452, %468 : vector<16x128xf32>
    %cst_188 = arith.constant 9.99999974E-6 : f32
    %470 = vector.broadcast %cst_188 : f32 to vector<16x1xf32>
    %471 = arith.addf %467, %470 : vector<16x1xf32>
    %472 = math.rsqrt %471 : vector<16x1xf32>
    %473 = vector.broadcast %472 : vector<16x1xf32> to vector<16x128xf32>
    %474 = arith.mulf %469, %473 : vector<16x128xf32>
    %475 = vector.broadcast %454 : vector<1x128xf32> to vector<16x128xf32>
    %476 = arith.mulf %474, %475 : vector<16x128xf32>
    %477 = vector.broadcast %456 : vector<1x128xf32> to vector<16x128xf32>
    %478 = arith.addf %476, %477 : vector<16x128xf32>
    %c2 = arith.constant 2 : index
    %c0_189 = arith.constant 0 : index
    %c0_190 = arith.constant 0 : index
    %479 = vector.load %arg4[%c2, %c0_189, %c0_190] : memref<3x128x384xbf16, #tpu.memory_space<vmem>>, vector<1x128x384xbf16>
    %480 = vector.shape_cast %479 : vector<1x128x384xbf16> to vector<128x384xbf16>
    %c2_191 = arith.constant 2 : index
    %c0_192 = arith.constant 0 : index
    %c0_193 = arith.constant 0 : index
    %481 = vector.load %arg5[%c2_191, %c0_192, %c0_193] : memref<3x1x384xf32, #tpu.memory_space<vmem>>, vector<1x1x384xf32>
    %482 = vector.shape_cast %481 : vector<1x1x384xf32> to vector<1x384xf32>
    %483 = arith.truncf %478 : vector<16x128xf32> to vector<16x128xbf16>
    %cst_194 = arith.constant dense<0.000000e+00> : vector<16x384xf32>
    %484 = tpu.matmul %483, %480, %cst_194 {dimension_numbers = #tpu.dot_dimension_numbers<[1], [0], [0], [1], [0, 0, 1, 1], [], []>} : vector<16x128xbf16>, vector<128x384xbf16>, vector<16x384xf32> -> vector<16x384xf32>
    %485 = vector.broadcast %482 : vector<1x384xf32> to vector<16x384xf32>
    %486 = arith.addf %484, %485 : vector<16x384xf32>
    %487 = vector.extract_strided_slice %486 {offsets = [0, 0], sizes = [16, 128], strides = [1, 1]} : vector<16x384xf32> to vector<16x128xf32>
    %488 = vector.shape_cast %487 : vector<16x128xf32> to vector<2x8x128xf32>
    %489 = vector.extract_strided_slice %486 {offsets = [0, 128], sizes = [16, 128], strides = [1, 1]} : vector<16x384xf32> to vector<16x128xf32>
    %490 = vector.shape_cast %489 : vector<16x128xf32> to vector<2x8x128xf32>
    %491 = vector.extract_strided_slice %486 {offsets = [0, 256], sizes = [16, 128], strides = [1, 1]} : vector<16x384xf32> to vector<16x128xf32>
    %492 = vector.shape_cast %491 : vector<16x128xf32> to vector<2x8x128xf32>
    %493 = vector.extract_strided_slice %488 {offsets = [0, 0, 0], sizes = [2, 8, 16], strides = [1, 1, 1]} : vector<2x8x128xf32> to vector<2x8x16xf32>
    %494 = vector.extract_strided_slice %490 {offsets = [0, 0, 0], sizes = [2, 8, 16], strides = [1, 1, 1]} : vector<2x8x128xf32> to vector<2x8x16xf32>
    %495 = vector.extract_strided_slice %492 {offsets = [0, 0, 0], sizes = [2, 8, 16], strides = [1, 1, 1]} : vector<2x8x128xf32> to vector<2x8x16xf32>
    %cst_195 = arith.constant dense<0.000000e+00> : vector<2x8x8xf32>
    %496 = tpu.matmul %493, %494, %cst_195 {dimension_numbers = #tpu.dot_dimension_numbers<[2], [2], [1], [1], [0, 0, 0, 1, 1, 1], [0], [0]>} : vector<2x8x16xf32>, vector<2x8x16xf32>, vector<2x8x8xf32> -> vector<2x8x8xf32>
    %cst_196 = arith.constant 2.500000e-01 : f32
    %497 = vector.broadcast %cst_196 : f32 to vector<2x8x8xf32>
    %498 = arith.mulf %496, %497 : vector<2x8x8xf32>
    %cst_197 = arith.constant dense<0xFF800000> : vector<2x8xf32>
    %499 = vector.multi_reduction <maximumf>, %498, %cst_197 [2] : vector<2x8x8xf32> to vector<2x8xf32>
    %500 = vector.shape_cast %499 : vector<2x8xf32> to vector<2x8x1xf32>
    %501 = vector.broadcast %500 : vector<2x8x1xf32> to vector<2x8x8xf32>
    %502 = arith.subf %498, %501 : vector<2x8x8xf32>
    %503 = math.exp %502 : vector<2x8x8xf32>
    %cst_198 = arith.constant dense<0.000000e+00> : vector<2x8xf32>
    %504 = vector.multi_reduction <add>, %503, %cst_198 [2] : vector<2x8x8xf32> to vector<2x8xf32>
    %505 = vector.shape_cast %504 : vector<2x8xf32> to vector<2x8x1xf32>
    %506 = tpu.reciprocal %505 {approx = true} : vector<2x8x1xf32> -> vector<2x8x1xf32>
    %507 = vector.broadcast %506 : vector<2x8x1xf32> to vector<2x8x8xf32>
    %508 = arith.mulf %503, %507 : vector<2x8x8xf32>
    %cst_199 = arith.constant dense<0.000000e+00> : vector<2x8x16xf32>
    %509 = tpu.matmul %508, %495, %cst_199 {dimension_numbers = #tpu.dot_dimension_numbers<[2], [1], [1], [2], [0, 0, 0, 1, 1, 2], [0], [0]>} : vector<2x8x8xf32>, vector<2x8x16xf32>, vector<2x8x16xf32> -> vector<2x8x16xf32>
    %510 = vector.extract_strided_slice %488 {offsets = [0, 0, 16], sizes = [2, 8, 16], strides = [1, 1, 1]} : vector<2x8x128xf32> to vector<2x8x16xf32>
    %511 = vector.extract_strided_slice %490 {offsets = [0, 0, 16], sizes = [2, 8, 16], strides = [1, 1, 1]} : vector<2x8x128xf32> to vector<2x8x16xf32>
    %512 = vector.extract_strided_slice %492 {offsets = [0, 0, 16], sizes = [2, 8, 16], strides = [1, 1, 1]} : vector<2x8x128xf32> to vector<2x8x16xf32>
    %cst_200 = arith.constant dense<0.000000e+00> : vector<2x8x8xf32>
    %513 = tpu.matmul %510, %511, %cst_200 {dimension_numbers = #tpu.dot_dimension_numbers<[2], [2], [1], [1], [0, 0, 0, 1, 1, 1], [0], [0]>} : vector<2x8x16xf32>, vector<2x8x16xf32>, vector<2x8x8xf32> -> vector<2x8x8xf32>
    %cst_201 = arith.constant 2.500000e-01 : f32
    %514 = vector.broadcast %cst_201 : f32 to vector<2x8x8xf32>
    %515 = arith.mulf %513, %514 : vector<2x8x8xf32>
    %cst_202 = arith.constant dense<0xFF800000> : vector<2x8xf32>
    %516 = vector.multi_reduction <maximumf>, %515, %cst_202 [2] : vector<2x8x8xf32> to vector<2x8xf32>
    %517 = vector.shape_cast %516 : vector<2x8xf32> to vector<2x8x1xf32>
    %518 = vector.broadcast %517 : vector<2x8x1xf32> to vector<2x8x8xf32>
    %519 = arith.subf %515, %518 : vector<2x8x8xf32>
    %520 = math.exp %519 : vector<2x8x8xf32>
    %cst_203 = arith.constant dense<0.000000e+00> : vector<2x8xf32>
    %521 = vector.multi_reduction <add>, %520, %cst_203 [2] : vector<2x8x8xf32> to vector<2x8xf32>
    %522 = vector.shape_cast %521 : vector<2x8xf32> to vector<2x8x1xf32>
    %523 = tpu.reciprocal %522 {approx = true} : vector<2x8x1xf32> -> vector<2x8x1xf32>
    %524 = vector.broadcast %523 : vector<2x8x1xf32> to vector<2x8x8xf32>
    %525 = arith.mulf %520, %524 : vector<2x8x8xf32>
    %cst_204 = arith.constant dense<0.000000e+00> : vector<2x8x16xf32>
    %526 = tpu.matmul %525, %512, %cst_204 {dimension_numbers = #tpu.dot_dimension_numbers<[2], [1], [1], [2], [0, 0, 0, 1, 1, 2], [0], [0]>} : vector<2x8x8xf32>, vector<2x8x16xf32>, vector<2x8x16xf32> -> vector<2x8x16xf32>
    %527 = vector.extract_strided_slice %488 {offsets = [0, 0, 32], sizes = [2, 8, 16], strides = [1, 1, 1]} : vector<2x8x128xf32> to vector<2x8x16xf32>
    %528 = vector.extract_strided_slice %490 {offsets = [0, 0, 32], sizes = [2, 8, 16], strides = [1, 1, 1]} : vector<2x8x128xf32> to vector<2x8x16xf32>
    %529 = vector.extract_strided_slice %492 {offsets = [0, 0, 32], sizes = [2, 8, 16], strides = [1, 1, 1]} : vector<2x8x128xf32> to vector<2x8x16xf32>
    %cst_205 = arith.constant dense<0.000000e+00> : vector<2x8x8xf32>
    %530 = tpu.matmul %527, %528, %cst_205 {dimension_numbers = #tpu.dot_dimension_numbers<[2], [2], [1], [1], [0, 0, 0, 1, 1, 1], [0], [0]>} : vector<2x8x16xf32>, vector<2x8x16xf32>, vector<2x8x8xf32> -> vector<2x8x8xf32>
    %cst_206 = arith.constant 2.500000e-01 : f32
    %531 = vector.broadcast %cst_206 : f32 to vector<2x8x8xf32>
    %532 = arith.mulf %530, %531 : vector<2x8x8xf32>
    %cst_207 = arith.constant dense<0xFF800000> : vector<2x8xf32>
    %533 = vector.multi_reduction <maximumf>, %532, %cst_207 [2] : vector<2x8x8xf32> to vector<2x8xf32>
    %534 = vector.shape_cast %533 : vector<2x8xf32> to vector<2x8x1xf32>
    %535 = vector.broadcast %534 : vector<2x8x1xf32> to vector<2x8x8xf32>
    %536 = arith.subf %532, %535 : vector<2x8x8xf32>
    %537 = math.exp %536 : vector<2x8x8xf32>
    %cst_208 = arith.constant dense<0.000000e+00> : vector<2x8xf32>
    %538 = vector.multi_reduction <add>, %537, %cst_208 [2] : vector<2x8x8xf32> to vector<2x8xf32>
    %539 = vector.shape_cast %538 : vector<2x8xf32> to vector<2x8x1xf32>
    %540 = tpu.reciprocal %539 {approx = true} : vector<2x8x1xf32> -> vector<2x8x1xf32>
    %541 = vector.broadcast %540 : vector<2x8x1xf32> to vector<2x8x8xf32>
    %542 = arith.mulf %537, %541 : vector<2x8x8xf32>
    %cst_209 = arith.constant dense<0.000000e+00> : vector<2x8x16xf32>
    %543 = tpu.matmul %542, %529, %cst_209 {dimension_numbers = #tpu.dot_dimension_numbers<[2], [1], [1], [2], [0, 0, 0, 1, 1, 2], [0], [0]>} : vector<2x8x8xf32>, vector<2x8x16xf32>, vector<2x8x16xf32> -> vector<2x8x16xf32>
    %544 = vector.extract_strided_slice %488 {offsets = [0, 0, 48], sizes = [2, 8, 16], strides = [1, 1, 1]} : vector<2x8x128xf32> to vector<2x8x16xf32>
    %545 = vector.extract_strided_slice %490 {offsets = [0, 0, 48], sizes = [2, 8, 16], strides = [1, 1, 1]} : vector<2x8x128xf32> to vector<2x8x16xf32>
    %546 = vector.extract_strided_slice %492 {offsets = [0, 0, 48], sizes = [2, 8, 16], strides = [1, 1, 1]} : vector<2x8x128xf32> to vector<2x8x16xf32>
    %cst_210 = arith.constant dense<0.000000e+00> : vector<2x8x8xf32>
    %547 = tpu.matmul %544, %545, %cst_210 {dimension_numbers = #tpu.dot_dimension_numbers<[2], [2], [1], [1], [0, 0, 0, 1, 1, 1], [0], [0]>} : vector<2x8x16xf32>, vector<2x8x16xf32>, vector<2x8x8xf32> -> vector<2x8x8xf32>
    %cst_211 = arith.constant 2.500000e-01 : f32
    %548 = vector.broadcast %cst_211 : f32 to vector<2x8x8xf32>
    %549 = arith.mulf %547, %548 : vector<2x8x8xf32>
    %cst_212 = arith.constant dense<0xFF800000> : vector<2x8xf32>
    %550 = vector.multi_reduction <maximumf>, %549, %cst_212 [2] : vector<2x8x8xf32> to vector<2x8xf32>
    %551 = vector.shape_cast %550 : vector<2x8xf32> to vector<2x8x1xf32>
    %552 = vector.broadcast %551 : vector<2x8x1xf32> to vector<2x8x8xf32>
    %553 = arith.subf %549, %552 : vector<2x8x8xf32>
    %554 = math.exp %553 : vector<2x8x8xf32>
    %cst_213 = arith.constant dense<0.000000e+00> : vector<2x8xf32>
    %555 = vector.multi_reduction <add>, %554, %cst_213 [2] : vector<2x8x8xf32> to vector<2x8xf32>
    %556 = vector.shape_cast %555 : vector<2x8xf32> to vector<2x8x1xf32>
    %557 = tpu.reciprocal %556 {approx = true} : vector<2x8x1xf32> -> vector<2x8x1xf32>
    %558 = vector.broadcast %557 : vector<2x8x1xf32> to vector<2x8x8xf32>
    %559 = arith.mulf %554, %558 : vector<2x8x8xf32>
    %cst_214 = arith.constant dense<0.000000e+00> : vector<2x8x16xf32>
    %560 = tpu.matmul %559, %546, %cst_214 {dimension_numbers = #tpu.dot_dimension_numbers<[2], [1], [1], [2], [0, 0, 0, 1, 1, 2], [0], [0]>} : vector<2x8x8xf32>, vector<2x8x16xf32>, vector<2x8x16xf32> -> vector<2x8x16xf32>
    %561 = vector.extract_strided_slice %488 {offsets = [0, 0, 64], sizes = [2, 8, 16], strides = [1, 1, 1]} : vector<2x8x128xf32> to vector<2x8x16xf32>
    %562 = vector.extract_strided_slice %490 {offsets = [0, 0, 64], sizes = [2, 8, 16], strides = [1, 1, 1]} : vector<2x8x128xf32> to vector<2x8x16xf32>
    %563 = vector.extract_strided_slice %492 {offsets = [0, 0, 64], sizes = [2, 8, 16], strides = [1, 1, 1]} : vector<2x8x128xf32> to vector<2x8x16xf32>
    %cst_215 = arith.constant dense<0.000000e+00> : vector<2x8x8xf32>
    %564 = tpu.matmul %561, %562, %cst_215 {dimension_numbers = #tpu.dot_dimension_numbers<[2], [2], [1], [1], [0, 0, 0, 1, 1, 1], [0], [0]>} : vector<2x8x16xf32>, vector<2x8x16xf32>, vector<2x8x8xf32> -> vector<2x8x8xf32>
    %cst_216 = arith.constant 2.500000e-01 : f32
    %565 = vector.broadcast %cst_216 : f32 to vector<2x8x8xf32>
    %566 = arith.mulf %564, %565 : vector<2x8x8xf32>
    %cst_217 = arith.constant dense<0xFF800000> : vector<2x8xf32>
    %567 = vector.multi_reduction <maximumf>, %566, %cst_217 [2] : vector<2x8x8xf32> to vector<2x8xf32>
    %568 = vector.shape_cast %567 : vector<2x8xf32> to vector<2x8x1xf32>
    %569 = vector.broadcast %568 : vector<2x8x1xf32> to vector<2x8x8xf32>
    %570 = arith.subf %566, %569 : vector<2x8x8xf32>
    %571 = math.exp %570 : vector<2x8x8xf32>
    %cst_218 = arith.constant dense<0.000000e+00> : vector<2x8xf32>
    %572 = vector.multi_reduction <add>, %571, %cst_218 [2] : vector<2x8x8xf32> to vector<2x8xf32>
    %573 = vector.shape_cast %572 : vector<2x8xf32> to vector<2x8x1xf32>
    %574 = tpu.reciprocal %573 {approx = true} : vector<2x8x1xf32> -> vector<2x8x1xf32>
    %575 = vector.broadcast %574 : vector<2x8x1xf32> to vector<2x8x8xf32>
    %576 = arith.mulf %571, %575 : vector<2x8x8xf32>
    %cst_219 = arith.constant dense<0.000000e+00> : vector<2x8x16xf32>
    %577 = tpu.matmul %576, %563, %cst_219 {dimension_numbers = #tpu.dot_dimension_numbers<[2], [1], [1], [2], [0, 0, 0, 1, 1, 2], [0], [0]>} : vector<2x8x8xf32>, vector<2x8x16xf32>, vector<2x8x16xf32> -> vector<2x8x16xf32>
    %578 = vector.extract_strided_slice %488 {offsets = [0, 0, 80], sizes = [2, 8, 16], strides = [1, 1, 1]} : vector<2x8x128xf32> to vector<2x8x16xf32>
    %579 = vector.extract_strided_slice %490 {offsets = [0, 0, 80], sizes = [2, 8, 16], strides = [1, 1, 1]} : vector<2x8x128xf32> to vector<2x8x16xf32>
    %580 = vector.extract_strided_slice %492 {offsets = [0, 0, 80], sizes = [2, 8, 16], strides = [1, 1, 1]} : vector<2x8x128xf32> to vector<2x8x16xf32>
    %cst_220 = arith.constant dense<0.000000e+00> : vector<2x8x8xf32>
    %581 = tpu.matmul %578, %579, %cst_220 {dimension_numbers = #tpu.dot_dimension_numbers<[2], [2], [1], [1], [0, 0, 0, 1, 1, 1], [0], [0]>} : vector<2x8x16xf32>, vector<2x8x16xf32>, vector<2x8x8xf32> -> vector<2x8x8xf32>
    %cst_221 = arith.constant 2.500000e-01 : f32
    %582 = vector.broadcast %cst_221 : f32 to vector<2x8x8xf32>
    %583 = arith.mulf %581, %582 : vector<2x8x8xf32>
    %cst_222 = arith.constant dense<0xFF800000> : vector<2x8xf32>
    %584 = vector.multi_reduction <maximumf>, %583, %cst_222 [2] : vector<2x8x8xf32> to vector<2x8xf32>
    %585 = vector.shape_cast %584 : vector<2x8xf32> to vector<2x8x1xf32>
    %586 = vector.broadcast %585 : vector<2x8x1xf32> to vector<2x8x8xf32>
    %587 = arith.subf %583, %586 : vector<2x8x8xf32>
    %588 = math.exp %587 : vector<2x8x8xf32>
    %cst_223 = arith.constant dense<0.000000e+00> : vector<2x8xf32>
    %589 = vector.multi_reduction <add>, %588, %cst_223 [2] : vector<2x8x8xf32> to vector<2x8xf32>
    %590 = vector.shape_cast %589 : vector<2x8xf32> to vector<2x8x1xf32>
    %591 = tpu.reciprocal %590 {approx = true} : vector<2x8x1xf32> -> vector<2x8x1xf32>
    %592 = vector.broadcast %591 : vector<2x8x1xf32> to vector<2x8x8xf32>
    %593 = arith.mulf %588, %592 : vector<2x8x8xf32>
    %cst_224 = arith.constant dense<0.000000e+00> : vector<2x8x16xf32>
    %594 = tpu.matmul %593, %580, %cst_224 {dimension_numbers = #tpu.dot_dimension_numbers<[2], [1], [1], [2], [0, 0, 0, 1, 1, 2], [0], [0]>} : vector<2x8x8xf32>, vector<2x8x16xf32>, vector<2x8x16xf32> -> vector<2x8x16xf32>
    %595 = vector.extract_strided_slice %488 {offsets = [0, 0, 96], sizes = [2, 8, 16], strides = [1, 1, 1]} : vector<2x8x128xf32> to vector<2x8x16xf32>
    %596 = vector.extract_strided_slice %490 {offsets = [0, 0, 96], sizes = [2, 8, 16], strides = [1, 1, 1]} : vector<2x8x128xf32> to vector<2x8x16xf32>
    %597 = vector.extract_strided_slice %492 {offsets = [0, 0, 96], sizes = [2, 8, 16], strides = [1, 1, 1]} : vector<2x8x128xf32> to vector<2x8x16xf32>
    %cst_225 = arith.constant dense<0.000000e+00> : vector<2x8x8xf32>
    %598 = tpu.matmul %595, %596, %cst_225 {dimension_numbers = #tpu.dot_dimension_numbers<[2], [2], [1], [1], [0, 0, 0, 1, 1, 1], [0], [0]>} : vector<2x8x16xf32>, vector<2x8x16xf32>, vector<2x8x8xf32> -> vector<2x8x8xf32>
    %cst_226 = arith.constant 2.500000e-01 : f32
    %599 = vector.broadcast %cst_226 : f32 to vector<2x8x8xf32>
    %600 = arith.mulf %598, %599 : vector<2x8x8xf32>
    %cst_227 = arith.constant dense<0xFF800000> : vector<2x8xf32>
    %601 = vector.multi_reduction <maximumf>, %600, %cst_227 [2] : vector<2x8x8xf32> to vector<2x8xf32>
    %602 = vector.shape_cast %601 : vector<2x8xf32> to vector<2x8x1xf32>
    %603 = vector.broadcast %602 : vector<2x8x1xf32> to vector<2x8x8xf32>
    %604 = arith.subf %600, %603 : vector<2x8x8xf32>
    %605 = math.exp %604 : vector<2x8x8xf32>
    %cst_228 = arith.constant dense<0.000000e+00> : vector<2x8xf32>
    %606 = vector.multi_reduction <add>, %605, %cst_228 [2] : vector<2x8x8xf32> to vector<2x8xf32>
    %607 = vector.shape_cast %606 : vector<2x8xf32> to vector<2x8x1xf32>
    %608 = tpu.reciprocal %607 {approx = true} : vector<2x8x1xf32> -> vector<2x8x1xf32>
    %609 = vector.broadcast %608 : vector<2x8x1xf32> to vector<2x8x8xf32>
    %610 = arith.mulf %605, %609 : vector<2x8x8xf32>
    %cst_229 = arith.constant dense<0.000000e+00> : vector<2x8x16xf32>
    %611 = tpu.matmul %610, %597, %cst_229 {dimension_numbers = #tpu.dot_dimension_numbers<[2], [1], [1], [2], [0, 0, 0, 1, 1, 2], [0], [0]>} : vector<2x8x8xf32>, vector<2x8x16xf32>, vector<2x8x16xf32> -> vector<2x8x16xf32>
    %612 = vector.extract_strided_slice %488 {offsets = [0, 0, 112], sizes = [2, 8, 16], strides = [1, 1, 1]} : vector<2x8x128xf32> to vector<2x8x16xf32>
    %613 = vector.extract_strided_slice %490 {offsets = [0, 0, 112], sizes = [2, 8, 16], strides = [1, 1, 1]} : vector<2x8x128xf32> to vector<2x8x16xf32>
    %614 = vector.extract_strided_slice %492 {offsets = [0, 0, 112], sizes = [2, 8, 16], strides = [1, 1, 1]} : vector<2x8x128xf32> to vector<2x8x16xf32>
    %cst_230 = arith.constant dense<0.000000e+00> : vector<2x8x8xf32>
    %615 = tpu.matmul %612, %613, %cst_230 {dimension_numbers = #tpu.dot_dimension_numbers<[2], [2], [1], [1], [0, 0, 0, 1, 1, 1], [0], [0]>} : vector<2x8x16xf32>, vector<2x8x16xf32>, vector<2x8x8xf32> -> vector<2x8x8xf32>
    %cst_231 = arith.constant 2.500000e-01 : f32
    %616 = vector.broadcast %cst_231 : f32 to vector<2x8x8xf32>
    %617 = arith.mulf %615, %616 : vector<2x8x8xf32>
    %cst_232 = arith.constant dense<0xFF800000> : vector<2x8xf32>
    %618 = vector.multi_reduction <maximumf>, %617, %cst_232 [2] : vector<2x8x8xf32> to vector<2x8xf32>
    %619 = vector.shape_cast %618 : vector<2x8xf32> to vector<2x8x1xf32>
    %620 = vector.broadcast %619 : vector<2x8x1xf32> to vector<2x8x8xf32>
    %621 = arith.subf %617, %620 : vector<2x8x8xf32>
    %622 = math.exp %621 : vector<2x8x8xf32>
    %cst_233 = arith.constant dense<0.000000e+00> : vector<2x8xf32>
    %623 = vector.multi_reduction <add>, %622, %cst_233 [2] : vector<2x8x8xf32> to vector<2x8xf32>
    %624 = vector.shape_cast %623 : vector<2x8xf32> to vector<2x8x1xf32>
    %625 = tpu.reciprocal %624 {approx = true} : vector<2x8x1xf32> -> vector<2x8x1xf32>
    %626 = vector.broadcast %625 : vector<2x8x1xf32> to vector<2x8x8xf32>
    %627 = arith.mulf %622, %626 : vector<2x8x8xf32>
    %cst_234 = arith.constant dense<0.000000e+00> : vector<2x8x16xf32>
    %628 = tpu.matmul %627, %614, %cst_234 {dimension_numbers = #tpu.dot_dimension_numbers<[2], [1], [1], [2], [0, 0, 0, 1, 1, 2], [0], [0]>} : vector<2x8x8xf32>, vector<2x8x16xf32>, vector<2x8x16xf32> -> vector<2x8x16xf32>
    %629 = tpu.concatenate %509, %526, %543, %560, %577, %594, %611, %628 in 2 : vector<2x8x16xf32>, vector<2x8x16xf32>, vector<2x8x16xf32>, vector<2x8x16xf32>, vector<2x8x16xf32>, vector<2x8x16xf32>, vector<2x8x16xf32>, vector<2x8x16xf32> -> vector<2x8x128xf32>
    %630 = vector.shape_cast %629 : vector<2x8x128xf32> to vector<16x128xf32>
    %c2_235 = arith.constant 2 : index
    %c0_236 = arith.constant 0 : index
    %c0_237 = arith.constant 0 : index
    %631 = vector.load %arg6[%c2_235, %c0_236, %c0_237] : memref<3x128x128xbf16, #tpu.memory_space<vmem>>, vector<1x128x128xbf16>
    %632 = vector.shape_cast %631 : vector<1x128x128xbf16> to vector<128x128xbf16>
    %c2_238 = arith.constant 2 : index
    %c0_239 = arith.constant 0 : index
    %c0_240 = arith.constant 0 : index
    %633 = vector.load %arg7[%c2_238, %c0_239, %c0_240] : memref<3x1x128xf32, #tpu.memory_space<vmem>>, vector<1x1x128xf32>
    %634 = vector.shape_cast %633 : vector<1x1x128xf32> to vector<1x128xf32>
    %635 = arith.truncf %630 : vector<16x128xf32> to vector<16x128xbf16>
    %cst_241 = arith.constant dense<0.000000e+00> : vector<16x128xf32>
    %636 = tpu.matmul %635, %632, %cst_241 {dimension_numbers = #tpu.dot_dimension_numbers<[1], [0], [0], [1], [0, 0, 1, 1], [], []>} : vector<16x128xbf16>, vector<128x128xbf16>, vector<16x128xf32> -> vector<16x128xf32>
    %637 = vector.broadcast %634 : vector<1x128xf32> to vector<16x128xf32>
    %638 = arith.addf %636, %637 : vector<16x128xf32>
    %639 = arith.addf %478, %638 : vector<16x128xf32>
    %c2_242 = arith.constant 2 : index
    %c0_243 = arith.constant 0 : index
    %c0_244 = arith.constant 0 : index
    %640 = vector.load %arg8[%c2_242, %c0_243, %c0_244] : memref<3x1x128xf32, #tpu.memory_space<vmem>>, vector<1x1x128xf32>
    %641 = vector.shape_cast %640 : vector<1x1x128xf32> to vector<1x128xf32>
    %c2_245 = arith.constant 2 : index
    %c0_246 = arith.constant 0 : index
    %c0_247 = arith.constant 0 : index
    %642 = vector.load %arg9[%c2_245, %c0_246, %c0_247] : memref<3x1x128xf32, #tpu.memory_space<vmem>>, vector<1x1x128xf32>
    %643 = vector.shape_cast %642 : vector<1x1x128xf32> to vector<1x128xf32>
    %cst_248 = arith.constant dense<0.000000e+00> : vector<16xf32>
    %644 = vector.multi_reduction <add>, %639, %cst_248 [1] : vector<16x128xf32> to vector<16xf32>
    %645 = vector.shape_cast %644 : vector<16xf32> to vector<16x1xf32>
    %cst_249 = arith.constant 1.280000e+02 : f32
    %646 = vector.broadcast %cst_249 : f32 to vector<16x1xf32>
    %647 = arith.divf %645, %646 : vector<16x1xf32>
    %648 = vector.broadcast %647 : vector<16x1xf32> to vector<16x128xf32>
    %649 = arith.subf %639, %648 : vector<16x128xf32>
    %650 = arith.mulf %649, %649 : vector<16x128xf32>
    %cst_250 = arith.constant dense<0.000000e+00> : vector<16xf32>
    %651 = vector.multi_reduction <add>, %650, %cst_250 [1] : vector<16x128xf32> to vector<16xf32>
    %652 = vector.shape_cast %651 : vector<16xf32> to vector<16x1xf32>
    %cst_251 = arith.constant 1.280000e+02 : f32
    %653 = vector.broadcast %cst_251 : f32 to vector<16x1xf32>
    %654 = arith.divf %652, %653 : vector<16x1xf32>
    %655 = vector.broadcast %647 : vector<16x1xf32> to vector<16x128xf32>
    %656 = arith.subf %639, %655 : vector<16x128xf32>
    %cst_252 = arith.constant 9.99999974E-6 : f32
    %657 = vector.broadcast %cst_252 : f32 to vector<16x1xf32>
    %658 = arith.addf %654, %657 : vector<16x1xf32>
    %659 = math.rsqrt %658 : vector<16x1xf32>
    %660 = vector.broadcast %659 : vector<16x1xf32> to vector<16x128xf32>
    %661 = arith.mulf %656, %660 : vector<16x128xf32>
    %662 = vector.broadcast %641 : vector<1x128xf32> to vector<16x128xf32>
    %663 = arith.mulf %661, %662 : vector<16x128xf32>
    %664 = vector.broadcast %643 : vector<1x128xf32> to vector<16x128xf32>
    %665 = arith.addf %663, %664 : vector<16x128xf32>
    %c2_253 = arith.constant 2 : index
    %c0_254 = arith.constant 0 : index
    %c0_255 = arith.constant 0 : index
    %666 = vector.load %arg10[%c2_253, %c0_254, %c0_255] : memref<3x128x2048xbf16, #tpu.memory_space<vmem>>, vector<1x128x2048xbf16>
    %667 = vector.shape_cast %666 : vector<1x128x2048xbf16> to vector<128x2048xbf16>
    %c2_256 = arith.constant 2 : index
    %c0_257 = arith.constant 0 : index
    %c0_258 = arith.constant 0 : index
    %668 = vector.load %arg11[%c2_256, %c0_257, %c0_258] : memref<3x1x2048xf32, #tpu.memory_space<vmem>>, vector<1x1x2048xf32>
    %669 = vector.shape_cast %668 : vector<1x1x2048xf32> to vector<1x2048xf32>
    %670 = arith.truncf %665 : vector<16x128xf32> to vector<16x128xbf16>
    %cst_259 = arith.constant dense<0.000000e+00> : vector<16x2048xf32>
    %671 = tpu.matmul %670, %667, %cst_259 {dimension_numbers = #tpu.dot_dimension_numbers<[1], [0], [0], [1], [0, 0, 1, 1], [], []>} : vector<16x128xbf16>, vector<128x2048xbf16>, vector<16x2048xf32> -> vector<16x2048xf32>
    %672 = vector.broadcast %669 : vector<1x2048xf32> to vector<16x2048xf32>
    %673 = arith.addf %671, %672 : vector<16x2048xf32>
    %cst_260 = arith.constant 0.000000e+00 : f32
    %674 = vector.broadcast %cst_260 : f32 to vector<16x2048xf32>
    %675 = arith.maximumf %673, %674 : vector<16x2048xf32>
    %c2_261 = arith.constant 2 : index
    %c0_262 = arith.constant 0 : index
    %c0_263 = arith.constant 0 : index
    %676 = vector.load %arg12[%c2_261, %c0_262, %c0_263] : memref<3x2048x128xbf16, #tpu.memory_space<vmem>>, vector<1x2048x128xbf16>
    %677 = vector.shape_cast %676 : vector<1x2048x128xbf16> to vector<2048x128xbf16>
    %c2_264 = arith.constant 2 : index
    %c0_265 = arith.constant 0 : index
    %c0_266 = arith.constant 0 : index
    %678 = vector.load %arg13[%c2_264, %c0_265, %c0_266] : memref<3x1x128xf32, #tpu.memory_space<vmem>>, vector<1x1x128xf32>
    %679 = vector.shape_cast %678 : vector<1x1x128xf32> to vector<1x128xf32>
    %680 = arith.truncf %675 : vector<16x2048xf32> to vector<16x2048xbf16>
    %cst_267 = arith.constant dense<0.000000e+00> : vector<16x128xf32>
    %681 = tpu.matmul %680, %677, %cst_267 {dimension_numbers = #tpu.dot_dimension_numbers<[1], [0], [0], [1], [0, 0, 1, 1], [], []>} : vector<16x2048xbf16>, vector<2048x128xbf16>, vector<16x128xf32> -> vector<16x128xf32>
    %682 = vector.broadcast %679 : vector<1x128xf32> to vector<16x128xf32>
    %683 = arith.addf %681, %682 : vector<16x128xf32>
    %684 = arith.addf %665, %683 : vector<16x128xf32>
    %c2_268 = arith.constant 2 : index
    %c0_269 = arith.constant 0 : index
    %c0_270 = arith.constant 0 : index
    %685 = vector.load %arg14[%c2_268, %c0_269, %c0_270] : memref<3x1x128xf32, #tpu.memory_space<vmem>>, vector<1x1x128xf32>
    %686 = vector.shape_cast %685 : vector<1x1x128xf32> to vector<1x128xf32>
    %c2_271 = arith.constant 2 : index
    %c0_272 = arith.constant 0 : index
    %c0_273 = arith.constant 0 : index
    %687 = vector.load %arg15[%c2_271, %c0_272, %c0_273] : memref<3x1x128xf32, #tpu.memory_space<vmem>>, vector<1x1x128xf32>
    %688 = vector.shape_cast %687 : vector<1x1x128xf32> to vector<1x128xf32>
    %cst_274 = arith.constant dense<0.000000e+00> : vector<16xf32>
    %689 = vector.multi_reduction <add>, %684, %cst_274 [1] : vector<16x128xf32> to vector<16xf32>
    %690 = vector.shape_cast %689 : vector<16xf32> to vector<16x1xf32>
    %cst_275 = arith.constant 1.280000e+02 : f32
    %691 = vector.broadcast %cst_275 : f32 to vector<16x1xf32>
    %692 = arith.divf %690, %691 : vector<16x1xf32>
    %693 = vector.broadcast %692 : vector<16x1xf32> to vector<16x128xf32>
    %694 = arith.subf %684, %693 : vector<16x128xf32>
    %695 = arith.mulf %694, %694 : vector<16x128xf32>
    %cst_276 = arith.constant dense<0.000000e+00> : vector<16xf32>
    %696 = vector.multi_reduction <add>, %695, %cst_276 [1] : vector<16x128xf32> to vector<16xf32>
    %697 = vector.shape_cast %696 : vector<16xf32> to vector<16x1xf32>
    %cst_277 = arith.constant 1.280000e+02 : f32
    %698 = vector.broadcast %cst_277 : f32 to vector<16x1xf32>
    %699 = arith.divf %697, %698 : vector<16x1xf32>
    %700 = vector.broadcast %692 : vector<16x1xf32> to vector<16x128xf32>
    %701 = arith.subf %684, %700 : vector<16x128xf32>
    %cst_278 = arith.constant 9.99999974E-6 : f32
    %702 = vector.broadcast %cst_278 : f32 to vector<16x1xf32>
    %703 = arith.addf %699, %702 : vector<16x1xf32>
    %704 = math.rsqrt %703 : vector<16x1xf32>
    %705 = vector.broadcast %704 : vector<16x1xf32> to vector<16x128xf32>
    %706 = arith.mulf %701, %705 : vector<16x128xf32>
    %707 = vector.broadcast %686 : vector<1x128xf32> to vector<16x128xf32>
    %708 = arith.mulf %706, %707 : vector<16x128xf32>
    %709 = vector.broadcast %688 : vector<1x128xf32> to vector<16x128xf32>
    %710 = arith.addf %708, %709 : vector<16x128xf32>
    %c0_279 = arith.constant 0 : index
    %c0_280 = arith.constant 0 : index
    %711 = vector.load %arg16[%c0_279, %c0_280] : memref<128x1xf32, #tpu.memory_space<vmem>>, vector<128x1xf32>
    %cst_281 = arith.constant dense<0.000000e+00> : vector<16x1xf32>
    %712 = tpu.matmul %710, %711, %cst_281 {dimension_numbers = #tpu.dot_dimension_numbers<[1], [0], [0], [1], [0, 0, 1, 1], [], []>} : vector<16x128xf32>, vector<128x1xf32>, vector<16x1xf32> -> vector<16x1xf32>
    %c0_282 = arith.constant 0 : index
    %c0_283 = arith.constant 0 : index
    %713 = vector.load %arg17[%c0_282, %c0_283] : memref<1x1xf32, #tpu.memory_space<vmem>>, vector<1x1xf32>
    %714 = vector.broadcast %713 : vector<1x1xf32> to vector<16x1xf32>
    %715 = arith.addf %712, %714 : vector<16x1xf32>
    %716 = vector.shape_cast %715 : vector<16x1xf32> to vector<2x8x1xf32>
    %cst_284 = arith.constant dense<0xFF800000> : vector<2x1xf32>
    %717 = vector.multi_reduction <maximumf>, %716, %cst_284 [1] : vector<2x8x1xf32> to vector<2x1xf32>
    %718 = vector.shape_cast %717 : vector<2x1xf32> to vector<2x1x1xf32>
    %719 = vector.broadcast %718 : vector<2x1x1xf32> to vector<2x8x1xf32>
    %720 = arith.subf %716, %719 : vector<2x8x1xf32>
    %721 = math.exp %720 : vector<2x8x1xf32>
    %cst_285 = arith.constant dense<0.000000e+00> : vector<2x1xf32>
    %722 = vector.multi_reduction <add>, %721, %cst_285 [1] : vector<2x8x1xf32> to vector<2x1xf32>
    %723 = vector.shape_cast %722 : vector<2x1xf32> to vector<2x1x1xf32>
    %724 = tpu.reciprocal %723 {approx = true} : vector<2x1x1xf32> -> vector<2x1x1xf32>
    %725 = vector.broadcast %724 : vector<2x1x1xf32> to vector<2x8x1xf32>
    %726 = arith.mulf %721, %725 : vector<2x8x1xf32>
    %727 = vector.shape_cast %710 : vector<16x128xf32> to vector<2x8x128xf32>
    %728 = vector.broadcast %726 : vector<2x8x1xf32> to vector<2x8x128xf32>
    %729 = arith.mulf %727, %728 : vector<2x8x128xf32>
    %cst_286 = arith.constant dense<0.000000e+00> : vector<2x128xf32>
    %730 = vector.multi_reduction <add>, %729, %cst_286 [1] : vector<2x8x128xf32> to vector<2x128xf32>
    %c0_287 = arith.constant 0 : index
    %c0_288 = arith.constant 0 : index
    %731 = vector.load %arg18[%c0_287, %c0_288] : memref<128x1024xbf16, #tpu.memory_space<vmem>>, vector<128x1024xbf16>
    %c0_289 = arith.constant 0 : index
    %c0_290 = arith.constant 0 : index
    %732 = vector.load %arg19[%c0_289, %c0_290] : memref<1x1024xf32, #tpu.memory_space<vmem>>, vector<1x1024xf32>
    %733 = arith.truncf %730 : vector<2x128xf32> to vector<2x128xbf16>
    %cst_291 = arith.constant dense<0.000000e+00> : vector<2x1024xf32>
    %734 = tpu.matmul %733, %731, %cst_291 {dimension_numbers = #tpu.dot_dimension_numbers<[1], [0], [0], [1], [0, 0, 1, 1], [], []>} : vector<2x128xbf16>, vector<128x1024xbf16>, vector<2x1024xf32> -> vector<2x1024xf32>
    %735 = vector.broadcast %732 : vector<1x1024xf32> to vector<2x1024xf32>
    %736 = arith.addf %734, %735 : vector<2x1024xf32>
    %c0_292 = arith.constant 0 : index
    %c0_293 = arith.constant 0 : index
    %737 = vector.load %arg20[%c0_292, %c0_293] : memref<2x1024xf32, #tpu.memory_space<vmem>>, vector<2x1024xf32>
    tpu.vector_store %arg20[%c0_292, %c0_293], %736 {strides = array<i32>} : memref<2x1024xf32, #tpu.memory_space<vmem>>, vector<2x1024xf32>,
    return
  }
}

</mosaic_0001>

<bundles_post_ra>
// kernel: forward.1
= control target key start
LH: loop header
LB: loop body
LE: loop exit
PB: predicated region body
PF: predicated region fallthrough
CT: control target
= control target key end

     0   :  { %s20441_s0 = inlined_call_operand.vmem [shape: f32[16,768], index: 0, kind: input, shape index: {}]   ;;  %s20442_s1 = inlined_call_operand.hbm [shape: f32[8,128], index: 1, kind: input, shape index: {}]   ;;  %s20443_s2 = inlined_call_operand.hbm [shape: bf16[768,128], index: 2, kind: input, shape index: {}]   ;;  %s20444_s3 = inlined_call_operand.hbm [shape: f32[1,128], index: 3, kind: input, shape index: {}]   ;;  %s20445_s4 = inlined_call_operand.hbm [shape: bf16[3,128,384], index: 4, kind: input, shape index: {}]   ;;  %s20446_s5 = inlined_call_operand.hbm [shape: f32[3,1,384], index: 5, kind: input, shape index: {}]   ;;  %s20447_s6 = inlined_call_operand.hbm [shape: bf16[3,128,128], index: 6, kind: input, shape index: {}]   ;;  %s20448_s7 = inlined_call_operand.hbm [shape: f32[3,1,128], index: 7, kind: input, shape index: {}]   ;;  %s20449_s8 = inlined_call_operand.hbm [shape: f32[3,1,128], index: 8, kind: input, shape index: {}]   ;;  %s20450_s9 = inlined_call_operand.hbm [shape: f32[3,1,128], index: 9, kind: input, shape index: {}]   ;;  %s20451_s10 = inlined_call_operand.hbm [shape: bf16[3,128,2048], index: 10, kind: input, shape index: {}]   ;;  %s20452_s11 = inlined_call_operand.hbm [shape: f32[3,1,2048], index: 11, kind: input, shape index: {}]   ;;  %s20453_s12 = inlined_call_operand.hbm [shape: bf16[3,2048,128], index: 12, kind: input, shape index: {}]   ;;  %s20454_s13 = inlined_call_operand.hbm [shape: f32[3,1,128], index: 13, kind: input, shape index: {}]   ;;  %s20455_s14 = inlined_call_operand.hbm [shape: f32[3,1,128], index: 14, kind: input, shape index: {}]   ;;  %s20456_s15 = inlined_call_operand.hbm [shape: f32[3,1,128], index: 15, kind: input, shape index: {}]   ;;  %s20457_s16 = inlined_call_operand.vmem [shape: f32[128,1], index: 16, kind: input, shape index: {}]   ;;  %s20458_s17 = inlined_call_operand.<no memory space> [shape: f32[1,1], index: 17, kind: input, shape index: {}]   ;;  %s20459_s18 = inlined_call_operand.hbm [shape: bf16[128,1024], index: 18, kind: input, shape index: {}]   ;;  %s20460_s19 = inlined_call_operand.hbm [shape: f32[1,1024], index: 19, kind: input, shape index: {}]   ;;  %s20461_s20 = inlined_call_operand.hbm [shape: f32[2,1024], index: 20, kind: output, shape index: {}]  }
   0x1   :  { %20463 = sst [smem:[#allocation41_spill]] %s20441_s0  ;;  %v25_v0 = vstv %s20458_s17 }
   0x2   :  { %20464 = sst [smem:[#allocation42_spill]] %s20442_s1  ;;  %26 = vst [vmem:[#allocation2] sm:$0x1] %v25_v0 }
   0x3   :  { %20465 = sst [smem:[#allocation43_spill]] %s20443_s2 }
   0x4   :  { %20466 = sst [smem:[#allocation44_spill]] %s20444_s3 }
   0x5   :  { %20467 = sst [smem:[#allocation45_spill]] %s20445_s4 }
   0x6   :  { %27 = vsyncpa [#allocation4], 0 }
   0x7   :  { %28 = vsyncpa [#allocation7], 0 }
   0x8   :  { %29 = vsyncpa [#allocation10], 0 }
   0x9   :  { %30 = vsyncpa [#allocation13], 0 }
   0xa   :  { %31 = vsyncpa [#allocation16], 0 }
   0xb   :  { %32 = vsyncpa [#allocation19], 0 }
   0xc   :  { %33 = vsyncpa [#allocation22], 0 }
   0xd   :  { %34 = vsyncpa [#allocation25], 0 }
   0xe   :  { %35 = vsyncpa [#allocation28], 0  ;;  %s20468_s2 = sld [smem:[#allocation43_spill]] }
  0x14   :  { %s54_s25 = sshll.u32 %s20468_s2, 4  ;;  %s55_s25 = int_to_ptr.hbm [resolvable:$true] %s54_s25 }
  0x15   :  { %36 = vsyncpa [#allocation5], 0  ;;  %s19035_s3 = smov [#allocation6]   ;;  %s20469_s28 = sld [smem:[#allocation45_spill]] }
  0x16   :  { %s56_s26 = sshll.u32 %s19035_s3, 4  ;;  %s19036_s29 = smov 64   ;;  %s57_s26 = int_to_ptr.vmem [resolvable:$true] %s56_s26 }
  0x17   :  { %s19037_s30 = smov 4   ;;  %s19038_s0 = smov [#allocation9]  }
  0x18   :  { %62 = dma.hbm_to_vmem [thread:$0]  %s55_s25, 6144, %s57_s26, [#allocation7], %s19036_s29, %s19036_s29, %s19037_s30  }
  0x19   :  { %s80_s21 = sshll.u32 %s19038_s0, 4  ;;  %s19039_s1 = smov 192   ;;  %s81_s21 = int_to_ptr.vmem [resolvable:$true] %s80_s21 }
  0x1a   :  { %s19040_s22 = smov 12   ;;  %s104_s2 = sshll.u32 %s20447_s6, 4  ;;  %s105_s2 = int_to_ptr.hbm [resolvable:$true] %s104_s2 }
  0x1b   :  { %s78_s4 = sshll.u32 %s20469_s28, 4  ;;  %s19041_s3 = smov [#allocation12]   ;;  %s79_s4 = int_to_ptr.hbm [resolvable:$true] %s78_s4 }
  0x1c   :  { %86 = dma.hbm_to_vmem [thread:$0]  %s79_s4, 9216, %s81_s21, [#allocation10], %s19039_s1, %s19039_s1, %s19040_s22  }
  0x1d   :  { %s106_s17 = sshll.u32 %s19041_s3, 4  ;;  %s130_s27 = sshll.u32 %s20449_s8, 4  ;;  %s107_s17 = int_to_ptr.vmem [resolvable:$true] %s106_s17  ;;  %s131_s27 = int_to_ptr.hbm [resolvable:$true] %s130_s27 }
  0x1e   :  { %112 = dma.hbm_to_vmem [thread:$0]  %s105_s2, 3072, %s107_s17, [#allocation13], %s19036_s29, %s19036_s29, %s19037_s30  }
  0x1f   :  { %s19042_s28 = smov [#allocation15]   ;;  %s156_s1 = sshll.u32 %s20451_s10, 4  ;;  %s157_s1 = int_to_ptr.hbm [resolvable:$true] %s156_s1 }
  0x20   :  { %s132_s0 = sshll.u32 %s19042_s28, 4  ;;  %s19043_s6 = smov 16   ;;  %s133_s0 = int_to_ptr.vmem [resolvable:$true] %s132_s0 }
  0x21   :  { %s19044_s22 = smov 1   ;;  %s19045_s23 = smov [#allocation18]  }
  0x22   :  { %138 = dma.hbm_to_vmem [thread:$0]  %s131_s27, 48, %s133_s0, [#allocation16], %s19043_s6, %s19043_s6, %s19044_s22  }
  0x23   :  { %s158_s24 = sshll.u32 %s19045_s23, 4  ;;  %s182_s8 = sshll.u32 %s20453_s12, 4  ;;  %s159_s24 = int_to_ptr.vmem [resolvable:$true] %s158_s24  ;;  %s183_s8 = int_to_ptr.hbm [resolvable:$true] %s182_s8 }
  0x24   :  { %s19046_s17 = smov 1024   ;;  %s208_s26 = sshll.u32 %s20455_s14, 4  ;;  %s209_s26 = int_to_ptr.hbm [resolvable:$true] %s208_s26 }
  0x25   :  { %164 = dma.hbm_to_vmem [thread:$0]  %s157_s1, 49152, %s159_s24, [#allocation19], %s19046_s17, %s19046_s17, %s19036_s29  }
  0x26   :  { %s19047_s28 = smov [#allocation21]   ;;  %s19048_s27 = smov [#allocation24]  }
  0x27   :  { %s184_s4 = sshll.u32 %s19047_s28, 4  ;;  %s210_s0 = sshll.u32 %s19048_s27, 4  ;;  %s185_s4 = int_to_ptr.vmem [resolvable:$true] %s184_s4  ;;  %s211_s0 = int_to_ptr.vmem [resolvable:$true] %s210_s0 }
  0x28   :  { %190 = dma.hbm_to_vmem [thread:$0]  %s183_s8, 49152, %s185_s4, [#allocation22], %s19036_s29, %s19036_s29, %s19037_s30  }
  0x29   :  { %s238_s23 = sshll.u32 %s20459_s18, 4  ;;  %s19049_s14 = smov [#allocation27]   ;;  %s239_s23 = int_to_ptr.hbm [resolvable:$true] %s238_s23 }
  0x2a   :  { %216 = dma.hbm_to_vmem [thread:$0]  %s209_s26, 48, %s211_s0, [#allocation25], %s19043_s6, %s19043_s6, %s19044_s22  }
  0x2b   :  { %s240_s1 = sshll.u32 %s19049_s14, 4  ;;  %s20470_s3 = sld [smem:[#allocation42_spill]]  ;;  %s241_s1 = int_to_ptr.vmem [resolvable:$true] %s240_s1 }
  0x2c   :  { %s19050_s30 = smov 512   ;;  %s19051_s8 = smov 32  }
  0x2d   :  { %246 = dma.hbm_to_vmem [thread:$0]  %s239_s23, 8192, %s241_s1, [#allocation28], %s19050_s30, %s19050_s30, %s19051_s8  }
  0x2e   :  { %s19052_s10 = smov [#allocation3]   ;;  %s20471_s4 = sld [smem:[#allocation44_spill]] }
  0x2f   :  { %s46_s18 = sshll.u32 %s19052_s10, 4  ;;  %s91_s12 = sshll.u32 %s20446_s5, 4  ;;  %s47_s18 = int_to_ptr.vmem [resolvable:$true] %s46_s18  ;;  %s92_s12 = int_to_ptr.hbm [resolvable:$true] %s91_s12 }
  0x30   :  { %s19053_s21 = smov [#allocation8]   ;;  %s19054_s23 = smov [#allocation11]  }
  0x31   :  { %s44_s17 = sshll.u32 %s20470_s3, 4  ;;  %s70_s14 = sshll.u32 %s19053_s21, 4  ;;  %s45_s17 = int_to_ptr.hbm [resolvable:$true] %s44_s17  ;;  %s71_s14 = int_to_ptr.vmem [resolvable:$true] %s70_s14 }
  0x32   :  { %49 = dma.hbm_to_vmem [thread:$0]  %s45_s17, 128, %s47_s18, [#allocation4]  }
  0x33   :  { %s93_s1 = sshll.u32 %s19054_s23, 4  ;;  %s19055_s24 = smov 48   ;;  %s94_s1 = int_to_ptr.vmem [resolvable:$true] %s93_s1 }
  0x34   :  { %s68_s27 = sshll.u32 %s20471_s4, 4  ;;  %s19056_s2 = smov 3   ;;  %s69_s27 = int_to_ptr.hbm [resolvable:$true] %s68_s27 }
  0x35   :  { %73 = dma.hbm_to_vmem [thread:$0]  %s69_s27, 16, %s71_s14, [#allocation7]  }
  0x36   :  { %99 = dma.hbm_to_vmem [thread:$0]  %s92_s12, 144, %s94_s1, [#allocation10], %s19055_s24, %s19055_s24, %s19056_s2  }
  0x37   :  { %s117_s17 = sshll.u32 %s20448_s7, 4  ;;  %s19057_s10 = smov [#allocation14]   ;;  %s118_s17 = int_to_ptr.hbm [resolvable:$true] %s117_s17 }
  0x38   :  { %s119_s5 = sshll.u32 %s19057_s10, 4  ;;  %s143_s28 = sshll.u32 %s20450_s9, 4  ;;  %s120_s5 = int_to_ptr.vmem [resolvable:$true] %s119_s5  ;;  %s144_s28 = int_to_ptr.hbm [resolvable:$true] %s143_s28 }
  0x39   :  { %125 = dma.hbm_to_vmem [thread:$0]  %s118_s17, 48, %s120_s5, [#allocation13], %s19043_s6, %s19043_s6, %s19044_s22  }
  0x3a   :  { %s19058_s4 = smov [#allocation17]   ;;  %s169_s12 = sshll.u32 %s20452_s11, 4  ;;  %s170_s12 = int_to_ptr.hbm [resolvable:$true] %s169_s12 }
  0x3b   :  { %s145_s27 = sshll.u32 %s19058_s4, 4  ;;  %s19059_s7 = smov [#allocation20]   ;;  %s146_s27 = int_to_ptr.vmem [resolvable:$true] %s145_s27 }
  0x3c   :  { %151 = dma.hbm_to_vmem [thread:$0]  %s144_s28, 48, %s146_s27, [#allocation16], %s19043_s6, %s19043_s6, %s19044_s22  }
  0x3d   :  { %s171_s21 = sshll.u32 %s19059_s7, 4  ;;  %s195_s23 = sshll.u32 %s20454_s13, 4  ;;  %s172_s21 = int_to_ptr.vmem [resolvable:$true] %s171_s21  ;;  %s196_s23 = int_to_ptr.hbm [resolvable:$true] %s195_s23 }
  0x3e   :  { %s19060_s1 = smov 256   ;;  %s221_s11 = sshll.u32 %s20456_s15, 4  ;;  %s222_s11 = int_to_ptr.hbm [resolvable:$true] %s221_s11 }
  0x3f   :  { %177 = dma.hbm_to_vmem [thread:$0]  %s170_s12, 768, %s172_s21, [#allocation19], %s19060_s1, %s19060_s1, %s19043_s6  }
  0x40   :  { %s19061_s30 = smov [#allocation23]   ;;  %s19062_s10 = smov [#allocation26]  }
  0x41   :  { %s197_s17 = sshll.u32 %s19061_s30, 4  ;;  %s223_s5 = sshll.u32 %s19062_s10, 4  ;;  %s198_s17 = int_to_ptr.vmem [resolvable:$true] %s197_s17  ;;  %s224_s5 = int_to_ptr.vmem [resolvable:$true] %s223_s5 }
  0x42   :  { %203 = dma.hbm_to_vmem [thread:$0]  %s196_s23, 48, %s198_s17, [#allocation22], %s19043_s6, %s19043_s6, %s19044_s22  }
  0x43   :  { %s252_s25 = sshll.u32 %s20460_s19, 4  ;;  %s19063_s15 = smov [#allocation29]   ;;  %s253_s25 = int_to_ptr.hbm [resolvable:$true] %s252_s25 }
  0x44   :  { %229 = dma.hbm_to_vmem [thread:$0]  %s222_s11, 48, %s224_s5, [#allocation25], %s19043_s6, %s19043_s6, %s19044_s22  }
  0x45   :  { %s254_s28 = sshll.u32 %s19063_s15, 4  ;;  %s255_s28 = int_to_ptr.vmem [resolvable:$true] %s254_s28 }
  0x46   :  { %257 = dma.hbm_to_vmem [thread:$0]  %s253_s25, 128, %s255_s28, [#allocation28]  }
  0x47   :  { %19015 = dma.done.wait [#allocation4], 128  }
  0x48   :  { %19016 = vsyncadd [#allocation4], 4294967168 }
  0x49   :  { %19017 = dma.done.wait [#allocation7], 6160  }
  0x4a   :  { %19018 = vsyncadd [#allocation7], 4294961136 }
  0x4b   :  { %19019 = dma.done.wait [#allocation10], 9360  }
  0x4c   :  { %19020 = vsyncadd [#allocation10], 4294957936 }
  0x4d   :  { %19021 = dma.done.wait [#allocation13], 3120  }
  0x4e   :  { %19022 = vsyncadd [#allocation13], 4294964176 }
  0x4f   :  { %19023 = dma.done.wait [#allocation16], 96  }
  0x50   :  { %19024 = vsyncadd [#allocation16], 4294967200 }
  0x51   :  { %19025 = dma.done.wait [#allocation19], 49920  }
  0x52   :  { %19026 = vsyncadd [#allocation19], 4294917376 }
  0x53   :  { %19027 = dma.done.wait [#allocation22], 49200  }
  0x54   :  { %19028 = vsyncadd [#allocation22], 4294918096 }
  0x55   :  { %19029 = dma.done.wait [#allocation25], 96  }
  0x56   :  { %19030 = vsyncadd [#allocation25], 4294967200 }
  0x57   :  { %19031 = dma.done.wait [#allocation28], 8320  }
  0x58   :  { %19032 = vsyncadd [#allocation28], 4294958976  ;;  %v17136_v1 = vld [vmem:[#allocation6 + $0x38] sm:$0xff]  ;;  %v17135_v5 = vld [vmem:[#allocation6 + $0x30] sm:$0xff]  ;;  %s20472_s4 = sld [smem:[#allocation41_spill]]  ;;  %vm1032_vm0 = vcmask 130048  }
  0x59   :  { %v17144_v2 = vld [vmem:[#allocation6 + $0x78] sm:$0xff]  ;;  %732 = vmatpush.bf16.msra.mxu0 %v17136_v1  ;;  %v17143_v6 = vld [vmem:[#allocation6 + $0x70] sm:$0xff]  ;;  %v17134_v9 = vld [vmem:[#allocation6 + $0x28] sm:$0xff]  ;;  %s19064_s19 = smov 112   ;;  %vm1087_vm1 = vcmask 64512   ;;  %s19065_s22 = smov 96  }
  0x5a   :  { %v17152_v3 = vld [vmem:[#allocation6 + $0xb8] sm:$0xff]  ;;  %746 = vmatpush.bf16.msra.mxu1 %v17144_v2  ;;  %v17151_v7 = vld [vmem:[#allocation6 + $0xb0] sm:$0xff]  ;;  %v17142_v10 = vld [vmem:[#allocation6 + $0x68] sm:$0xff]  ;;  %vm2140_vm2 = vcmask 261120   ;;  %vm2143_vm3 = vcmask 392192   ;;  %vm2146_vm4 = vcmask 523264  }
  0x5b   :  { %v17160_v4 = vld [vmem:[#allocation6 + $0xf8] sm:$0xff]  ;;  %760 = vmatpush.bf16.msra.mxu2 %v17152_v3  ;;  %v17159_v8 = vld [vmem:[#allocation6 + $0xf0] sm:$0xff]  ;;  %v17150_v11 = vld [vmem:[#allocation6 + $0xa8] sm:$0xff]  ;;  %vm2149_vm5 = vcmask 654336   ;;  %vm2152_vm6 = vcmask 785408   ;;  %vm2155_vm7 = vcmask 916480  }
  0x5c   :  { %774 = vmatpush.bf16.msra.mxu3 %v17160_v4  ;;  %v17158_v12 = vld [vmem:[#allocation6 + $0xe8] sm:$0xff]  ;;  %v17133_v13 = vld [vmem:[#allocation6 + $0x20] sm:$0xff]  ;;  %v17132_v17 = vld [vmem:[#allocation6 + $0x18] sm:$0xff]  ;;  %s13063_s0 = sshll.u32 %s20461_s20, 4  ;;  %s13064_s0 = int_to_ptr.hbm [resolvable:$true] %s13063_s0 }
  0x5d   :  { %733 = vmatpush.bf16.msra.mxu0 %v17135_v5  ;;  %v17141_v14 = vld [vmem:[#allocation6 + $0x60] sm:$0xff]  ;;  %v17140_v18 = vld [vmem:[#allocation6 + $0x58] sm:$0xff]  ;;  %v17131_v21 = vld [vmem:[#allocation6 + $0x10] sm:$0xff] }
  0x5e   :  { %747 = vmatpush.bf16.msra.mxu1 %v17143_v6  ;;  %v17149_v15 = vld [vmem:[#allocation6 + $0xa0] sm:$0xff]  ;;  %v17148_v19 = vld [vmem:[#allocation6 + $0x98] sm:$0xff]  ;;  %v17139_v22 = vld [vmem:[#allocation6 + $0x50] sm:$0xff] }
  0x5f   :  { %761 = vmatpush.bf16.msra.mxu2 %v17151_v7  ;;  %v17157_v16 = vld [vmem:[#allocation6 + $0xe0] sm:$0xff]  ;;  %v17156_v20 = vld [vmem:[#allocation6 + $0xd8] sm:$0xff]  ;;  %v17147_v23 = vld [vmem:[#allocation6 + $0x90] sm:$0xff] }
  0x60   :  { %775 = vmatpush.bf16.msra.mxu3 %v17159_v8  ;;  %v17155_v24 = vld [vmem:[#allocation6 + $0xd0] sm:$0xff]  ;;  %v17130_v25 = vld [vmem:[#allocation6 + $0x8] sm:$0xff]  ;;  %v17129_v29 = vld [vmem:[#allocation6] sm:$0xff] }
  0x61   :  { %734 = vmatpush.bf16.msra.mxu0 %v17134_v9  ;;  %v17138_v26 = vld [vmem:[#allocation6 + $0x48] sm:$0xff]  ;;  %v17137_v30 = vld [vmem:[#allocation6 + $0x40] sm:$0xff]  ;;  %v326_v31 = vld [vmem:[%s20472_s4] sm:$0xff] }
  0x62   :  { %748 = vmatpush.bf16.msra.mxu1 %v17142_v10  ;;  %v17146_v27 = vld [vmem:[#allocation6 + $0x88] sm:$0xff]  ;;  %v327_v33 = vld [vmem:[%s20472_s4 + $0x8] sm:$0xff]  ;;  %v334_v40 = vld [vmem:[%s20472_s4 + $0x40] sm:$0xff] }
  0x63   :  { %762 = vmatpush.bf16.msra.mxu2 %v17150_v11  ;;  %v17154_v28 = vld [vmem:[#allocation6 + $0xc8] sm:$0xff]  ;;  %v17168_v35 = vld [vmem:[#allocation6 + $0x138] sm:$0xff]  ;;  %v17145_v37 = vld [vmem:[#allocation6 + $0x80] sm:$0xff] }
  0x64   :  { %776 = vmatpush.bf16.msra.mxu3 %v17158_v12  ;;  %v332_v32 = vld [vmem:[%s20472_s4 + $0x30] sm:$0xff]  ;;  %v333_v34 = vld [vmem:[%s20472_s4 + $0x38] sm:$0xff]  ;;  %v17176_v36 = vld [vmem:[#allocation6 + $0x178] sm:$0xff] }
  0x65   :  { %735 = vmatpush.bf16.msra.mxu0 %v17133_v13  ;;  %v17153_v38 = vld [vmem:[#allocation6 + $0xc0] sm:$0xff]  ;;  %v435_v41 = vpack.c.bf16 %v332_v32, %v326_v31  ;;  %v329_v42 = vld [vmem:[%s20472_s4 + $0x18] sm:$0xff]  ;;  %v436_v44 = vpack.c.bf16 %v333_v34, %v327_v33  ;;  %v17164_v53 = vld [vmem:[#allocation6 + $0x118] sm:$0xff] }
  0x66   :  { %749 = vmatpush.bf16.msra.mxu1 %v17141_v14  ;;  %v328_v39 = vld [vmem:[%s20472_s4 + $0x10] sm:$0xff]  ;;  %v335_v43 = vld [vmem:[%s20472_s4 + $0x48] sm:$0xff]  ;;  %v17167_v45 = vld [vmem:[#allocation6 + $0x130] sm:$0xff] }
  0x67   :  { %763 = vmatpush.bf16.msra.mxu2 %v17149_v15  ;;  %v17175_v46 = vld [vmem:[#allocation6 + $0x170] sm:$0xff]  ;;  %v437_v47 = vpack.c.bf16 %v334_v40, %v328_v39  ;;  %v438_v48 = vpack.c.bf16 %v335_v43, %v329_v42  ;;  %v17166_v49 = vld [vmem:[#allocation6 + $0x128] sm:$0xff]  ;;  %v17165_v51 = vld [vmem:[#allocation6 + $0x120] sm:$0xff] }
  0x68   :  { %777 = vmatpush.bf16.msra.mxu3 %v17157_v16  ;;  %v17174_v50 = vld [vmem:[#allocation6 + $0x168] sm:$0xff]  ;;  %v17173_v52 = vld [vmem:[#allocation6 + $0x160] sm:$0xff]  ;;  %v17172_v54 = vld [vmem:[#allocation6 + $0x158] sm:$0xff] }
  0x69   :  { %736 = vmatpush.bf16.msra.mxu0 %v17132_v17  ;;  %v17163_v55 = vld [vmem:[#allocation6 + $0x110] sm:$0xff]  ;;  %v17162_v57 = vld [vmem:[#allocation6 + $0x108] sm:$0xff]  ;;  %v17161_v59 = vld [vmem:[#allocation6 + $0x100] sm:$0xff] }
  0x6a   :  { %750 = vmatpush.bf16.msra.mxu1 %v17140_v18  ;;  %v17171_v56 = vld [vmem:[#allocation6 + $0x150] sm:$0xff]  ;;  %v17170_v58 = vld [vmem:[#allocation6 + $0x148] sm:$0xff]  ;;  %v17169_v60 = vld [vmem:[#allocation6 + $0x140] sm:$0xff] }
  0x6b   :  { %764 = vmatpush.bf16.msra.mxu2 %v17148_v19  ;;  %v330_v61 = vld [vmem:[%s20472_s4 + $0x20] sm:$0xff]  ;;  %v336_v62 = vld [vmem:[%s20472_s4 + $0x50] sm:$0xff]  ;;  %v331_v63 = vld [vmem:[%s20472_s4 + $0x28] sm:$0xff] }
  0x6c   :  { %778 = vmatpush.bf16.msra.mxu3 %v17156_v20  ;;  %v337_v0 = vld [vmem:[%s20472_s4 + $0x58] sm:$0xff]  ;;  %v439_v1 = vpack.c.bf16 %v336_v62, %v330_v61  ;;  %v13359_v3 = vld [vmem:[#allocation9 + $0xa8] sm:$0xf]  ;;  %v13361_v7 = vld [vmem:[#allocation9 + $0xb4] sm:$0xf0]  ;;  %s19066_s4 = smov 80  }
  0x6d   :  { %737 = vmatpush.bf16.msra.mxu0 %v17131_v21  ;;  %v440_v2 = vpack.c.bf16 %v337_v0, %v331_v63  ;;  %v17199_v4 = vld [vmem:[#allocation9 + $0xb0] sm:$0xf0]  ;;  %v17198_v5 = vld [vmem:[#allocation9 + $0xac] sm:$0xf]  ;;  %v13367_v8 = vld [vmem:[#allocation9 + $0xb0] sm:$0xf] }
  0x6e   :  { %751 = vmatpush.bf16.msra.mxu1 %v17139_v22  ;;  %v13360_v6 = vor.u32 %v17199_v4, %v13359_v3  ;;  %v17200_v9 = vld [vmem:[#allocation9 + $0xb8] sm:$0xf0]  ;;  %v13364_v10 = vor.u32 %v17198_v5, %v13361_v7  ;;  %v13347_v12 = vld [vmem:[#allocation9 + $0x90] sm:$0xf]  ;;  %v17195_v14 = vld [vmem:[#allocation9 + $0x94] sm:$0xf] }
  0x6f   :  { %765 = vmatpush.bf16.msra.mxu2 %v17147_v23  ;;  %v13368_v11 = vor.u32 %v17200_v9, %v13367_v8  ;;  %v17196_v13 = vld [vmem:[#allocation9 + $0x98] sm:$0xf0]  ;;  %v13349_v16 = vld [vmem:[#allocation9 + $0x9c] sm:$0xf0]  ;;  %v13355_v17 = vld [vmem:[#allocation9 + $0x98] sm:$0xf] }
  0x70   :  { %779 = vmatpush.bf16.msra.mxu3 %v17155_v24  ;;  %v13348_v15 = vor.u32 %v17196_v13, %v13347_v12  ;;  %v17197_v18 = vld [vmem:[#allocation9 + $0xa0] sm:$0xf0]  ;;  %v13352_v19 = vor.u32 %v17195_v14, %v13349_v16  ;;  %v13335_v21 = vld [vmem:[#allocation9 + $0x78] sm:$0xf]  ;;  %v17192_v23 = vld [vmem:[#allocation9 + $0x7c] sm:$0xf] }
  0x71   :  { %738 = vmatpush.bf16.msra.mxu0 %v17130_v25  ;;  %v13356_v20 = vor.u32 %v17197_v18, %v13355_v17  ;;  %v17193_v22 = vld [vmem:[#allocation9 + $0x80] sm:$0xf0]  ;;  %v13337_v25 = vld [vmem:[#allocation9 + $0x84] sm:$0xf0]  ;;  %v17190_v31 = vld [vmem:[#allocation9 + $0x68] sm:$0xf0] }
  0x72   :  { %752 = vmatpush.bf16.msra.mxu1 %v17138_v26  ;;  %v13336_v24 = vor.u32 %v17193_v22, %v13335_v21  ;;  %v13343_v26 = vld [vmem:[#allocation9 + $0x80] sm:$0xf]  ;;  %v17189_v32 = vld [vmem:[#allocation9 + $0x64] sm:$0xf]  ;;  %v13325_v34 = vld [vmem:[#allocation9 + $0x6c] sm:$0xf0] }
  0x73   :  { %766 = vmatpush.bf16.msra.mxu2 %v17146_v27  ;;  %v17194_v27 = vld [vmem:[#allocation9 + $0x88] sm:$0xf0]  ;;  %v13311_v39 = vld [vmem:[#allocation9 + $0x48] sm:$0xf]  ;;  %v17187_v40 = vld [vmem:[#allocation9 + $0x50] sm:$0xf0] }
  0x74   :  { %780 = vmatpush.bf16.msra.mxu3 %v17154_v28  ;;  %v13340_v28 = vor.u32 %v17192_v23, %v13337_v25  ;;  %v13312_v42 = vor.u32 %v17187_v40, %v13311_v39  ;;  %v13313_v43 = vld [vmem:[#allocation9 + $0x54] sm:$0xf0]  ;;  %v13289_v61 = vld [vmem:[#allocation9 + $0x24] sm:$0xf0]  ;;  %v13295_v62 = vld [vmem:[#allocation9 + $0x20] sm:$0xf] }
  0x75   :  { %739 = vmatpush.bf16.msra.mxu0 %v17129_v29  ;;  %v13344_v29 = vor.u32 %v17194_v27, %v13343_v26  ;;  %v17182_v63 = vld [vmem:[#allocation9 + $0x28] sm:$0xf0]  ;;  %v17177_v4 = vld [vmem:[#allocation9 + $0x4] sm:$0xf]  ;;  %v13277_v8 = vld [vmem:[#allocation9 + $0xc] sm:$0xf0] }
  0x76   :  { %753 = vmatpush.bf16.msra.mxu1 %v17137_v30  ;;  %v13323_v30 = vld [vmem:[#allocation9 + $0x60] sm:$0xf]  ;;  %v17178_v3 = vld [vmem:[#allocation9 + $0x8] sm:$0xf0]  ;;  %v13283_v9 = vld [vmem:[#allocation9 + $0x8] sm:$0xf] }
  0x77   :  { %767 = vmatpush.bf16.msra.mxu2 %v17145_v37  ;;  %v13324_v33 = vor.u32 %v17190_v31, %v13323_v30  ;;  %v13328_v37 = vor.u32 %v17189_v32, %v13325_v34  ;;  %v18337_v13 = vld [vmem:[#allocation8] ss:$0 sm:$0xff] }
  0x78   :  { %781 = vmatpush.bf16.msra.mxu3 %v17153_v38  ;;  %740 = vmatmul.bf16.vlgmr.msra.gmra.mxu0 %v435_v41  ;;  %v17186_v41 = vld [vmem:[#allocation9 + $0x4c] sm:$0xf] }
  0x79   :  { %788 = vmatpush.bf16.msrb.mxu0 %v17168_v35  ;;  %754 = vmatmul.bf16.vlgmr.msra.gmra.mxu1 %v436_v44  ;;  %v13331_v35 = vld [vmem:[#allocation9 + $0x68] sm:$0xf]  ;;  %v13319_v44 = vld [vmem:[#allocation9 + $0x50] sm:$0xf] }
  0x7a   :  { %802 = vmatpush.bf16.msrb.mxu1 %v17176_v36  ;;  %768 = vmatmul.bf16.vlgmr.msra.gmra.mxu2 %v437_v47  ;;  %v17191_v36 = vld [vmem:[#allocation9 + $0x70] sm:$0xf0] }
  0x7b   :  { %782 = vmatmul.bf16.vlgmr.msra.gmra.mxu3 %v438_v48  ;;  %990 = vmatpush.bf16.msrb.mxu2 %v13360_v6  ;;  %v13332_v38 = vor.u32 %v17191_v36, %v13331_v35  ;;  %v13299_v48 = vld [vmem:[#allocation9 + $0x30] sm:$0xf] }
  0x7c   :  { %1004 = vmatpush.bf16.msrb.mxu3 %v13364_v10  ;;  %v17179_v10 = vld [vmem:[#allocation9 + $0x10] sm:$0xf0] }
  0x7d   :  { %789 = vmatpush.bf16.msrb.mxu0 %v17167_v45  ;;  %v17188_v45 = vld [vmem:[#allocation9 + $0x58] sm:$0xf0]  ;;  %v13284_v12 = vor.u32 %v17179_v10, %v13283_v9 }
  0x7e   :  { %803 = vmatpush.bf16.msrb.mxu1 %v17175_v46  ;;  %v13316_v46 = vor.u32 %v17186_v41, %v13313_v43  ;;  %v13320_v47 = vor.u32 %v17188_v45, %v13319_v44 }
  0x7f   :  { %991 = vmatpush.bf16.msrb.mxu2 %v13348_v15 }
  0x80   :  { %1005 = vmatpush.bf16.msrb.mxu3 %v13352_v19 }
  0x81   :  { %790 = vmatpush.bf16.msrb.mxu0 %v17166_v49  ;;  %v17184_v49 = vld [vmem:[#allocation9 + $0x38] sm:$0xf0] }
  0x82   :  { %804 = vmatpush.bf16.msrb.mxu1 %v17174_v50  ;;  %v17183_v50 = vld [vmem:[#allocation9 + $0x34] sm:$0xf] }
  0x83   :  { %992 = vmatpush.bf16.msrb.mxu2 %v13336_v24 }
  0x84   :  { %1006 = vmatpush.bf16.msrb.mxu3 %v13340_v28 }
  0x85   :  { %791 = vmatpush.bf16.msrb.mxu0 %v17165_v51  ;;  %v13300_v51 = vor.u32 %v17184_v49, %v13299_v48 }
  0x86   :  { %805 = vmatpush.bf16.msrb.mxu1 %v17173_v52  ;;  %v13301_v52 = vld [vmem:[#allocation9 + $0x3c] sm:$0xf0] }
  0x87   :  { %993 = vmatpush.bf16.msrb.mxu2 %v13324_v33 }
  0x88   :  { %1007 = vmatpush.bf16.msrb.mxu3 %v13328_v37  ;;  %v818_v37 = vld [vmem:[#allocation3] sm:$0xff] }
  0x89   :  { %792 = vmatpush.bf16.msrb.mxu0 %v17164_v53  ;;  %v13307_v53 = vld [vmem:[#allocation9 + $0x38] sm:$0xf] }
  0x8a   :  { %806 = vmatpush.bf16.msrb.mxu1 %v17172_v54  ;;  %v13304_v54 = vor.u32 %v17183_v50, %v13301_v52 }
  0x8b   :  { %994 = vmatpush.bf16.msrb.mxu2 %v13312_v42  ;;  %v853_v42 = vld [vmem:[#allocation11] sm:$0x7] }
  0x8c   :  { %1008 = vmatpush.bf16.msrb.mxu3 %v13316_v46  ;;  %v857_v44 = vperm.slane %v853_v42, 1  ;;  %v858_v45 = vperm.slane %v853_v42, 2  ;;  %v856_v46 = vperm.slane %v853_v42, 0 }
  0x8d   :  { %793 = vmatpush.bf16.msrb.mxu0 %v17163_v55  ;;  %v17185_v55 = vld [vmem:[#allocation9 + $0x40] sm:$0xf0] }
  0x8e   :  { %807 = vmatpush.bf16.msrb.mxu1 %v17171_v56  ;;  %v13308_v56 = vor.u32 %v17185_v55, %v13307_v53 }
  0x8f   :  { %995 = vmatpush.bf16.msrb.mxu2 %v13300_v51 }
  0x90   :  { %1009 = vmatpush.bf16.msrb.mxu3 %v13304_v54 }
  0x91   :  { %794 = vmatpush.bf16.msrb.mxu0 %v17162_v57  ;;  %v13287_v57 = vld [vmem:[#allocation9 + $0x18] sm:$0xf] }
  0x92   :  { %808 = vmatpush.bf16.msrb.mxu1 %v17170_v58  ;;  %v17181_v58 = vld [vmem:[#allocation9 + $0x20] sm:$0xf0] }
  0x95   :  { %795 = vmatpush.bf16.msrb.mxu0 %v17161_v59  ;;  %v17180_v59 = vld [vmem:[#allocation9 + $0x1c] sm:$0xf] }
  0x96   :  { %809 = vmatpush.bf16.msrb.mxu1 %v17169_v60  ;;  %v13288_v60 = vor.u32 %v17181_v58, %v13287_v57  ;;  %v13292_v0 = vor.u32 %v17180_v59, %v13289_v61 }
  0x98   :  { %796 = vmatmul.bf16.vlgmr.msrb.gmra.mxu0 %v439_v1  ;;  %v13296_v1 = vor.u32 %v17182_v63, %v13295_v62  ;;  %996 = vmatpush.bf16.msrb.mxu2 %v13288_v60 }
  0x99   :  { %810 = vmatmul.bf16.vlgmr.msrb.gmra.mxu1 %v440_v2  ;;  %1018 = vmatpush.bf16.msra.mxu0 %v13368_v11  ;;  %v13275_v2 = vld [vmem:[#allocation9] sm:$0xf]  ;;  %v13280_v11 = vor.u32 %v17177_v4, %v13277_v8 }
  0x9a   :  { %1010 = vmatpush.bf16.msrb.mxu3 %v13292_v0  ;;  %v13276_v7 = vor.u32 %v17178_v3, %v13275_v2 }
  0x9c   :  { %997 = vmatpush.bf16.msrb.mxu2 %v13276_v7 }
  0x9d   :  { %1019 = vmatpush.bf16.msra.mxu0 %v13356_v20 }
  0x9e   :  { %1011 = vmatpush.bf16.msrb.mxu3 %v13280_v11 }
  0xa1   :  { %1020 = vmatpush.bf16.msra.mxu0 %v13344_v29 }
  0xa5   :  { %1021 = vmatpush.bf16.msra.mxu0 %v13332_v38 }
  0xa9   :  { %1022 = vmatpush.bf16.msra.mxu0 %v13320_v47 }
  0xad   :  { %1023 = vmatpush.bf16.msra.mxu0 %v13308_v56 }
  0xb1   :  { %1024 = vmatpush.bf16.msra.mxu0 %v13296_v1 }
  0xb5   :  { %1025 = vmatpush.bf16.msra.mxu0 %v13284_v12 }
  0xf5   :  { %v741_v5 = vpop.f32.mrf.mxu0 }
  0xf6   :  { %v755_v6 = vpop.f32.mrf.mxu1  ;;  %v742_v14 = vadd.f32 %v18337_v13, %v741_v5 }
  0xf8   :  { %v756_v18 = vadd.f32 %v755_v6, %v742_v14 }
  0xfd   :  { %v769_v15 = vpop.f32.mrf.mxu2  ;;  %v743_v16 = vpop.f32.mrf.mxu0 }
  0xfe   :  { %v757_v17 = vpop.f32.mrf.mxu1  ;;  %v783_v19 = vpop.f32.mrf.mxu3  ;;  %v744_v20 = vadd.f32 %v18337_v13, %v743_v16  ;;  %v770_v21 = vadd.f32 %v769_v15, %v756_v18 }
 0x100   :  { %v758_v22 = vadd.f32 %v757_v17, %v744_v20  ;;  %v784_v26 = vadd.f32 %v783_v19, %v770_v21 }
 0x105   :  { %v771_v23 = vpop.f32.mrf.mxu2 }
 0x106   :  { %v772_v27 = vadd.f32 %v771_v23, %v758_v22  ;;  %v785_v29 = vpop.f32.mrf.mxu3 }
 0x108   :  { %v786_v30 = vadd.f32 %v785_v29, %v772_v27 }
 0x115   :  { %v797_v24 = vpop.f32.mrf.mxu0 }
 0x116   :  { %v811_v25 = vpop.f32.mrf.mxu1  ;;  %v798_v28 = vadd.f32 %v797_v24, %v784_v26 }
 0x118   :  { %v812_v31 = vadd.f32 %v811_v25, %v798_v28 }
 0x11a   :  { %v816_v35 = vmax.f32 %v812_v31, 0.0 }
 0x11c   :  { %v19297_v39 = vadd.f32 %v818_v37, %v816_v35 }
 0x11d   :  { %v799_v32 = vpop.f32.mrf.mxu0 }
 0x11e   :  { %v800_v33 = vadd.f32 %v799_v32, %v786_v30  ;;  %v813_v34 = vpop.f32.mrf.mxu1 }
 0x120   :  { %v814_v36 = vadd.f32 %v813_v34, %v800_v33 }
 0x122   :  { %v817_v38 = vmax.f32 %v814_v36, 0.0 }
 0x124   :  { %v19299_v40 = vadd.f32 %v818_v37, %v817_v38 }
 0x126   :  { %v854_v41 = vpack.c.bf16 %v19299_v40, %v19297_v39 }
 0x128   :  { %998 = vmatmul.bf16.vlgmr.msrb.gmra.mxu2 %v854_v41  ;;  %1012 = vmatmul.bf16.vlgmr.msrb.gmra.mxu3 %v854_v41 }
 0x129   :  { %1026 = vmatmul.bf16.vlgmr.msra.gmra.mxu0 %v854_v41 }
 0x1a6   :  { %v1027_v43 = vpop.f32.mrf.mxu0 }
 0x1a7   :  { %v19305_v50 = vadd.f32 %v1027_v43, %v858_v45 }
 0x1ab   :  { %v999_v47 = vpop.f32.mrf.mxu2  ;;  %v1013_v48 = vpop.f32.mrf.mxu3 }
 0x1ac   :  { %v19303_v49 = vadd.f32 %v1013_v48, %v857_v44  ;;  %v19309_v52 = vadd.f32 %v999_v47, %v856_v46 }
 0x1ae   :  { %v1029_v51 = vpop.f32.mrf.mxu0  ;;  %13369 = vmatpush.xpose.msk.msra.mxu3 %vm1032_vm0, %v19303_v49 }
 0x1af   :  { %v19312_v53 = vadd.f32 %v1029_v51, %v858_v45 }
 0x1b1   :  { %13370 = vmatmul.msk.f32.vlgmr.msra.gmra.mxu3 %vm1032_vm0, %v19309_v52 }
 0x1b2   :  { %1128 = vmatpush.msrb.mxu3 %v19305_v50 }
 0x1b3   :  { %v1015_v54 = vpop.f32.mrf.mxu3  ;;  %v1001_v55 = vpop.f32.mrf.mxu2 }
 0x1b4   :  { %1151 = vmatpush.msra.mxu3 %v19312_v53  ;;  %v19317_v56 = vadd.f32 %v1015_v54, %v857_v44  ;;  %v19323_v57 = vadd.f32 %v1001_v55, %v856_v46 }
 0x1b6   :  { %1186 = vrot.lane.b32.xlu2 %v19317_v56, %s19064_s19  ;;  %13371 = vmatpush.xpose.msk.msra.mxu2 %vm1032_vm0, %v19317_v56 }
 0x1b9   :  { %13372 = vmatmul.msk.f32.vlgmr.msra.gmra.mxu2 %vm1032_vm0, %v19323_v57 }
 0x1be   :  { %1184 = vrot.lane.b32.xlu2 %v19323_v57, %s19064_s19 }
 0x210   :  { %v1187_v14 = vpop.permute.xlu2 %1186 }
 0x218   :  { %v1185_v18 = vpop.permute.xlu2 %1184 }
 0x234   :  { %v1056_v58 = vpop.f32.mrf.mxu3 }
 0x235   :  { %v1085_v59 = vmul.f32 0.25, %v1056_v58 }
 0x237   :  { %v1088_v60 = vsel %vm1087_vm1, %v1085_v59, -inf }
 0x238   :  { %1089 = vmax.xlane.f32.xlu0 %v1088_v60 }
 0x23c   :  { %v1082_v61 = vpop.f32.mrf.mxu2 }
 0x23d   :  { %v1086_v62 = vmul.f32 0.25, %v1082_v61 }
 0x23f   :  { %v1091_v63 = vsel %vm1087_vm1, %v1086_v62, -inf }
 0x240   :  { %1092 = vmax.xlane.f32.xlu0 %v1091_v63 }
 0x254   :  { %1292 = vrot.lane.b32.xlu0 %v19303_v49, %s19065_s22 }
 0x2ab   :  { %v1090_v0 = vpop.xlane.xlu0 %1089 }
 0x2ac   :  { %v1094_v1 = vsub.f32 %v1085_v59, %v1090_v0 }
 0x2ae   :  { %v1096_v2 = vmul.f32 1.442695, %v1094_v1 }
 0x2b0   :  { %18357 = vpow2.f32 %v1096_v2 }
 0x2b3   :  { %v1093_v3 = vpop.xlane.xlu0 %1092 }
 0x2b4   :  { %v1095_v4 = vsub.f32 %v1086_v62, %v1093_v3 }
 0x2b6   :  { %v18358_v5 = vpop.eup %18357  ;;  %v1098_v6 = vmul.f32 1.442695, %v1095_v4 }
 0x2b7   :  { %v1100_v7 = vsel %vm1087_vm1, %v18358_v5, 0.0 }
 0x2b8   :  { %18359 = vpow2.f32 %v1098_v6  ;;  %1101 = vadd.xlane.f32.xlu1 %v1100_v7 }
 0x2be   :  { %v18360_v8 = vpop.eup %18359 }
 0x2bf   :  { %v1103_v9 = vsel %vm1087_vm1, %v18360_v8, 0.0 }
 0x2c0   :  { %1104 = vadd.xlane.f32.xlu1 %v1103_v9 }
 0x2c6   :  { %v1293_v17 = vpop.permute.xlu0 %1292 }
 0x2d9   :  { %1290 = vrot.lane.b32.xlu1 %v19309_v52, %s19065_s22 }
 0x2e1   :  { %1158 = vrot.lane.b32.xlu1 %v19303_v49, %s19064_s19 }
 0x32b   :  { %v1102_v10 = vpop.xlane.xlu1 %1101 }
 0x32c   :  { %18361 = vrcp.f32 %v1102_v10 }
 0x332   :  { %v18362_v11 = vpop.eup %18361 }
 0x333   :  { %v1108_v12 = vmul.f32 %v18362_v11, %v18358_v5  ;;  %v1105_v13 = vpop.xlane.xlu1 %1104 }
 0x334   :  { %18363 = vrcp.f32 %v1105_v13 }
 0x335   :  { %13373 = vmatmul.msk.f32.vlgmr.msrb.gmra.mxu3 %vm1087_vm1, %v1108_v12 }
 0x336   :  { %13377 = vmatpush.xpose.msk.msrb.mxu3 %vm1032_vm0, %v1187_v14 }
 0x33a   :  { %v18364_v15 = vpop.eup %18363 }
 0x33b   :  { %v1109_v16 = vmul.f32 %v18364_v15, %v18360_v8 }
 0x33d   :  { %13374 = vmatmul.msk.f32.vlgmr.msra.gmra.mxu3 %vm1087_vm1, %v1109_v16 }
 0x33e   :  { %13381 = vmatpush.xpose.msk.msra.mxu3 %vm1032_vm0, %v1293_v17 }
 0x345   :  { %13378 = vmatmul.msk.f32.vlgmr.msrb.gmra.mxu3 %vm1032_vm0, %v1185_v18 }
 0x34b   :  { %v1291_v19 = vpop.permute.xlu1 %1290 }
 0x34d   :  { %13382 = vmatmul.msk.f32.vlgmr.msra.gmra.mxu3 %vm1032_vm0, %v1291_v19 }
 0x353   :  { %v1159_v20 = vpop.permute.xlu1 %1158 }
 0x354   :  { %13375 = vmatpush.xpose.msk.msrb.mxu2 %vm1032_vm0, %v1159_v20 }
 0x3b8   :  { %v19346_v21 = vpop.f32.mrf.mxu3 }
 0x3c0   :  { %v19348_v22 = vpop.f32.mrf.mxu3 }
 0x3c8   :  { %v1209_v23 = vpop.f32.mrf.mxu3 }
 0x3c9   :  { %v1213_v24 = vmul.f32 0.25, %v1209_v23 }
 0x3cb   :  { %v1217_v25 = vsel %vm1087_vm1, %v1213_v24, -inf }
 0x3cc   :  { %1218 = vmax.xlane.f32.xlu2 %v1217_v25 }
 0x3d0   :  { %v1315_v26 = vpop.f32.mrf.mxu3 }
 0x3d1   :  { %v1346_v27 = vmul.f32 0.25, %v1315_v26 }
 0x3d3   :  { %v1348_v28 = vsel %vm1087_vm1, %v1346_v27, -inf }
 0x3d4   :  { %1349 = vmax.xlane.f32.xlu0 %v1348_v28 }
 0x3e4   :  { %1156 = vrot.lane.b32.xlu2 %v19309_v52, %s19064_s19 }
 0x3ec   :  { %1264 = vrot.lane.b32.xlu2 %v19312_v53, %s19064_s19 }
 0x3f4   :  { %1424 = vrot.lane.b32.xlu2 %v19303_v49, %s19066_s4 }
 0x43f   :  { %v1219_v29 = vpop.xlane.xlu2 %1218 }
 0x440   :  { %v1221_v30 = vsub.f32 %v1213_v24, %v1219_v29 }
 0x442   :  { %v1224_v31 = vmul.f32 1.442695, %v1221_v30 }
 0x444   :  { %18365 = vpow2.f32 %v1224_v31 }
 0x447   :  { %v1157_v32 = vpop.permute.xlu2 %1156  ;;  %v1350_v33 = vpop.xlane.xlu0 %1349 }
 0x448   :  { %v1354_v34 = vsub.f32 %v1346_v27, %v1350_v33  ;;  %13376 = vmatmul.msk.f32.vlgmr.msrb.gmra.mxu2 %vm1032_vm0, %v1157_v32 }
 0x44a   :  { %v18366_v35 = vpop.eup %18365  ;;  %v1356_v36 = vmul.f32 1.442695, %v1354_v34 }
 0x44b   :  { %v1229_v37 = vsel %vm1087_vm1, %v18366_v35, 0.0 }
 0x44c   :  { %18367 = vpow2.f32 %v1356_v36  ;;  %1230 = vadd.xlane.f32.xlu1 %v1229_v37 }
 0x44f   :  { %v1265_v38 = vpop.permute.xlu2 %1264 }
 0x450   :  { %1285 = vmatpush.msra.mxu2 %v1265_v38 }
 0x452   :  { %v18368_v41 = vpop.eup %18367 }
 0x453   :  { %v1360_v42 = vsel %vm1087_vm1, %v18368_v41, 0.0 }
 0x454   :  { %1361 = vadd.xlane.f32.xlu0 %v1360_v42 }
 0x457   :  { %v1425_v59 = vpop.permute.xlu2 %1424 }
 0x465   :  { %1422 = vrot.lane.b32.xlu1 %v19309_v52, %s19066_s4 }
 0x468   :  { %1370 = vrot.lane.b32.xlu0 %v19305_v50, %s19065_s22 }
 0x470   :  { %1320 = vrot.lane.b32.xlu0 %v19317_v56, %s19065_s22 }
 0x478   :  { %1556 = vrot.lane.b32.xlu0 %v19303_v49, %s19036_s29 }
 0x480   :  { %1584 = vrot.lane.b32.xlu0 %v19317_v56, %s19036_s29 }
 0x488   :  { %1716 = vrot.lane.b32.xlu0 %v19317_v56, %s19055_s24 }
 0x4bf   :  { %v1231_v43 = vpop.xlane.xlu1 %1230 }
 0x4c0   :  { %18369 = vrcp.f32 %v1231_v43 }
 0x4c6   :  { %v18370_v44 = vpop.eup %18369 }
 0x4c7   :  { %v1235_v45 = vmul.f32 %v18370_v44, %v18366_v35  ;;  %v1362_v48 = vpop.xlane.xlu0 %1361 }
 0x4c8   :  { %18371 = vrcp.f32 %v1362_v48 }
 0x4c9   :  { %13380 = vmatmul.msk.f32.vlgmr.msra.gmra.mxu2 %vm1087_vm1, %v1235_v45 }
 0x4cb   :  { %v1181_v46 = vpop.f32.mrf.mxu2 }
 0x4cc   :  { %v1212_v47 = vmul.f32 0.25, %v1181_v46 }
 0x4ce   :  { %v1214_v51 = vsel %vm1087_vm1, %v1212_v47, -inf  ;;  %v18372_v54 = vpop.eup %18371 }
 0x4cf   :  { %1215 = vmax.xlane.f32.xlu2 %v1214_v51  ;;  %v1368_v55 = vmul.f32 %v18372_v54, %v18368_v41 }
 0x4d7   :  { %v1423_v60 = vpop.permute.xlu1 %1422 }
 0x4da   :  { %v1371_v58 = vpop.permute.xlu0 %1370 }
 0x4db   :  { %1391 = vmatpush.msrb.mxu2 %v1371_v58 }
 0x4dc   :  { %13385 = vmatmul.msk.f32.vlgmr.msrb.gmra.mxu2 %vm1087_vm1, %v1368_v55 }
 0x4dd   :  { %13387 = vmatpush.xpose.msk.msra.mxu2 %vm1032_vm0, %v1425_v59 }
 0x4e2   :  { %v1321_v0 = vpop.permute.xlu0 %1320 }
 0x4e4   :  { %13388 = vmatmul.msk.f32.vlgmr.msra.gmra.mxu2 %vm1032_vm0, %v1423_v60 }
 0x4e7   :  { %1237 = vrot.lane.b32.xlu2 %v19305_v50, %s19064_s19 }
 0x4ea   :  { %v1557_v5 = vpop.permute.xlu0 %1556 }
 0x4ef   :  { %1502 = vrot.lane.b32.xlu2 %v19305_v50, %s19066_s4 }
 0x4f2   :  { %v1585_v16 = vpop.permute.xlu0 %1584 }
 0x4f7   :  { %1452 = vrot.lane.b32.xlu2 %v19317_v56, %s19066_s4 }
 0x4fa   :  { %v1717_v17 = vpop.permute.xlu0 %1716 }
 0x4ff   :  { %1450 = vrot.lane.b32.xlu2 %v19323_v57, %s19066_s4 }
 0x507   :  { %1582 = vrot.lane.b32.xlu2 %v19323_v57, %s19036_s29 }
 0x50f   :  { %1686 = vrot.lane.b32.xlu2 %v19309_v52, %s19055_s24 }
 0x517   :  { %1848 = vrot.lane.b32.xlu2 %v19317_v56, %s19051_s8 }
 0x51f   :  { %1952 = vrot.lane.b32.xlu2 %v19303_v49, %s19043_s6 }
 0x527   :  { %1978 = vrot.lane.b32.xlu2 %v19323_v57, %s19043_s6 }
 0x542   :  { %v1216_v61 = vpop.xlane.xlu2 %1215 }
 0x543   :  { %v1220_v62 = vsub.f32 %v1212_v47, %v1216_v61 }
 0x545   :  { %v1222_v63 = vmul.f32 1.442695, %v1220_v62 }
 0x547   :  { %18373 = vpow2.f32 %v1222_v63 }
 0x54a   :  { %v1238_v1 = vpop.permute.xlu2 %1237 }
 0x54b   :  { %1258 = vmatpush.msra.mxu1 %v1238_v1 }
 0x54c   :  { %v19399_v6 = vpop.f32.mrf.mxu2 }
 0x54d   :  { %13383 = vmatpush.xpose.msk.msrb.mxu1 %vm1032_vm0, %v1321_v0  ;;  %v18374_v2 = vpop.eup %18373 }
 0x54e   :  { %v1226_v3 = vsel %vm1087_vm1, %v18374_v2, 0.0 }
 0x54f   :  { %1227 = vadd.xlane.f32.xlu1 %v1226_v3 }
 0x552   :  { %v1503_v4 = vpop.permute.xlu2 %1502 }
 0x553   :  { %1523 = vmatpush.msrb.mxu2 %v1503_v4 }
 0x555   :  { %13393 = vmatpush.xpose.msk.msra.mxu2 %vm1032_vm0, %v1557_v5 }
 0x55a   :  { %v1453_v11 = vpop.permute.xlu2 %1452 }
 0x55f   :  { %v19401_v7 = vpop.f32.mrf.mxu2 }
 0x562   :  { %v1451_v14 = vpop.permute.xlu2 %1450 }
 0x567   :  { %v1447_v8 = vpop.f32.mrf.mxu2 }
 0x568   :  { %v1478_v9 = vmul.f32 0.25, %v1447_v8  ;;  %1318 = vrot.lane.b32.xlu1 %v19323_v57, %s19065_s22 }
 0x56a   :  { %v1480_v10 = vsel %vm1087_vm1, %v1478_v9, -inf }
 0x56b   :  { %1481 = vmax.xlane.f32.xlu0 %v1480_v10 }
 0x570   :  { %1554 = vrot.lane.b32.xlu1 %v19309_v52, %s19036_s29 }
 0x578   :  { %1688 = vrot.lane.b32.xlu1 %v19303_v49, %s19055_s24 }
 0x57f   :  { %1820 = vrot.lane.b32.xlu0 %v19303_v49, %s19051_s8  ;;  %v1583_v49 = vpop.permute.xlu2 %1582 }
 0x580   :  { %1714 = vrot.lane.b32.xlu1 %v19323_v57, %s19055_s24 }
 0x587   :  { %v1687_v19 = vpop.permute.xlu2 %1686 }
 0x588   :  { %1818 = vrot.lane.b32.xlu1 %v19309_v52, %s19051_s8 }
 0x58f   :  { %v1849_v25 = vpop.permute.xlu2 %1848 }
 0x590   :  { %1980 = vrot.lane.b32.xlu1 %v19317_v56, %s19043_s6 }
 0x597   :  { %v1953_v30 = vpop.permute.xlu2 %1952 }
 0x59f   :  { %v1979_v62 = vpop.permute.xlu2 %1978 }
 0x5c2   :  { %v1228_v12 = vpop.xlane.xlu1 %1227 }
 0x5c3   :  { %18375 = vrcp.f32 %v1228_v12 }
 0x5c9   :  { %v18376_v13 = vpop.eup %18375 }
 0x5ca   :  { %v1234_v15 = vmul.f32 %v18376_v13, %v18374_v2 }
 0x5cc   :  { %13379 = vmatmul.msk.f32.vlgmr.msra.gmra.mxu1 %vm1087_vm1, %v1234_v15 }
 0x5cd   :  { %13389 = vmatpush.xpose.msk.msra.mxu1 %vm1032_vm0, %v1453_v11 }
 0x5da   :  { %v1319_v18 = vpop.permute.xlu1 %1318 }
 0x5db   :  { %13384 = vmatmul.msk.f32.vlgmr.msrb.gmra.mxu1 %vm1032_vm0, %v1319_v18 }
 0x5dc   :  { %13395 = vmatpush.xpose.msk.msrb.mxu1 %vm1032_vm0, %v1585_v16 }
 0x5de   :  { %v1482_v56 = vpop.xlane.xlu0 %1481 }
 0x5df   :  { %v1486_v20 = vsub.f32 %v1478_v9, %v1482_v56 }
 0x5e1   :  { %v1488_v23 = vmul.f32 1.442695, %v1486_v20 }
 0x5e2   :  { %v1555_v24 = vpop.permute.xlu1 %1554 }
 0x5e3   :  { %18377 = vpow2.f32 %v1488_v23  ;;  %13390 = vmatmul.msk.f32.vlgmr.msra.gmra.mxu1 %vm1032_vm0, %v1451_v14 }
 0x5e4   :  { %13401 = vmatpush.xpose.msk.msra.mxu1 %vm1032_vm0, %v1717_v17 }
 0x5e9   :  { %v18378_v26 = vpop.eup %18377 }
 0x5ea   :  { %v1689_v27 = vpop.permute.xlu1 %1688  ;;  %v1492_v28 = vsel %vm1087_vm1, %v18378_v26, 0.0 }
 0x5eb   :  { %13396 = vmatmul.msk.f32.vlgmr.msrb.gmra.mxu1 %vm1032_vm0, %v1583_v49  ;;  %13399 = vmatpush.xpose.msk.msrb.mxu0 %vm1032_vm0, %v1689_v27 }
 0x5ec   :  { %13407 = vmatpush.xpose.msk.msrb.mxu1 %vm1032_vm0, %v1849_v25  ;;  %1493 = vadd.xlane.f32.xlu0 %v1492_v28 }
 0x5ee   :  { %13400 = vmatmul.msk.f32.vlgmr.msrb.gmra.mxu0 %vm1032_vm0, %v1687_v19 }
 0x5f1   :  { %v1821_v29 = vpop.permute.xlu0 %1820 }
 0x5f2   :  { %v1715_v31 = vpop.permute.xlu1 %1714  ;;  %13405 = vmatpush.xpose.msk.msra.mxu0 %vm1032_vm0, %v1821_v29 }
 0x5f3   :  { %13402 = vmatmul.msk.f32.vlgmr.msra.gmra.mxu1 %vm1032_vm0, %v1715_v31 }
 0x5f6   :  { %13411 = vmatpush.xpose.msk.msrb.mxu0 %vm1032_vm0, %v1953_v30 }
 0x5fa   :  { %v1819_v32 = vpop.permute.xlu1 %1818 }
 0x5fb   :  { %13406 = vmatmul.msk.f32.vlgmr.msra.gmra.mxu0 %vm1032_vm0, %v1819_v32 }
 0x600   :  { %1846 = vrot.lane.b32.xlu0 %v19323_v57, %s19051_s8 }
 0x602   :  { %v1981_v33 = vpop.permute.xlu1 %1980 }
 0x603   :  { %13413 = vmatpush.xpose.msk.msra.mxu1 %vm1032_vm0, %v1981_v33 }
 0x608   :  { %1950 = vrot.lane.b32.xlu0 %v19309_v52, %s19043_s6 }
 0x649   :  { %v19438_v34 = vpop.f32.mrf.mxu1 }
 0x658   :  { %v1343_v35 = vpop.f32.mrf.mxu1 }
 0x659   :  { %v1347_v36 = vmul.f32 0.25, %v1343_v35 }
 0x65b   :  { %v1351_v37 = vsel %vm1087_vm1, %v1347_v36, -inf }
 0x65c   :  { %1352 = vmax.xlane.f32.xlu1 %v1351_v37 }
 0x65f   :  { %v1494_v38 = vpop.xlane.xlu0 %1493 }
 0x660   :  { %18379 = vrcp.f32 %v1494_v38  ;;  %v1475_v41 = vpop.f32.mrf.mxu1 }
 0x661   :  { %v1479_v42 = vmul.f32 0.25, %v1475_v41 }
 0x663   :  { %v1483_v43 = vsel %vm1087_vm1, %v1479_v42, -inf }
 0x664   :  { %1484 = vmax.xlane.f32.xlu0 %v1483_v43  ;;  %v18140_v43 = vpack.i.bf16 %v19312_v53, %v19305_v50 }
 0x666   :  { %v18380_v57 = vpop.eup %18379 }
 0x667   :  { %v1500_v44 = vmul.f32 %v18380_v57, %v18378_v26 }
 0x668   :  { %v1607_v45 = vpop.f32.mrf.mxu1 }
 0x669   :  { %13391 = vmatmul.msk.f32.vlgmr.msrb.gmra.mxu2 %vm1087_vm1, %v1500_v44  ;;  %v1611_v52 = vmul.f32 0.25, %v1607_v45 }
 0x66b   :  { %v1711_v46 = vpop.f32.mrf.mxu0  ;;  %v1615_v47 = vsel %vm1087_vm1, %v1611_v52, -inf }
 0x66c   :  { %v1742_v48 = vmul.f32 0.25, %v1711_v46  ;;  %1616 = vmax.xlane.f32.xlu1 %v1615_v47 }
 0x66e   :  { %v1744_v51 = vsel %vm1087_vm1, %v1742_v48, -inf }
 0x66f   :  { %1745 = vmax.xlane.f32.xlu0 %v1744_v51 }
 0x670   :  { %v1739_v54 = vpop.f32.mrf.mxu1 }
 0x671   :  { %13394 = vmatmul.msk.f32.vlgmr.msra.gmra.mxu2 %vm1032_vm0, %v1555_v24  ;;  %v1743_v55 = vmul.f32 0.25, %v1739_v54 }
 0x672   :  { %v1847_v58 = vpop.permute.xlu0 %1846 }
 0x673   :  { %13408 = vmatmul.msk.f32.vlgmr.msrb.gmra.mxu1 %vm1032_vm0, %v1847_v58  ;;  %v1747_v59 = vsel %vm1087_vm1, %v1743_v55, -inf }
 0x674   :  { %1748 = vmax.xlane.f32.xlu2 %v1747_v59 }
 0x678   :  { %v1843_v60 = vpop.f32.mrf.mxu0 }
 0x679   :  { %v1874_v61 = vmul.f32 0.25, %v1843_v60 }
 0x67a   :  { %v1951_v63 = vpop.permute.xlu0 %1950 }
 0x67b   :  { %13412 = vmatmul.msk.f32.vlgmr.msrb.gmra.mxu0 %vm1032_vm0, %v1951_v63  ;;  %13414 = vmatmul.msk.f32.vlgmr.msra.gmra.mxu1 %vm1032_vm0, %v1979_v62  ;;  %v1876_v0 = vsel %vm1087_vm1, %v1874_v61, -inf }
 0x67c   :  { %1877 = vmax.xlane.f32.xlu1 %v1876_v0 }
 0x6cf   :  { %v1353_v1 = vpop.xlane.xlu1 %1352 }
 0x6d0   :  { %v1355_v2 = vsub.f32 %v1347_v36, %v1353_v1 }
 0x6d2   :  { %v1358_v3 = vmul.f32 1.442695, %v1355_v2 }
 0x6d4   :  { %18381 = vpow2.f32 %v1358_v3 }
 0x6d7   :  { %v1485_v4 = vpop.xlane.xlu0 %1484 }
 0x6d8   :  { %v1487_v9 = vsub.f32 %v1479_v42, %v1485_v4 }
 0x6da   :  { %v1490_v11 = vmul.f32 1.442695, %v1487_v9  ;;  %v19455_v12 = vpop.eup %18381 }
 0x6db   :  { %v1363_v18 = vsel %vm1087_vm1, %v19455_v12, 0.0 }
 0x6dc   :  { %18383 = vpow2.f32 %v1490_v11 }
 0x6df   :  { %v1617_v56 = vpop.xlane.xlu1 %1616 }
 0x6e0   :  { %v1619_v23 = vsub.f32 %v1611_v52, %v1617_v56 }
 0x6e2   :  { %v19463_v20 = vpop.eup %18383  ;;  %v1622_v26 = vmul.f32 1.442695, %v1619_v23  ;;  %v1746_v27 = vpop.xlane.xlu0 %1745 }
 0x6e3   :  { %v1495_v24 = vsel %vm1087_vm1, %v19463_v20, 0.0  ;;  %v1750_v29 = vsub.f32 %v1742_v48, %v1746_v27 }
 0x6e4   :  { %18385 = vpow2.f32 %v1622_v26 }
 0x6e5   :  { %v1752_v31 = vmul.f32 1.442695, %v1750_v29 }
 0x6e7   :  { %v1749_v32 = vpop.xlane.xlu2 %1748  ;;  %18387 = vpow2.f32 %v1752_v31 }
 0x6e8   :  { %v1751_v35 = vsub.f32 %v1743_v55, %v1749_v32 }
 0x6ea   :  { %v19468_v33 = vpop.eup %18385  ;;  %v1754_v37 = vmul.f32 1.442695, %v1751_v35 }
 0x6eb   :  { %v1627_v36 = vsel %vm1087_vm1, %v19468_v33, 0.0 }
 0x6ec   :  { %v19457_v49 = vpop.f32.mrf.mxu2  ;;  %18389 = vpow2.f32 %v1754_v37 }
 0x6ed   :  { %v19474_v41 = vpop.eup %18387 }
 0x6ee   :  { %v1756_v57 = vsel %vm1087_vm1, %v19474_v41, 0.0 }
 0x6ef   :  { %v1878_v38 = vpop.xlane.xlu1 %1877 }
 0x6f0   :  { %v1871_v5 = vpop.f32.mrf.mxu1  ;;  %v1882_v42 = vsub.f32 %v1874_v61, %v1878_v38 }
 0x6f1   :  { %v19451_v8 = vmul.f32 0.25, %v1871_v5 }
 0x6f2   :  { %v1884_v44 = vmul.f32 1.442695, %v1882_v42  ;;  %v19481_v45 = vpop.eup %18389 }
 0x6f3   :  { %v1879_v10 = vsel %vm1087_vm1, %v19451_v8, -inf  ;;  %v1759_v52 = vsel %vm1087_vm1, %v19481_v45, 0.0 }
 0x6f4   :  { %1880 = vmax.xlane.f32.xlu0 %v1879_v10  ;;  %v1579_v25 = vpop.f32.mrf.mxu2  ;;  %18391 = vpow2.f32 %v1884_v44 }
 0x6f5   :  { %v1610_v28 = vmul.f32 0.25, %v1579_v25 }
 0x6f7   :  { %v1612_v30 = vsel %vm1087_vm1, %v1610_v28, -inf }
 0x6f8   :  { %v1975_v13 = vpop.f32.mrf.mxu0  ;;  %v2003_v14 = vpop.f32.mrf.mxu1 }
 0x6f9   :  { %v2006_v15 = vmul.f32 0.25, %v1975_v13  ;;  %v2007_v16 = vmul.f32 0.25, %v2003_v14 }
 0x6fa   :  { %v19486_v46 = vpop.eup %18391 }
 0x6fb   :  { %v2011_v17 = vsel %vm1087_vm1, %v2007_v16, -inf  ;;  %v2008_v19 = vsel %vm1087_vm1, %v2006_v15, -inf  ;;  %v1888_v50 = vsel %vm1087_vm1, %v19486_v46, 0.0 }
 0x6fc   :  { %2012 = vmax.xlane.f32.xlu1 %v2011_v17  ;;  %1364 = vadd.xlane.f32.xlu0 %v1363_v18 }
 0x6fd   :  { %2009 = vmax.xlane.f32.xlu2 %v2008_v19 }
 0x705   :  { %1496 = vadd.xlane.f32.xlu2 %v1495_v24  ;;  %v18160_v24 = vpack.i.bf16 %v19399_v6, %v19438_v34 }
 0x70d   :  { %1613 = vmax.xlane.f32.xlu2 %v1612_v30 }
 0x715   :  { %1628 = vadd.xlane.f32.xlu2 %v1627_v36  ;;  %1396 = vrot.lane.b32.xlu1 %v19312_v53, %s19065_s22 }
 0x71d   :  { %1757 = vadd.xlane.f32.xlu2 %v1756_v57  ;;  %18141 = vrot.lane.b32.xlu1 %v18140_v43, %s19036_s29 }
 0x725   :  { %1760 = vadd.xlane.f32.xlu2 %v1759_v52  ;;  %18146 = vrot.lane.b32.xlu1 %v18140_v43, %s19055_s24 }
 0x72d   :  { %1889 = vadd.xlane.f32.xlu2 %v1888_v50 }
 0x767   :  { %v1881_v54 = vpop.xlane.xlu0 %1880 }
 0x76f   :  { %v2013_v47 = vpop.xlane.xlu1 %2012  ;;  %v1365_v63 = vpop.xlane.xlu0 %1364 }
 0x770   :  { %v2015_v48 = vsub.f32 %v2007_v16, %v2013_v47  ;;  %v2010_v51 = vpop.xlane.xlu2 %2009 }
 0x771   :  { %v2014_v55 = vsub.f32 %v2006_v15, %v2010_v51 }
 0x772   :  { %v2018_v58 = vmul.f32 1.442695, %v2015_v48 }
 0x773   :  { %v2016_v59 = vmul.f32 1.442695, %v2014_v55 }
 0x774   :  { %18393 = vpow2.f32 %v2018_v58 }
 0x775   :  { %18395 = vpow2.f32 %v2016_v59 }
 0x776   :  { %18397 = vrcp.f32 %v1365_v63 }
 0x778   :  { %v1497_v60 = vpop.xlane.xlu2 %1496 }
 0x77a   :  { %v19490_v61 = vpop.eup %18393 }
 0x77b   :  { %v19492_v62 = vpop.eup %18395  ;;  %v2023_v0 = vsel %vm1087_vm1, %v19490_v61, 0.0 }
 0x77c   :  { %2024 = vadd.xlane.f32.xlu1 %v2023_v0  ;;  %v2020_v1 = vsel %vm1087_vm1, %v19492_v62, 0.0  ;;  %v18398_v5 = vpop.eup %18397 }
 0x77d   :  { %2021 = vadd.xlane.f32.xlu2 %v2020_v1  ;;  %v1369_v9 = vmul.f32 %v18398_v5, %v19455_v12  ;;  %v1883_v12 = vsub.f32 %v19451_v8, %v1881_v54 }
 0x77f   :  { %v1886_v18 = vmul.f32 1.442695, %v1883_v12  ;;  %v17204_v12 = vld [vmem:[#allocation12 + $0x18] sm:$0xff] }
 0x780   :  { %v1614_v2 = vpop.xlane.xlu2 %1613 }
 0x781   :  { %v1618_v3 = vsub.f32 %v1610_v28, %v1614_v2 }
 0x783   :  { %v1620_v4 = vmul.f32 1.442695, %v1618_v3 }
 0x785   :  { %18399 = vpow2.f32 %v1620_v4 }
 0x786   :  { %18401 = vpow2.f32 %v1886_v18  ;;  %v17203_v18 = vld [vmem:[#allocation12 + $0x10] sm:$0xff] }
 0x787   :  { %v1397_v10 = vpop.permute.xlu1 %1396 }
 0x788   :  { %1417 = vmatpush.msrb.mxu3 %v1397_v10  ;;  %v1629_v23 = vpop.xlane.xlu2 %1628 }
 0x789   :  { %13386 = vmatmul.msk.f32.vlgmr.msrb.gmra.mxu3 %vm1087_vm1, %v1369_v9 }
 0x78b   :  { %v18400_v11 = vpop.eup %18399 }
 0x78c   :  { %v1624_v13 = vsel %vm1087_vm1, %v18400_v11, 0.0  ;;  %v19506_v19 = vpop.eup %18401 }
 0x78d   :  { %1625 = vadd.xlane.f32.xlu0 %v1624_v13  ;;  %v1891_v56 = vsel %vm1087_vm1, %v19506_v19, 0.0 }
 0x78f   :  { %v18142_v14 = vpop.permute.xlu1 %18141 }
 0x790   :  { %v18143_v15 = vunpack.i.l.bf16 %v18142_v14  ;;  %v1758_v25 = vpop.xlane.xlu2 %1757  ;;  %v18144_v57 = vunpack.i.h.bf16 %v18142_v14  ;;  %v17208_v14 = vld [vmem:[#allocation12 + $0x38] sm:$0xff] }
 0x791   :  { %2227 = vmatpush.bf16.msra.mxu0 %v17208_v14 }
 0x792   :  { %1655 = vmatpush.msrb.mxu2 %v18143_v15  ;;  %v17207_v15 = vld [vmem:[#allocation12 + $0x30] sm:$0xff] }
 0x795   :  { %18151 = vrot.lane.b32.xlu2 %v18140_v43, %s19051_s8  ;;  %2228 = vmatpush.bf16.msra.mxu0 %v17207_v15  ;;  %v13909_v15 = vld [vmem:[#allocation18 + $0x3c8] sm:$0xf0] }
 0x797   :  { %v18147_v16 = vpop.permute.xlu1 %18146 }
 0x798   :  { %v18148_v17 = vunpack.i.l.bf16 %v18147_v16  ;;  %v1761_v26 = vpop.xlane.xlu2 %1760  ;;  %v18149_v52 = vunpack.i.h.bf16 %v18147_v16  ;;  %v17206_v16 = vld [vmem:[#allocation12 + $0x28] sm:$0xff] }
 0x799   :  { %2229 = vmatpush.bf16.msra.mxu0 %v17206_v16  ;;  %v13835_v16 = vld [vmem:[#allocation18 + $0x300] sm:$0xf] }
 0x79a   :  { %1787 = vmatpush.msra.mxu2 %v18148_v17  ;;  %v17205_v17 = vld [vmem:[#allocation12 + $0x20] sm:$0xff] }
 0x79d   :  { %18156 = vrot.lane.b32.xlu2 %v18140_v43, %s19043_s6  ;;  %2230 = vmatpush.bf16.msra.mxu0 %v17205_v17 }
 0x7a0   :  { %v1890_v27 = vpop.xlane.xlu2 %1889 }
 0x7a1   :  { %1528 = vrot.lane.b32.xlu0 %v19312_v53, %s19066_s4  ;;  %2231 = vmatpush.bf16.msra.mxu0 %v17204_v12  ;;  %v17313_v12 = vld [vmem:[#allocation18 + $0x33c] sm:$0xf0] }
 0x7a5   :  { %2232 = vmatpush.bf16.msra.mxu0 %v17203_v18  ;;  %v17305_v18 = vld [vmem:[#allocation18 + $0x304] sm:$0xf] }
 0x7cb   :  { %1892 = vadd.xlane.f32.xlu0 %v1891_v56  ;;  %v17201_v56 = vld [vmem:[#allocation12] sm:$0xff] }
 0x7df   :  { %18161 = vrot.lane.b32.xlu0 %v18160_v24, %s19043_s6 }
 0x7ef   :  { %v2025_v58 = vpop.xlane.xlu1 %2024 }
 0x7f0   :  { %v2022_v53 = vpop.xlane.xlu2 %2021 }
 0x7f8   :  { %v18152_v8 = vpop.permute.xlu2 %18151 }
 0x7f9   :  { %v18153_v31 = vunpack.i.l.bf16 %v18152_v8 }
 0x800   :  { %v1626_v28 = vpop.xlane.xlu0 %1625  ;;  %v18157_v34 = vpop.permute.xlu2 %18156 }
 0x801   :  { %18403 = vrcp.f32 %v1626_v28  ;;  %v18158_v38 = vunpack.i.l.bf16 %v18157_v34  ;;  %v18159_v55 = vunpack.i.h.bf16 %v18157_v34 }
 0x802   :  { %18405 = vrcp.f32 %v1758_v25 }
 0x803   :  { %18407 = vrcp.f32 %v1497_v60 }
 0x804   :  { %18409 = vrcp.f32 %v1890_v27 }
 0x805   :  { %18411 = vrcp.f32 %v1629_v23 }
 0x806   :  { %18413 = vrcp.f32 %v2022_v53 }
 0x807   :  { %v18404_v29 = vpop.eup %18403  ;;  %18415 = vrcp.f32 %v1761_v26 }
 0x808   :  { %v1632_v30 = vmul.f32 %v18404_v29, %v18400_v11  ;;  %v18406_v35 = vpop.eup %18405 }
 0x809   :  { %v18408_v36 = vpop.eup %18407  ;;  %v1764_v37 = vmul.f32 %v18406_v35, %v19474_v41 }
 0x80a   :  { %13397 = vmatmul.msk.f32.vlgmr.msrb.gmra.mxu2 %vm1087_vm1, %v1632_v30  ;;  %v1501_v42 = vmul.f32 %v18408_v36, %v19463_v20  ;;  %v18410_v44 = vpop.eup %18409  ;;  %v18154_v20 = vunpack.i.h.bf16 %v18152_v8 }
 0x80b   :  { %1919 = vmatpush.msrb.mxu2 %v18153_v31  ;;  %v1896_v41 = vmul.f32 %v18410_v44, %v19486_v46 }
 0x80c   :  { %v1419_v32 = vpop.f32.mrf.mxu3 }
 0x80d   :  { %v18165_v6 = vpack.i.bf16 %v1419_v32, %v19401_v7  ;;  %v18412_v7 = vpop.eup %18411 }
 0x80e   :  { %v1633_v50 = vmul.f32 %v18412_v7, %v19468_v33  ;;  %v18414_v47 = vpop.eup %18413 }
 0x80f   :  { %18166 = vrot.lane.b32.xlu2 %v18165_v6, %s19051_s8  ;;  %v18416_v48 = vpop.eup %18415  ;;  %v2028_v51 = vmul.f32 %v18414_v47, %v19492_v62 }
 0x810   :  { %v1765_v54 = vmul.f32 %v18416_v48, %v19481_v45 }
 0x812   :  { %13403 = vmatmul.msk.f32.vlgmr.msra.gmra.mxu2 %vm1087_vm1, %v1764_v37 }
 0x813   :  { %2051 = vmatpush.msra.mxu2 %v18158_v38  ;;  %v1529_v43 = vpop.permute.xlu0 %1528 }
 0x814   :  { %1549 = vmatpush.msra.mxu3 %v1529_v43 }
 0x815   :  { %13392 = vmatmul.msk.f32.vlgmr.msra.gmra.mxu3 %vm1087_vm1, %v1501_v42 }
 0x816   :  { %1681 = vmatpush.msrb.mxu3 %v18144_v57 }
 0x818   :  { %1813 = vmatpush.msra.mxu3 %v18149_v52 }
 0x81a   :  { %13409 = vmatmul.msk.f32.vlgmr.msrb.gmra.mxu2 %vm1087_vm1, %v1896_v41 }
 0x81d   :  { %13398 = vmatmul.msk.f32.vlgmr.msrb.gmra.mxu3 %vm1087_vm1, %v1633_v50 }
 0x81e   :  { %1945 = vmatpush.msrb.mxu3 %v18154_v20 }
 0x822   :  { %13415 = vmatmul.msk.f32.vlgmr.msra.gmra.mxu2 %vm1087_vm1, %v2028_v51 }
 0x825   :  { %13404 = vmatmul.msk.f32.vlgmr.msra.gmra.mxu3 %vm1087_vm1, %v1765_v54 }
 0x826   :  { %2077 = vmatpush.msra.mxu3 %v18159_v55 }
 0x83e   :  { %v1893_v46 = vpop.xlane.xlu0 %1892 }
 0x83f   :  { %18417 = vrcp.f32 %v1893_v46 }
 0x840   :  { %18419 = vrcp.f32 %v2025_v58 }
 0x845   :  { %v18418_v33 = vpop.eup %18417 }
 0x846   :  { %v1897_v59 = vmul.f32 %v18418_v33, %v19506_v19  ;;  %v18420_v60 = vpop.eup %18419  ;;  %v17202_v19 = vld [vmem:[#allocation12 + $0x8] sm:$0xff]  ;;  %v18338_v33 = vld [vmem:[#allocation14] ss:$0 sm:$0xff] }
 0x847   :  { %v2029_v62 = vmul.f32 %v18420_v60, %v19490_v61  ;;  %2233 = vmatpush.bf16.msra.mxu0 %v17202_v19  ;;  %v13837_v19 = vld [vmem:[#allocation18 + $0x340] sm:$0xf0] }
 0x848   :  { %13410 = vmatmul.msk.f32.vlgmr.msrb.gmra.mxu3 %vm1087_vm1, %v1897_v59 }
 0x84b   :  { %2234 = vmatpush.bf16.msra.mxu0 %v17201_v56  ;;  %v13836_v56 = vor.u32 %v17313_v12, %v13835_v16  ;;  %v13587_v12 = vld [vmem:[#allocation18 + $0x108] sm:$0xf] }
 0x850   :  { %13416 = vmatmul.msk.f32.vlgmr.msra.gmra.mxu3 %vm1087_vm1, %v2029_v62 }
 0x851   :  { %v18162_v25 = vpop.permute.xlu0 %18161 }
 0x852   :  { %v18164_v27 = vunpack.i.h.bf16 %v18162_v25  ;;  %v18163_v53 = vunpack.i.l.bf16 %v18162_v25  ;;  %v17314_v25 = vld [vmem:[#allocation18 + $0x344] sm:$0xf0] }
 0x854   :  { %v2139_v6 = vsel %vm1032_vm0, %v19348_v22, %v18164_v27  ;;  %v2138_v34 = vsel %vm1032_vm0, %v19346_v21, %v18163_v53  ;;  %v13845_v53 = vld [vmem:[#allocation18 + $0x348] sm:$0xf0] }
 0x869   :  { %v18167_v23 = vpop.permute.xlu2 %18166 }
 0x86a   :  { %v18169_v8 = vunpack.i.h.bf16 %v18167_v23  ;;  %v18168_v29 = vunpack.i.l.bf16 %v18167_v23  ;;  %v13840_v23 = vor.u32 %v17305_v18, %v13837_v19  ;;  %v17250_v18 = vld [vmem:[#allocation18 + $0x144] sm:$0xf0] }
 0x86c   :  { %v2141_v36 = vsel %vm2140_vm2, %v2138_v34, %v18168_v29  ;;  %v2142_v37 = vsel %vm2140_vm2, %v2139_v6, %v18169_v8  ;;  %v17297_v8 = vld [vmem:[#allocation18 + $0x2bc] sm:$0xf0]  ;;  %v17298_v34 = vld [vmem:[#allocation18 + $0x2c4] sm:$0xf0] }
 0x88d   :  { %v1657_v0 = vpop.f32.mrf.mxu2 }
 0x895   :  { %v1789_v3 = vpop.f32.mrf.mxu2 }
 0x898   :  { %v1551_v63 = vpop.f32.mrf.mxu3 }
 0x899   :  { %v18170_v45 = vpack.i.bf16 %v1551_v63, %v19457_v49 }
 0x89b   :  { %18171 = vrot.lane.b32.xlu2 %v18170_v45, %s19055_s24 }
 0x89d   :  { %v1921_v9 = vpop.f32.mrf.mxu2 }
 0x8a0   :  { %v1683_v1 = vpop.f32.mrf.mxu3 }
 0x8a1   :  { %v18175_v2 = vpack.i.bf16 %v1683_v1, %v1657_v0  ;;  %v19067_v1 = vmov 128.0  }
 0x8a2   :  { %18421 = vrcp.f32 %v19067_v1 }
 0x8a3   :  { %18176 = vrot.lane.b32.xlu1 %v18175_v2, %s19036_s29 }
 0x8a5   :  { %v2053_v11 = vpop.f32.mrf.mxu2 }
 0x8a8   :  { %v1815_v4 = vpop.f32.mrf.mxu3  ;;  %v19562_v2 = vpop.eup %18421 }
 0x8a9   :  { %v18180_v5 = vpack.i.bf16 %v1815_v4, %v1789_v3  ;;  %v2250_v3 = vmul.f32 128.0, %v19562_v2  ;;  %vm2254_vm8 = vweird.f32 %v19562_v2 }
 0x8ab   :  { %18181 = vrot.lane.b32.xlu2 %v18180_v5, %s19066_s4  ;;  %v2251_v4 = vsub.f32 1.0, %v2250_v3  ;;  %v13899_v5 = vld [vmem:[#allocation18 + $0x380] sm:$0xf] }
 0x8cb   :  { %v1947_v10 = vpop.f32.mrf.mxu3 }
 0x8cc   :  { %v18185_v61 = vpack.i.bf16 %v1947_v10, %v1921_v9  ;;  %v17329_v9 = vld [vmem:[#allocation18 + $0x3bc] sm:$0xf0] }
 0x8cd   :  { %v13900_v10 = vor.u32 %v17329_v9, %v13899_v5 }
 0x8ce   :  { %18186 = vrot.lane.b32.xlu0 %v18185_v61, %s19065_s22  ;;  %v13901_v61 = vld [vmem:[#allocation18 + $0x3c0] sm:$0xf0] }
 0x8cf   :  { %3107 = vmatpush.bf16.msrb.mxu1 %v13900_v10 }
 0x8d3   :  { %v2079_v13 = vpop.f32.mrf.mxu3  ;;  %3108 = vmatpush.bf16.msrb.mxu1 %v13836_v56  ;;  %v13588_v56 = vor.u32 %v17250_v18, %v13587_v12  ;;  %v17300_v12 = vld [vmem:[#allocation18 + $0x2d4] sm:$0xf0] }
 0x8d4   :  { %v18190_v49 = vpack.i.bf16 %v2079_v13, %v2053_v11  ;;  %v13907_v11 = vld [vmem:[#allocation18 + $0x388] sm:$0xf] }
 0x8d5   :  { %v17330_v13 = vld [vmem:[#allocation18 + $0x3c4] sm:$0xf0] }
 0x8d6   :  { %18191 = vrot.lane.b32.xlu2 %v18190_v49, %s19064_s19  ;;  %v13908_v14 = vor.u32 %v17330_v13, %v13907_v11 }
 0x8d8   :  { %3135 = vmatpush.bf16.msrb.mxu3 %v13908_v14 }
 0x8f5   :  { %v18172_v24 = vpop.permute.xlu2 %18171 }
 0x8f6   :  { %v18174_v30 = vunpack.i.h.bf16 %v18172_v24  ;;  %v18173_v31 = vunpack.i.l.bf16 %v18172_v24  ;;  %v13843_v24 = vld [vmem:[#allocation18 + $0x308] sm:$0xf] }
 0x8f7   :  { %v13844_v27 = vor.u32 %v17314_v25, %v13843_v24  ;;  %v13589_v24 = vld [vmem:[#allocation18 + $0x148] sm:$0xf0] }
 0x8f8   :  { %v2144_v38 = vsel %vm2143_vm3, %v2141_v36, %v18173_v31  ;;  %v2145_v42 = vsel %vm2143_vm3, %v2142_v37, %v18174_v30  ;;  %v17289_v30 = vld [vmem:[#allocation18 + $0x284] sm:$0xf]  ;;  %v17290_v36 = vld [vmem:[#allocation18 + $0x28c] sm:$0xf] }
 0x8f9   :  { %v13773_v31 = vld [vmem:[#allocation18 + $0x2c0] sm:$0xf0]  ;;  %v13781_v37 = vld [vmem:[#allocation18 + $0x2c8] sm:$0xf0]  ;;  %3136 = vmatpush.bf16.msrb.mxu3 %v13844_v27 }
 0x8fa   :  { %v17225_v27 = vld [vmem:[#allocation18 + $0x84] sm:$0xf] }
 0x905   :  { %v18182_v26 = vpop.permute.xlu2 %18181 }
 0x906   :  { %v18184_v52 = vunpack.i.h.bf16 %v18182_v26  ;;  %v18183_v22 = vunpack.i.l.bf16 %v18182_v26  ;;  %v17306_v26 = vld [vmem:[#allocation18 + $0x30c] sm:$0xf] }
 0x907   :  { %v13848_v29 = vor.u32 %v17306_v26, %v13845_v53  ;;  %v17233_v26 = vld [vmem:[#allocation18 + $0xbc] sm:$0xf0] }
 0x915   :  { %v18177_v28 = vpop.permute.xlu1 %18176 }
 0x916   :  { %v18179_v32 = vunpack.i.h.bf16 %v18177_v28  ;;  %v18178_v35 = vunpack.i.l.bf16 %v18177_v28  ;;  %v13771_v28 = vld [vmem:[#allocation18 + $0x280] sm:$0xf] }
 0x917   :  { %v13772_v6 = vor.u32 %v17297_v8, %v13771_v28  ;;  %v13517_v28 = vld [vmem:[#allocation18 + $0xc0] sm:$0xf0]  ;;  %v13523_v8 = vld [vmem:[#allocation18 + $0x88] sm:$0xf] }
 0x918   :  { %v2147_v43 = vsel %vm2146_vm4, %v2144_v38, %v18178_v35  ;;  %v2148_v57 = vsel %vm2146_vm4, %v2145_v42, %v18179_v32  ;;  %v13779_v32 = vld [vmem:[#allocation18 + $0x288] sm:$0xf]  ;;  %v2252_v35 = vmul.f32 %v19562_v2, %v2251_v4  ;;  %v13776_v38 = vor.u32 %v17289_v30, %v13773_v31 }
 0x919   :  { %v2150_v47 = vsel %vm2149_vm5, %v2147_v43, %v18183_v22  ;;  %v2151_v48 = vsel %vm2149_vm5, %v2148_v57, %v18184_v52  ;;  %v13780_v42 = vor.u32 %v17298_v34, %v13779_v32  ;;  %v13707_v43 = vld [vmem:[#allocation18 + $0x200] sm:$0xf]  ;;  %v13784_v52 = vor.u32 %v17290_v36, %v13781_v37  ;;  %v13709_v22 = vld [vmem:[#allocation18 + $0x240] sm:$0xf0]  ;;  %3109 = vmatpush.bf16.msrb.mxu1 %v13772_v6  ;;  %v17226_v32 = vld [vmem:[#allocation18 + $0x8c] sm:$0xf] }
 0x91a   :  { %v17281_v57 = vld [vmem:[#allocation18 + $0x23c] sm:$0xf0]  ;;  %v13520_v30 = vor.u32 %v17225_v27, %v13517_v28  ;;  %v17209_v37 = vld [vmem:[#allocation18 + $0x4] sm:$0xf]  ;;  %v13731_v28 = vld [vmem:[#allocation18 + $0x218] sm:$0xf] }
 0x91b   :  { %3137 = vmatpush.bf16.msrb.mxu3 %v13780_v42  ;;  %v13451_v34 = vld [vmem:[#allocation18] sm:$0xf]  ;;  %v13453_v42 = vld [vmem:[#allocation18 + $0x40] sm:$0xf0] }
 0x91c   :  { %v17217_v36 = vld [vmem:[#allocation18 + $0x3c] sm:$0xf0] }
 0x930   :  { %v18192_v44 = vpop.permute.xlu2 %18191 }
 0x931   :  { %v18194_v50 = vunpack.i.h.bf16 %v18192_v44  ;;  %v18193_v20 = vunpack.i.l.bf16 %v18192_v44  ;;  %v17273_v44 = vld [vmem:[#allocation18 + $0x204] sm:$0xf] }
 0x940   :  { %v18187_v7 = vpop.permute.xlu0 %18186 }
 0x941   :  { %v18189_v21 = vunpack.i.h.bf16 %v18187_v7  ;;  %v18188_v41 = vunpack.i.l.bf16 %v18187_v7  ;;  %v13715_v7 = vld [vmem:[#allocation18 + $0x208] sm:$0xf] }
 0x943   :  { %v2153_v51 = vsel %vm2152_vm6, %v2150_v47, %v18188_v41  ;;  %v2154_v54 = vsel %vm2152_vm6, %v2151_v48, %v18189_v21  ;;  %v17282_v21 = vld [vmem:[#allocation18 + $0x244] sm:$0xf0]  ;;  %v17274_v41 = vld [vmem:[#allocation18 + $0x20c] sm:$0xf]  ;;  %v13708_v47 = vor.u32 %v17281_v57, %v13707_v43  ;;  %v13712_v48 = vor.u32 %v17273_v44, %v13709_v22 }
 0x944   :  { %v2156_v55 = vsel %vm2155_vm7, %v2153_v51, %v18193_v20  ;;  %v2157_v46 = vsel %vm2155_vm7, %v2154_v54, %v18194_v50  ;;  %v13717_v50 = vld [vmem:[#allocation18 + $0x248] sm:$0xf0]  ;;  %v2253_v20 = vadd.f32 %v19562_v2, %v2252_v35  ;;  %v13716_v51 = vor.u32 %v17282_v21, %v13715_v7  ;;  %v13643_v54 = vld [vmem:[#allocation18 + $0x180] sm:$0xf]  ;;  %v13459_v43 = vld [vmem:[#allocation18 + $0x8] sm:$0xf] }
 0x945   :  { %v2175_v58 = vpack.c.bf16 %v2157_v46, %v2156_v55  ;;  %v17265_v55 = vld [vmem:[#allocation18 + $0x1bc] sm:$0xf0]  ;;  %v17257_v46 = vld [vmem:[#allocation18 + $0x184] sm:$0xf]  ;;  %3110 = vmatpush.bf16.msrb.mxu1 %v13708_v47  ;;  %v13525_v35 = vld [vmem:[#allocation18 + $0xc8] sm:$0xf0]  ;;  %v13456_v44 = vor.u32 %v17209_v37, %v13453_v42 }
 0x946   :  { %v19569_v1 = vsel %vm2254_vm8, %v19562_v2, %v2253_v20  ;;  %v13644_v3 = vor.u32 %v17265_v55, %v13643_v54  ;;  %3138 = vmatpush.bf16.msrb.mxu3 %v13716_v51  ;;  %v13528_v6 = vor.u32 %v17226_v32, %v13525_v35  ;;  %v17218_v57 = vld [vmem:[#allocation18 + $0x44] sm:$0xf0]  ;;  %v17210_v22 = vld [vmem:[#allocation18 + $0xc] sm:$0xf]  ;;  %v13915_v21 = vld [vmem:[#allocation18 + $0x390] sm:$0xf] }
 0x947   :  { %2235 = vmatmul.bf16.vlgmr.msra.gmra.mxu0 %v2175_v58  ;;  %v13720_v58 = vor.u32 %v17274_v41, %v13717_v50  ;;  %v13461_v7 = vld [vmem:[#allocation18 + $0x48] sm:$0xf0]  ;;  %v17331_v50 = vld [vmem:[#allocation18 + $0x3cc] sm:$0xf0]  ;;  %v17323_v20 = vld [vmem:[#allocation18 + $0x394] sm:$0xf] }
 0x948   :  { %v13464_v41 = vor.u32 %v17210_v22, %v13461_v7  ;;  %v13917_v47 = vld [vmem:[#allocation18 + $0x3d0] sm:$0xf0]  ;;  %v13923_v54 = vld [vmem:[#allocation18 + $0x398] sm:$0xf]  ;;  %v13733_v32 = vld [vmem:[#allocation18 + $0x258] sm:$0xf0] }
 0x949   :  { %3111 = vmatpush.bf16.msrb.mxu1 %v13644_v3  ;;  %v13920_v51 = vor.u32 %v17323_v20, %v13917_v47  ;;  %v17332_v55 = vld [vmem:[#allocation18 + $0x3d4] sm:$0xf0]  ;;  %v17307_v3 = vld [vmem:[#allocation18 + $0x314] sm:$0xf]  ;;  %v13669_v22 = vld [vmem:[#allocation18 + $0x1d8] sm:$0xf0] }
 0x94a   :  { %v13667_v42 = vld [vmem:[#allocation18 + $0x198] sm:$0xf]  ;;  %v13597_v47 = vld [vmem:[#allocation18 + $0x150] sm:$0xf0] }
 0x9c4   :  { %v2236_v59 = vpop.f32.mrf.mxu0 }
 0x9c5   :  { %v2237_v60 = vadd.f32 %v18338_v33, %v2236_v59  ;;  %v13651_v59 = vld [vmem:[#allocation18 + $0x188] sm:$0xf] }
 0x9c7   :  { %v19555_v62 = vadd.f32 %v2237_v60, %v19297_v39  ;;  %v17321_v39 = vld [vmem:[#allocation18 + $0x384] sm:$0xf]  ;;  %v17266_v60 = vld [vmem:[#allocation18 + $0x1c4] sm:$0xf0] }
 0x9c8   :  { %v13904_v49 = vor.u32 %v17321_v39, %v13901_v61  ;;  %v13652_v5 = vor.u32 %v17266_v60, %v13651_v59  ;;  %v13851_v59 = vld [vmem:[#allocation18 + $0x310] sm:$0xf] }
 0x9c9   :  { %2245 = vadd.xlane.f32.xlu0 %v19555_v62  ;;  %v17315_v60 = vld [vmem:[#allocation18 + $0x34c] sm:$0xf0] }
 0x9ca   :  { %3121 = vmatpush.bf16.msrb.mxu2 %v13904_v49  ;;  %3139 = vmatpush.bf16.msrb.mxu3 %v13652_v5  ;;  %v13859_v5 = vld [vmem:[#allocation18 + $0x318] sm:$0xf] }
 0x9cc   :  { %v2238_v63 = vpop.f32.mrf.mxu0 }
 0x9cd   :  { %v2239_v45 = vadd.f32 %v18338_v33, %v2238_v63  ;;  %v13645_v33 = vld [vmem:[#allocation18 + $0x1c0] sm:$0xf0]  ;;  %v17258_v63 = vld [vmem:[#allocation18 + $0x18c] sm:$0xf] }
 0x9ce   :  { %3122 = vmatpush.bf16.msrb.mxu2 %v13840_v23  ;;  %v13648_v4 = vor.u32 %v17257_v46, %v13645_v33  ;;  %v17242_v23 = vld [vmem:[#allocation18 + $0x10c] sm:$0xf]  ;;  %3140 = vmatpush.bf16.msrb.mxu3 %v13588_v56  ;;  %v17324_v46 = vld [vmem:[#allocation18 + $0x39c] sm:$0xf] }
 0x9cf   :  { %v19559_v0 = vadd.f32 %v2239_v45, %v19299_v40  ;;  %v17322_v40 = vld [vmem:[#allocation18 + $0x38c] sm:$0xf]  ;;  %v13592_v25 = vor.u32 %v17242_v23, %v13589_v24  ;;  %v13925_v33 = vld [vmem:[#allocation18 + $0x3d8] sm:$0xf0] }
 0x9d0   :  { %v13912_v17 = vor.u32 %v17322_v40, %v13909_v15  ;;  %v13653_v45 = vld [vmem:[#allocation18 + $0x1c8] sm:$0xf0]  ;;  %v13579_v40 = vld [vmem:[#allocation18 + $0x100] sm:$0xf]  ;;  %v17241_v15 = vld [vmem:[#allocation18 + $0x104] sm:$0xf] }
 0x9d1   :  { %2247 = vadd.xlane.f32.xlu2 %v19559_v0  ;;  %v13656_v39 = vor.u32 %v17258_v63, %v13653_v45  ;;  %v13928_v63 = vor.u32 %v17324_v46, %v13925_v33  ;;  %v13852_v45 = vor.u32 %v17315_v60, %v13851_v59  ;;  %v17292_v56 = vld [vmem:[#allocation18 + $0x29c] sm:$0xf]  ;;  %v13531_v60 = vld [vmem:[#allocation18 + $0x90] sm:$0xf] }
 0x9d2   :  { %3149 = vmatpush.bf16.msrb.mxu0 %v13912_v17  ;;  %3123 = vmatpush.bf16.msrb.mxu2 %v13776_v38  ;;  %v13581_v17 = vld [vmem:[#allocation18 + $0x140] sm:$0xf0]  ;;  %v13452_v38 = vor.u32 %v17217_v36, %v13451_v34  ;;  %v13797_v23 = vld [vmem:[#allocation18 + $0x2d8] sm:$0xf0]  ;;  %v17267_v34 = vld [vmem:[#allocation18 + $0x1cc] sm:$0xf0] }
 0x9d3   :  { %v13584_v19 = vor.u32 %v17241_v15, %v13581_v17  ;;  %v13795_v17 = vld [vmem:[#allocation18 + $0x298] sm:$0xf]  ;;  %v13800_v24 = vor.u32 %v17292_v56, %v13797_v23  ;;  %v17259_v36 = vld [vmem:[#allocation18 + $0x194] sm:$0xf]  ;;  %v17244_v46 = vld [vmem:[#allocation18 + $0x11c] sm:$0xf] }
 0x9d6   :  { %3150 = vmatpush.bf16.msrb.mxu0 %v13848_v29  ;;  %3124 = vmatpush.bf16.msrb.mxu2 %v13712_v48  ;;  %v17234_v29 = vld [vmem:[#allocation18 + $0xc4] sm:$0xf0]  ;;  %v13916_v48 = vor.u32 %v17331_v50, %v13915_v21  ;;  %v13595_v21 = vld [vmem:[#allocation18 + $0x110] sm:$0xf]  ;;  %v17243_v50 = vld [vmem:[#allocation18 + $0x114] sm:$0xf] }
 0x9d7   :  { %v13524_v31 = vor.u32 %v17234_v29, %v13523_v8  ;;  %v17284_v8 = vld [vmem:[#allocation18 + $0x254] sm:$0xf0] }
 0x9d9   :  { %3141 = vmatpush.bf16.msrb.mxu3 %v13524_v31  ;;  %v17276_v31 = vld [vmem:[#allocation18 + $0x21c] sm:$0xf] }
 0x9da   :  { %3151 = vmatpush.bf16.msrb.mxu0 %v13784_v52  ;;  %3125 = vmatpush.bf16.msrb.mxu2 %v13648_v4  ;;  %v13460_v52 = vor.u32 %v17218_v57, %v13459_v43  ;;  %v13853_v4 = vld [vmem:[#allocation18 + $0x350] sm:$0xf0]  ;;  %v13736_v35 = vor.u32 %v17276_v31, %v13733_v32  ;;  %v17268_v43 = vld [vmem:[#allocation18 + $0x1d4] sm:$0xf0] }
 0x9dd   :  { %3142 = vmatpush.bf16.msrb.mxu3 %v13460_v52  ;;  %v17260_v52 = vld [vmem:[#allocation18 + $0x19c] sm:$0xf] }
 0x9de   :  { %3152 = vmatpush.bf16.msrb.mxu0 %v13720_v58  ;;  %3126 = vmatpush.bf16.msrb.mxu2 %v13584_v19  ;;  %v13924_v58 = vor.u32 %v17332_v55, %v13923_v54  ;;  %v13796_v19 = vor.u32 %v17300_v12, %v13795_v17  ;;  %v13672_v7 = vor.u32 %v17260_v52, %v13669_v22  ;;  %v13469_v12 = vld [vmem:[#allocation18 + $0x50] sm:$0xf0]  ;;  %v18340_v52 = vld [vmem:[#allocation17] ss:$0 sm:$0xff] }
 0x9df   :  { %v13600_v54 = vor.u32 %v17243_v50, %v13597_v47  ;;  %v17333_v50 = vld [vmem:[#allocation18 + $0x3dc] sm:$0xf0]  ;;  %v13933_v47 = vld [vmem:[#allocation18 + $0x3e0] sm:$0xf0] }
 0x9e1   :  { %3191 = vmatpush.bf16.msra.mxu3 %v13924_v58  ;;  %v13605_v58 = vld [vmem:[#allocation18 + $0x158] sm:$0xf0] }
 0x9e2   :  { %3153 = vmatpush.bf16.msrb.mxu0 %v13656_v39  ;;  %3127 = vmatpush.bf16.msrb.mxu2 %v13520_v30  ;;  %v17316_v39 = vld [vmem:[#allocation18 + $0x354] sm:$0xf0]  ;;  %v13732_v30 = vor.u32 %v17284_v8, %v13731_v28  ;;  %v13608_v33 = vor.u32 %v17244_v46, %v13605_v58  ;;  %v13941_v46 = vld [vmem:[#allocation18 + $0x3e8] sm:$0xf0] }
 0x9e6   :  { %3154 = vmatpush.bf16.msrb.mxu0 %v13592_v25  ;;  %3128 = vmatpush.bf16.msrb.mxu2 %v13456_v44  ;;  %v13723_v25 = vld [vmem:[#allocation18 + $0x210] sm:$0xf]  ;;  %v13668_v44 = vor.u32 %v17268_v43, %v13667_v42  ;;  %v18339_v42 = vld [vmem:[#allocation15] ss:$0 sm:$0xff] }
 0x9ea   :  { %3155 = vmatpush.bf16.msrb.mxu0 %v13528_v6  ;;  %3177 = vmatpush.bf16.msra.mxu2 %v13920_v51  ;;  %v13659_v6 = vld [vmem:[#allocation18 + $0x190] sm:$0xf]  ;;  %v17252_v51 = vld [vmem:[#allocation18 + $0x154] sm:$0xf0] }
 0x9eb   :  { %v13660_v37 = vor.u32 %v17267_v34, %v13659_v6 }
 0x9ee   :  { %3156 = vmatpush.bf16.msrb.mxu0 %v13464_v41  ;;  %v17251_v41 = vld [vmem:[#allocation18 + $0x14c] sm:$0xf0] }
 0x9ef   :  { %v13596_v20 = vor.u32 %v17251_v41, %v13595_v21  ;;  %v13931_v41 = vld [vmem:[#allocation18 + $0x3a0] sm:$0xf] }
 0x9f2   :  { %3205 = vmatpush.bf16.msra.mxu0 %v13928_v63  ;;  %v17235_v63 = vld [vmem:[#allocation18 + $0xcc] sm:$0xf0] }
 0xa3c   :  { %v2246_v9 = vpop.xlane.xlu0 %2245 }
 0xa3d   :  { %v2256_v10 = vmul.f32 %v19569_v1, %v2246_v9  ;;  %v13856_v9 = vor.u32 %v17307_v3, %v13853_v4  ;;  %v13532_v4 = vor.u32 %v17235_v63, %v13531_v60  ;;  %v17317_v60 = vld [vmem:[#allocation18 + $0x35c] sm:$0xf0] }
 0xa3f   :  { %v19573_v61 = vsub.f32 %v19555_v62, %v2256_v10  ;;  %v17249_v62 = vld [vmem:[#allocation18 + $0x13c] sm:$0xf0]  ;;  %v17308_v10 = vld [vmem:[#allocation18 + $0x31c] sm:$0xf]  ;;  %3178 = vmatpush.bf16.msra.mxu2 %v13856_v9  ;;  %v13539_v9 = vld [vmem:[#allocation18 + $0x98] sm:$0xf] }
 0xa40   :  { %v13580_v16 = vor.u32 %v17249_v62, %v13579_v40  ;;  %v17299_v40 = vld [vmem:[#allocation18 + $0x2cc] sm:$0xf0]  ;;  %v17291_v62 = vld [vmem:[#allocation18 + $0x294] sm:$0xf] }
 0xa41   :  { %v2260_v2 = vmul.f32 %v19573_v61, %v19573_v61 }
 0xa42   :  { %3112 = vmatpush.bf16.msrb.mxu1 %v13580_v16  ;;  %v13789_v16 = vld [vmem:[#allocation18 + $0x2d0] sm:$0xf0] }
 0xa43   :  { %2262 = vadd.xlane.f32.xlu1 %v2260_v2  ;;  %v13861_v2 = vld [vmem:[#allocation18 + $0x358] sm:$0xf0]  ;;  %v13792_v18 = vor.u32 %v17291_v62, %v13789_v16  ;;  %v13467_v62 = vld [vmem:[#allocation18 + $0x10] sm:$0xf]  ;;  %v17211_v16 = vld [vmem:[#allocation18 + $0x14] sm:$0xf] }
 0xa44   :  { %v2248_v11 = vpop.xlane.xlu2 %2247  ;;  %v13472_v56 = vor.u32 %v17211_v16, %v13469_v12  ;;  %v13805_v16 = vld [vmem:[#allocation18 + $0x2e0] sm:$0xf0]  ;;  %v17302_v12 = vld [vmem:[#allocation18 + $0x2e4] sm:$0xf0] }
 0xa45   :  { %v2257_v13 = vmul.f32 %v19569_v1, %v2248_v11  ;;  %v13860_v11 = vor.u32 %v17316_v39, %v13859_v5  ;;  %3179 = vmatpush.bf16.msra.mxu2 %v13792_v18  ;;  %v13533_v5 = vld [vmem:[#allocation18 + $0xd0] sm:$0xf0]  ;;  %v17236_v39 = vld [vmem:[#allocation18 + $0xd4] sm:$0xf0] }
 0xa46   :  { %v13475_v18 = vld [vmem:[#allocation18 + $0x18] sm:$0xf] }
 0xa47   :  { %v19579_v49 = vsub.f32 %v19559_v0, %v2257_v13  ;;  %v13515_v0 = vld [vmem:[#allocation18 + $0x80] sm:$0xf]  ;;  %v13864_v13 = vor.u32 %v17308_v10, %v13861_v2  ;;  %3192 = vmatpush.bf16.msra.mxu3 %v13860_v11  ;;  %v13540_v2 = vor.u32 %v17236_v39, %v13539_v9  ;;  %v17228_v11 = vld [vmem:[#allocation18 + $0x9c] sm:$0xf]  ;;  %v17318_v9 = vld [vmem:[#allocation18 + $0x364] sm:$0xf0] }
 0xa48   :  { %v13516_v53 = vor.u32 %v17233_v26, %v13515_v0  ;;  %v17283_v0 = vld [vmem:[#allocation18 + $0x24c] sm:$0xf0]  ;;  %v17275_v26 = vld [vmem:[#allocation18 + $0x214] sm:$0xf]  ;;  %v17310_v39 = vld [vmem:[#allocation18 + $0x32c] sm:$0xf] }
 0xa49   :  { %v2261_v14 = vmul.f32 %v19579_v49, %v19579_v49  ;;  %3206 = vmatpush.bf16.msra.mxu0 %v13864_v13  ;;  %v13724_v27 = vor.u32 %v17283_v0, %v13723_v25  ;;  %v13541_v13 = vld [vmem:[#allocation18 + $0xd8] sm:$0xf0] }
 0xa4a   :  { %3113 = vmatpush.bf16.msrb.mxu1 %v13516_v53  ;;  %v13725_v53 = vld [vmem:[#allocation18 + $0x250] sm:$0xf0]  ;;  %v13477_v25 = vld [vmem:[#allocation18 + $0x58] sm:$0xf0] }
 0xa4b   :  { %2264 = vadd.xlane.f32.xlu0 %v2261_v14  ;;  %v13787_v14 = vld [vmem:[#allocation18 + $0x290] sm:$0xf]  ;;  %3193 = vmatpush.bf16.msra.mxu3 %v13796_v19  ;;  %v13728_v29 = vor.u32 %v17275_v26, %v13725_v53  ;;  %v17220_v19 = vld [vmem:[#allocation18 + $0x54] sm:$0xf0] }
 0xa4c   :  { %v13788_v15 = vor.u32 %v17299_v40, %v13787_v14  ;;  %v13544_v40 = vor.u32 %v17228_v11, %v13541_v13  ;;  %v13476_v23 = vor.u32 %v17220_v19, %v13475_v18  ;;  %v13803_v13 = vld [vmem:[#allocation18 + $0x2a0] sm:$0xf]  ;;  %v17294_v18 = vld [vmem:[#allocation18 + $0x2ac] sm:$0xf] }
 0xa4d   :  { %3207 = vmatpush.bf16.msra.mxu0 %v13800_v24  ;;  %3180 = vmatpush.bf16.msra.mxu2 %v13728_v29  ;;  %v17212_v24 = vld [vmem:[#allocation18 + $0x1c] sm:$0xf]  ;;  %v13813_v19 = vld [vmem:[#allocation18 + $0x2e8] sm:$0xf0] }
 0xa4e   :  { %3114 = vmatpush.bf16.msrb.mxu1 %v13452_v38  ;;  %v13661_v38 = vld [vmem:[#allocation18 + $0x1d0] sm:$0xf0]  ;;  %v13480_v0 = vor.u32 %v17212_v24, %v13477_v25  ;;  %v13739_v24 = vld [vmem:[#allocation18 + $0x220] sm:$0xf] }
 0xa4f   :  { %3194 = vmatpush.bf16.msra.mxu3 %v13732_v30  ;;  %v13664_v57 = vor.u32 %v17259_v36, %v13661_v38  ;;  %v17285_v25 = vld [vmem:[#allocation18 + $0x25c] sm:$0xf0] }
 0xa51   :  { %3208 = vmatpush.bf16.msra.mxu0 %v13736_v35  ;;  %3181 = vmatpush.bf16.msra.mxu2 %v13664_v57 }
 0xa52   :  { %3163 = vmatpush.bf16.msra.mxu1 %v13916_v48  ;;  %v13603_v48 = vld [vmem:[#allocation18 + $0x118] sm:$0xf] }
 0xa53   :  { %3195 = vmatpush.bf16.msra.mxu3 %v13668_v44  ;;  %v13604_v55 = vor.u32 %v17252_v51, %v13603_v48  ;;  %v13939_v48 = vld [vmem:[#allocation18 + $0x3a8] sm:$0xf] }
 0xa55   :  { %3209 = vmatpush.bf16.msra.mxu0 %v13672_v7  ;;  %3182 = vmatpush.bf16.msra.mxu2 %v13600_v54 }
 0xa56   :  { %3164 = vmatpush.bf16.msra.mxu1 %v13852_v45  ;;  %v17227_v45 = vld [vmem:[#allocation18 + $0x94] sm:$0xf] }
 0xa57   :  { %3196 = vmatpush.bf16.msra.mxu3 %v13604_v55  ;;  %v13536_v10 = vor.u32 %v17227_v45, %v13533_v5  ;;  %v17334_v55 = vld [vmem:[#allocation18 + $0x3e4] sm:$0xf0] }
 0xa58   :  { %v13940_v63 = vor.u32 %v17334_v55, %v13939_v48  ;;  %v13875_v5 = vld [vmem:[#allocation18 + $0x328] sm:$0xf] }
 0xa59   :  { %3210 = vmatpush.bf16.msra.mxu0 %v13608_v33  ;;  %3183 = vmatpush.bf16.msra.mxu2 %v13536_v10  ;;  %v13932_v33 = vor.u32 %v17333_v50, %v13931_v41  ;;  %v13877_v10 = vld [vmem:[#allocation18 + $0x368] sm:$0xf0]  ;;  %v13619_v48 = vld [vmem:[#allocation18 + $0x128] sm:$0xf] }
 0xa5a   :  { %3165 = vmatpush.bf16.msra.mxu1 %v13788_v15  ;;  %v17219_v15 = vld [vmem:[#allocation18 + $0x4c] sm:$0xf0]  ;;  %v17254_v55 = vld [vmem:[#allocation18 + $0x164] sm:$0xf0] }
 0xa5b   :  { %v13468_v17 = vor.u32 %v17219_v15, %v13467_v62  ;;  %3197 = vmatpush.bf16.msra.mxu3 %v13540_v2  ;;  %v13880_v62 = vor.u32 %v17310_v39, %v13877_v10  ;;  %v17293_v15 = vld [vmem:[#allocation18 + $0x2a4] sm:$0xf]  ;;  %v17230_v39 = vld [vmem:[#allocation18 + $0xac] sm:$0xf] }
 0xa5c   :  { %v13557_v10 = vld [vmem:[#allocation18 + $0xe8] sm:$0xf0] }
 0xa5d   :  { %3211 = vmatpush.bf16.msra.mxu0 %v13544_v40  ;;  %3184 = vmatpush.bf16.msra.mxu2 %v13472_v56  ;;  %v13876_v40 = vor.u32 %v17318_v9, %v13875_v5  ;;  %v13555_v5 = vld [vmem:[#allocation18 + $0xa8] sm:$0xf] }
 0xa5e   :  { %3166 = vmatpush.bf16.msra.mxu1 %v13724_v27  ;;  %v17238_v9 = vld [vmem:[#allocation18 + $0xe4] sm:$0xf0] }
 0xa5f   :  { %3198 = vmatpush.bf16.msra.mxu3 %v13476_v23  ;;  %v13808_v23 = vor.u32 %v17293_v15, %v13805_v16  ;;  %v13556_v15 = vor.u32 %v17238_v9, %v13555_v5  ;;  %v13560_v16 = vor.u32 %v17230_v39, %v13557_v10  ;;  %v13763_v5 = vld [vmem:[#allocation18 + $0x238] sm:$0xf]  ;;  %v17280_v39 = vld [vmem:[#allocation18 + $0x23c] sm:$0xf] }
 0xa60   :  { %v17288_v9 = vld [vmem:[#allocation18 + $0x274] sm:$0xf0]  ;;  %v13765_v10 = vld [vmem:[#allocation18 + $0x278] sm:$0xf0] }
 0xa61   :  { %3212 = vmatpush.bf16.msra.mxu0 %v13480_v0 }
 0xa62   :  { %3167 = vmatpush.bf16.msra.mxu1 %v13660_v37 }
 0xa66   :  { %3168 = vmatpush.bf16.msra.mxu1 %v13596_v20  ;;  %v17325_v20 = vld [vmem:[#allocation18 + $0x3a4] sm:$0xf] }
 0xa6a   :  { %3169 = vmatpush.bf16.msra.mxu1 %v13532_v4  ;;  %v13869_v4 = vld [vmem:[#allocation18 + $0x360] sm:$0xf0] }
 0xa6e   :  { %3170 = vmatpush.bf16.msra.mxu1 %v13468_v17  ;;  %v13811_v17 = vld [vmem:[#allocation18 + $0x2a8] sm:$0xf] }
 0xa6f   :  { %v13812_v0 = vor.u32 %v17302_v12, %v13811_v17  ;;  %v13491_v17 = vld [vmem:[#allocation18 + $0x28] sm:$0xf] }
 0xa70   :  { %v17222_v12 = vld [vmem:[#allocation18 + $0x64] sm:$0xf0] }
 0xab6   :  { %v2263_v59 = vpop.xlane.xlu1 %2262 }
 0xab7   :  { %v2266_v3 = vmul.f32 %v2263_v59, %v19569_v1  ;;  %v13936_v59 = vor.u32 %v17325_v20, %v13933_v47  ;;  %v17245_v20 = vld [vmem:[#allocation18 + $0x124] sm:$0xf] }
 0xab8   :  { %v13613_v47 = vld [vmem:[#allocation18 + $0x160] sm:$0xf0] }
 0xab9   :  { %v2268_v14 = vadd.f32 1e-05, %v2266_v3  ;;  %v17309_v3 = vld [vmem:[#allocation18 + $0x324] sm:$0xf] }
 0xaba   :  { %v13872_v11 = vor.u32 %v17309_v3, %v13869_v4  ;;  %v17229_v3 = vld [vmem:[#allocation18 + $0xa4] sm:$0xf] }
 0xabb   :  { %18423 = vrsqrt.f32 %v2268_v14  ;;  %vm2276_vm10 = vweird.f32 %v2268_v14  ;;  %v13549_v4 = vld [vmem:[#allocation18 + $0xe0] sm:$0xf0] }
 0xabe   :  { %v2265_v26 = vpop.xlane.xlu0 %2264 }
 0xabf   :  { %v2267_v27 = vmul.f32 %v2265_v26, %v19569_v1  ;;  %v13816_v26 = vor.u32 %v17294_v18, %v13813_v19  ;;  %v17214_v18 = vld [vmem:[#allocation18 + $0x2c] sm:$0xf] }
 0xac0   :  { %v13493_v19 = vld [vmem:[#allocation18 + $0x68] sm:$0xf0] }
 0xac1   :  { %v18424_v53 = vpop.eup %18423  ;;  %v2269_v28 = vadd.f32 1e-05, %v2267_v27  ;;  %v17277_v27 = vld [vmem:[#allocation18 + $0x224] sm:$0xf] }
 0xac2   :  { %v2271_v8 = vmul.f32 %v18424_v53, %v2268_v14  ;;  %vm2277_vm9 = vweird.f32 %v18424_v53  ;;  %v17301_v14 = vld [vmem:[#allocation18 + $0x2dc] sm:$0xf0] }
 0xac3   :  { %18425 = vrsqrt.f32 %v2269_v28  ;;  %vm2278_vm11 = vmor %vm2276_vm10, %vm2277_vm9  ;;  %vm2286_vm13 = vweird.f32 %v2269_v28  ;;  %v13804_v56 = vor.u32 %v17301_v14, %v13803_v13  ;;  %v13552_v13 = vor.u32 %v17229_v3, %v13549_v4  ;;  %v17221_v14 = vld [vmem:[#allocation18 + $0x5c] sm:$0xf0]  ;;  %v17279_v3 = vld [vmem:[#allocation18 + $0x234] sm:$0xf] }
 0xac4   :  { %v2272_v29 = vmul.f32 %v18424_v53, %v2271_v8  ;;  %v17286_v8 = vld [vmem:[#allocation18 + $0x264] sm:$0xf0]  ;;  %v13757_v4 = vld [vmem:[#allocation18 + $0x270] sm:$0xf0] }
 0xac6   :  { %v2273_v30 = vmul.f32 0.5, %v2272_v29  ;;  %v17278_v29 = vld [vmem:[#allocation18 + $0x22c] sm:$0xf] }
 0xac8   :  { %v2274_v31 = vsub.f32 1.5, %v2273_v30  ;;  %v13749_v30 = vld [vmem:[#allocation18 + $0x268] sm:$0xf0] }
 0xac9   :  { %v18426_v32 = vpop.eup %18425 }
 0xaca   :  { %v2275_v35 = vmul.f32 %v18424_v53, %v2274_v31  ;;  %v2281_v6 = vmul.f32 %v18426_v32, %v2269_v28  ;;  %vm2287_vm12 = vweird.f32 %v18426_v32  ;;  %v13747_v28 = vld [vmem:[#allocation18 + $0x228] sm:$0xf]  ;;  %v13740_v31 = vor.u32 %v17285_v25, %v13739_v24  ;;  %v17327_v24 = vld [vmem:[#allocation18 + $0x3b4] sm:$0xf] }
 0xacb   :  { %vm2288_vm14 = vmor %vm2286_vm13, %vm2287_vm12  ;;  %v13949_v25 = vld [vmem:[#allocation18 + $0x3f0] sm:$0xf0] }
 0xacc   :  { %v2282_v34 = vmul.f32 %v18426_v32, %v2281_v6  ;;  %v2279_v36 = vsel %vm2278_vm11, %v18424_v53, %v2275_v35  ;;  %v13741_v53 = vld [vmem:[#allocation18 + $0x260] sm:$0xf0]  ;;  %v13675_v35 = vld [vmem:[#allocation18 + $0x1a0] sm:$0xf] }
 0xacd   :  { %v2290_v43 = vmul.f32 %v2279_v36, %v19573_v61  ;;  %v17326_v61 = vld [vmem:[#allocation18 + $0x3ac] sm:$0xf]  ;;  %v17269_v6 = vld [vmem:[#allocation18 + $0x1dc] sm:$0xf0]  ;;  %v13752_v36 = vor.u32 %v17278_v29, %v13749_v30  ;;  %v13492_v29 = vor.u32 %v17222_v12, %v13491_v17  ;;  %v13496_v30 = vor.u32 %v17214_v18, %v13493_v19  ;;  %v13699_v17 = vld [vmem:[#allocation18 + $0x1b8] sm:$0xf] }
 0xace   :  { %v2283_v37 = vmul.f32 0.5, %v2282_v34  ;;  %v13944_v45 = vor.u32 %v17326_v61, %v13941_v46  ;;  %v13748_v34 = vor.u32 %v17286_v8, %v13747_v28  ;;  %v17246_v61 = vld [vmem:[#allocation18 + $0x12c] sm:$0xf]  ;;  %v17328_v28 = vld [vmem:[#allocation18 + $0x3bc] sm:$0xf] }
 0xacf   :  { %v2295_v22 = vmul.f32 %v18339_v42, %v2290_v43  ;;  %v17270_v43 = vld [vmem:[#allocation18 + $0x1e4] sm:$0xf0]  ;;  %v13621_v46 = vld [vmem:[#allocation18 + $0x168] sm:$0xf0]  ;;  %v13957_v8 = vld [vmem:[#allocation18 + $0x3f8] sm:$0xf0] }
 0xad0   :  { %v2284_v38 = vsub.f32 1.5, %v2283_v37  ;;  %v17261_v37 = vld [vmem:[#allocation18 + $0x1a4] sm:$0xf]  ;;  %v17272_v12 = vld [vmem:[#allocation18 + $0x1f4] sm:$0xf0] }
 0xad1   :  { %v19587_v51 = vadd.f32 %v18340_v52, %v2295_v22  ;;  %v17264_v18 = vld [vmem:[#allocation18 + $0x1bc] sm:$0xf] }
 0xad2   :  { %v2285_v57 = vmul.f32 %v18426_v32, %v2284_v38  ;;  %v13677_v38 = vld [vmem:[#allocation18 + $0x1e0] sm:$0xf0]  ;;  %v13701_v19 = vld [vmem:[#allocation18 + $0x1f8] sm:$0xf0] }
 0xad3   :  { %v13680_v22 = vor.u32 %v17261_v37, %v13677_v38  ;;  %v17311_v37 = vld [vmem:[#allocation18 + $0x334] sm:$0xf] }
 0xad4   :  { %v2289_v44 = vsel %vm2288_vm14, %v18426_v32, %v2285_v57  ;;  %v13744_v32 = vor.u32 %v17277_v27, %v13741_v53  ;;  %v17262_v57 = vld [vmem:[#allocation18 + $0x1ac] sm:$0xf]  ;;  %v17336_v53 = vld [vmem:[#allocation18 + $0x3f4] sm:$0xf0]  ;;  %v13885_v38 = vld [vmem:[#allocation18 + $0x370] sm:$0xf0] }
 0xad5   :  { %v2291_v7 = vmul.f32 %v2289_v44, %v19579_v49  ;;  %v13867_v49 = vld [vmem:[#allocation18 + $0x320] sm:$0xf]  ;;  %v13685_v44 = vld [vmem:[#allocation18 + $0x1e8] sm:$0xf0] }
 0xad6   :  { %v13868_v2 = vor.u32 %v17317_v60, %v13867_v49  ;;  %v13688_v50 = vor.u32 %v17262_v57, %v13685_v44  ;;  %v13547_v49 = vld [vmem:[#allocation18 + $0xa0] sm:$0xf]  ;;  %v17312_v57 = vld [vmem:[#allocation18 + $0x33c] sm:$0xf] }
 0xad7   :  { %v2296_v21 = vmul.f32 %v18339_v42, %v2291_v7  ;;  %v13683_v42 = vld [vmem:[#allocation18 + $0x1a8] sm:$0xf]  ;;  %v13611_v7 = vld [vmem:[#allocation18 + $0x120] sm:$0xf]  ;;  %v13893_v44 = vld [vmem:[#allocation18 + $0x378] sm:$0xf0] }
 0xad8   :  { %v13684_v41 = vor.u32 %v17270_v43, %v13683_v42  ;;  %v17237_v60 = vld [vmem:[#allocation18 + $0xdc] sm:$0xf0]  ;;  %v13891_v42 = vld [vmem:[#allocation18 + $0x338] sm:$0xf] }
 0xad9   :  { %v19589_v54 = vadd.f32 %v18340_v52, %v2296_v21  ;;  %v13676_v52 = vor.u32 %v17269_v6, %v13675_v35  ;;  %v17253_v21 = vld [vmem:[#allocation18 + $0x15c] sm:$0xf0]  ;;  %v13883_v35 = vld [vmem:[#allocation18 + $0x330] sm:$0xf]  ;;  %v17320_v43 = vld [vmem:[#allocation18 + $0x374] sm:$0xf0] }
 0xada   :  { %v17319_v6 = vld [vmem:[#allocation18 + $0x36c] sm:$0xf0] }
 0xadb   :  { %v19593_v58 = vpack.c.bf16 %v19589_v54, %v19587_v51 }
 0xadd   :  { %3115 = vmatmul.bf16.vlgmr.msrb.gmra.mxu1 %v19593_v58  ;;  %3129 = vmatmul.bf16.vlgmr.msrb.gmra.mxu2 %v19593_v58 }
 0xade   :  { %3143 = vmatmul.bf16.vlgmr.msrb.gmra.mxu3 %v19593_v58  ;;  %3157 = vmatmul.bf16.vlgmr.msrb.gmra.mxu0 %v19593_v58 }
 0xadf   :  { %3219 = vmatpush.bf16.msrb.mxu1 %v13932_v33  ;;  %3233 = vmatpush.bf16.msrb.mxu2 %v13936_v59  ;;  %v13612_v33 = vor.u32 %v17253_v21, %v13611_v7  ;;  %v13616_v59 = vor.u32 %v17245_v20, %v13613_v47  ;;  %v13819_v7 = vld [vmem:[#allocation18 + $0x2b0] sm:$0xf]  ;;  %v17295_v20 = vld [vmem:[#allocation18 + $0x2b4] sm:$0xf] }
 0xae0   :  { %3247 = vmatpush.bf16.msrb.mxu3 %v13940_v63  ;;  %3261 = vmatpush.bf16.msrb.mxu0 %v13944_v45  ;;  %v13620_v63 = vor.u32 %v17254_v55, %v13619_v48  ;;  %v13624_v45 = vor.u32 %v17246_v61, %v13621_v46  ;;  %v17303_v21 = vld [vmem:[#allocation18 + $0x2ec] sm:$0xf0]  ;;  %v13821_v47 = vld [vmem:[#allocation18 + $0x2f0] sm:$0xf0]  ;;  %v13827_v48 = vld [vmem:[#allocation18 + $0x2b8] sm:$0xf] }
 0xae1   :  { %v17304_v55 = vld [vmem:[#allocation18 + $0x2f4] sm:$0xf0]  ;;  %v17296_v61 = vld [vmem:[#allocation18 + $0x2bc] sm:$0xf] }
 0xae2   :  { %v13829_v46 = vld [vmem:[#allocation18 + $0x2f8] sm:$0xf0] }
 0xae3   :  { %3220 = vmatpush.bf16.msrb.mxu1 %v13868_v2  ;;  %3234 = vmatpush.bf16.msrb.mxu2 %v13872_v11  ;;  %v13483_v2 = vld [vmem:[#allocation18 + $0x20] sm:$0xf]  ;;  %v13548_v11 = vor.u32 %v17237_v60, %v13547_v49  ;;  %v13755_v49 = vld [vmem:[#allocation18 + $0x230] sm:$0xf] }
 0xae4   :  { %3248 = vmatpush.bf16.msrb.mxu3 %v13876_v40  ;;  %3262 = vmatpush.bf16.msrb.mxu0 %v13880_v62  ;;  %v17213_v40 = vld [vmem:[#allocation18 + $0x24] sm:$0xf]  ;;  %v17287_v60 = vld [vmem:[#allocation18 + $0x26c] sm:$0xf0] }
 0xae5   :  { %v13485_v62 = vld [vmem:[#allocation18 + $0x60] sm:$0xf0] }
 0xae6   :  { %v13488_v27 = vor.u32 %v17213_v40, %v13485_v62  ;;  %v13764_v40 = vor.u32 %v17288_v9, %v13763_v5  ;;  %v13768_v62 = vor.u32 %v17280_v39, %v13765_v10  ;;  %v17343_v5 = vld [vmem:[#allocation21 + $0x30] sm:$0xff] }
 0xae7   :  { %3221 = vmatpush.bf16.msrb.mxu1 %v13804_v56  ;;  %3235 = vmatpush.bf16.msrb.mxu2 %v13808_v23  ;;  %v13947_v56 = vld [vmem:[#allocation18 + $0x3b0] sm:$0xf]  ;;  %v17367_v9 = vld [vmem:[#allocation21 + $0xf0] sm:$0xff] }
 0xae8   :  { %3249 = vmatpush.bf16.msrb.mxu3 %v13812_v0  ;;  %3263 = vmatpush.bf16.msrb.mxu0 %v13816_v26  ;;  %v17335_v23 = vld [vmem:[#allocation18 + $0x3ec] sm:$0xf0]  ;;  %v13955_v0 = vld [vmem:[#allocation18 + $0x3b8] sm:$0xf]  ;;  %v13484_v26 = vor.u32 %v17221_v14, %v13483_v2  ;;  %v13756_v2 = vor.u32 %v17287_v60, %v13755_v49  ;;  %v17351_v39 = vld [vmem:[#allocation21 + $0x70] sm:$0xff] }
 0xae9   :  { %v17271_v14 = vld [vmem:[#allocation18 + $0x1ec] sm:$0xf0]  ;;  %v17359_v10 = vld [vmem:[#allocation21 + $0xb0] sm:$0xff] }
 0xaeb   :  { %3222 = vmatpush.bf16.msrb.mxu1 %v13740_v31  ;;  %3236 = vmatpush.bf16.msrb.mxu2 %v13744_v32  ;;  %v13948_v31 = vor.u32 %v17335_v23, %v13947_v56  ;;  %v13952_v32 = vor.u32 %v17327_v24, %v13949_v25  ;;  %v13627_v24 = vld [vmem:[#allocation18 + $0x130] sm:$0xf] }
 0xaec   :  { %3250 = vmatpush.bf16.msrb.mxu3 %v13748_v34  ;;  %3264 = vmatpush.bf16.msrb.mxu0 %v13752_v36  ;;  %v13956_v34 = vor.u32 %v17336_v53, %v13955_v0  ;;  %v13960_v36 = vor.u32 %v17328_v28, %v13957_v8  ;;  %v17255_v25 = vld [vmem:[#allocation18 + $0x16c] sm:$0xf0]  ;;  %v13700_v0 = vor.u32 %v17272_v12, %v13699_v17  ;;  %v13629_v53 = vld [vmem:[#allocation18 + $0x170] sm:$0xf0]  ;;  %v13635_v28 = vld [vmem:[#allocation18 + $0x138] sm:$0xf] }
 0xaed   :  { %3171 = vmatmul.bf16.vlgmr.msra.gmra.mxu1 %v19593_v58  ;;  %3185 = vmatmul.bf16.vlgmr.msra.gmra.mxu2 %v19593_v58  ;;  %v17256_v8 = vld [vmem:[#allocation18 + $0x174] sm:$0xf0]  ;;  %v17364_v17 = vld [vmem:[#allocation21 + $0xd8] sm:$0xff] }
 0xaee   :  { %3199 = vmatmul.bf16.vlgmr.msra.gmra.mxu3 %v19593_v58  ;;  %3213 = vmatmul.bf16.vlgmr.msra.gmra.mxu0 %v19593_v58  ;;  %v17348_v12 = vld [vmem:[#allocation21 + $0x58] sm:$0xff] }
 0xaef   :  { %3223 = vmatpush.bf16.msrb.mxu1 %v13676_v52  ;;  %3237 = vmatpush.bf16.msrb.mxu2 %v13680_v22  ;;  %v13884_v52 = vor.u32 %v17319_v6, %v13883_v35  ;;  %v13888_v22 = vor.u32 %v17311_v37, %v13885_v38  ;;  %v13563_v35 = vld [vmem:[#allocation18 + $0xb0] sm:$0xf]  ;;  %v17231_v37 = vld [vmem:[#allocation18 + $0xb4] sm:$0xf] }
 0xaf0   :  { %3251 = vmatpush.bf16.msrb.mxu3 %v13684_v41  ;;  %3265 = vmatpush.bf16.msrb.mxu0 %v13688_v50  ;;  %v13892_v41 = vor.u32 %v17320_v43, %v13891_v42  ;;  %v13896_v50 = vor.u32 %v17312_v57, %v13893_v44  ;;  %v17239_v6 = vld [vmem:[#allocation18 + $0xec] sm:$0xf0]  ;;  %v13565_v38 = vld [vmem:[#allocation18 + $0xf0] sm:$0xf0]  ;;  %v13571_v42 = vld [vmem:[#allocation18 + $0xb8] sm:$0xf] }
 0xaf1   :  { %v17240_v43 = vld [vmem:[#allocation18 + $0xf4] sm:$0xf0]  ;;  %v17232_v57 = vld [vmem:[#allocation18 + $0xbc] sm:$0xf] }
 0xaf2   :  { %v13573_v44 = vld [vmem:[#allocation18 + $0xf8] sm:$0xf0] }
 0xaf3   :  { %3224 = vmatpush.bf16.msrb.mxu1 %v13612_v33  ;;  %3238 = vmatpush.bf16.msrb.mxu2 %v13616_v59  ;;  %v13820_v33 = vor.u32 %v17303_v21, %v13819_v7  ;;  %v13824_v59 = vor.u32 %v17295_v20, %v13821_v47  ;;  %v13499_v7 = vld [vmem:[#allocation18 + $0x30] sm:$0xf]  ;;  %v17215_v20 = vld [vmem:[#allocation18 + $0x34] sm:$0xf] }
 0xaf4   :  { %3252 = vmatpush.bf16.msrb.mxu3 %v13620_v63  ;;  %3266 = vmatpush.bf16.msrb.mxu0 %v13624_v45  ;;  %v13828_v63 = vor.u32 %v17304_v55, %v13827_v48  ;;  %v13832_v45 = vor.u32 %v17296_v61, %v13829_v46  ;;  %v17223_v21 = vld [vmem:[#allocation18 + $0x6c] sm:$0xf0]  ;;  %v13501_v47 = vld [vmem:[#allocation18 + $0x70] sm:$0xf0]  ;;  %v13507_v48 = vld [vmem:[#allocation18 + $0x38] sm:$0xf] }
 0xaf5   :  { %v17224_v55 = vld [vmem:[#allocation18 + $0x74] sm:$0xf0]  ;;  %v17216_v61 = vld [vmem:[#allocation18 + $0x3c] sm:$0xf] }
 0xaf6   :  { %v13509_v46 = vld [vmem:[#allocation18 + $0x78] sm:$0xf0]  ;;  %v13508_v49 = vor.u32 %v17224_v55, %v13507_v48  ;;  %v17395_v48 = vld [vmem:[#allocation21 + $0x1d0] sm:$0xff] }
 0xaf7   :  { %3225 = vmatpush.bf16.msrb.mxu1 %v13548_v11  ;;  %3239 = vmatpush.bf16.msrb.mxu2 %v13552_v13  ;;  %v13760_v11 = vor.u32 %v17279_v3, %v13757_v4  ;;  %v13691_v13 = vld [vmem:[#allocation18 + $0x1b0] sm:$0xf]  ;;  %v13512_v60 = vor.u32 %v17216_v61, %v13509_v46  ;;  %v17352_v3 = vld [vmem:[#allocation21 + $0x78] sm:$0xff]  ;;  %v17379_v55 = vld [vmem:[#allocation21 + $0x150] sm:$0xff] }
 0xaf8   :  { %3253 = vmatpush.bf16.msrb.mxu3 %v13556_v15  ;;  %3267 = vmatpush.bf16.msrb.mxu0 %v13560_v16  ;;  %v17263_v15 = vld [vmem:[#allocation18 + $0x1b4] sm:$0xf]  ;;  %v13692_v56 = vor.u32 %v17271_v14, %v13691_v13  ;;  %v17360_v4 = vld [vmem:[#allocation21 + $0xb8] sm:$0xff]  ;;  %v17350_v13 = vld [vmem:[#allocation21 + $0x68] sm:$0xff] }
 0xaf9   :  { %v13693_v16 = vld [vmem:[#allocation18 + $0x1f0] sm:$0xf0]  ;;  %v17358_v14 = vld [vmem:[#allocation21 + $0xa8] sm:$0xff]  ;;  %v17387_v61 = vld [vmem:[#allocation21 + $0x190] sm:$0xff] }
 0xafa   :  { %v13696_v23 = vor.u32 %v17263_v15, %v13693_v16  ;;  %v17349_v15 = vld [vmem:[#allocation21 + $0x60] sm:$0xff]  ;;  %v17340_v16 = vld [vmem:[#allocation21 + $0x18] sm:$0xff]  ;;  %v17370_v46 = vld [vmem:[#allocation21 + $0x108] sm:$0xff] }
 0xafb   :  { %3226 = vmatpush.bf16.msrb.mxu1 %v13484_v26  ;;  %3240 = vmatpush.bf16.msrb.mxu2 %v13488_v27  ;;  %v13704_v26 = vor.u32 %v17264_v18, %v13701_v19  ;;  %v17247_v27 = vld [vmem:[#allocation18 + $0x134] sm:$0xf]  ;;  %v17356_v18 = vld [vmem:[#allocation21 + $0x98] sm:$0xff]  ;;  %v17339_v19 = vld [vmem:[#allocation21 + $0x10] sm:$0xff] }
 0xafc   :  { %3254 = vmatpush.bf16.msrb.mxu3 %v13492_v29  ;;  %3268 = vmatpush.bf16.msrb.mxu0 %v13496_v30  ;;  %v17248_v29 = vld [vmem:[#allocation18 + $0x13c] sm:$0xf] }
 0xafd   :  { %v13637_v30 = vld [vmem:[#allocation18 + $0x178] sm:$0xf0] }
 0xafe   :  { %3227 = vmatmul.bf16.vlgmr.msrb.gmra.mxu1 %v19593_v58  ;;  %3241 = vmatmul.bf16.vlgmr.msrb.gmra.mxu2 %v19593_v58 }
 0xaff   :  { %3275 = vmatpush.bf16.msra.mxu1 %v13948_v31  ;;  %3289 = vmatpush.bf16.msra.mxu2 %v13952_v32  ;;  %v13628_v31 = vor.u32 %v17255_v25, %v13627_v24  ;;  %v13632_v32 = vor.u32 %v17247_v27, %v13629_v53  ;;  %v17355_v24 = vld [vmem:[#allocation21 + $0x90] sm:$0xff]  ;;  %v17338_v25 = vld [vmem:[#allocation21 + $0x8] sm:$0xff]  ;;  %v17337_v53 = vld [vmem:[#allocation21] sm:$0xff] }
 0xb00   :  { %3303 = vmatpush.bf16.msra.mxu3 %v13956_v34  ;;  %3317 = vmatpush.bf16.msra.mxu0 %v13960_v36  ;;  %v13636_v34 = vor.u32 %v17256_v8, %v13635_v28  ;;  %v13640_v36 = vor.u32 %v17248_v29, %v13637_v30  ;;  %v17354_v27 = vld [vmem:[#allocation21 + $0x88] sm:$0xff]  ;;  %v17361_v28 = vld [vmem:[#allocation21 + $0xc0] sm:$0xff]  ;;  %v17376_v8 = vld [vmem:[#allocation21 + $0x138] sm:$0xff] }
 0xb01   :  { %3255 = vmatmul.bf16.vlgmr.msrb.gmra.mxu3 %v19593_v58  ;;  %3269 = vmatmul.bf16.vlgmr.msrb.gmra.mxu0 %v19593_v58  ;;  %v17400_v29 = vld [vmem:[#allocation21 + $0x1f8] sm:$0xff]  ;;  %v17345_v30 = vld [vmem:[#allocation21 + $0x40] sm:$0xff] }
 0xb03   :  { %3276 = vmatpush.bf16.msra.mxu1 %v13884_v52  ;;  %3290 = vmatpush.bf16.msra.mxu2 %v13888_v22  ;;  %v13564_v52 = vor.u32 %v17239_v6, %v13563_v35  ;;  %v13568_v22 = vor.u32 %v17231_v37, %v13565_v38  ;;  %v17392_v35 = vld [vmem:[#allocation21 + $0x1b8] sm:$0xff]  ;;  %v17375_v6 = vld [vmem:[#allocation21 + $0x130] sm:$0xff]  ;;  %v17374_v38 = vld [vmem:[#allocation21 + $0x128] sm:$0xff] }
 0xb04   :  { %3304 = vmatpush.bf16.msra.mxu3 %v13892_v41  ;;  %3318 = vmatpush.bf16.msra.mxu0 %v13896_v50  ;;  %v13572_v41 = vor.u32 %v17240_v43, %v13571_v42  ;;  %v13576_v50 = vor.u32 %v17232_v57, %v13573_v44  ;;  %v17391_v37 = vld [vmem:[#allocation21 + $0x1b0] sm:$0xff]  ;;  %v17398_v42 = vld [vmem:[#allocation21 + $0x1e8] sm:$0xff]  ;;  %v17373_v44 = vld [vmem:[#allocation21 + $0x120] sm:$0xff] }
 0xb05   :  { %v17382_v43 = vld [vmem:[#allocation21 + $0x168] sm:$0xff] }
 0xb06   :  { %v17390_v57 = vld [vmem:[#allocation21 + $0x1a8] sm:$0xff] }
 0xb07   :  { %3277 = vmatpush.bf16.msra.mxu1 %v13820_v33  ;;  %3291 = vmatpush.bf16.msra.mxu2 %v13824_v59  ;;  %v13500_v33 = vor.u32 %v17223_v21, %v13499_v7  ;;  %v13504_v59 = vor.u32 %v17215_v20, %v13501_v47  ;;  %v17389_v7 = vld [vmem:[#allocation21 + $0x1a0] sm:$0xff]  ;;  %v17372_v21 = vld [vmem:[#allocation21 + $0x118] sm:$0xff]  ;;  %v17371_v47 = vld [vmem:[#allocation21 + $0x110] sm:$0xff] }
 0xb08   :  { %3305 = vmatpush.bf16.msra.mxu3 %v13828_v63  ;;  %3319 = vmatpush.bf16.msra.mxu0 %v13832_v45  ;;  %v17344_v63 = vld [vmem:[#allocation21 + $0x38] sm:$0xff] }
 0xb09   :  { %v17368_v45 = vld [vmem:[#allocation21 + $0xf8] sm:$0xff] }
 0xb0a   :  { %v17388_v20 = vld [vmem:[#allocation21 + $0x198] sm:$0xff] }
 0xb0b   :  { %3278 = vmatpush.bf16.msra.mxu1 %v13756_v2  ;;  %3292 = vmatpush.bf16.msra.mxu2 %v13760_v11  ;;  %v17342_v2 = vld [vmem:[#allocation21 + $0x28] sm:$0xff] }
 0xb0c   :  { %3306 = vmatpush.bf16.msra.mxu3 %v13764_v40  ;;  %3320 = vmatpush.bf16.msra.mxu0 %v13768_v62  ;;  %v17366_v11 = vld [vmem:[#allocation21 + $0xe8] sm:$0xff]  ;;  %v17341_v40 = vld [vmem:[#allocation21 + $0x20] sm:$0xff] }
 0xb0d   :  { %v17365_v62 = vld [vmem:[#allocation21 + $0xe0] sm:$0xff] }
 0xb0f   :  { %3279 = vmatpush.bf16.msra.mxu1 %v13692_v56  ;;  %3293 = vmatpush.bf16.msra.mxu2 %v13696_v23  ;;  %v17363_v56 = vld [vmem:[#allocation21 + $0xd0] sm:$0xff] }
 0xb10   :  { %3307 = vmatpush.bf16.msra.mxu3 %v13700_v0  ;;  %3321 = vmatpush.bf16.msra.mxu0 %v13704_v26  ;;  %v17347_v23 = vld [vmem:[#allocation21 + $0x50] sm:$0xff]  ;;  %v17362_v0 = vld [vmem:[#allocation21 + $0xc8] sm:$0xff] }
 0xb11   :  { %v17346_v26 = vld [vmem:[#allocation21 + $0x48] sm:$0xff] }
 0xb13   :  { %3280 = vmatpush.bf16.msra.mxu1 %v13628_v31  ;;  %3294 = vmatpush.bf16.msra.mxu2 %v13632_v32  ;;  %v17353_v31 = vld [vmem:[#allocation21 + $0x80] sm:$0xff]  ;;  %v17384_v32 = vld [vmem:[#allocation21 + $0x178] sm:$0xff] }
 0xb14   :  { %3308 = vmatpush.bf16.msra.mxu3 %v13636_v34  ;;  %3322 = vmatpush.bf16.msra.mxu0 %v13640_v36  ;;  %v17399_v34 = vld [vmem:[#allocation21 + $0x1f0] sm:$0xff] }
 0xb15   :  { %v17383_v36 = vld [vmem:[#allocation21 + $0x170] sm:$0xff] }
 0xb17   :  { %3281 = vmatpush.bf16.msra.mxu1 %v13564_v52  ;;  %3295 = vmatpush.bf16.msra.mxu2 %v13568_v22  ;;  %v17397_v52 = vld [vmem:[#allocation21 + $0x1e0] sm:$0xff] }
 0xb18   :  { %3309 = vmatpush.bf16.msra.mxu3 %v13572_v41  ;;  %3323 = vmatpush.bf16.msra.mxu0 %v13576_v50  ;;  %v17381_v22 = vld [vmem:[#allocation21 + $0x160] sm:$0xff]  ;;  %v17396_v41 = vld [vmem:[#allocation21 + $0x1d8] sm:$0xff] }
 0xb19   :  { %v17380_v50 = vld [vmem:[#allocation21 + $0x158] sm:$0xff] }
 0xb1b   :  { %3282 = vmatpush.bf16.msra.mxu1 %v13500_v33  ;;  %3296 = vmatpush.bf16.msra.mxu2 %v13504_v59  ;;  %v17394_v33 = vld [vmem:[#allocation21 + $0x1c8] sm:$0xff] }
 0xb1c   :  { %3310 = vmatpush.bf16.msra.mxu3 %v13508_v49  ;;  %3324 = vmatpush.bf16.msra.mxu0 %v13512_v60  ;;  %v17378_v59 = vld [vmem:[#allocation21 + $0x148] sm:$0xff]  ;;  %v17369_v60 = vld [vmem:[#allocation21 + $0x100] sm:$0xff] }
 0xb1d   :  { %v17386_v49 = vld [vmem:[#allocation21 + $0x188] sm:$0xff] }
 0xb1e   :  { %3283 = vmatmul.bf16.vlgmr.msra.gmra.mxu1 %v19593_v58  ;;  %3297 = vmatmul.bf16.vlgmr.msra.gmra.mxu2 %v19593_v58 }
 0xb1f   :  { %4407 = vmatpush.bf16.msrb.mxu1 %v17344_v63  ;;  %3311 = vmatmul.bf16.vlgmr.msra.gmra.mxu3 %v19593_v58  ;;  %v17393_v63 = vld [vmem:[#allocation21 + $0x1c0] sm:$0xff] }
 0xb20   :  { %4449 = vmatpush.bf16.msrb.mxu0 %v17368_v45  ;;  %4421 = vmatpush.bf16.msrb.mxu2 %v17352_v3  ;;  %v17377_v45 = vld [vmem:[#allocation21 + $0x140] sm:$0xff] }
 0xb21   :  { %3325 = vmatmul.bf16.vlgmr.msra.gmra.mxu0 %v19593_v58  ;;  %4435 = vmatpush.bf16.msrb.mxu3 %v17360_v4  ;;  %v17357_v58 = vld [vmem:[#allocation21 + $0xa0] sm:$0xff]  ;;  %v19611_v4 = vld [vmem:[#allocation20] sm:$0xff] }
 0xb22   :  { %v17385_v3 = vld [vmem:[#allocation21 + $0x180] sm:$0xff] }
 0xb23   :  { %4408 = vmatpush.bf16.msrb.mxu1 %v17343_v5 }
 0xb24   :  { %4450 = vmatpush.bf16.msrb.mxu0 %v17367_v9  ;;  %4422 = vmatpush.bf16.msrb.mxu2 %v17351_v39  ;;  %v2435_v39 = vperm.slane %v19611_v4, 0 }
 0xb25   :  { %4436 = vmatpush.bf16.msrb.mxu3 %v17359_v10  ;;  %v2438_v10 = vperm.slane %v19611_v4, 3 }
 0xb27   :  { %4409 = vmatpush.bf16.msrb.mxu1 %v17342_v2 }
 0xb28   :  { %4451 = vmatpush.bf16.msrb.mxu0 %v17366_v11  ;;  %4423 = vmatpush.bf16.msrb.mxu2 %v17350_v13 }
 0xb29   :  { %4437 = vmatpush.bf16.msrb.mxu3 %v17358_v14 }
 0xb2b   :  { %4410 = vmatpush.bf16.msrb.mxu1 %v17341_v40 }
 0xb2c   :  { %4452 = vmatpush.bf16.msrb.mxu0 %v17365_v62  ;;  %4424 = vmatpush.bf16.msrb.mxu2 %v17349_v15  ;;  %v2436_v62 = vperm.slane %v19611_v4, 1 }
 0xb2d   :  { %4438 = vmatpush.bf16.msrb.mxu3 %v17357_v58 }
 0xb2f   :  { %4411 = vmatpush.bf16.msrb.mxu1 %v17340_v16  ;;  %v2437_v16 = vperm.slane %v19611_v4, 2 }
 0xb30   :  { %4453 = vmatpush.bf16.msrb.mxu0 %v17364_v17  ;;  %4425 = vmatpush.bf16.msrb.mxu2 %v17348_v12 }
 0xb31   :  { %4439 = vmatpush.bf16.msrb.mxu3 %v17356_v18 }
 0xb33   :  { %4412 = vmatpush.bf16.msrb.mxu1 %v17339_v19 }
 0xb34   :  { %4454 = vmatpush.bf16.msrb.mxu0 %v17363_v56  ;;  %4426 = vmatpush.bf16.msrb.mxu2 %v17347_v23  ;;  %v17408_v23 = vld [vmem:[#allocation21 + $0x238] sm:$0xff] }
 0xb35   :  { %4440 = vmatpush.bf16.msrb.mxu3 %v17355_v24 }
 0xb37   :  { %4413 = vmatpush.bf16.msrb.mxu1 %v17338_v25 }
 0xb38   :  { %4455 = vmatpush.bf16.msrb.mxu0 %v17362_v0  ;;  %4427 = vmatpush.bf16.msrb.mxu2 %v17346_v26  ;;  %v17432_v0 = vld [vmem:[#allocation21 + $0x2f8] sm:$0xff] }
 0xb39   :  { %4441 = vmatpush.bf16.msrb.mxu3 %v17354_v27 }
 0xb3b   :  { %4414 = vmatpush.bf16.msrb.mxu1 %v17337_v53 }
 0xb3c   :  { %4456 = vmatpush.bf16.msrb.mxu0 %v17361_v28  ;;  %4428 = vmatpush.bf16.msrb.mxu2 %v17345_v30 }
 0xb3d   :  { %4442 = vmatpush.bf16.msrb.mxu3 %v17353_v31  ;;  %v17407_v31 = vld [vmem:[#allocation21 + $0x230] sm:$0xff] }
 0xb3f   :  { %4463 = vmatpush.bf16.msra.mxu1 %v17376_v8 }
 0xb40   :  { %4505 = vmatpush.bf16.msra.mxu0 %v17400_v29  ;;  %4477 = vmatpush.bf16.msra.mxu2 %v17384_v32 }
 0xb41   :  { %4491 = vmatpush.bf16.msra.mxu3 %v17392_v35 }
 0xb43   :  { %4464 = vmatpush.bf16.msra.mxu1 %v17375_v6 }
 0xb44   :  { %4506 = vmatpush.bf16.msra.mxu0 %v17399_v34  ;;  %4478 = vmatpush.bf16.msra.mxu2 %v17383_v36  ;;  %v17431_v34 = vld [vmem:[#allocation21 + $0x2f0] sm:$0xff] }
 0xb45   :  { %4492 = vmatpush.bf16.msra.mxu3 %v17391_v37 }
 0xb47   :  { %4465 = vmatpush.bf16.msra.mxu1 %v17374_v38  ;;  %v17416_v38 = vld [vmem:[#allocation21 + $0x278] sm:$0xff] }
 0xb48   :  { %4507 = vmatpush.bf16.msra.mxu0 %v17398_v42  ;;  %4479 = vmatpush.bf16.msra.mxu2 %v17382_v43  ;;  %v2439_v43 = vperm.slane %v19611_v4, 4 }
 0xb49   :  { %4493 = vmatpush.bf16.msra.mxu3 %v17390_v57  ;;  %v17424_v57 = vld [vmem:[#allocation21 + $0x2b8] sm:$0xff] }
 0xb4b   :  { %4466 = vmatpush.bf16.msra.mxu1 %v17373_v44 }
 0xb4c   :  { %4508 = vmatpush.bf16.msra.mxu0 %v17397_v52  ;;  %4480 = vmatpush.bf16.msra.mxu2 %v17381_v22  ;;  %v2442_v52 = vperm.slane %v19611_v4, 7  ;;  %v17406_v22 = vld [vmem:[#allocation21 + $0x228] sm:$0xff] }
 0xb4d   :  { %4494 = vmatpush.bf16.msra.mxu3 %v17389_v7  ;;  %v17430_v7 = vld [vmem:[#allocation21 + $0x2e8] sm:$0xff] }
 0xb4f   :  { %4467 = vmatpush.bf16.msra.mxu1 %v17372_v21 }
 0xb50   :  { %4509 = vmatpush.bf16.msra.mxu0 %v17396_v41  ;;  %4481 = vmatpush.bf16.msra.mxu2 %v17380_v50  ;;  %v17415_v41 = vld [vmem:[#allocation21 + $0x270] sm:$0xff] }
 0xb51   :  { %4495 = vmatpush.bf16.msra.mxu3 %v17388_v20 }
 0xb53   :  { %4468 = vmatpush.bf16.msra.mxu1 %v17371_v47  ;;  %v17423_v47 = vld [vmem:[#allocation21 + $0x2b0] sm:$0xff] }
 0xb54   :  { %4510 = vmatpush.bf16.msra.mxu0 %v17395_v48  ;;  %4482 = vmatpush.bf16.msra.mxu2 %v17379_v55 }
 0xb55   :  { %4496 = vmatpush.bf16.msra.mxu3 %v17387_v61  ;;  %v17405_v61 = vld [vmem:[#allocation21 + $0x220] sm:$0xff] }
 0xb57   :  { %4469 = vmatpush.bf16.msra.mxu1 %v17370_v46  ;;  %v2440_v46 = vperm.slane %v19611_v4, 5 }
 0xb58   :  { %4511 = vmatpush.bf16.msra.mxu0 %v17394_v33  ;;  %4483 = vmatpush.bf16.msra.mxu2 %v17378_v59 }
 0xb59   :  { %4497 = vmatpush.bf16.msra.mxu3 %v17386_v49  ;;  %v17429_v49 = vld [vmem:[#allocation21 + $0x2e0] sm:$0xff] }
 0xb5a   :  { %v3116_v5 = vpop.f32.mrf.mxu1 }
 0xb5b   :  { %4470 = vmatpush.bf16.msra.mxu1 %v17369_v60  ;;  %v3158_v9 = vpop.f32.mrf.mxu0  ;;  %v3117_v11 = vadd.f32 %v3116_v5, %v2435_v39  ;;  %v2441_v60 = vperm.slane %v19611_v4, 6  ;;  %v17413_v4 = vld [vmem:[#allocation21 + $0x260] sm:$0xff] }
 0xb5c   :  { %4512 = vmatpush.bf16.msra.mxu0 %v17393_v63  ;;  %4484 = vmatpush.bf16.msra.mxu2 %v17377_v45  ;;  %v3159_v14 = vadd.f32 %v3158_v9, %v2438_v10  ;;  %v17414_v45 = vld [vmem:[#allocation21 + $0x268] sm:$0xff] }
 0xb5d   :  { %4498 = vmatpush.bf16.msra.mxu3 %v17385_v3  ;;  %v3331_v12 = vmax.f32 %v3117_v11, 0.0  ;;  %v17422_v9 = vld [vmem:[#allocation21 + $0x2a8] sm:$0xff] }
 0xb5e   :  { %v3334_v19 = vmax.f32 %v3159_v14, 0.0  ;;  %v17428_v14 = vld [vmem:[#allocation21 + $0x2d8] sm:$0xff] }
 0xb60   :  { %v3130_v2 = vpop.f32.mrf.mxu2 }
 0xb61   :  { %v3144_v13 = vpop.f32.mrf.mxu3  ;;  %v3131_v24 = vadd.f32 %v3130_v2, %v2436_v62  ;;  %v17404_v2 = vld [vmem:[#allocation21 + $0x218] sm:$0xff] }
 0xb62   :  { %v3118_v40 = vpop.f32.mrf.mxu1  ;;  %v3145_v26 = vadd.f32 %v3144_v13, %v2437_v16 }
 0xb63   :  { %v3119_v15 = vadd.f32 %v3118_v40, %v2435_v39  ;;  %v3160_v58 = vpop.f32.mrf.mxu0  ;;  %v3332_v32 = vmax.f32 %v3131_v24, 0.0 }
 0xb64   :  { %v3161_v17 = vadd.f32 %v3160_v58, %v2438_v10  ;;  %v3333_v36 = vmax.f32 %v3145_v26, 0.0 }
 0xb65   :  { %v3347_v18 = vmax.f32 %v3119_v15, 0.0 }
 0xb66   :  { %v3350_v56 = vmax.f32 %v3161_v17, 0.0  ;;  %v17421_v17 = vld [vmem:[#allocation21 + $0x2a0] sm:$0xff] }
 0xb67   :  { %v3620_v25 = vpack.c.bf16 %v3347_v18, %v3331_v12  ;;  %v17403_v18 = vld [vmem:[#allocation21 + $0x210] sm:$0xff] }
 0xb68   :  { %v3623_v27 = vpack.c.bf16 %v3350_v56, %v3334_v19  ;;  %v3132_v53 = vpop.f32.mrf.mxu2 }
 0xb69   :  { %v3133_v28 = vadd.f32 %v3132_v53, %v2436_v62  ;;  %v3146_v8 = vpop.f32.mrf.mxu3  ;;  %4415 = vmatmul.bf16.vlgmr.msrb.gmra.mxu1 %v3620_v25 }
 0xb6a   :  { %v3147_v29 = vadd.f32 %v3146_v8, %v2437_v16  ;;  %4457 = vmatmul.bf16.vlgmr.msrb.gmra.mxu0 %v3623_v27  ;;  %4519 = vmatpush.bf16.msrb.mxu1 %v17408_v23  ;;  %v3172_v30 = vpop.f32.mrf.mxu1  ;;  %v17427_v23 = vld [vmem:[#allocation21 + $0x2d0] sm:$0xff]  ;;  %v17412_v27 = vld [vmem:[#allocation21 + $0x258] sm:$0xff] }
 0xb6b   :  { %v3348_v35 = vmax.f32 %v3133_v28, 0.0  ;;  %4561 = vmatpush.bf16.msrb.mxu0 %v17432_v0  ;;  %v3214_v6 = vpop.f32.mrf.mxu0  ;;  %v3173_v50 = vadd.f32 %v3172_v30, %v2439_v43  ;;  %v19621_v0 = vld [vmem:[#allocation20 + $0x8] sm:$0xff]  ;;  %v17402_v30 = vld [vmem:[#allocation21 + $0x208] sm:$0xff] }
 0xb6c   :  { %v3349_v37 = vmax.f32 %v3147_v29, 0.0  ;;  %v3215_v48 = vadd.f32 %v3214_v6, %v2442_v52  ;;  %v17420_v8 = vld [vmem:[#allocation21 + $0x298] sm:$0xff]  ;;  %v17411_v6 = vld [vmem:[#allocation21 + $0x250] sm:$0xff] }
 0xb6d   :  { %v3621_v42 = vpack.c.bf16 %v3348_v35, %v3332_v32  ;;  %v3335_v3 = vmax.f32 %v3173_v50, 0.0  ;;  %v17426_v32 = vld [vmem:[#allocation21 + $0x2c8] sm:$0xff]  ;;  %v2446_v35 = vperm.slane %v19621_v0, 3 }
 0xb6e   :  { %v3622_v44 = vpack.c.bf16 %v3349_v37, %v3333_v36  ;;  %4520 = vmatpush.bf16.msrb.mxu1 %v17407_v31  ;;  %v3338_v39 = vmax.f32 %v3215_v48, 0.0  ;;  %v2443_v31 = vperm.slane %v19621_v0, 0  ;;  %v17401_v37 = vld [vmem:[#allocation21 + $0x200] sm:$0xff] }
 0xb6f   :  { %4562 = vmatpush.bf16.msrb.mxu0 %v17431_v34  ;;  %4429 = vmatmul.bf16.vlgmr.msrb.gmra.mxu2 %v3621_v42  ;;  %v17419_v34 = vld [vmem:[#allocation21 + $0x290] sm:$0xff] }
 0xb70   :  { %4443 = vmatmul.bf16.vlgmr.msrb.gmra.mxu3 %v3622_v44  ;;  %4533 = vmatpush.bf16.msrb.mxu2 %v17416_v38  ;;  %v3186_v21 = vpop.f32.mrf.mxu2 }
 0xb71   :  { %4547 = vmatpush.bf16.msrb.mxu3 %v17424_v57  ;;  %v3200_v20 = vpop.f32.mrf.mxu3  ;;  %v3187_v11 = vadd.f32 %v3186_v21, %v2440_v46  ;;  %v17440_v57 = vld [vmem:[#allocation21 + $0x338] sm:$0xff]  ;;  %v2444_v21 = vperm.slane %v19621_v0, 1 }
 0xb72   :  { %4521 = vmatpush.bf16.msrb.mxu1 %v17406_v22  ;;  %v3174_v55 = vpop.f32.mrf.mxu1  ;;  %v3201_v40 = vadd.f32 %v3200_v20, %v2441_v60  ;;  %v17464_v22 = vld [vmem:[#allocation21 + $0x3f8] sm:$0xff]  ;;  %v17418_v20 = vld [vmem:[#allocation21 + $0x288] sm:$0xff] }
 0xb73   :  { %4563 = vmatpush.bf16.msrb.mxu0 %v17430_v7  ;;  %v3175_v33 = vadd.f32 %v3174_v55, %v2439_v43  ;;  %v3216_v59 = vpop.f32.mrf.mxu0  ;;  %v3336_v19 = vmax.f32 %v3187_v11, 0.0  ;;  %v17425_v43 = vld [vmem:[#allocation21 + $0x2c0] sm:$0xff]  ;;  %v17410_v7 = vld [vmem:[#allocation21 + $0x248] sm:$0xff] }
 0xb74   :  { %v3217_v63 = vadd.f32 %v3216_v59, %v2442_v52  ;;  %4534 = vmatpush.bf16.msrb.mxu2 %v17415_v41  ;;  %v3337_v24 = vmax.f32 %v3201_v40, 0.0  ;;  %v17439_v59 = vld [vmem:[#allocation21 + $0x330] sm:$0xff]  ;;  %v17438_v40 = vld [vmem:[#allocation21 + $0x328] sm:$0xff] }
 0xb75   :  { %v3351_v5 = vmax.f32 %v3175_v33, 0.0  ;;  %4548 = vmatpush.bf16.msrb.mxu3 %v17423_v47  ;;  %v2445_v47 = vperm.slane %v19621_v0, 2 }
 0xb76   :  { %v3354_v10 = vmax.f32 %v3217_v63, 0.0  ;;  %4522 = vmatpush.bf16.msrb.mxu1 %v17405_v61  ;;  %v17463_v63 = vld [vmem:[#allocation21 + $0x3f0] sm:$0xff] }
 0xb77   :  { %v3624_v13 = vpack.c.bf16 %v3351_v5, %v3335_v3  ;;  %4564 = vmatpush.bf16.msrb.mxu0 %v17429_v49 }
 0xb78   :  { %v3627_v62 = vpack.c.bf16 %v3354_v10, %v3338_v39  ;;  %4535 = vmatpush.bf16.msrb.mxu2 %v17414_v45  ;;  %v3188_v15 = vpop.f32.mrf.mxu2  ;;  %v17409_v45 = vld [vmem:[#allocation21 + $0x240] sm:$0xff]  ;;  %v17448_v10 = vld [vmem:[#allocation21 + $0x378] sm:$0xff] }
 0xb79   :  { %4549 = vmatpush.bf16.msrb.mxu3 %v17422_v9  ;;  %v3189_v58 = vadd.f32 %v3188_v15, %v2440_v46  ;;  %v3202_v16 = vpop.f32.mrf.mxu3  ;;  %4471 = vmatmul.bf16.vlgmr.msra.gmra.mxu1 %v3624_v13  ;;  %v17417_v39 = vld [vmem:[#allocation21 + $0x280] sm:$0xff]  ;;  %v17456_v13 = vld [vmem:[#allocation21 + $0x3b8] sm:$0xff] }
 0xb7a   :  { %v3203_v12 = vadd.f32 %v3202_v16, %v2441_v60  ;;  %4513 = vmatmul.bf16.vlgmr.msra.gmra.mxu0 %v3627_v62  ;;  %4523 = vmatpush.bf16.msrb.mxu1 %v17404_v2 }
 0xb7b   :  { %v3352_v56 = vmax.f32 %v3189_v58, 0.0  ;;  %4565 = vmatpush.bf16.msrb.mxu0 %v17428_v14  ;;  %v3228_v26 = vpop.f32.mrf.mxu1 }
 0xb7c   :  { %v3353_v25 = vmax.f32 %v3203_v12, 0.0  ;;  %4536 = vmatpush.bf16.msrb.mxu2 %v17413_v4  ;;  %v3229_v38 = vadd.f32 %v3228_v26, %v2443_v31  ;;  %v17462_v4 = vld [vmem:[#allocation21 + $0x3e8] sm:$0xff]  ;;  %v17436_v26 = vld [vmem:[#allocation21 + $0x318] sm:$0xff] }
 0xb7d   :  { %v3625_v53 = vpack.c.bf16 %v3352_v56, %v3336_v19  ;;  %4550 = vmatpush.bf16.msrb.mxu3 %v17421_v17  ;;  %v17447_v17 = vld [vmem:[#allocation21 + $0x370] sm:$0xff]  ;;  %v17437_v56 = vld [vmem:[#allocation21 + $0x320] sm:$0xff] }
 0xb7e   :  { %v3270_v28 = vpop.f32.mrf.mxu0  ;;  %v3626_v29 = vpack.c.bf16 %v3353_v25, %v3337_v24  ;;  %4524 = vmatpush.bf16.msrb.mxu1 %v17403_v18  ;;  %v3339_v55 = vmax.f32 %v3229_v38, 0.0  ;;  %v17455_v18 = vld [vmem:[#allocation21 + $0x3b0] sm:$0xff]  ;;  %v17446_v24 = vld [vmem:[#allocation21 + $0x368] sm:$0xff] }
 0xb7f   :  { %4566 = vmatpush.bf16.msrb.mxu0 %v17427_v23  ;;  %4485 = vmatmul.bf16.vlgmr.msra.gmra.mxu2 %v3625_v53  ;;  %v3271_v44 = vadd.f32 %v3270_v28, %v2446_v35  ;;  %v17461_v23 = vld [vmem:[#allocation21 + $0x3e0] sm:$0xff]  ;;  %v17454_v25 = vld [vmem:[#allocation21 + $0x3a8] sm:$0xff]  ;;  %v17443_v38 = vld [vmem:[#allocation21 + $0x350] sm:$0xff] }
 0xb80   :  { %4499 = vmatmul.bf16.vlgmr.msra.gmra.mxu3 %v3626_v29  ;;  %4537 = vmatpush.bf16.msrb.mxu2 %v17412_v27  ;;  %v17460_v27 = vld [vmem:[#allocation21 + $0x3d8] sm:$0xff]  ;;  %v17445_v53 = vld [vmem:[#allocation21 + $0x360] sm:$0xff] }
 0xb81   :  { %4551 = vmatpush.bf16.msrb.mxu3 %v17420_v8  ;;  %v3242_v36 = vpop.f32.mrf.mxu2  ;;  %v3342_v46 = vmax.f32 %v3271_v44, 0.0  ;;  %v17453_v28 = vld [vmem:[#allocation21 + $0x3a0] sm:$0xff]  ;;  %v17435_v8 = vld [vmem:[#allocation21 + $0x310] sm:$0xff] }
 0xb82   :  { %4525 = vmatpush.bf16.msrb.mxu1 %v17402_v30  ;;  %v3243_v49 = vadd.f32 %v3242_v36, %v2444_v21  ;;  %v17459_v30 = vld [vmem:[#allocation21 + $0x3d0] sm:$0xff]  ;;  %v2450_v36 = vperm.slane %v19621_v0, 7 }
 0xb83   :  { %4567 = vmatpush.bf16.msrb.mxu0 %v17426_v32  ;;  %v3230_v52 = vpop.f32.mrf.mxu1  ;;  %v17444_v32 = vld [vmem:[#allocation21 + $0x358] sm:$0xff] }
 0xb84   :  { %v3256_v42 = vpop.f32.mrf.mxu3  ;;  %4538 = vmatpush.bf16.msrb.mxu2 %v17411_v6  ;;  %v3231_v41 = vadd.f32 %v3230_v52, %v2443_v31  ;;  %v3340_v62 = vmax.f32 %v3243_v49, 0.0  ;;  %v2447_v6 = vperm.slane %v19621_v0, 4  ;;  %v17433_v52 = vld [vmem:[#allocation21 + $0x300] sm:$0xff] }
 0xb85   :  { %4552 = vmatpush.bf16.msrb.mxu3 %v17419_v34  ;;  %v3257_v3 = vadd.f32 %v3256_v42, %v2445_v47  ;;  %v17434_v34 = vld [vmem:[#allocation21 + $0x308] sm:$0xff] }
 0xb86   :  { %v3272_v50 = vpop.f32.mrf.mxu0  ;;  %4526 = vmatpush.bf16.msrb.mxu1 %v17401_v37  ;;  %v3355_v61 = vmax.f32 %v3231_v41, 0.0  ;;  %v17458_v37 = vld [vmem:[#allocation21 + $0x3c8] sm:$0xff]  ;;  %v2448_v41 = vperm.slane %v19621_v0, 5 }
 0xb87   :  { %v3273_v48 = vadd.f32 %v3272_v50, %v2446_v35  ;;  %4568 = vmatpush.bf16.msrb.mxu0 %v17425_v43  ;;  %v3341_v58 = vmax.f32 %v3257_v3, 0.0  ;;  %v17452_v35 = vld [vmem:[#allocation21 + $0x398] sm:$0xff]  ;;  %v17451_v43 = vld [vmem:[#allocation21 + $0x390] sm:$0xff] }
 0xb88   :  { %4539 = vmatpush.bf16.msrb.mxu2 %v17410_v7  ;;  %v3628_v60 = vpack.c.bf16 %v3355_v61, %v3339_v55  ;;  %v17450_v61 = vld [vmem:[#allocation21 + $0x388] sm:$0xff] }
 0xb89   :  { %v3358_v33 = vmax.f32 %v3273_v48, 0.0  ;;  %4553 = vmatpush.bf16.msrb.mxu3 %v17418_v20  ;;  %v3244_v9 = vpop.f32.mrf.mxu2  ;;  %v2449_v48 = vperm.slane %v19621_v0, 6 }
 0xb8a   :  { %4575 = vmatpush.bf16.msra.mxu1 %v17440_v57  ;;  %v3245_v2 = vadd.f32 %v3244_v9, %v2444_v21  ;;  %v17457_v21 = vld [vmem:[#allocation21 + $0x3c0] sm:$0xff] }
 0xb8b   :  { %4617 = vmatpush.bf16.msra.mxu0 %v17464_v22  ;;  %v3631_v5 = vpack.c.bf16 %v3358_v33, %v3342_v46  ;;  %4527 = vmatmul.bf16.vlgmr.msrb.gmra.mxu1 %v3628_v60 }
 0xb8c   :  { %v3258_v11 = vpop.f32.mrf.mxu3  ;;  %v3356_v15 = vmax.f32 %v3245_v2, 0.0  ;;  %4540 = vmatpush.bf16.msrb.mxu2 %v17409_v45  ;;  %v17441_v45 = vld [vmem:[#allocation21 + $0x340] sm:$0xff] }
 0xb8d   :  { %v3259_v14 = vadd.f32 %v3258_v11, %v2445_v47  ;;  %4569 = vmatmul.bf16.vlgmr.msrb.gmra.mxu0 %v3631_v5  ;;  %4554 = vmatpush.bf16.msrb.mxu3 %v17417_v39  ;;  %v17442_v47 = vld [vmem:[#allocation21 + $0x348] sm:$0xff]  ;;  %v17449_v39 = vld [vmem:[#allocation21 + $0x380] sm:$0xff] }
 0xb8e   :  { %4576 = vmatpush.bf16.msra.mxu1 %v17439_v59  ;;  %v3629_v12 = vpack.c.bf16 %v3356_v15, %v3340_v62 }
 0xb8f   :  { %4618 = vmatpush.bf16.msra.mxu0 %v17463_v63  ;;  %v3357_v16 = vmax.f32 %v3259_v14, 0.0 }
 0xb90   :  { %4589 = vmatpush.bf16.msra.mxu2 %v17448_v10 }
 0xb91   :  { %4603 = vmatpush.bf16.msra.mxu3 %v17456_v13  ;;  %v3630_v19 = vpack.c.bf16 %v3357_v16, %v3341_v58  ;;  %4541 = vmatmul.bf16.vlgmr.msrb.gmra.mxu2 %v3629_v12 }
 0xb92   :  { %4577 = vmatpush.bf16.msra.mxu1 %v17438_v40 }
 0xb93   :  { %4619 = vmatpush.bf16.msra.mxu0 %v17462_v4  ;;  %4555 = vmatmul.bf16.vlgmr.msrb.gmra.mxu3 %v3630_v19 }
 0xb94   :  { %4590 = vmatpush.bf16.msra.mxu2 %v17447_v17 }
 0xb95   :  { %4604 = vmatpush.bf16.msra.mxu3 %v17455_v18 }
 0xb96   :  { %4578 = vmatpush.bf16.msra.mxu1 %v17437_v56 }
 0xb97   :  { %4620 = vmatpush.bf16.msra.mxu0 %v17461_v23  ;;  %v18341_v23 = vld [vmem:[#allocation23] ss:$0 sm:$0xff] }
 0xb98   :  { %4591 = vmatpush.bf16.msra.mxu2 %v17446_v24 }
 0xb99   :  { %4605 = vmatpush.bf16.msra.mxu3 %v17454_v25 }
 0xb9a   :  { %4579 = vmatpush.bf16.msra.mxu1 %v17436_v26 }
 0xb9b   :  { %v3284_v29 = vpop.f32.mrf.mxu1  ;;  %4621 = vmatpush.bf16.msra.mxu0 %v17460_v27 }
 0xb9c   :  { %4592 = vmatpush.bf16.msra.mxu2 %v17445_v53  ;;  %v3285_v57 = vadd.f32 %v3284_v29, %v2447_v6 }
 0xb9d   :  { %4606 = vmatpush.bf16.msra.mxu3 %v17453_v28 }
 0xb9e   :  { %v3326_v31 = vpop.f32.mrf.mxu0  ;;  %4580 = vmatpush.bf16.msra.mxu1 %v17435_v8  ;;  %v3343_v46 = vmax.f32 %v3285_v57, 0.0 }
 0xb9f   :  { %4622 = vmatpush.bf16.msra.mxu0 %v17459_v30  ;;  %v3327_v22 = vadd.f32 %v3326_v31, %v2450_v36 }
 0xba0   :  { %4593 = vmatpush.bf16.msra.mxu2 %v17444_v32 }
 0xba1   :  { %v3298_v42 = vpop.f32.mrf.mxu2  ;;  %4607 = vmatpush.bf16.msra.mxu3 %v17452_v35  ;;  %v3346_v59 = vmax.f32 %v3327_v22, 0.0 }
 0xba2   :  { %v3312_v44 = vpop.f32.mrf.mxu3  ;;  %4581 = vmatpush.bf16.msra.mxu1 %v17434_v34  ;;  %v3299_v60 = vadd.f32 %v3298_v42, %v2448_v41 }
 0xba3   :  { %v3286_v7 = vpop.f32.mrf.mxu1  ;;  %4623 = vmatpush.bf16.msra.mxu0 %v17458_v37  ;;  %v3313_v3 = vadd.f32 %v3312_v44, %v2449_v48 }
 0xba4   :  { %v3287_v50 = vadd.f32 %v3286_v7, %v2447_v6  ;;  %4594 = vmatpush.bf16.msra.mxu2 %v17443_v38  ;;  %v3344_v11 = vmax.f32 %v3299_v60, 0.0 }
 0xba5   :  { %4608 = vmatpush.bf16.msra.mxu3 %v17451_v43  ;;  %v3345_v14 = vmax.f32 %v3313_v3, 0.0 }
 0xba6   :  { %v3328_v20 = vpop.f32.mrf.mxu0  ;;  %v3359_v33 = vmax.f32 %v3287_v50, 0.0  ;;  %4582 = vmatpush.bf16.msra.mxu1 %v17433_v52 }
 0xba7   :  { %v3329_v55 = vadd.f32 %v3328_v20, %v2450_v36  ;;  %4624 = vmatpush.bf16.msra.mxu0 %v17457_v21 }
 0xba8   :  { %v3632_v63 = vpack.c.bf16 %v3359_v33, %v3343_v46  ;;  %4595 = vmatpush.bf16.msra.mxu2 %v17442_v47 }
 0xba9   :  { %v3362_v49 = vmax.f32 %v3329_v55, 0.0  ;;  %v3300_v9 = vpop.f32.mrf.mxu2  ;;  %4609 = vmatpush.bf16.msra.mxu3 %v17450_v61 }
 0xbaa   :  { %v3301_v10 = vadd.f32 %v3300_v9, %v2448_v41  ;;  %v3314_v0 = vpop.f32.mrf.mxu3  ;;  %4583 = vmatmul.bf16.vlgmr.msra.gmra.mxu1 %v3632_v63 }
 0xbab   :  { %v3635_v5 = vpack.c.bf16 %v3362_v49, %v3346_v59  ;;  %v3315_v2 = vadd.f32 %v3314_v0, %v2449_v48 }
 0xbac   :  { %v3360_v13 = vmax.f32 %v3301_v10, 0.0  ;;  %4596 = vmatpush.bf16.msra.mxu2 %v17441_v45 }
 0xbad   :  { %4625 = vmatmul.bf16.vlgmr.msra.gmra.mxu0 %v3635_v5  ;;  %v3361_v40 = vmax.f32 %v3315_v2, 0.0  ;;  %4610 = vmatpush.bf16.msra.mxu3 %v17449_v39 }
 0xbae   :  { %v3633_v62 = vpack.c.bf16 %v3360_v13, %v3344_v11 }
 0xbaf   :  { %v3634_v15 = vpack.c.bf16 %v3361_v40, %v3345_v14 }
 0xbb0   :  { %4597 = vmatmul.bf16.vlgmr.msra.gmra.mxu2 %v3633_v62 }
 0xbb1   :  { %4611 = vmatmul.bf16.vlgmr.msra.gmra.mxu3 %v3634_v15 }
 0xbe6   :  { %v4416_v4 = vpop.f32.mrf.mxu1 }
 0xbe7   :  { %v4458_v17 = vpop.f32.mrf.mxu0  ;;  %v4417_v25 = vadd.f32 %v18341_v23, %v4416_v4 }
 0xbee   :  { %v4418_v12 = vpop.f32.mrf.mxu1 }
 0xbef   :  { %v4460_v56 = vpop.f32.mrf.mxu0  ;;  %v4419_v30 = vadd.f32 %v18341_v23, %v4418_v12 }
 0xbf2   :  { %v4430_v58 = vpop.f32.mrf.mxu2 }
 0xbf3   :  { %v4444_v16 = vpop.f32.mrf.mxu3  ;;  %v4431_v26 = vadd.f32 %v4430_v58, %v4417_v25 }
 0xbf5   :  { %v4445_v8 = vadd.f32 %v4444_v16, %v4431_v26 }
 0xbf6   :  { %v4472_v24 = vpop.f32.mrf.mxu1 }
 0xbf7   :  { %v4514_v28 = vpop.f32.mrf.mxu0  ;;  %v4459_v31 = vadd.f32 %v4458_v17, %v4445_v8 }
 0xbf9   :  { %v4473_v6 = vadd.f32 %v4472_v24, %v4459_v31  ;;  %v17488_v31 = vld [vmem:[#allocation9 + $0x178] sm:$0xf0] }
 0xbfa   :  { %v4432_v18 = vpop.f32.mrf.mxu2 }
 0xbfb   :  { %v4446_v19 = vpop.f32.mrf.mxu3  ;;  %v4433_v32 = vadd.f32 %v4432_v18, %v4419_v30  ;;  %v14567_v30 = vld [vmem:[#allocation9 + $0x170] sm:$0xf] }
 0xbfd   :  { %v4447_v34 = vadd.f32 %v4446_v19, %v4433_v32 }
 0xbfe   :  { %v4474_v29 = vpop.f32.mrf.mxu1 }
 0xbff   :  { %v4516_v37 = vpop.f32.mrf.mxu0  ;;  %v4461_v43 = vadd.f32 %v4460_v56, %v4447_v34  ;;  %v17484_v34 = vld [vmem:[#allocation9 + $0x158] sm:$0xf0] }
 0xc01   :  { %v4475_v44 = vadd.f32 %v4474_v29, %v4461_v43  ;;  %v14561_v29 = vld [vmem:[#allocation9 + $0x174] sm:$0xf0]  ;;  %v17485_v43 = vld [vmem:[#allocation9 + $0x160] sm:$0xf0] }
 0xc02   :  { %v4486_v27 = vpop.f32.mrf.mxu2 }
 0xc03   :  { %v4500_v53 = vpop.f32.mrf.mxu3  ;;  %v4487_v38 = vadd.f32 %v4486_v27, %v4473_v6  ;;  %v14547_v6 = vld [vmem:[#allocation9 + $0x150] sm:$0xf] }
 0xc05   :  { %v4501_v57 = vadd.f32 %v4500_v53, %v4487_v38  ;;  %v17487_v53 = vld [vmem:[#allocation9 + $0x170] sm:$0xf0]  ;;  %v14549_v38 = vld [vmem:[#allocation9 + $0x15c] sm:$0xf0] }
 0xc07   :  { %v4515_v22 = vadd.f32 %v4514_v28, %v4501_v57  ;;  %v17486_v28 = vld [vmem:[#allocation9 + $0x16c] sm:$0xf] }
 0xc08   :  { %v4528_v42 = vpop.f32.mrf.mxu1  ;;  %v14564_v32 = vor.u32 %v17486_v28, %v14561_v29  ;;  %v14475_v29 = vld [vmem:[#allocation9 + $0xc0] sm:$0xf] }
 0xc09   :  { %v4529_v20 = vadd.f32 %v4528_v42, %v4515_v22  ;;  %v14555_v42 = vld [vmem:[#allocation9 + $0x158] sm:$0xf]  ;;  %v17481_v22 = vld [vmem:[#allocation9 + $0x140] sm:$0xf0] }
 0xc0a   :  { %v4488_v35 = vpop.f32.mrf.mxu2  ;;  %v4570_v41 = vpop.f32.mrf.mxu0  ;;  %4870 = vmatpush.bf16.msrb.mxu2 %v14564_v32 }
 0xc0b   :  { %v4502_v36 = vpop.f32.mrf.mxu3  ;;  %v4489_v7 = vadd.f32 %v4488_v35, %v4475_v44  ;;  %v14568_v35 = vor.u32 %v17488_v31, %v14567_v30  ;;  %v14556_v44 = vor.u32 %v17485_v43, %v14555_v42  ;;  %v17466_v30 = vld [vmem:[#allocation9 + $0xc8] sm:$0xf0]  ;;  %v17465_v31 = vld [vmem:[#allocation9 + $0xc4] sm:$0xf] }
 0xc0c   :  { %v14476_v32 = vor.u32 %v17466_v30, %v14475_v29 }
 0xc0d   :  { %v4503_v47 = vadd.f32 %v4502_v36, %v4489_v7  ;;  %4884 = vmatpush.bf16.msrb.mxu3 %v14568_v35  ;;  %v17483_v36 = vld [vmem:[#allocation9 + $0x154] sm:$0xf]  ;;  %v17480_v7 = vld [vmem:[#allocation9 + $0x13c] sm:$0xf]  ;;  %v14477_v35 = vld [vmem:[#allocation9 + $0xcc] sm:$0xf0] }
 0xc0e   :  { %v14552_v57 = vor.u32 %v17483_v36, %v14549_v38 }
 0xc0f   :  { %v4517_v55 = vadd.f32 %v4516_v37, %v4503_v47  ;;  %v14548_v37 = vor.u32 %v17484_v34, %v14547_v6  ;;  %v14483_v6 = vld [vmem:[#allocation9 + $0xc8] sm:$0xf]  ;;  %v17467_v34 = vld [vmem:[#allocation9 + $0xd0] sm:$0xf0] }
 0xc10   :  { %v4530_v50 = vpop.f32.mrf.mxu1  ;;  %4871 = vmatpush.bf16.msrb.mxu2 %v14552_v57  ;;  %v14484_v38 = vor.u32 %v17467_v34, %v14483_v6 }
 0xc11   :  { %v4531_v60 = vadd.f32 %v4530_v50, %v4517_v55  ;;  %4885 = vmatpush.bf16.msrb.mxu3 %v14556_v44  ;;  %v14543_v50 = vld [vmem:[#allocation9 + $0x140] sm:$0xf] }
 0xc12   :  { %v4572_v59 = vpop.f32.mrf.mxu0  ;;  %v14523_v55 = vld [vmem:[#allocation9 + $0x120] sm:$0xf] }
 0xc14   :  { %v4542_v52 = vpop.f32.mrf.mxu2 }
 0xc15   :  { %v4543_v48 = vadd.f32 %v4542_v52, %v4529_v20  ;;  %v14535_v52 = vld [vmem:[#allocation9 + $0x138] sm:$0xf]  ;;  %v17482_v20 = vld [vmem:[#allocation9 + $0x148] sm:$0xf0] }
 0xc16   :  { %v4556_v21 = vpop.f32.mrf.mxu3 }
 0xc17   :  { %v4557_v46 = vadd.f32 %v4556_v21, %v4543_v48  ;;  %v14536_v21 = vor.u32 %v17481_v22, %v14535_v52  ;;  %v14544_v48 = vor.u32 %v17482_v20, %v14543_v50 }
 0xc19   :  { %v4571_v45 = vadd.f32 %v4570_v41, %v4557_v46  ;;  %v14537_v41 = vld [vmem:[#allocation9 + $0x144] sm:$0xf0]  ;;  %4886 = vmatpush.bf16.msrb.mxu3 %v14544_v48  ;;  %v17477_v46 = vld [vmem:[#allocation9 + $0x124] sm:$0xf] }
 0xc1a   :  { %v14540_v47 = vor.u32 %v17480_v7, %v14537_v41 }
 0xc1c   :  { %v4544_v61 = vpop.f32.mrf.mxu2  ;;  %4872 = vmatpush.bf16.msrb.mxu2 %v14540_v47 }
 0xc1d   :  { %v4545_v63 = vadd.f32 %v4544_v61, %v4531_v60  ;;  %v17478_v61 = vld [vmem:[#allocation9 + $0x128] sm:$0xf0]  ;;  %v17479_v60 = vld [vmem:[#allocation9 + $0x130] sm:$0xf0] }
 0xc1e   :  { %v4558_v33 = vpop.f32.mrf.mxu3 }
 0xc1f   :  { %v4559_v9 = vadd.f32 %v4558_v33, %v4545_v63  ;;  %v14524_v33 = vor.u32 %v17478_v61, %v14523_v55 }
 0xc21   :  { %v4573_v13 = vadd.f32 %v4572_v59, %v4559_v9  ;;  %v14525_v59 = vld [vmem:[#allocation9 + $0x12c] sm:$0xf0]  ;;  %v17474_v9 = vld [vmem:[#allocation9 + $0x10c] sm:$0xf] }
 0xc22   :  { %v14528_v63 = vor.u32 %v17477_v46, %v14525_v59  ;;  %v18342_v46 = vld [vmem:[#allocation24] ss:$0 sm:$0xff] }
 0xc24   :  { %4873 = vmatpush.bf16.msrb.mxu2 %v14528_v63 }
 0xc27   :  { %v4584_v49 = vpop.f32.mrf.mxu1 }
 0xc28   :  { %v4585_v3 = vadd.f32 %v4584_v49, %v4571_v45  ;;  %v14531_v49 = vld [vmem:[#allocation9 + $0x128] sm:$0xf] }
 0xc29   :  { %v14532_v45 = vor.u32 %v17479_v60, %v14531_v49 }
 0xc2a   :  { %v4626_v0 = vpop.f32.mrf.mxu0 }
 0xc2b   :  { %4887 = vmatpush.bf16.msrb.mxu3 %v14532_v45  ;;  %v18343_v45 = vld [vmem:[#allocation26] ss:$0 sm:$0xff] }
 0xc2f   :  { %v4586_v11 = vpop.f32.mrf.mxu1 }
 0xc30   :  { %v4587_v40 = vadd.f32 %v4586_v11, %v4573_v13 }
 0xc32   :  { %v4628_v17 = vpop.f32.mrf.mxu0 }
 0xc33   :  { %v4598_v5 = vpop.f32.mrf.mxu2 }
 0xc34   :  { %v4599_v39 = vadd.f32 %v4598_v5, %v4585_v3  ;;  %v4612_v10 = vpop.f32.mrf.mxu3  ;;  %v14511_v3 = vld [vmem:[#allocation9 + $0x108] sm:$0xf]  ;;  %v17475_v5 = vld [vmem:[#allocation9 + $0x110] sm:$0xf0] }
 0xc36   :  { %v4613_v2 = vadd.f32 %v4612_v10, %v4599_v39  ;;  %v14512_v39 = vor.u32 %v17475_v5, %v14511_v3  ;;  %v14513_v10 = vld [vmem:[#allocation9 + $0x114] sm:$0xf0] }
 0xc37   :  { %v14516_v11 = vor.u32 %v17474_v9, %v14513_v10 }
 0xc38   :  { %v4627_v14 = vadd.f32 %v4626_v0, %v4613_v2  ;;  %v14519_v0 = vld [vmem:[#allocation9 + $0x110] sm:$0xf]  ;;  %v17476_v2 = vld [vmem:[#allocation9 + $0x118] sm:$0xf0] }
 0xc39   :  { %v14520_v13 = vor.u32 %v17476_v2, %v14519_v0  ;;  %4874 = vmatpush.bf16.msrb.mxu2 %v14516_v11 }
 0xc3a   :  { %v4631_v62 = vadd.f32 %v4627_v14, %v19587_v51  ;;  %v14499_v14 = vld [vmem:[#allocation9 + $0xf0] sm:$0xf] }
 0xc3b   :  { %v4600_v15 = vpop.f32.mrf.mxu2  ;;  %4888 = vmatpush.bf16.msrb.mxu3 %v14520_v13 }
 0xc3c   :  { %v4601_v4 = vadd.f32 %v4600_v15, %v4587_v40  ;;  %4635 = vadd.xlane.f32.xlu2 %v4631_v62  ;;  %v4614_v58 = vpop.f32.mrf.mxu3  ;;  %v17472_v40 = vld [vmem:[#allocation9 + $0xf8] sm:$0xf0] }
 0xc3d   :  { %v14500_v15 = vor.u32 %v17472_v40, %v14499_v14 }
 0xc3e   :  { %v4615_v16 = vadd.f32 %v4614_v58, %v4601_v4  ;;  %v14501_v4 = vld [vmem:[#allocation9 + $0xfc] sm:$0xf0]  ;;  %v14507_v58 = vld [vmem:[#allocation9 + $0xf8] sm:$0xf] }
 0xc40   :  { %v4629_v12 = vadd.f32 %v4628_v17, %v4615_v16  ;;  %v17473_v16 = vld [vmem:[#allocation9 + $0x100] sm:$0xf0] }
 0xc42   :  { %v4632_v18 = vadd.f32 %v4629_v12, %v19589_v54  ;;  %v14559_v54 = vld [vmem:[#allocation9 + $0x168] sm:$0xf]  ;;  %v14508_v12 = vor.u32 %v17473_v16, %v14507_v58 }
 0xc43   :  { %v14560_v8 = vor.u32 %v17487_v53, %v14559_v54 }
 0xc44   :  { %4637 = vadd.xlane.f32.xlu0 %v4632_v18  ;;  %4889 = vmatpush.bf16.msrb.mxu3 %v14508_v12 }
 0xc45   :  { %4856 = vmatpush.bf16.msrb.mxu1 %v14560_v8 }
 0xc49   :  { %4857 = vmatpush.bf16.msrb.mxu1 %v14548_v37  ;;  %v14480_v37 = vor.u32 %v17465_v31, %v14477_v35 }
 0xc4d   :  { %4858 = vmatpush.bf16.msrb.mxu1 %v14536_v21 }
 0xc51   :  { %4859 = vmatpush.bf16.msrb.mxu1 %v14524_v33 }
 0xc55   :  { %4860 = vmatpush.bf16.msrb.mxu1 %v14512_v39 }
 0xc59   :  { %4861 = vmatpush.bf16.msrb.mxu1 %v14500_v15 }
 0xcaf   :  { %v4636_v19 = vpop.xlane.xlu2 %4635 }
 0xcb0   :  { %v4639_v56 = vmul.f32 %v4636_v19, %v19569_v1  ;;  %v17469_v19 = vld [vmem:[#allocation9 + $0xe0] sm:$0xf0] }
 0xcb2   :  { %v19634_v23 = vsub.f32 %v4631_v62, %v4639_v56  ;;  %v17471_v62 = vld [vmem:[#allocation9 + $0xf4] sm:$0xf]  ;;  %v17468_v56 = vld [vmem:[#allocation9 + $0xdc] sm:$0xf] }
 0xcb3   :  { %v14504_v17 = vor.u32 %v17471_v62, %v14501_v4 }
 0xcb4   :  { %v4643_v24 = vmul.f32 %v19634_v23, %v19634_v23 }
 0xcb5   :  { %4875 = vmatpush.bf16.msrb.mxu2 %v14504_v17 }
 0xcb6   :  { %4645 = vadd.xlane.f32.xlu1 %v4643_v24 }
 0xcb7   :  { %v4638_v51 = vpop.xlane.xlu0 %4637 }
 0xcb8   :  { %v4640_v25 = vmul.f32 %v4638_v51, %v19569_v1  ;;  %v14489_v51 = vld [vmem:[#allocation9 + $0xe4] sm:$0xf0] }
 0xcb9   :  { %v14492_v53 = vor.u32 %v17468_v56, %v14489_v51 }
 0xcba   :  { %v19639_v26 = vsub.f32 %v4632_v18, %v4640_v25  ;;  %v14487_v18 = vld [vmem:[#allocation9 + $0xd8] sm:$0xf]  ;;  %v14495_v25 = vld [vmem:[#allocation9 + $0xe0] sm:$0xf] }
 0xcbb   :  { %v14488_v24 = vor.u32 %v17469_v19, %v14487_v18  ;;  %4876 = vmatpush.bf16.msrb.mxu2 %v14492_v53 }
 0xcbc   :  { %v4644_v27 = vmul.f32 %v19639_v26, %v19639_v26 }
 0xcbd   :  { %4862 = vmatpush.bf16.msrb.mxu1 %v14488_v24 }
 0xcbe   :  { %4647 = vadd.xlane.f32.xlu2 %v4644_v27  ;;  %v17470_v27 = vld [vmem:[#allocation9 + $0xe8] sm:$0xf0] }
 0xcbf   :  { %v14496_v28 = vor.u32 %v17470_v27, %v14495_v25  ;;  %4877 = vmatpush.bf16.msrb.mxu2 %v14480_v37 }
 0xcc1   :  { %4890 = vmatpush.bf16.msrb.mxu3 %v14496_v28  ;;  %4863 = vmatpush.bf16.msrb.mxu1 %v14476_v32 }
 0xcc5   :  { %4891 = vmatpush.bf16.msrb.mxu3 %v14484_v38 }
 0xd29   :  { %v4646_v54 = vpop.xlane.xlu1 %4645 }
 0xd2a   :  { %v4649_v8 = vmul.f32 %v4646_v54, %v19569_v1 }
 0xd2c   :  { %v4651_v36 = vadd.f32 1e-05, %v4649_v8 }
 0xd2e   :  { %18427 = vrsqrt.f32 %v4651_v36  ;;  %vm4659_vm8 = vweird.f32 %v4651_v36 }
 0xd31   :  { %v4648_v42 = vpop.xlane.xlu2 %4647 }
 0xd32   :  { %v4650_v43 = vmul.f32 %v4648_v42, %v19569_v1 }
 0xd34   :  { %v18428_v57 = vpop.eup %18427  ;;  %v4652_v44 = vadd.f32 1e-05, %v4650_v43 }
 0xd35   :  { %v4654_v52 = vmul.f32 %v18428_v57, %v4651_v36  ;;  %vm4660_vm15 = vweird.f32 %v18428_v57 }
 0xd36   :  { %18429 = vrsqrt.f32 %v4652_v44  ;;  %vm4661_vm9 = vmor %vm4659_vm8, %vm4660_vm15  ;;  %vm4669_vm11 = vweird.f32 %v4652_v44 }
 0xd37   :  { %v4655_v22 = vmul.f32 %v18428_v57, %v4654_v52 }
 0xd39   :  { %v4656_v7 = vmul.f32 0.5, %v4655_v22 }
 0xd3b   :  { %v4657_v21 = vsub.f32 1.5, %v4656_v7 }
 0xd3c   :  { %v18430_v41 = vpop.eup %18429 }
 0xd3d   :  { %v4658_v50 = vmul.f32 %v18428_v57, %v4657_v21  ;;  %v4664_v20 = vmul.f32 %v18430_v41, %v4652_v44  ;;  %vm4670_vm10 = vweird.f32 %v18430_v41 }
 0xd3e   :  { %vm4671_vm12 = vmor %vm4669_vm11, %vm4670_vm10 }
 0xd3f   :  { %v4665_v47 = vmul.f32 %v18430_v41, %v4664_v20  ;;  %v4662_v48 = vsel %vm4661_vm9, %v18428_v57, %v4658_v50 }
 0xd40   :  { %v4673_v33 = vmul.f32 %v4662_v48, %v19634_v23  ;;  %v4719_v23 = vld [vmem:[#allocation11 + $0x3] sm:$0x7] }
 0xd41   :  { %v4666_v55 = vmul.f32 0.5, %v4665_v47  ;;  %v4722_v10 = vperm.slane %v4719_v23, 0  ;;  %v4723_v11 = vperm.slane %v4719_v23, 1 }
 0xd42   :  { %v4678_v60 = vmul.f32 %v18342_v46, %v4673_v33 }
 0xd43   :  { %v4667_v61 = vsub.f32 1.5, %v4666_v55 }
 0xd44   :  { %v19647_v5 = vadd.f32 %v18343_v45, %v4678_v60 }
 0xd45   :  { %v4668_v59 = vmul.f32 %v18430_v41, %v4667_v61 }
 0xd47   :  { %v4672_v49 = vsel %vm4671_vm12, %v18430_v41, %v4668_v59 }
 0xd48   :  { %v4674_v63 = vmul.f32 %v4672_v49, %v19639_v26  ;;  %v4724_v26 = vperm.slane %v4719_v23, 2 }
 0xd4a   :  { %v4679_v3 = vmul.f32 %v18342_v46, %v4674_v63 }
 0xd4c   :  { %v19649_v9 = vadd.f32 %v18343_v45, %v4679_v3 }
 0xd4e   :  { %v4720_v39 = vpack.c.bf16 %v19649_v9, %v19647_v5 }
 0xd50   :  { %4864 = vmatmul.bf16.vlgmr.msrb.gmra.mxu1 %v4720_v39  ;;  %4878 = vmatmul.bf16.vlgmr.msrb.gmra.mxu2 %v4720_v39 }
 0xd51   :  { %4892 = vmatmul.bf16.vlgmr.msrb.gmra.mxu3 %v4720_v39 }
 0xdcd   :  { %v4865_v0 = vpop.f32.mrf.mxu1 }
 0xdce   :  { %v4866_v2 = vadd.f32 %v4865_v0, %v4722_v10 }
 0xdd0   :  { %5020 = vrot.lane.b32.xlu2 %v4866_v2, %s19064_s19 }
 0xdd3   :  { %v4879_v13 = vpop.f32.mrf.mxu2 }
 0xdd4   :  { %v4880_v14 = vadd.f32 %v4879_v13, %v4723_v11  ;;  %v4893_v40 = vpop.f32.mrf.mxu3 }
 0xdd5   :  { %v4894_v62 = vadd.f32 %v4893_v40, %v4724_v26  ;;  %v4867_v15 = vpop.f32.mrf.mxu1 }
 0xdd6   :  { %5156 = vrot.lane.b32.xlu1 %v4880_v14, %s19065_s22  ;;  %5022 = vrot.lane.b32.xlu0 %v4880_v14, %s19064_s19  ;;  %v4868_v17 = vadd.f32 %v4867_v15, %v4722_v10 }
 0xdd7   :  { %4992 = vmatpush.msra.mxu2 %v4894_v62  ;;  %14569 = vmatpush.xpose.msk.msrb.mxu0 %vm1032_vm0, %v4880_v14 }
 0xdd8   :  { %5154 = vrot.lane.b32.xlu2 %v4866_v2, %s19065_s22 }
 0xdda   :  { %14570 = vmatmul.msk.f32.vlgmr.msrb.gmra.mxu0 %vm1032_vm0, %v4866_v2 }
 0xddb   :  { %v4881_v4 = vpop.f32.mrf.mxu2 }
 0xddc   :  { %v4882_v58 = vadd.f32 %v4881_v4, %v4723_v11  ;;  %v4895_v16 = vpop.f32.mrf.mxu3 }
 0xddd   :  { %v4896_v12 = vadd.f32 %v4895_v16, %v4724_v26 }
 0xdde   :  { %14571 = vmatpush.xpose.msk.msra.mxu1 %vm1032_vm0, %v4882_v58  ;;  %5288 = vrot.lane.b32.xlu0 %v4880_v14, %s19066_s4 }
 0xddf   :  { %5015 = vmatpush.msra.mxu3 %v4896_v12  ;;  %5182 = vrot.lane.b32.xlu1 %v4868_v17, %s19065_s22  ;;  %v19662_v18 = vpack.i.bf16 %v4896_v12, %v4894_v62 }
 0xde0   :  { %5420 = vrot.lane.b32.xlu2 %v4880_v14, %s19036_s29 }
 0xde1   :  { %14572 = vmatmul.msk.f32.vlgmr.msra.gmra.mxu1 %vm1032_vm0, %v4868_v17 }
 0xde6   :  { %5048 = vrot.lane.b32.xlu0 %v4868_v17, %s19064_s19 }
 0xde7   :  { %5050 = vrot.lane.b32.xlu1 %v4882_v58, %s19064_s19 }
 0xde8   :  { %5316 = vrot.lane.b32.xlu2 %v4882_v58, %s19066_s4 }
 0xdee   :  { %5184 = vrot.lane.b32.xlu0 %v4882_v58, %s19065_s22 }
 0xdef   :  { %5286 = vrot.lane.b32.xlu1 %v4866_v2, %s19066_s4 }
 0xdf0   :  { %5446 = vrot.lane.b32.xlu2 %v4868_v17, %s19036_s29 }
 0xdf6   :  { %5314 = vrot.lane.b32.xlu0 %v4868_v17, %s19066_s4 }
 0xdf7   :  { %5552 = vrot.lane.b32.xlu1 %v4880_v14, %s19055_s24 }
 0xdf8   :  { %5550 = vrot.lane.b32.xlu2 %v4866_v2, %s19055_s24 }
 0xdfe   :  { %5418 = vrot.lane.b32.xlu0 %v4866_v2, %s19036_s29 }
 0xdff   :  { %5448 = vrot.lane.b32.xlu1 %v4882_v58, %s19036_s29 }
 0xe00   :  { %5712 = vrot.lane.b32.xlu2 %v4882_v58, %s19051_s8 }
 0xe06   :  { %5580 = vrot.lane.b32.xlu0 %v4882_v58, %s19055_s24 }
 0xe07   :  { %5578 = vrot.lane.b32.xlu1 %v4868_v17, %s19055_s24 }
 0xe08   :  { %5816 = vrot.lane.b32.xlu2 %v4880_v14, %s19043_s6 }
 0xe0e   :  { %5684 = vrot.lane.b32.xlu0 %v4880_v14, %s19051_s8 }
 0xe0f   :  { %5682 = vrot.lane.b32.xlu1 %v4866_v2, %s19051_s8 }
 0xe10   :  { %5842 = vrot.lane.b32.xlu2 %v4868_v17, %s19043_s6 }
 0xe16   :  { %5710 = vrot.lane.b32.xlu0 %v4868_v17, %s19051_s8 }
 0xe17   :  { %5844 = vrot.lane.b32.xlu1 %v4882_v58, %s19043_s6 }
 0xe18   :  { %18201 = vrot.lane.b32.xlu2 %v19662_v18, %s19065_s22 }
 0xe1e   :  { %5814 = vrot.lane.b32.xlu0 %v4866_v2, %s19043_s6 }
 0xe1f   :  { %18206 = vrot.lane.b32.xlu1 %v19662_v18, %s19066_s4 }
 0xe26   :  { %18196 = vrot.lane.b32.xlu0 %v19662_v18, %s19064_s19 }
 0xe2a   :  { %v5021_v19 = vpop.permute.xlu2 %5020 }
 0xe32   :  { %v5155_v56 = vpop.permute.xlu2 %5154 }
 0xe3a   :  { %v5421_v25 = vpop.permute.xlu2 %5420 }
 0xe42   :  { %v5317_v29 = vpop.permute.xlu2 %5316 }
 0xe48   :  { %v5157_v24 = vpop.permute.xlu1 %5156  ;;  %v5023_v51 = vpop.permute.xlu0 %5022 }
 0xe49   :  { %14575 = vmatpush.xpose.msk.msra.mxu0 %vm1032_vm0, %v5023_v51 }
 0xe4a   :  { %v5447_v37 = vpop.permute.xlu2 %5446 }
 0xe4c   :  { %14576 = vmatmul.msk.f32.vlgmr.msra.gmra.mxu0 %vm1032_vm0, %v5021_v19 }
 0xe4d   :  { %14581 = vmatpush.xpose.msk.msrb.mxu0 %vm1032_vm0, %v5157_v24 }
 0xe50   :  { %v5289_v27 = vpop.permute.xlu0 %5288 }
 0xe51   :  { %v5183_v54 = vpop.permute.xlu1 %5182  ;;  %14587 = vmatpush.xpose.msk.msra.mxu0 %vm1032_vm0, %v5289_v27 }
 0xe52   :  { %v5551_v43 = vpop.permute.xlu2 %5550 }
 0xe54   :  { %14582 = vmatmul.msk.f32.vlgmr.msrb.gmra.mxu0 %vm1032_vm0, %v5155_v56 }
 0xe55   :  { %14593 = vmatpush.xpose.msk.msrb.mxu0 %vm1032_vm0, %v5421_v25 }
 0xe57   :  { %v4921_v53 = vpop.f32.mrf.mxu0 }
 0xe58   :  { %v4950_v28 = vmul.f32 0.25, %v4921_v53  ;;  %v5049_v8 = vpop.permute.xlu0 %5048 }
 0xe59   :  { %v5051_v30 = vpop.permute.xlu1 %5050 }
 0xe5a   :  { %14577 = vmatpush.xpose.msk.msrb.mxu1 %vm1032_vm0, %v5051_v30  ;;  %v4952_v31 = vsel %vm1087_vm1, %v4950_v28, -inf  ;;  %v5713_v52 = vpop.permute.xlu2 %5712 }
 0xe5b   :  { %4953 = vmax.xlane.f32.xlu1 %v4952_v31 }
 0xe5d   :  { %14578 = vmatmul.msk.f32.vlgmr.msrb.gmra.mxu1 %vm1032_vm0, %v5049_v8 }
 0xe5e   :  { %v4947_v32 = vpop.f32.mrf.mxu1 }
 0xe5f   :  { %v19702_v35 = vmul.f32 0.25, %v4947_v32 }
 0xe60   :  { %v5185_v6 = vpop.permute.xlu0 %5184 }
 0xe61   :  { %v5287_v34 = vpop.permute.xlu1 %5286  ;;  %14583 = vmatpush.xpose.msk.msra.mxu1 %vm1032_vm0, %v5185_v6  ;;  %v4955_v36 = vsel %vm1087_vm1, %v19702_v35, -inf }
 0xe62   :  { %14588 = vmatmul.msk.f32.vlgmr.msra.gmra.mxu0 %vm1032_vm0, %v5287_v34  ;;  %4956 = vmax.xlane.f32.xlu0 %v4955_v36  ;;  %v5817_v41 = vpop.permute.xlu2 %5816 }
 0xe65   :  { %14589 = vmatpush.xpose.msk.msrb.mxu1 %vm1032_vm0, %v5317_v29 }
 0xe66   :  { %14584 = vmatmul.msk.f32.vlgmr.msra.gmra.mxu1 %vm1032_vm0, %v5183_v54 }
 0xe68   :  { %v5315_v38 = vpop.permute.xlu0 %5314 }
 0xe69   :  { %v5553_v42 = vpop.permute.xlu1 %5552 }
 0xe6a   :  { %14599 = vmatpush.xpose.msk.msra.mxu0 %vm1032_vm0, %v5553_v42  ;;  %v5843_v48 = vpop.permute.xlu2 %5842 }
 0xe6e   :  { %14590 = vmatmul.msk.f32.vlgmr.msrb.gmra.mxu1 %vm1032_vm0, %v5315_v38 }
 0xe70   :  { %v5419_v57 = vpop.permute.xlu0 %5418 }
 0xe71   :  { %v5449_v44 = vpop.permute.xlu1 %5448  ;;  %14594 = vmatmul.msk.f32.vlgmr.msrb.gmra.mxu0 %vm1032_vm0, %v5419_v57 }
 0xe72   :  { %14595 = vmatpush.xpose.msk.msra.mxu1 %vm1032_vm0, %v5449_v44 }
 0xe76   :  { %14596 = vmatmul.msk.f32.vlgmr.msra.gmra.mxu1 %vm1032_vm0, %v5447_v37 }
 0xe78   :  { %v5581_v22 = vpop.permute.xlu0 %5580 }
 0xe79   :  { %v5579_v7 = vpop.permute.xlu1 %5578  ;;  %14600 = vmatmul.msk.f32.vlgmr.msra.gmra.mxu0 %vm1032_vm0, %v5551_v43  ;;  %14601 = vmatpush.xpose.msk.msrb.mxu1 %vm1032_vm0, %v5581_v22 }
 0xe7d   :  { %14607 = vmatpush.xpose.msk.msra.mxu1 %vm1032_vm0, %v5713_v52 }
 0xe7e   :  { %14602 = vmatmul.msk.f32.vlgmr.msrb.gmra.mxu1 %vm1032_vm0, %v5579_v7 }
 0xe80   :  { %v5685_v21 = vpop.permute.xlu0 %5684 }
 0xe81   :  { %v5683_v50 = vpop.permute.xlu1 %5682  ;;  %14605 = vmatpush.xpose.msk.msrb.mxu0 %vm1032_vm0, %v5685_v21 }
 0xe84   :  { %14606 = vmatmul.msk.f32.vlgmr.msrb.gmra.mxu0 %vm1032_vm0, %v5683_v50 }
 0xe85   :  { %14611 = vmatpush.xpose.msk.msra.mxu0 %vm1032_vm0, %v5817_v41 }
 0xe88   :  { %v5711_v20 = vpop.permute.xlu0 %5710 }
 0xe89   :  { %v5845_v47 = vpop.permute.xlu1 %5844  ;;  %14608 = vmatmul.msk.f32.vlgmr.msra.gmra.mxu1 %vm1032_vm0, %v5711_v20  ;;  %v18202_v20 = vpop.permute.xlu2 %18201 }
 0xe8a   :  { %14613 = vmatpush.xpose.msk.msrb.mxu1 %vm1032_vm0, %v5845_v47 }
 0xe90   :  { %v5815_v55 = vpop.permute.xlu0 %5814 }
 0xe91   :  { %14612 = vmatmul.msk.f32.vlgmr.msra.gmra.mxu0 %vm1032_vm0, %v5815_v55  ;;  %14614 = vmatmul.msk.f32.vlgmr.msrb.gmra.mxu1 %vm1032_vm0, %v5843_v48  ;;  %v19726_v59 = vpop.permute.xlu1 %18206 }
 0xe98   :  { %v18197_v61 = vpop.permute.xlu0 %18196 }
 0xe99   :  { %v18199_v46 = vunpack.i.h.bf16 %v18197_v61  ;;  %v18198_v33 = vunpack.i.l.bf16 %v18197_v61 }
 0xe9b   :  { %5122 = vmatpush.msrb.mxu2 %v18198_v33  ;;  %5149 = vmatpush.msrb.mxu3 %v18199_v46 }
 0xec9   :  { %v5045_v49 = vpop.f32.mrf.mxu0 }
 0xeca   :  { %v19728_v60 = vmul.f32 0.25, %v5045_v49 }
 0xecc   :  { %v5078_v63 = vsel %vm1087_vm1, %v19728_v60, -inf }
 0xecd   :  { %5079 = vmax.xlane.f32.xlu2 %v5078_v63 }
 0xece   :  { %v4954_v45 = vpop.xlane.xlu1 %4953 }
 0xecf   :  { %v4958_v3 = vsub.f32 %v4950_v28, %v4954_v45 }
 0xed1   :  { %v4960_v39 = vmul.f32 1.442695, %v4958_v3  ;;  %v5179_v23 = vpop.f32.mrf.mxu0 }
 0xed2   :  { %v19732_v10 = vmul.f32 0.25, %v5179_v23 }
 0xed3   :  { %18431 = vpow2.f32 %v4960_v39 }
 0xed4   :  { %v5212_v0 = vsel %vm1087_vm1, %v19732_v10, -inf }
 0xed5   :  { %5213 = vmax.xlane.f32.xlu0 %v5212_v0  ;;  %v4957_v11 = vpop.xlane.xlu0 %4956 }
 0xed6   :  { %v4959_v40 = vsub.f32 %v19702_v35, %v4957_v11 }
 0xed8   :  { %v4962_v4 = vmul.f32 1.442695, %v4959_v40 }
 0xed9   :  { %v19736_v2 = vpop.eup %18431 }
 0xeda   :  { %v5073_v26 = vpop.f32.mrf.mxu1  ;;  %v4964_v13 = vsel %vm1087_vm1, %v19736_v2, 0.0  ;;  %18433 = vpow2.f32 %v4962_v4 }
 0xedb   :  { %v19740_v14 = vmul.f32 0.25, %v5073_v26  ;;  %4965 = vadd.xlane.f32.xlu2 %v4964_v13  ;;  %v18203_v26 = vunpack.i.l.bf16 %v18202_v20 }
 0xedd   :  { %v5081_v62 = vsel %vm1087_vm1, %v19740_v14, -inf }
 0xede   :  { %5082 = vmax.xlane.f32.xlu1 %v5081_v62 }
 0xedf   :  { %v5311_v15 = vpop.f32.mrf.mxu0 }
 0xee0   :  { %v19745_v58 = vmul.f32 0.25, %v5311_v15  ;;  %v19753_v56 = vpop.eup %18433 }
 0xee1   :  { %v4967_v27 = vsel %vm1087_vm1, %v19753_v56, 0.0 }
 0xee2   :  { %v5344_v12 = vsel %vm1087_vm1, %v19745_v58, -inf }
 0xee3   :  { %v5207_v16 = vpop.f32.mrf.mxu1 }
 0xee4   :  { %v19747_v17 = vmul.f32 0.25, %v5207_v16 }
 0xee6   :  { %v5215_v19 = vsel %vm1087_vm1, %v19747_v17, -inf  ;;  %5345 = vmax.xlane.f32.xlu1 %v5344_v12 }
 0xee7   :  { %5216 = vmax.xlane.f32.xlu2 %v5215_v19 }
 0xeeb   :  { %v5339_v24 = vpop.f32.mrf.mxu1 }
 0xeec   :  { %v19755_v51 = vmul.f32 0.25, %v5339_v24 }
 0xeee   :  { %v5347_v25 = vsel %vm1087_vm1, %v19755_v51, -inf  ;;  %4968 = vadd.xlane.f32.xlu1 %v4967_v27  ;;  %v5443_v54 = vpop.f32.mrf.mxu0 }
 0xeef   :  { %5348 = vmax.xlane.f32.xlu0 %v5347_v25  ;;  %v19761_v53 = vmul.f32 0.25, %v5443_v54 }
 0xef1   :  { %v5476_v28 = vsel %vm1087_vm1, %v19761_v53, -inf }
 0xef2   :  { %5477 = vmax.xlane.f32.xlu2 %v5476_v28 }
 0xef3   :  { %v5471_v8 = vpop.f32.mrf.mxu1 }
 0xef4   :  { %v19765_v29 = vmul.f32 0.25, %v5471_v8 }
 0xef6   :  { %v5479_v30 = vsel %vm1087_vm1, %v19765_v29, -inf  ;;  %v5575_v31 = vpop.f32.mrf.mxu0 }
 0xef7   :  { %5480 = vmax.xlane.f32.xlu1 %v5479_v30  ;;  %v19769_v32 = vmul.f32 0.25, %v5575_v31 }
 0xef9   :  { %v5608_v35 = vsel %vm1087_vm1, %v19769_v32, -inf }
 0xefa   :  { %5609 = vmax.xlane.f32.xlu0 %v5608_v35 }
 0xefb   :  { %v5603_v6 = vpop.f32.mrf.mxu1 }
 0xefc   :  { %v19773_v34 = vmul.f32 0.25, %v5603_v6  ;;  %v18204_v6 = vunpack.i.h.bf16 %v18202_v20 }
 0xefe   :  { %v5611_v36 = vsel %vm1087_vm1, %v19773_v34, -inf }
 0xeff   :  { %5612 = vmax.xlane.f32.xlu2 %v5611_v36 }
 0xf01   :  { %v5707_v37 = vpop.f32.mrf.mxu0 }
 0xf02   :  { %v19777_v38 = vmul.f32 0.25, %v5707_v37 }
 0xf04   :  { %v5740_v42 = vsel %vm1087_vm1, %v19777_v38, -inf }
 0xf05   :  { %5741 = vmax.xlane.f32.xlu1 %v5740_v42 }
 0xf06   :  { %v5735_v43 = vpop.f32.mrf.mxu1 }
 0xf07   :  { %v19781_v57 = vmul.f32 0.25, %v5735_v43 }
 0xf09   :  { %v5743_v44 = vsel %vm1087_vm1, %v19781_v57, -inf }
 0xf0a   :  { %5744 = vmax.xlane.f32.xlu0 %v5743_v44 }
 0xf0e   :  { %v5839_v52 = vpop.f32.mrf.mxu0  ;;  %v5867_v22 = vpop.f32.mrf.mxu1 }
 0xf0f   :  { %v19785_v7 = vmul.f32 0.25, %v5839_v52  ;;  %v19787_v21 = vmul.f32 0.25, %v5867_v22 }
 0xf11   :  { %v5872_v41 = vsel %vm1087_vm1, %v19785_v7, -inf  ;;  %v5875_v50 = vsel %vm1087_vm1, %v19787_v21, -inf }
 0xf12   :  { %5873 = vmax.xlane.f32.xlu0 %v5872_v41  ;;  %5876 = vmax.xlane.f32.xlu2 %v5875_v50 }
 0xf40   :  { %v5080_v47 = vpop.xlane.xlu2 %5079 }
 0xf41   :  { %v5084_v48 = vsub.f32 %v19728_v60, %v5080_v47 }
 0xf43   :  { %v5086_v55 = vmul.f32 1.442695, %v5084_v48 }
 0xf45   :  { %18435 = vpow2.f32 %v5086_v55 }
 0xf48   :  { %v5214_v61 = vpop.xlane.xlu0 %5213 }
 0xf49   :  { %v5218_v46 = vsub.f32 %v19732_v10, %v5214_v61 }
 0xf4b   :  { %v19795_v33 = vpop.eup %18435  ;;  %v5220_v49 = vmul.f32 1.442695, %v5218_v46 }
 0xf4c   :  { %v5090_v63 = vsel %vm1087_vm1, %v19795_v33, 0.0 }
 0xf4d   :  { %18437 = vpow2.f32 %v5220_v49  ;;  %5091 = vadd.xlane.f32.xlu1 %v5090_v63 }
 0xf4e   :  { %v4966_v45 = vpop.xlane.xlu2 %4965 }
 0xf4f   :  { %18439 = vrcp.f32 %v4966_v45 }
 0xf51   :  { %v5083_v3 = vpop.xlane.xlu1 %5082 }
 0xf52   :  { %v5085_v39 = vsub.f32 %v19740_v14, %v5083_v3 }
 0xf53   :  { %v19800_v23 = vpop.eup %18437 }
 0xf54   :  { %v5088_v60 = vmul.f32 1.442695, %v5085_v39  ;;  %v5224_v0 = vsel %vm1087_vm1, %v19800_v23, 0.0 }
 0xf55   :  { %v18440_v10 = vpop.eup %18439  ;;  %5225 = vadd.xlane.f32.xlu2 %v5224_v0 }
 0xf56   :  { %v4972_v11 = vmul.f32 %v18440_v10, %v19736_v2  ;;  %18441 = vpow2.f32 %v5088_v60 }
 0xf58   :  { %14573 = vmatmul.msk.f32.vlgmr.msra.gmra.mxu2 %vm1087_vm1, %v4972_v11 }
 0xf59   :  { %5255 = vmatpush.msra.mxu2 %v18203_v26  ;;  %v5346_v40 = vpop.xlane.xlu1 %5345 }
 0xf5a   :  { %v5217_v13 = vpop.xlane.xlu2 %5216  ;;  %v5350_v14 = vsub.f32 %v19745_v58, %v5346_v40 }
 0xf5b   :  { %v5219_v62 = vsub.f32 %v19747_v17, %v5217_v13 }
 0xf5c   :  { %v19808_v15 = vpop.eup %18441  ;;  %v5352_v16 = vmul.f32 1.442695, %v5350_v14 }
 0xf5d   :  { %v5222_v4 = vmul.f32 1.442695, %v5219_v62  ;;  %v5093_v12 = vsel %vm1087_vm1, %v19808_v15, 0.0 }
 0xf5e   :  { %5094 = vadd.xlane.f32.xlu0 %v5093_v12 }
 0xf5f   :  { %18443 = vpow2.f32 %v5222_v4 }
 0xf60   :  { %18445 = vpow2.f32 %v5352_v16 }
 0xf61   :  { %v4969_v19 = vpop.xlane.xlu1 %4968 }
 0xf62   :  { %v5349_v2 = vpop.xlane.xlu0 %5348  ;;  %18447 = vrcp.f32 %v4969_v19  ;;  %v18208_v19 = vunpack.i.l.bf16 %v19726_v59 }
 0xf63   :  { %v5351_v24 = vsub.f32 %v19755_v51, %v5349_v2 }
 0xf65   :  { %v19813_v25 = vpop.eup %18443  ;;  %v5354_v17 = vmul.f32 1.442695, %v5351_v24  ;;  %v5478_v54 = vpop.xlane.xlu2 %5477 }
 0xf66   :  { %v19815_v27 = vpop.eup %18445  ;;  %v5227_v58 = vsel %vm1087_vm1, %v19813_v25, 0.0  ;;  %v5482_v28 = vsub.f32 %v19761_v53, %v5478_v54 }
 0xf67   :  { %18449 = vpow2.f32 %v5354_v17  ;;  %5228 = vadd.xlane.f32.xlu1 %v5227_v58  ;;  %v5356_v8 = vsel %vm1087_vm1, %v19815_v27, 0.0 }
 0xf68   :  { %5357 = vadd.xlane.f32.xlu2 %v5356_v8  ;;  %v18448_v30 = vpop.eup %18447  ;;  %v5484_v51 = vmul.f32 1.442695, %v5482_v28 }
 0xf69   :  { %v4973_v31 = vmul.f32 %v18448_v30, %v19753_v56 }
 0xf6a   :  { %v5481_v35 = vpop.xlane.xlu1 %5480  ;;  %18451 = vpow2.f32 %v5484_v51 }
 0xf6b   :  { %v5483_v36 = vsub.f32 %v19765_v29, %v5481_v35  ;;  %14574 = vmatmul.msk.f32.vlgmr.msra.gmra.mxu3 %vm1087_vm1, %v4973_v31 }
 0xf6c   :  { %5281 = vmatpush.msra.mxu3 %v18204_v6 }
 0xf6d   :  { %v19825_v37 = vpop.eup %18449  ;;  %v5486_v42 = vmul.f32 1.442695, %v5483_v36  ;;  %v5610_v53 = vpop.xlane.xlu0 %5609 }
 0xf6e   :  { %v5359_v43 = vsel %vm1087_vm1, %v19825_v37, 0.0  ;;  %v5614_v44 = vsub.f32 %v19769_v32, %v5610_v53 }
 0xf6f   :  { %18453 = vpow2.f32 %v5486_v42  ;;  %5360 = vadd.xlane.f32.xlu1 %v5359_v43 }
 0xf70   :  { %v5616_v56 = vmul.f32 1.442695, %v5614_v44  ;;  %v19830_v22 = vpop.eup %18451 }
 0xf71   :  { %v5488_v20 = vsel %vm1087_vm1, %v19830_v22, 0.0 }
 0xf72   :  { %v5613_v52 = vpop.xlane.xlu2 %5612  ;;  %18455 = vpow2.f32 %v5616_v56 }
 0xf73   :  { %v5615_v29 = vsub.f32 %v19773_v34, %v5613_v52 }
 0xf75   :  { %v19833_v41 = vpop.eup %18453  ;;  %v5618_v50 = vmul.f32 1.442695, %v5615_v29 }
 0xf76   :  { %v5491_v47 = vsel %vm1087_vm1, %v19833_v41, 0.0 }
 0xf77   :  { %18457 = vpow2.f32 %v5618_v50  ;;  %5489 = vadd.xlane.f32.xlu1 %v5488_v20  ;;  %5492 = vadd.xlane.f32.xlu0 %v5491_v47 }
 0xf78   :  { %v19839_v32 = vpop.eup %18455  ;;  %v5742_v48 = vpop.xlane.xlu1 %5741 }
 0xf79   :  { %v5746_v55 = vsub.f32 %v19777_v38, %v5742_v48  ;;  %v5620_v34 = vsel %vm1087_vm1, %v19839_v32, 0.0 }
 0xf7a   :  { %5621 = vadd.xlane.f32.xlu2 %v5620_v34 }
 0xf7b   :  { %v5748_v61 = vmul.f32 1.442695, %v5746_v55 }
 0xf7d   :  { %v19844_v46 = vpop.eup %18457  ;;  %18459 = vpow2.f32 %v5748_v61  ;;  %v5745_v49 = vpop.xlane.xlu0 %5744 }
 0xf7e   :  { %v5623_v63 = vsel %vm1087_vm1, %v19844_v46, 0.0 }
 0xf7f   :  { %5624 = vadd.xlane.f32.xlu1 %v5623_v63 }
 0xf83   :  { %v19848_v45 = vpop.eup %18459 }
 0xf84   :  { %v5752_v3 = vsel %vm1087_vm1, %v19848_v45, 0.0 }
 0xf85   :  { %v5874_v39 = vpop.xlane.xlu0 %5873  ;;  %v5877_v38 = vpop.xlane.xlu2 %5876  ;;  %5753 = vadd.xlane.f32.xlu2 %v5752_v3 }
 0xf86   :  { %v5878_v60 = vsub.f32 %v19785_v7, %v5874_v39  ;;  %v5879_v10 = vsub.f32 %v19787_v21, %v5877_v38  ;;  %v5747_v21 = vsub.f32 %v19781_v57, %v5745_v49 }
 0xf88   :  { %v5880_v0 = vmul.f32 1.442695, %v5878_v60  ;;  %v5882_v11 = vmul.f32 1.442695, %v5879_v10  ;;  %v5750_v62 = vmul.f32 1.442695, %v5747_v21 }
 0xf8a   :  { %18461 = vpow2.f32 %v5880_v0 }
 0xf8b   :  { %18211 = vrot.lane.b32.xlu0 %v19662_v18, %s19036_s29  ;;  %18463 = vpow2.f32 %v5882_v11 }
 0xf8c   :  { %18465 = vpow2.f32 %v5750_v62 }
 0xf90   :  { %v19856_v26 = vpop.eup %18461 }
 0xf91   :  { %v5884_v13 = vsel %vm1087_vm1, %v19856_v26, 0.0  ;;  %v19860_v40 = vpop.eup %18463 }
 0xf92   :  { %5885 = vadd.xlane.f32.xlu1 %v5884_v13  ;;  %v5887_v7 = vsel %vm1087_vm1, %v19860_v40, 0.0  ;;  %v19869_v14 = vpop.eup %18465 }
 0xf93   :  { %v5755_v4 = vsel %vm1087_vm1, %v19869_v14, 0.0 }
 0xf9a   :  { %5888 = vadd.xlane.f32.xlu1 %v5887_v7 }
 0xf9d   :  { %18216 = vrot.lane.b32.xlu2 %v19662_v18, %s19055_s24 }
 0xfa5   :  { %18226 = vrot.lane.b32.xlu2 %v19662_v18, %s19043_s6 }
 0xfb3   :  { %18221 = vrot.lane.b32.xlu1 %v19662_v18, %s19051_s8 }
 0xfb5   :  { %5756 = vadd.xlane.f32.xlu0 %v5755_v4 }
 0xfc0   :  { %v5092_v16 = vpop.xlane.xlu1 %5091 }
 0xfc1   :  { %18467 = vrcp.f32 %v5092_v16 }
 0xfc7   :  { %v18468_v12 = vpop.eup %18467 }
 0xfc8   :  { %v5098_v2 = vmul.f32 %v18468_v12, %v19795_v33  ;;  %v5226_v57 = vpop.xlane.xlu2 %5225  ;;  %v18209_v33 = vunpack.i.h.bf16 %v19726_v59 }
 0xfc9   :  { %18469 = vrcp.f32 %v5226_v57 }
 0xfca   :  { %14579 = vmatmul.msk.f32.vlgmr.msrb.gmra.mxu2 %vm1087_vm1, %v5098_v2 }
 0xfcb   :  { %5387 = vmatpush.msrb.mxu2 %v18208_v19 }
 0xfcf   :  { %v18470_v24 = vpop.eup %18469 }
 0xfd0   :  { %v5232_v17 = vmul.f32 %v18470_v24, %v19800_v23 }
 0xfd1   :  { %v5095_v18 = vpop.xlane.xlu0 %5094 }
 0xfd2   :  { %18471 = vrcp.f32 %v5095_v18  ;;  %14585 = vmatmul.msk.f32.vlgmr.msra.gmra.mxu2 %vm1087_vm1, %v5232_v17 }
 0xfd8   :  { %v18472_v58 = vpop.eup %18471 }
 0xfd9   :  { %v5099_v54 = vmul.f32 %v18472_v58, %v19808_v15 }
 0xfda   :  { %v5229_v28 = vpop.xlane.xlu1 %5228 }
 0xfdb   :  { %v5358_v8 = vpop.xlane.xlu2 %5357  ;;  %18473 = vrcp.f32 %v5229_v28  ;;  %14580 = vmatmul.msk.f32.vlgmr.msrb.gmra.mxu3 %vm1087_vm1, %v5099_v54  ;;  %v4994_v62 = vpop.f32.mrf.mxu2 }
 0xfdc   :  { %18475 = vrcp.f32 %v5358_v8  ;;  %5413 = vmatpush.msrb.mxu3 %v18209_v33 }
 0xfe1   :  { %v18474_v30 = vpop.eup %18473 }
 0xfe2   :  { %v18476_v51 = vpop.eup %18475  ;;  %v5233_v23 = vmul.f32 %v18474_v30, %v19813_v25  ;;  %v5361_v31 = vpop.xlane.xlu1 %5360 }
 0xfe3   :  { %v5364_v35 = vmul.f32 %v18476_v51, %v19815_v27  ;;  %18477 = vrcp.f32 %v5361_v31 }
 0xfe4   :  { %14586 = vmatmul.msk.f32.vlgmr.msra.gmra.mxu3 %vm1087_vm1, %v5233_v23 }
 0xfe5   :  { %14591 = vmatmul.msk.f32.vlgmr.msrb.gmra.mxu2 %vm1087_vm1, %v5364_v35 }
 0xfe9   :  { %v18478_v15 = vpop.eup %18477 }
 0xfea   :  { %v5365_v59 = vmul.f32 %v18478_v15, %v19825_v37  ;;  %v5490_v6 = vpop.xlane.xlu1 %5489  ;;  %v5493_v42 = vpop.xlane.xlu0 %5492  ;;  %v17496_v15 = vld [vmem:[#allocation12 + $0x78] sm:$0xff] }
 0xfeb   :  { %18479 = vrcp.f32 %v5493_v42  ;;  %6087 = vmatpush.bf16.msrb.mxu0 %v17496_v15  ;;  %v17492_v42 = vld [vmem:[#allocation12 + $0x58] sm:$0xff]  ;;  %v15035_v15 = vld [vmem:[#allocation18 + $0x700] sm:$0xf] }
 0xfec   :  { %14592 = vmatmul.msk.f32.vlgmr.msrb.gmra.mxu3 %vm1087_vm1, %v5365_v59  ;;  %18481 = vrcp.f32 %v5490_v6  ;;  %v17495_v59 = vld [vmem:[#allocation12 + $0x70] sm:$0xff]  ;;  %v17494_v6 = vld [vmem:[#allocation12 + $0x68] sm:$0xff] }
 0xfed   :  { %v5622_v36 = vpop.xlane.xlu2 %5621 }
 0xfee   :  { %18483 = vrcp.f32 %v5622_v36  ;;  %v5017_v4 = vpop.f32.mrf.mxu3  ;;  %v17493_v36 = vld [vmem:[#allocation12 + $0x60] sm:$0xff] }
 0xfef   :  { %6088 = vmatpush.bf16.msrb.mxu0 %v17495_v59 }
 0xff1   :  { %v18480_v25 = vpop.eup %18479 }
 0xff2   :  { %v5625_v43 = vpop.xlane.xlu1 %5624  ;;  %v18482_v44 = vpop.eup %18481  ;;  %v5497_v29 = vmul.f32 %v18480_v25, %v19833_v41  ;;  %v17490_v25 = vld [vmem:[#allocation12 + $0x48] sm:$0xff] }
 0xff3   :  { %18485 = vrcp.f32 %v5625_v43  ;;  %v5496_v37 = vmul.f32 %v18482_v44, %v19830_v22  ;;  %6089 = vmatpush.bf16.msrb.mxu0 %v17494_v6  ;;  %v17489_v43 = vld [vmem:[#allocation12 + $0x40] sm:$0xff]  ;;  %v17601_v6 = vld [vmem:[#allocation18 + $0x73c] sm:$0xf0] }
 0xff4   :  { %v18484_v48 = vpop.eup %18483 }
 0xff5   :  { %v5628_v34 = vmul.f32 %v18484_v48, %v19839_v32 }
 0xff7   :  { %6090 = vmatpush.bf16.msrb.mxu0 %v17493_v36  ;;  %v17593_v36 = vld [vmem:[#allocation18 + $0x704] sm:$0xf] }
 0xff8   :  { %v5754_v53 = vpop.xlane.xlu2 %5753 }
 0xff9   :  { %v18486_v55 = vpop.eup %18485  ;;  %18487 = vrcp.f32 %v5754_v53  ;;  %v17491_v53 = vld [vmem:[#allocation12 + $0x50] sm:$0xff] }
 0xffa   :  { %v5629_v61 = vmul.f32 %v18486_v55, %v19844_v46 }
 0xffb   :  { %6091 = vmatpush.bf16.msrb.mxu0 %v17492_v42  ;;  %v15036_v42 = vor.u32 %v17601_v6, %v15035_v15  ;;  %v14787_v15 = vld [vmem:[#allocation18 + $0x508] sm:$0xf] }
 0xffd   :  { %v18212_v27 = vpop.permute.xlu0 %18211 }
 0xffe   :  { %v18214_v56 = vunpack.i.h.bf16 %v18212_v27  ;;  %v18213_v52 = vunpack.i.l.bf16 %v18212_v27 }
 0xfff   :  { %v18488_v49 = vpop.eup %18487  ;;  %6092 = vmatpush.bf16.msrb.mxu0 %v17491_v53 }
0x1000   :  { %5519 = vmatpush.msra.mxu2 %v18213_v52  ;;  %5545 = vmatpush.msra.mxu3 %v18214_v56  ;;  %v18217_v50 = vpop.permute.xlu2 %18216  ;;  %v5760_v60 = vmul.f32 %v18488_v49, %v19848_v45 }
0x1001   :  { %14597 = vmatmul.msk.f32.vlgmr.msra.gmra.mxu2 %vm1087_vm1, %v5496_v37  ;;  %14598 = vmatmul.msk.f32.vlgmr.msra.gmra.mxu3 %vm1087_vm1, %v5497_v29  ;;  %v18219_v20 = vunpack.i.h.bf16 %v18217_v50  ;;  %v18218_v47 = vunpack.i.l.bf16 %v18217_v50 }
0x1003   :  { %5651 = vmatpush.msrb.mxu2 %v18218_v47  ;;  %5677 = vmatpush.msrb.mxu3 %v18219_v20 }
0x1004   :  { %6093 = vmatpush.bf16.msrb.mxu0 %v17490_v25  ;;  %v15043_v25 = vld [vmem:[#allocation18 + $0x708] sm:$0xf] }
0x1005   :  { %v5886_v22 = vpop.xlane.xlu1 %5885 }
0x1006   :  { %18489 = vrcp.f32 %v5886_v22 }
0x1008   :  { %v18227_v63 = vpop.permute.xlu2 %18226  ;;  %6094 = vmatpush.bf16.msrb.mxu0 %v17489_v43  ;;  %v17602_v43 = vld [vmem:[#allocation18 + $0x744] sm:$0xf0] }
0x1009   :  { %14603 = vmatmul.msk.f32.vlgmr.msrb.gmra.mxu2 %vm1087_vm1, %v5628_v34  ;;  %14604 = vmatmul.msk.f32.vlgmr.msrb.gmra.mxu3 %vm1087_vm1, %v5629_v61  ;;  %v18229_v0 = vunpack.i.h.bf16 %v18227_v63  ;;  %v18228_v32 = vunpack.i.l.bf16 %v18227_v63 }
0x100c   :  { %v18490_v46 = vpop.eup %18489 }
0x100d   :  { %v5889_v41 = vpop.xlane.xlu1 %5888  ;;  %v5892_v13 = vmul.f32 %v18490_v46, %v19856_v26 }
0x1025   :  { %v18222_v3 = vpop.permute.xlu1 %18221 }
0x1026   :  { %v18224_v39 = vunpack.i.h.bf16 %v18222_v3  ;;  %v18223_v38 = vunpack.i.l.bf16 %v18222_v3 }
0x1028   :  { %v5757_v10 = vpop.xlane.xlu0 %5756  ;;  %5783 = vmatpush.msra.mxu2 %v18223_v38  ;;  %5809 = vmatpush.msra.mxu3 %v18224_v39 }
0x1029   :  { %18491 = vrcp.f32 %v5757_v10  ;;  %14609 = vmatmul.msk.f32.vlgmr.msra.gmra.mxu2 %vm1087_vm1, %v5760_v60 }
0x102a   :  { %5941 = vmatpush.msrb.mxu3 %v18229_v0  ;;  %5915 = vmatpush.msrb.mxu2 %v18228_v32  ;;  %18493 = vrcp.f32 %v5889_v41 }
0x102f   :  { %v18492_v11 = vpop.eup %18491 }
0x1030   :  { %v5761_v7 = vmul.f32 %v18492_v11, %v19869_v14  ;;  %v18494_v45 = vpop.eup %18493 }
0x1031   :  { %14615 = vmatmul.msk.f32.vlgmr.msrb.gmra.mxu2 %vm1087_vm1, %v5892_v13  ;;  %v5893_v21 = vmul.f32 %v18494_v45, %v19860_v40 }
0x1032   :  { %14610 = vmatmul.msk.f32.vlgmr.msra.gmra.mxu3 %vm1087_vm1, %v5761_v7 }
0x103a   :  { %14616 = vmatmul.msk.f32.vlgmr.msrb.gmra.mxu3 %vm1087_vm1, %v5893_v21 }
0x104d   :  { %v5124_v16 = vpop.f32.mrf.mxu2 }
0x1055   :  { %v5257_v57 = vpop.f32.mrf.mxu2 }
0x105e   :  { %v5151_v12 = vpop.f32.mrf.mxu3 }
0x105f   :  { %v18230_v2 = vpack.i.bf16 %v5151_v12, %v5124_v16 }
0x1061   :  { %18231 = vrot.lane.b32.xlu2 %v18230_v2, %s19043_s6 }
0x1067   :  { %v5283_v26 = vpop.f32.mrf.mxu3 }
0x1068   :  { %v18235_v19 = vpack.i.bf16 %v5283_v26, %v5257_v57  ;;  %v5389_v14 = vpop.f32.mrf.mxu2  ;;  %v18344_v26 = vld [vmem:[#allocation14 + $0x1] ss:$0 sm:$0xff] }
0x106a   :  { %18236 = vrot.lane.b32.xlu2 %v18235_v19, %s19051_s8 }
0x106f   :  { %v5415_v24 = vpop.f32.mrf.mxu3 }
0x1070   :  { %v18240_v17 = vpack.i.bf16 %v5415_v24, %v5389_v14 }
0x1072   :  { %18241 = vrot.lane.b32.xlu0 %v18240_v17, %s19055_s24 }
0x1084   :  { %v5521_v40 = vpop.f32.mrf.mxu2  ;;  %v5547_v18 = vpop.f32.mrf.mxu3 }
0x1085   :  { %v18245_v58 = vpack.i.bf16 %v5547_v18, %v5521_v40 }
0x1087   :  { %18246 = vrot.lane.b32.xlu1 %v18245_v58, %s19036_s29  ;;  %v15099_v58 = vld [vmem:[#allocation18 + $0x780] sm:$0xf] }
0x108c   :  { %v5653_v54 = vpop.f32.mrf.mxu2  ;;  %v5679_v28 = vpop.f32.mrf.mxu3 }
0x108d   :  { %v18250_v33 = vpack.i.bf16 %v5679_v28, %v5653_v54  ;;  %v17617_v54 = vld [vmem:[#allocation18 + $0x7bc] sm:$0xf0]  ;;  %v17609_v28 = vld [vmem:[#allocation18 + $0x784] sm:$0xf] }
0x108f   :  { %18251 = vrot.lane.b32.xlu2 %v18250_v33, %s19066_s4  ;;  %v15100_v33 = vor.u32 %v17617_v54, %v15099_v58 }
0x1091   :  { %6964 = vmatpush.bf16.msra.mxu1 %v15100_v33 }
0x1095   :  { %6965 = vmatpush.bf16.msra.mxu1 %v15036_v42  ;;  %v14789_v42 = vld [vmem:[#allocation18 + $0x548] sm:$0xf0] }
0x10ac   :  { %v5785_v8 = vpop.f32.mrf.mxu2 }
0x10b4   :  { %v5917_v23 = vpop.f32.mrf.mxu2 }
0x10b5   :  { %v5811_v30 = vpop.f32.mrf.mxu3 }
0x10b6   :  { %v18255_v51 = vpack.i.bf16 %v5811_v30, %v5785_v8  ;;  %v15101_v8 = vld [vmem:[#allocation18 + $0x7c0] sm:$0xf0]  ;;  %v15107_v30 = vld [vmem:[#allocation18 + $0x788] sm:$0xf] }
0x10b8   :  { %18256 = vrot.lane.b32.xlu1 %v18255_v51, %s19065_s22  ;;  %v17618_v51 = vld [vmem:[#allocation18 + $0x7c4] sm:$0xf0] }
0x10bb   :  { %v18232_v44 = vpop.permute.xlu2 %18231 }
0x10bc   :  { %v18234_v29 = vunpack.i.h.bf16 %v18232_v44  ;;  %v18233_v37 = vunpack.i.l.bf16 %v18232_v44  ;;  %v17594_v44 = vld [vmem:[#allocation18 + $0x70c] sm:$0xf] }
0x10bd   :  { %v5943_v31 = vpop.f32.mrf.mxu3 }
0x10be   :  { %v18260_v35 = vpack.i.bf16 %v5943_v31, %v5917_v23  ;;  %v6003_v22 = vsel %vm1032_vm0, %v5017_v4, %v18234_v29  ;;  %v6002_v41 = vsel %vm1032_vm0, %v4994_v62, %v18233_v37  ;;  %v15104_v23 = vor.u32 %v17609_v28, %v15101_v8  ;;  %v17585_v29 = vld [vmem:[#allocation18 + $0x6bc] sm:$0xf0] }
0x10bf   :  { %v15108_v31 = vor.u32 %v17618_v51, %v15107_v30 }
0x10c0   :  { %18261 = vrot.lane.b32.xlu2 %v18260_v35, %s19064_s19  ;;  %v15109_v35 = vld [vmem:[#allocation18 + $0x7c8] sm:$0xf0]  ;;  %6978 = vmatpush.bf16.msra.mxu2 %v15104_v23  ;;  %v14779_v23 = vld [vmem:[#allocation18 + $0x500] sm:$0xf] }
0x10c1   :  { %6992 = vmatpush.bf16.msra.mxu3 %v15108_v31  ;;  %v17529_v31 = vld [vmem:[#allocation18 + $0x504] sm:$0xf] }
0x10c4   :  { %v18237_v27 = vpop.permute.xlu2 %18236 }
0x10c5   :  { %v18239_v20 = vunpack.i.h.bf16 %v18237_v27  ;;  %v18238_v47 = vunpack.i.l.bf16 %v18237_v27  ;;  %v15044_v27 = vor.u32 %v17602_v43, %v15043_v25  ;;  %v17521_v25 = vld [vmem:[#allocation18 + $0x4bc] sm:$0xf0]  ;;  %v17513_v43 = vld [vmem:[#allocation18 + $0x484] sm:$0xf] }
0x10c7   :  { %v6005_v49 = vsel %vm2140_vm2, %v6003_v22, %v18239_v20  ;;  %v6004_v63 = vsel %vm2140_vm2, %v6002_v41, %v18238_v47  ;;  %v14973_v20 = vld [vmem:[#allocation18 + $0x6c0] sm:$0xf0]  ;;  %v14979_v47 = vld [vmem:[#allocation18 + $0x688] sm:$0xf]  ;;  %6993 = vmatpush.bf16.msra.mxu3 %v15044_v27 }
0x10c8   :  { %v14717_v27 = vld [vmem:[#allocation18 + $0x4c0] sm:$0xf0] }
0x10e4   :  { %v18242_v56 = vpop.permute.xlu0 %18241 }
0x10e5   :  { %v18244_v48 = vunpack.i.h.bf16 %v18242_v56  ;;  %v18243_v55 = vunpack.i.l.bf16 %v18242_v56  ;;  %v15045_v56 = vld [vmem:[#allocation18 + $0x748] sm:$0xf0] }
0x10e6   :  { %v15048_v37 = vor.u32 %v17594_v44, %v15045_v56  ;;  %v14723_v56 = vld [vmem:[#allocation18 + $0x488] sm:$0xf] }
0x10e7   :  { %v6007_v3 = vsel %vm2143_vm3, %v6005_v49, %v18244_v48  ;;  %v6006_v39 = vsel %vm2143_vm3, %v6004_v63, %v18243_v55  ;;  %v17586_v55 = vld [vmem:[#allocation18 + $0x6c4] sm:$0xf0]  ;;  %v14907_v49 = vld [vmem:[#allocation18 + $0x600] sm:$0xf] }
0x10e8   :  { %v14980_v41 = vor.u32 %v17586_v55, %v14979_v47  ;;  %v17569_v63 = vld [vmem:[#allocation18 + $0x63c] sm:$0xf0] }
0x10e9   :  { %v18252_v52 = vpop.permute.xlu2 %18251  ;;  %v17505_v55 = vld [vmem:[#allocation18 + $0x43c] sm:$0xf0] }
0x10ea   :  { %v18254_v10 = vunpack.i.h.bf16 %v18252_v52  ;;  %v18253_v32 = vunpack.i.l.bf16 %v18252_v52  ;;  %v14971_v52 = vld [vmem:[#allocation18 + $0x680] sm:$0xf]  ;;  %6994 = vmatpush.bf16.msra.mxu3 %v14980_v41  ;;  %v14659_v41 = vld [vmem:[#allocation18 + $0x408] sm:$0xf] }
0x10eb   :  { %v14972_v48 = vor.u32 %v17585_v29, %v14971_v52  ;;  %v17522_v52 = vld [vmem:[#allocation18 + $0x4c4] sm:$0xf0]  ;;  %v14720_v29 = vor.u32 %v17513_v43, %v14717_v27  ;;  %v14931_v27 = vld [vmem:[#allocation18 + $0x618] sm:$0xf] }
0x10ed   :  { %6966 = vmatpush.bf16.msra.mxu1 %v14972_v48  ;;  %v14651_v48 = vld [vmem:[#allocation18 + $0x400] sm:$0xf] }
0x10f9   :  { %v18247_v50 = vpop.permute.xlu1 %18246 }
0x10fa   :  { %v18249_v34 = vunpack.i.h.bf16 %v18247_v50  ;;  %v18248_v61 = vunpack.i.l.bf16 %v18247_v50  ;;  %v17577_v50 = vld [vmem:[#allocation18 + $0x684] sm:$0xf] }
0x10fb   :  { %v14976_v22 = vor.u32 %v17577_v50, %v14973_v20  ;;  %v17514_v50 = vld [vmem:[#allocation18 + $0x48c] sm:$0xf] }
0x10fc   :  { %v6009_v38 = vsel %vm2146_vm4, %v6007_v3, %v18249_v34  ;;  %v6008_v60 = vsel %vm2146_vm4, %v6006_v39, %v18248_v61  ;;  %v17578_v34 = vld [vmem:[#allocation18 + $0x68c] sm:$0xf]  ;;  %v17561_v3 = vld [vmem:[#allocation18 + $0x604] sm:$0xf] }
0x10fd   :  { %v6010_v21 = vsel %vm2149_vm5, %v6008_v60, %v18253_v32  ;;  %v6011_v62 = vsel %vm2149_vm5, %v6009_v38, %v18254_v10  ;;  %v14981_v61 = vld [vmem:[#allocation18 + $0x6c8] sm:$0xf0]  ;;  %v14909_v38 = vld [vmem:[#allocation18 + $0x640] sm:$0xf0]  ;;  %v14915_v60 = vld [vmem:[#allocation18 + $0x608] sm:$0xf] }
0x10fe   :  { %v14984_v39 = vor.u32 %v17578_v34, %v14981_v61  ;;  %v17562_v10 = vld [vmem:[#allocation18 + $0x60c] sm:$0xf]  ;;  %v17497_v34 = vld [vmem:[#allocation18 + $0x404] sm:$0xf]  ;;  %v14652_v61 = vor.u32 %v17505_v55, %v14651_v48  ;;  %v17555_v48 = vld [vmem:[#allocation18 + $0x5cc] sm:$0xf0] }
0x10ff   :  { %v14917_v32 = vld [vmem:[#allocation18 + $0x648] sm:$0xf0]  ;;  %v17547_v55 = vld [vmem:[#allocation18 + $0x594] sm:$0xf] }
0x1100   :  { %v14725_v20 = vld [vmem:[#allocation18 + $0x4c8] sm:$0xf0] }
0x1101   :  { %v14728_v47 = vor.u32 %v17514_v50, %v14725_v20  ;;  %v14933_v50 = vld [vmem:[#allocation18 + $0x658] sm:$0xf0] }
0x111a   :  { %v18262_v0 = vpop.permute.xlu2 %18261 }
0x111b   :  { %v18264_v7 = vunpack.i.h.bf16 %v18262_v0  ;;  %v18263_v45 = vunpack.i.l.bf16 %v18262_v0  ;;  %v17570_v0 = vld [vmem:[#allocation18 + $0x644] sm:$0xf0] }
0x112a   :  { %v18257_v46 = vpop.permute.xlu1 %18256 }
0x112b   :  { %v18259_v11 = vunpack.i.h.bf16 %v18257_v46  ;;  %v18258_v13 = vunpack.i.l.bf16 %v18257_v46  ;;  %v14908_v46 = vor.u32 %v17569_v63, %v14907_v49  ;;  %v17506_v49 = vld [vmem:[#allocation18 + $0x444] sm:$0xf0] }
0x112d   :  { %v6013_v4 = vsel %vm2152_vm6, %v6011_v62, %v18259_v11  ;;  %v6012_v16 = vsel %vm2152_vm6, %v6010_v21, %v18258_v13  ;;  %v14912_v11 = vor.u32 %v17561_v3, %v14909_v38  ;;  %v14916_v13 = vor.u32 %v17570_v0, %v14915_v60  ;;  %v17545_v21 = vld [vmem:[#allocation18 + $0x584] sm:$0xf]  ;;  %6967 = vmatpush.bf16.msra.mxu1 %v14908_v46  ;;  %v14661_v38 = vld [vmem:[#allocation18 + $0x448] sm:$0xf0]  ;;  %v15115_v60 = vld [vmem:[#allocation18 + $0x790] sm:$0xf] }
0x112e   :  { %v6014_v12 = vsel %vm2155_vm7, %v6012_v16, %v18263_v45  ;;  %v6015_v2 = vsel %vm2155_vm7, %v6013_v4, %v18264_v7  ;;  %v14843_v7 = vld [vmem:[#allocation18 + $0x580] sm:$0xf]  ;;  %v14920_v62 = vor.u32 %v17562_v10, %v14917_v32  ;;  %v14845_v4 = vld [vmem:[#allocation18 + $0x5c0] sm:$0xf0]  ;;  %v14851_v16 = vld [vmem:[#allocation18 + $0x588] sm:$0xf]  ;;  %v14660_v3 = vor.u32 %v17506_v49, %v14659_v41 }
0x112f   :  { %v6035_v57 = vpack.c.bf16 %v6015_v2, %v6014_v12  ;;  %v17553_v45 = vld [vmem:[#allocation18 + $0x5bc] sm:$0xf0]  ;;  %v17554_v12 = vld [vmem:[#allocation18 + $0x5c4] sm:$0xf0]  ;;  %v17546_v2 = vld [vmem:[#allocation18 + $0x58c] sm:$0xf]  ;;  %6995 = vmatpush.bf16.msra.mxu3 %v14916_v13 }
0x1130   :  { %v17619_v10 = vld [vmem:[#allocation18 + $0x7cc] sm:$0xf0]  ;;  %v17611_v32 = vld [vmem:[#allocation18 + $0x794] sm:$0xf]  ;;  %v17556_v41 = vld [vmem:[#allocation18 + $0x5d4] sm:$0xf0] }
0x1131   :  { %6095 = vmatmul.bf16.vlgmr.msrb.gmra.mxu0 %v6035_v57  ;;  %v14853_v57 = vld [vmem:[#allocation18 + $0x5c8] sm:$0xf0]  ;;  %v15117_v46 = vld [vmem:[#allocation18 + $0x7d0] sm:$0xf0] }
0x1132   :  { %v15120_v13 = vor.u32 %v17611_v32, %v15117_v46  ;;  %v14797_v46 = vld [vmem:[#allocation18 + $0x550] sm:$0xf0] }
0x11ae   :  { %v6096_v19 = vpop.f32.mrf.mxu0 }
0x11af   :  { %v6097_v14 = vadd.f32 %v18344_v26, %v6096_v19  ;;  %v14848_v19 = vor.u32 %v17545_v21, %v14845_v4  ;;  %v17612_v21 = vld [vmem:[#allocation18 + $0x79c] sm:$0xf] }
0x11b0   :  { %v15125_v4 = vld [vmem:[#allocation18 + $0x7d8] sm:$0xf0] }
0x11b1   :  { %v19927_v24 = vadd.f32 %v6097_v14, %v19647_v5  ;;  %v17610_v5 = vld [vmem:[#allocation18 + $0x78c] sm:$0xf]  ;;  %v14852_v14 = vor.u32 %v17554_v12, %v14851_v16  ;;  %v15051_v16 = vld [vmem:[#allocation18 + $0x710] sm:$0xf] }
0x11b2   :  { %v15112_v59 = vor.u32 %v17610_v5, %v15109_v35  ;;  %v14781_v35 = vld [vmem:[#allocation18 + $0x540] sm:$0xf0]  ;;  %v17603_v12 = vld [vmem:[#allocation18 + $0x74c] sm:$0xf0] }
0x11b3   :  { %6107 = vadd.xlane.f32.xlu0 %v19927_v24  ;;  %6996 = vmatpush.bf16.msra.mxu3 %v14852_v14  ;;  %v14784_v6 = vor.u32 %v17529_v31, %v14781_v35  ;;  %v15059_v14 = vld [vmem:[#allocation18 + $0x718] sm:$0xf] }
0x11b4   :  { %7006 = vmatpush.bf16.msra.mxu0 %v15112_v59  ;;  %v17538_v59 = vld [vmem:[#allocation18 + $0x544] sm:$0xf0]  ;;  %v14995_v35 = vld [vmem:[#allocation18 + $0x698] sm:$0xf] }
0x11b6   :  { %v6098_v17 = vpop.f32.mrf.mxu0 }
0x11b7   :  { %v6099_v40 = vadd.f32 %v18344_v26, %v6098_v17  ;;  %v14844_v26 = vor.u32 %v17553_v45, %v14843_v7  ;;  %v15123_v7 = vld [vmem:[#allocation18 + $0x798] sm:$0xf] }
0x11b8   :  { %7007 = vmatpush.bf16.msra.mxu0 %v15048_v37  ;;  %v14724_v37 = vor.u32 %v17522_v52, %v14723_v56  ;;  %v17620_v45 = vld [vmem:[#allocation18 + $0x7d4] sm:$0xf0] }
0x11b9   :  { %v19931_v18 = vadd.f32 %v6099_v40, %v19649_v9  ;;  %v15037_v9 = vld [vmem:[#allocation18 + $0x740] sm:$0xf0]  ;;  %v14856_v40 = vor.u32 %v17546_v2, %v14853_v57  ;;  %6968 = vmatpush.bf16.msra.mxu1 %v14844_v26  ;;  %v15128_v2 = vor.u32 %v17612_v21, %v15125_v4  ;;  %v15052_v57 = vor.u32 %v17603_v12, %v15051_v16  ;;  %v17595_v26 = vld [vmem:[#allocation18 + $0x714] sm:$0xf]  ;;  %v17572_v56 = vld [vmem:[#allocation18 + $0x654] sm:$0xf0] }
0x11ba   :  { %v15040_v53 = vor.u32 %v17593_v36, %v15037_v9  ;;  %v14788_v36 = vor.u32 %v17538_v59, %v14787_v15  ;;  %v17530_v9 = vld [vmem:[#allocation18 + $0x50c] sm:$0xf]  ;;  %v17588_v15 = vld [vmem:[#allocation18 + $0x6d4] sm:$0xf0]  ;;  %v17532_v21 = vld [vmem:[#allocation18 + $0x51c] sm:$0xf] }
0x11bb   :  { %6109 = vadd.xlane.f32.xlu1 %v19931_v18  ;;  %v14731_v12 = vld [vmem:[#allocation18 + $0x490] sm:$0xf] }
0x11bc   :  { %6979 = vmatpush.bf16.msra.mxu2 %v15040_v53  ;;  %7008 = vmatpush.bf16.msra.mxu0 %v14984_v39  ;;  %v14792_v53 = vor.u32 %v17530_v9, %v14789_v42  ;;  %v17498_v39 = vld [vmem:[#allocation18 + $0x40c] sm:$0xf]  ;;  %v14997_v9 = vld [vmem:[#allocation18 + $0x6d8] sm:$0xf0] }
0x11bd   :  { %6997 = vmatpush.bf16.msra.mxu3 %v14788_v36  ;;  %v14664_v0 = vor.u32 %v17498_v39, %v14661_v38  ;;  %v17580_v36 = vld [vmem:[#allocation18 + $0x69c] sm:$0xf] }
0x11be   :  { %v15000_v42 = vor.u32 %v17580_v36, %v14997_v9  ;;  %v14869_v39 = vld [vmem:[#allocation18 + $0x5d8] sm:$0xf0] }
0x11c0   :  { %6980 = vmatpush.bf16.msra.mxu2 %v14976_v22  ;;  %7009 = vmatpush.bf16.msra.mxu0 %v14920_v62  ;;  %v14653_v22 = vld [vmem:[#allocation18 + $0x440] sm:$0xf0]  ;;  %v15124_v62 = vor.u32 %v17620_v45, %v15123_v7 }
0x11c1   :  { %6998 = vmatpush.bf16.msra.mxu3 %v14724_v37  ;;  %v14656_v63 = vor.u32 %v17497_v34, %v14653_v22  ;;  %v17564_v37 = vld [vmem:[#allocation18 + $0x61c] sm:$0xf]  ;;  %v14867_v22 = vld [vmem:[#allocation18 + $0x598] sm:$0xf] }
0x11c2   :  { %v14936_v20 = vor.u32 %v17564_v37, %v14933_v50 }
0x11c4   :  { %6981 = vmatpush.bf16.msra.mxu2 %v14912_v11  ;;  %7010 = vmatpush.bf16.msra.mxu0 %v14856_v40  ;;  %v15116_v11 = vor.u32 %v17619_v10, %v15115_v60  ;;  %v17604_v40 = vld [vmem:[#allocation18 + $0x754] sm:$0xf0]  ;;  %v14795_v60 = vld [vmem:[#allocation18 + $0x510] sm:$0xf]  ;;  %v17531_v10 = vld [vmem:[#allocation18 + $0x514] sm:$0xf] }
0x11c5   :  { %6999 = vmatpush.bf16.msra.mxu3 %v14660_v3  ;;  %v17548_v3 = vld [vmem:[#allocation18 + $0x59c] sm:$0xf]  ;;  %v14800_v7 = vor.u32 %v17531_v10, %v14797_v46  ;;  %v17621_v10 = vld [vmem:[#allocation18 + $0x7dc] sm:$0xf0]  ;;  %v15133_v46 = vld [vmem:[#allocation18 + $0x7e0] sm:$0xf0] }
0x11c6   :  { %v14872_v38 = vor.u32 %v17548_v3, %v14869_v39  ;;  %v18346_v3 = vld [vmem:[#allocation17 + $0x1] ss:$0 sm:$0xff] }
0x11c8   :  { %6982 = vmatpush.bf16.msra.mxu2 %v14848_v19  ;;  %7011 = vmatpush.bf16.msra.mxu0 %v14792_v53  ;;  %v15053_v19 = vld [vmem:[#allocation18 + $0x750] sm:$0xf0]  ;;  %v14923_v53 = vld [vmem:[#allocation18 + $0x610] sm:$0xf] }
0x11c9   :  { %7048 = vmatpush.bf16.msrb.mxu3 %v15124_v62  ;;  %v14805_v62 = vld [vmem:[#allocation18 + $0x558] sm:$0xf0] }
0x11ca   :  { %v14808_v4 = vor.u32 %v17532_v21, %v14805_v62  ;;  %v15141_v21 = vld [vmem:[#allocation18 + $0x7e8] sm:$0xf0] }
0x11cc   :  { %6983 = vmatpush.bf16.msra.mxu2 %v14784_v6  ;;  %7012 = vmatpush.bf16.msra.mxu0 %v14728_v47  ;;  %v14996_v6 = vor.u32 %v17588_v15, %v14995_v35  ;;  %v14859_v47 = vld [vmem:[#allocation18 + $0x590] sm:$0xf]  ;;  %v14669_v15 = vld [vmem:[#allocation18 + $0x450] sm:$0xf0] }
0x11cd   :  { %v14860_v34 = vor.u32 %v17555_v48, %v14859_v47 }
0x11d0   :  { %6984 = vmatpush.bf16.msra.mxu2 %v14720_v29  ;;  %7013 = vmatpush.bf16.msra.mxu0 %v14664_v0  ;;  %v14932_v29 = vor.u32 %v17572_v56, %v14931_v27  ;;  %v17539_v0 = vld [vmem:[#allocation18 + $0x54c] sm:$0xf0] }
0x11d1   :  { %v14796_v32 = vor.u32 %v17539_v0, %v14795_v60  ;;  %v15131_v0 = vld [vmem:[#allocation18 + $0x7a0] sm:$0xf] }
0x11d4   :  { %6985 = vmatpush.bf16.msra.mxu2 %v14656_v63  ;;  %7062 = vmatpush.bf16.msrb.mxu0 %v15128_v2  ;;  %v14868_v63 = vor.u32 %v17556_v41, %v14867_v22  ;;  %v17523_v2 = vld [vmem:[#allocation18 + $0x4cc] sm:$0xf0]  ;;  %v18345_v22 = vld [vmem:[#allocation15 + $0x1] ss:$0 sm:$0xff] }
0x11d8   :  { %7034 = vmatpush.bf16.msrb.mxu2 %v15120_v13  ;;  %v17540_v13 = vld [vmem:[#allocation18 + $0x554] sm:$0xf0] }
0x1226   :  { %v6108_v17 = vpop.xlane.xlu0 %6107 }
0x1227   :  { %v6111_v58 = vmul.f32 %v6108_v17, %v19569_v1  ;;  %v15056_v17 = vor.u32 %v17595_v26, %v15053_v19  ;;  %v14732_v19 = vor.u32 %v17523_v2, %v14731_v12  ;;  %v17605_v12 = vld [vmem:[#allocation18 + $0x75c] sm:$0xf0] }
0x1229   :  { %v19936_v54 = vsub.f32 %v19927_v24, %v6111_v58  ;;  %v17537_v24 = vld [vmem:[#allocation18 + $0x53c] sm:$0xf0]  ;;  %v17596_v58 = vld [vmem:[#allocation18 + $0x71c] sm:$0xf]  ;;  %7035 = vmatpush.bf16.msrb.mxu2 %v15056_v17  ;;  %v14739_v17 = vld [vmem:[#allocation18 + $0x498] sm:$0xf] }
0x122a   :  { %v14780_v5 = vor.u32 %v17537_v24, %v14779_v23  ;;  %v17587_v23 = vld [vmem:[#allocation18 + $0x6cc] sm:$0xf0]  ;;  %v17579_v24 = vld [vmem:[#allocation18 + $0x694] sm:$0xf] }
0x122b   :  { %v6115_v28 = vmul.f32 %v19936_v54, %v19936_v54 }
0x122c   :  { %6969 = vmatpush.bf16.msra.mxu1 %v14780_v5  ;;  %v14989_v5 = vld [vmem:[#allocation18 + $0x6d0] sm:$0xf0] }
0x122d   :  { %6117 = vadd.xlane.f32.xlu2 %v6115_v28  ;;  %v15061_v28 = vld [vmem:[#allocation18 + $0x758] sm:$0xf0]  ;;  %v14992_v59 = vor.u32 %v17579_v24, %v14989_v5  ;;  %v14667_v24 = vld [vmem:[#allocation18 + $0x410] sm:$0xf]  ;;  %v17499_v5 = vld [vmem:[#allocation18 + $0x414] sm:$0xf] }
0x122e   :  { %v6110_v33 = vpop.xlane.xlu1 %6109  ;;  %v14672_v36 = vor.u32 %v17499_v5, %v14669_v15  ;;  %v15005_v5 = vld [vmem:[#allocation18 + $0x6e0] sm:$0xf0]  ;;  %v17590_v15 = vld [vmem:[#allocation18 + $0x6e4] sm:$0xf0] }
0x122f   :  { %v6112_v8 = vmul.f32 %v6110_v33, %v19569_v1  ;;  %v15060_v33 = vor.u32 %v17604_v40, %v15059_v14  ;;  %7036 = vmatpush.bf16.msrb.mxu2 %v14992_v59  ;;  %v14733_v14 = vld [vmem:[#allocation18 + $0x4d0] sm:$0xf0]  ;;  %v17524_v40 = vld [vmem:[#allocation18 + $0x4d4] sm:$0xf0] }
0x1230   :  { %v14675_v59 = vld [vmem:[#allocation18 + $0x418] sm:$0xf] }
0x1231   :  { %v19942_v30 = vsub.f32 %v19931_v18, %v6112_v8  ;;  %v14715_v18 = vld [vmem:[#allocation18 + $0x480] sm:$0xf]  ;;  %v15064_v8 = vor.u32 %v17596_v58, %v15061_v28  ;;  %7049 = vmatpush.bf16.msrb.mxu3 %v15060_v33  ;;  %v14740_v28 = vor.u32 %v17524_v40, %v14739_v17  ;;  %v17516_v33 = vld [vmem:[#allocation18 + $0x49c] sm:$0xf]  ;;  %v17606_v17 = vld [vmem:[#allocation18 + $0x764] sm:$0xf0] }
0x1232   :  { %v14716_v44 = vor.u32 %v17521_v25, %v14715_v18  ;;  %v17571_v18 = vld [vmem:[#allocation18 + $0x64c] sm:$0xf0]  ;;  %v17563_v25 = vld [vmem:[#allocation18 + $0x614] sm:$0xf]  ;;  %v17598_v40 = vld [vmem:[#allocation18 + $0x72c] sm:$0xf] }
0x1233   :  { %v6116_v51 = vmul.f32 %v19942_v30, %v19942_v30  ;;  %7063 = vmatpush.bf16.msrb.mxu0 %v15064_v8  ;;  %v14924_v43 = vor.u32 %v17571_v18, %v14923_v53  ;;  %v14741_v8 = vld [vmem:[#allocation18 + $0x4d8] sm:$0xf0] }
0x1234   :  { %6970 = vmatpush.bf16.msra.mxu1 %v14716_v44  ;;  %v14925_v44 = vld [vmem:[#allocation18 + $0x650] sm:$0xf0]  ;;  %v14677_v53 = vld [vmem:[#allocation18 + $0x458] sm:$0xf0] }
0x1235   :  { %6119 = vadd.xlane.f32.xlu0 %v6116_v51  ;;  %v14987_v51 = vld [vmem:[#allocation18 + $0x690] sm:$0xf]  ;;  %7050 = vmatpush.bf16.msrb.mxu3 %v14996_v6  ;;  %v14928_v52 = vor.u32 %v17563_v25, %v14925_v44  ;;  %v17508_v6 = vld [vmem:[#allocation18 + $0x454] sm:$0xf0] }
0x1236   :  { %v14988_v31 = vor.u32 %v17587_v23, %v14987_v51  ;;  %v14744_v23 = vor.u32 %v17516_v33, %v14741_v8  ;;  %v14676_v9 = vor.u32 %v17508_v6, %v14675_v59  ;;  %v15003_v8 = vld [vmem:[#allocation18 + $0x6a0] sm:$0xf]  ;;  %v17582_v59 = vld [vmem:[#allocation18 + $0x6ac] sm:$0xf] }
0x1237   :  { %7064 = vmatpush.bf16.msrb.mxu0 %v15000_v42  ;;  %7037 = vmatpush.bf16.msrb.mxu2 %v14928_v52  ;;  %v17500_v42 = vld [vmem:[#allocation18 + $0x41c] sm:$0xf]  ;;  %v15013_v6 = vld [vmem:[#allocation18 + $0x6e8] sm:$0xf0] }
0x1238   :  { %6971 = vmatpush.bf16.msra.mxu1 %v14652_v61  ;;  %v14861_v61 = vld [vmem:[#allocation18 + $0x5d0] sm:$0xf0]  ;;  %v14680_v18 = vor.u32 %v17500_v42, %v14677_v53  ;;  %v14939_v42 = vld [vmem:[#allocation18 + $0x620] sm:$0xf] }
0x1239   :  { %7051 = vmatpush.bf16.msrb.mxu3 %v14932_v29  ;;  %v14864_v49 = vor.u32 %v17547_v55, %v14861_v61  ;;  %v17573_v53 = vld [vmem:[#allocation18 + $0x65c] sm:$0xf0] }
0x123b   :  { %7065 = vmatpush.bf16.msrb.mxu0 %v14936_v20  ;;  %7038 = vmatpush.bf16.msrb.mxu2 %v14864_v49 }
0x123c   :  { %7020 = vmatpush.bf16.msrb.mxu1 %v15116_v11  ;;  %v14803_v11 = vld [vmem:[#allocation18 + $0x518] sm:$0xf] }
0x123d   :  { %7052 = vmatpush.bf16.msrb.mxu3 %v14868_v63  ;;  %v14804_v45 = vor.u32 %v17540_v13, %v14803_v11  ;;  %v15139_v11 = vld [vmem:[#allocation18 + $0x7a8] sm:$0xf] }
0x123f   :  { %7066 = vmatpush.bf16.msrb.mxu0 %v14872_v38  ;;  %7039 = vmatpush.bf16.msrb.mxu2 %v14800_v7 }
0x1240   :  { %7021 = vmatpush.bf16.msrb.mxu1 %v15052_v57  ;;  %v17515_v57 = vld [vmem:[#allocation18 + $0x494] sm:$0xf] }
0x1241   :  { %7053 = vmatpush.bf16.msrb.mxu3 %v14804_v45  ;;  %v14736_v58 = vor.u32 %v17515_v57, %v14733_v14  ;;  %v17622_v45 = vld [vmem:[#allocation18 + $0x7e4] sm:$0xf0] }
0x1242   :  { %v15140_v2 = vor.u32 %v17622_v45, %v15139_v11  ;;  %v15075_v14 = vld [vmem:[#allocation18 + $0x728] sm:$0xf] }
0x1243   :  { %7067 = vmatpush.bf16.msrb.mxu0 %v14808_v4  ;;  %7040 = vmatpush.bf16.msrb.mxu2 %v14736_v58  ;;  %v15132_v4 = vor.u32 %v17621_v10, %v15131_v0  ;;  %v15077_v58 = vld [vmem:[#allocation18 + $0x768] sm:$0xf0]  ;;  %v14819_v11 = vld [vmem:[#allocation18 + $0x528] sm:$0xf] }
0x1244   :  { %7022 = vmatpush.bf16.msrb.mxu1 %v14988_v31  ;;  %v17507_v31 = vld [vmem:[#allocation18 + $0x44c] sm:$0xf0]  ;;  %v17542_v45 = vld [vmem:[#allocation18 + $0x564] sm:$0xf0] }
0x1245   :  { %v14668_v35 = vor.u32 %v17507_v31, %v14667_v24  ;;  %7054 = vmatpush.bf16.msrb.mxu3 %v14740_v28  ;;  %v15080_v24 = vor.u32 %v17598_v40, %v15077_v58  ;;  %v17581_v31 = vld [vmem:[#allocation18 + $0x6a4] sm:$0xf]  ;;  %v17518_v40 = vld [vmem:[#allocation18 + $0x4ac] sm:$0xf] }
0x1246   :  { %v14757_v58 = vld [vmem:[#allocation18 + $0x4e8] sm:$0xf0] }
0x1247   :  { %7068 = vmatpush.bf16.msrb.mxu0 %v14744_v23  ;;  %7041 = vmatpush.bf16.msrb.mxu2 %v14672_v36  ;;  %v15076_v23 = vor.u32 %v17606_v17, %v15075_v14  ;;  %v14755_v14 = vld [vmem:[#allocation18 + $0x4a8] sm:$0xf] }
0x1248   :  { %7023 = vmatpush.bf16.msrb.mxu1 %v14924_v43  ;;  %v17526_v17 = vld [vmem:[#allocation18 + $0x4e4] sm:$0xf0] }
0x1249   :  { %7055 = vmatpush.bf16.msrb.mxu3 %v14676_v9  ;;  %v15008_v9 = vor.u32 %v17581_v31, %v15005_v5  ;;  %v14756_v31 = vor.u32 %v17526_v17, %v14755_v14  ;;  %v14760_v5 = vor.u32 %v17518_v40, %v14757_v58  ;;  %v14963_v14 = vld [vmem:[#allocation18 + $0x638] sm:$0xf]  ;;  %v17568_v40 = vld [vmem:[#allocation18 + $0x63c] sm:$0xf] }
0x124a   :  { %v17576_v17 = vld [vmem:[#allocation18 + $0x674] sm:$0xf0]  ;;  %v14965_v58 = vld [vmem:[#allocation18 + $0x678] sm:$0xf0] }
0x124b   :  { %7069 = vmatpush.bf16.msrb.mxu0 %v14680_v18 }
0x124c   :  { %7024 = vmatpush.bf16.msrb.mxu1 %v14860_v34 }
0x1250   :  { %7025 = vmatpush.bf16.msrb.mxu1 %v14796_v32  ;;  %v17613_v32 = vld [vmem:[#allocation18 + $0x7a4] sm:$0xf] }
0x1254   :  { %7026 = vmatpush.bf16.msrb.mxu1 %v14732_v19  ;;  %v15069_v19 = vld [vmem:[#allocation18 + $0x760] sm:$0xf0] }
0x1258   :  { %7027 = vmatpush.bf16.msrb.mxu1 %v14668_v35  ;;  %v15011_v35 = vld [vmem:[#allocation18 + $0x6a8] sm:$0xf] }
0x1259   :  { %v15012_v18 = vor.u32 %v17590_v15, %v15011_v35  ;;  %v14691_v35 = vld [vmem:[#allocation18 + $0x428] sm:$0xf] }
0x125a   :  { %v17510_v15 = vld [vmem:[#allocation18 + $0x464] sm:$0xf0] }
0x12a0   :  { %v6118_v16 = vpop.xlane.xlu2 %6117 }
0x12a1   :  { %v6121_v26 = vmul.f32 %v6118_v16, %v19569_v1  ;;  %v15136_v16 = vor.u32 %v17613_v32, %v15133_v46  ;;  %v17533_v32 = vld [vmem:[#allocation18 + $0x524] sm:$0xf] }
0x12a2   :  { %v14813_v46 = vld [vmem:[#allocation18 + $0x560] sm:$0xf0] }
0x12a3   :  { %v6123_v51 = vadd.f32 1e-05, %v6121_v26  ;;  %v17597_v26 = vld [vmem:[#allocation18 + $0x724] sm:$0xf] }
0x12a4   :  { %v15072_v33 = vor.u32 %v17597_v26, %v15069_v19  ;;  %v17517_v26 = vld [vmem:[#allocation18 + $0x4a4] sm:$0xf] }
0x12a5   :  { %18495 = vrsqrt.f32 %v6123_v51  ;;  %vm6131_vm14 = vweird.f32 %v6123_v51  ;;  %v14749_v19 = vld [vmem:[#allocation18 + $0x4e0] sm:$0xf0] }
0x12a8   :  { %v6120_v25 = vpop.xlane.xlu0 %6119 }
0x12a9   :  { %v6122_v43 = vmul.f32 %v6120_v25, %v19569_v1  ;;  %v15016_v25 = vor.u32 %v17582_v59, %v15013_v6  ;;  %v17502_v59 = vld [vmem:[#allocation18 + $0x42c] sm:$0xf] }
0x12aa   :  { %v14693_v6 = vld [vmem:[#allocation18 + $0x468] sm:$0xf0] }
0x12ab   :  { %v18496_v44 = vpop.eup %18495  ;;  %v6124_v27 = vadd.f32 1e-05, %v6122_v43  ;;  %v17565_v43 = vld [vmem:[#allocation18 + $0x624] sm:$0xf] }
0x12ac   :  { %v6126_v56 = vmul.f32 %v18496_v44, %v6123_v51  ;;  %vm6132_vm13 = vweird.f32 %v18496_v44  ;;  %v17589_v51 = vld [vmem:[#allocation18 + $0x6dc] sm:$0xf0] }
0x12ad   :  { %18497 = vrsqrt.f32 %v6124_v27  ;;  %vm6133_vm15 = vmor %vm6131_vm14, %vm6132_vm13  ;;  %vm6141_vm9 = vweird.f32 %v6124_v27  ;;  %v15004_v36 = vor.u32 %v17589_v51, %v15003_v8  ;;  %v14752_v8 = vor.u32 %v17517_v26, %v14749_v19  ;;  %v17509_v51 = vld [vmem:[#allocation18 + $0x45c] sm:$0xf0]  ;;  %v17567_v26 = vld [vmem:[#allocation18 + $0x634] sm:$0xf] }
0x12ae   :  { %v6127_v52 = vmul.f32 %v18496_v44, %v6126_v56  ;;  %v17574_v56 = vld [vmem:[#allocation18 + $0x664] sm:$0xf0]  ;;  %v14957_v19 = vld [vmem:[#allocation18 + $0x670] sm:$0xf0] }
0x12b0   :  { %v6128_v29 = vmul.f32 0.5, %v6127_v52  ;;  %v17566_v52 = vld [vmem:[#allocation18 + $0x62c] sm:$0xf] }
0x12b2   :  { %v6129_v37 = vsub.f32 1.5, %v6128_v29  ;;  %v14949_v29 = vld [vmem:[#allocation18 + $0x668] sm:$0xf0] }
0x12b3   :  { %v18498_v50 = vpop.eup %18497 }
0x12b4   :  { %v6130_v20 = vmul.f32 %v18496_v44, %v6129_v37  ;;  %v6136_v47 = vmul.f32 %v18498_v50, %v6124_v27  ;;  %vm6142_vm8 = vweird.f32 %v18498_v50  ;;  %v14947_v27 = vld [vmem:[#allocation18 + $0x628] sm:$0xf]  ;;  %v14940_v37 = vor.u32 %v17573_v53, %v14939_v42  ;;  %v17615_v42 = vld [vmem:[#allocation18 + $0x7b4] sm:$0xf] }
0x12b5   :  { %vm6143_vm10 = vmor %vm6141_vm9, %vm6142_vm8  ;;  %v15149_v53 = vld [vmem:[#allocation18 + $0x7f0] sm:$0xf0] }
0x12b6   :  { %v6137_v48 = vmul.f32 %v18498_v50, %v6136_v47  ;;  %v6134_v55 = vsel %vm6133_vm15, %v18496_v44, %v6130_v20  ;;  %v14941_v44 = vld [vmem:[#allocation18 + $0x660] sm:$0xf0]  ;;  %v14875_v20 = vld [vmem:[#allocation18 + $0x5a0] sm:$0xf] }
0x12b7   :  { %v6145_v41 = vmul.f32 %v6134_v55, %v19936_v54  ;;  %v17614_v54 = vld [vmem:[#allocation18 + $0x7ac] sm:$0xf]  ;;  %v17557_v47 = vld [vmem:[#allocation18 + $0x5dc] sm:$0xf0]  ;;  %v14952_v55 = vor.u32 %v17566_v52, %v14949_v29  ;;  %v14692_v52 = vor.u32 %v17510_v15, %v14691_v35  ;;  %v14696_v29 = vor.u32 %v17502_v59, %v14693_v6  ;;  %v14899_v35 = vld [vmem:[#allocation18 + $0x5b8] sm:$0xf] }
0x12b8   :  { %v6138_v34 = vmul.f32 0.5, %v6137_v48  ;;  %v15144_v57 = vor.u32 %v17614_v54, %v15141_v21  ;;  %v14948_v48 = vor.u32 %v17574_v56, %v14947_v27  ;;  %v17534_v54 = vld [vmem:[#allocation18 + $0x52c] sm:$0xf]  ;;  %v17616_v27 = vld [vmem:[#allocation18 + $0x7bc] sm:$0xf] }
0x12b9   :  { %v6150_v39 = vmul.f32 %v18345_v22, %v6145_v41  ;;  %v17558_v41 = vld [vmem:[#allocation18 + $0x5e4] sm:$0xf0]  ;;  %v14821_v21 = vld [vmem:[#allocation18 + $0x568] sm:$0xf0]  ;;  %v15157_v56 = vld [vmem:[#allocation18 + $0x7f8] sm:$0xf0] }
0x12ba   :  { %v6139_v61 = vsub.f32 1.5, %v6138_v34  ;;  %v17549_v34 = vld [vmem:[#allocation18 + $0x5a4] sm:$0xf]  ;;  %v17560_v15 = vld [vmem:[#allocation18 + $0x5f4] sm:$0xf0] }
0x12bb   :  { %v19950_v13 = vadd.f32 %v18346_v3, %v6150_v39  ;;  %v17552_v59 = vld [vmem:[#allocation18 + $0x5bc] sm:$0xf] }
0x12bc   :  { %v6140_v49 = vmul.f32 %v18498_v50, %v6139_v61  ;;  %v14877_v61 = vld [vmem:[#allocation18 + $0x5e0] sm:$0xf0]  ;;  %v14901_v6 = vld [vmem:[#allocation18 + $0x5f8] sm:$0xf0] }
0x12bd   :  { %v14880_v39 = vor.u32 %v17549_v34, %v14877_v61  ;;  %v17599_v34 = vld [vmem:[#allocation18 + $0x734] sm:$0xf] }
0x12be   :  { %v6144_v63 = vsel %vm6143_vm10, %v18498_v50, %v6140_v49  ;;  %v14944_v50 = vor.u32 %v17565_v43, %v14941_v44  ;;  %v17550_v49 = vld [vmem:[#allocation18 + $0x5ac] sm:$0xf]  ;;  %v17624_v44 = vld [vmem:[#allocation18 + $0x7f4] sm:$0xf0]  ;;  %v15085_v61 = vld [vmem:[#allocation18 + $0x770] sm:$0xf0] }
0x12bf   :  { %v6146_v38 = vmul.f32 %v6144_v63, %v19942_v30  ;;  %v15067_v30 = vld [vmem:[#allocation18 + $0x720] sm:$0xf]  ;;  %v14885_v63 = vld [vmem:[#allocation18 + $0x5e8] sm:$0xf0] }
0x12c0   :  { %v15068_v28 = vor.u32 %v17605_v12, %v15067_v30  ;;  %v14888_v10 = vor.u32 %v17550_v49, %v14885_v63  ;;  %v14747_v30 = vld [vmem:[#allocation18 + $0x4a0] sm:$0xf]  ;;  %v17600_v49 = vld [vmem:[#allocation18 + $0x73c] sm:$0xf] }
0x12c1   :  { %v6151_v60 = vmul.f32 %v18345_v22, %v6146_v38  ;;  %v14883_v22 = vld [vmem:[#allocation18 + $0x5a8] sm:$0xf]  ;;  %v14811_v38 = vld [vmem:[#allocation18 + $0x520] sm:$0xf]  ;;  %v15093_v63 = vld [vmem:[#allocation18 + $0x778] sm:$0xf0] }
0x12c2   :  { %v14884_v0 = vor.u32 %v17558_v41, %v14883_v22  ;;  %v17525_v12 = vld [vmem:[#allocation18 + $0x4dc] sm:$0xf0]  ;;  %v15091_v22 = vld [vmem:[#allocation18 + $0x738] sm:$0xf] }
0x12c3   :  { %v19952_v7 = vadd.f32 %v18346_v3, %v6151_v60  ;;  %v14876_v3 = vor.u32 %v17557_v47, %v14875_v20  ;;  %v17541_v60 = vld [vmem:[#allocation18 + $0x55c] sm:$0xf0]  ;;  %v15083_v20 = vld [vmem:[#allocation18 + $0x730] sm:$0xf]  ;;  %v17608_v41 = vld [vmem:[#allocation18 + $0x774] sm:$0xf0] }
0x12c4   :  { %v17607_v47 = vld [vmem:[#allocation18 + $0x76c] sm:$0xf0] }
0x12c5   :  { %v19956_v62 = vpack.c.bf16 %v19952_v7, %v19950_v13 }
0x12c7   :  { %6972 = vmatmul.bf16.vlgmr.msra.gmra.mxu1 %v19956_v62  ;;  %6986 = vmatmul.bf16.vlgmr.msra.gmra.mxu2 %v19956_v62 }
0x12c8   :  { %7000 = vmatmul.bf16.vlgmr.msra.gmra.mxu3 %v19956_v62  ;;  %7014 = vmatmul.bf16.vlgmr.msra.gmra.mxu0 %v19956_v62 }
0x12c9   :  { %7076 = vmatpush.bf16.msra.mxu1 %v15132_v4  ;;  %7090 = vmatpush.bf16.msra.mxu2 %v15136_v16  ;;  %v14812_v4 = vor.u32 %v17541_v60, %v14811_v38  ;;  %v14816_v16 = vor.u32 %v17533_v32, %v14813_v46  ;;  %v15019_v38 = vld [vmem:[#allocation18 + $0x6b0] sm:$0xf]  ;;  %v17583_v32 = vld [vmem:[#allocation18 + $0x6b4] sm:$0xf] }
0x12ca   :  { %7104 = vmatpush.bf16.msra.mxu3 %v15140_v2  ;;  %7118 = vmatpush.bf16.msra.mxu0 %v15144_v57  ;;  %v14820_v2 = vor.u32 %v17542_v45, %v14819_v11  ;;  %v14824_v57 = vor.u32 %v17534_v54, %v14821_v21  ;;  %v17591_v60 = vld [vmem:[#allocation18 + $0x6ec] sm:$0xf0]  ;;  %v15021_v46 = vld [vmem:[#allocation18 + $0x6f0] sm:$0xf0]  ;;  %v15027_v11 = vld [vmem:[#allocation18 + $0x6b8] sm:$0xf] }
0x12cb   :  { %v17592_v45 = vld [vmem:[#allocation18 + $0x6f4] sm:$0xf0]  ;;  %v17584_v54 = vld [vmem:[#allocation18 + $0x6bc] sm:$0xf] }
0x12cc   :  { %v15029_v21 = vld [vmem:[#allocation18 + $0x6f8] sm:$0xf0] }
0x12cd   :  { %7077 = vmatpush.bf16.msra.mxu1 %v15068_v28  ;;  %7091 = vmatpush.bf16.msra.mxu2 %v15072_v33  ;;  %v14683_v28 = vld [vmem:[#allocation18 + $0x420] sm:$0xf]  ;;  %v14748_v33 = vor.u32 %v17525_v12, %v14747_v30  ;;  %v14955_v30 = vld [vmem:[#allocation18 + $0x630] sm:$0xf] }
0x12ce   :  { %7105 = vmatpush.bf16.msra.mxu3 %v15076_v23  ;;  %7119 = vmatpush.bf16.msra.mxu0 %v15080_v24  ;;  %v17501_v23 = vld [vmem:[#allocation18 + $0x424] sm:$0xf]  ;;  %v17575_v12 = vld [vmem:[#allocation18 + $0x66c] sm:$0xf0] }
0x12cf   :  { %v14685_v24 = vld [vmem:[#allocation18 + $0x460] sm:$0xf0] }
0x12d0   :  { %v14688_v43 = vor.u32 %v17501_v23, %v14685_v24  ;;  %v14964_v23 = vor.u32 %v17576_v17, %v14963_v14  ;;  %v14968_v24 = vor.u32 %v17568_v40, %v14965_v58  ;;  %v17631_v14 = vld [vmem:[#allocation21 + $0x430] sm:$0xff] }
0x12d1   :  { %7078 = vmatpush.bf16.msra.mxu1 %v15004_v36  ;;  %7092 = vmatpush.bf16.msra.mxu2 %v15008_v9  ;;  %v15147_v36 = vld [vmem:[#allocation18 + $0x7b0] sm:$0xf]  ;;  %v17655_v17 = vld [vmem:[#allocation21 + $0x4f0] sm:$0xff] }
0x12d2   :  { %7106 = vmatpush.bf16.msra.mxu3 %v15012_v18  ;;  %7120 = vmatpush.bf16.msra.mxu0 %v15016_v25  ;;  %v17623_v9 = vld [vmem:[#allocation18 + $0x7ec] sm:$0xf0]  ;;  %v15155_v18 = vld [vmem:[#allocation18 + $0x7b8] sm:$0xf]  ;;  %v14684_v25 = vor.u32 %v17509_v51, %v14683_v28  ;;  %v14956_v28 = vor.u32 %v17575_v12, %v14955_v30  ;;  %v17639_v40 = vld [vmem:[#allocation21 + $0x470] sm:$0xff] }
0x12d3   :  { %v17559_v51 = vld [vmem:[#allocation18 + $0x5ec] sm:$0xf0]  ;;  %v17647_v58 = vld [vmem:[#allocation21 + $0x4b0] sm:$0xff] }
0x12d5   :  { %7079 = vmatpush.bf16.msra.mxu1 %v14940_v37  ;;  %7093 = vmatpush.bf16.msra.mxu2 %v14944_v50  ;;  %v15148_v37 = vor.u32 %v17623_v9, %v15147_v36  ;;  %v15152_v50 = vor.u32 %v17615_v42, %v15149_v53  ;;  %v14827_v42 = vld [vmem:[#allocation18 + $0x530] sm:$0xf] }
0x12d6   :  { %7107 = vmatpush.bf16.msra.mxu3 %v14948_v48  ;;  %7121 = vmatpush.bf16.msra.mxu0 %v14952_v55  ;;  %v15156_v48 = vor.u32 %v17624_v44, %v15155_v18  ;;  %v15160_v55 = vor.u32 %v17616_v27, %v15157_v56  ;;  %v17543_v53 = vld [vmem:[#allocation18 + $0x56c] sm:$0xf0]  ;;  %v14900_v18 = vor.u32 %v17560_v15, %v14899_v35  ;;  %v14829_v44 = vld [vmem:[#allocation18 + $0x570] sm:$0xf0]  ;;  %v14835_v27 = vld [vmem:[#allocation18 + $0x538] sm:$0xf] }
0x12d7   :  { %7028 = vmatmul.bf16.vlgmr.msrb.gmra.mxu1 %v19956_v62  ;;  %7042 = vmatmul.bf16.vlgmr.msrb.gmra.mxu2 %v19956_v62  ;;  %v17544_v56 = vld [vmem:[#allocation18 + $0x574] sm:$0xf0]  ;;  %v17652_v35 = vld [vmem:[#allocation21 + $0x4d8] sm:$0xff] }
0x12d8   :  { %7056 = vmatmul.bf16.vlgmr.msrb.gmra.mxu3 %v19956_v62  ;;  %7070 = vmatmul.bf16.vlgmr.msrb.gmra.mxu0 %v19956_v62  ;;  %v17636_v15 = vld [vmem:[#allocation21 + $0x458] sm:$0xff] }
0x12d9   :  { %7080 = vmatpush.bf16.msra.mxu1 %v14876_v3  ;;  %7094 = vmatpush.bf16.msra.mxu2 %v14880_v39  ;;  %v15084_v3 = vor.u32 %v17607_v47, %v15083_v20  ;;  %v15088_v39 = vor.u32 %v17599_v34, %v15085_v61  ;;  %v14763_v20 = vld [vmem:[#allocation18 + $0x4b0] sm:$0xf]  ;;  %v17519_v34 = vld [vmem:[#allocation18 + $0x4b4] sm:$0xf] }
0x12da   :  { %7108 = vmatpush.bf16.msra.mxu3 %v14884_v0  ;;  %7122 = vmatpush.bf16.msra.mxu0 %v14888_v10  ;;  %v15092_v0 = vor.u32 %v17608_v41, %v15091_v22  ;;  %v15096_v10 = vor.u32 %v17600_v49, %v15093_v63  ;;  %v17527_v47 = vld [vmem:[#allocation18 + $0x4ec] sm:$0xf0]  ;;  %v14765_v61 = vld [vmem:[#allocation18 + $0x4f0] sm:$0xf0]  ;;  %v14771_v22 = vld [vmem:[#allocation18 + $0x4b8] sm:$0xf] }
0x12db   :  { %v17528_v41 = vld [vmem:[#allocation18 + $0x4f4] sm:$0xf0]  ;;  %v17520_v49 = vld [vmem:[#allocation18 + $0x4bc] sm:$0xf] }
0x12dc   :  { %v14773_v63 = vld [vmem:[#allocation18 + $0x4f8] sm:$0xf0] }
0x12dd   :  { %7081 = vmatpush.bf16.msra.mxu1 %v14812_v4  ;;  %7095 = vmatpush.bf16.msra.mxu2 %v14816_v16  ;;  %v15020_v4 = vor.u32 %v17591_v60, %v15019_v38  ;;  %v15024_v16 = vor.u32 %v17583_v32, %v15021_v46  ;;  %v14699_v38 = vld [vmem:[#allocation18 + $0x430] sm:$0xf]  ;;  %v17503_v32 = vld [vmem:[#allocation18 + $0x434] sm:$0xf] }
0x12de   :  { %7109 = vmatpush.bf16.msra.mxu3 %v14820_v2  ;;  %7123 = vmatpush.bf16.msra.mxu0 %v14824_v57  ;;  %v15028_v2 = vor.u32 %v17592_v45, %v15027_v11  ;;  %v15032_v57 = vor.u32 %v17584_v54, %v15029_v21  ;;  %v17511_v60 = vld [vmem:[#allocation18 + $0x46c] sm:$0xf0]  ;;  %v14701_v46 = vld [vmem:[#allocation18 + $0x470] sm:$0xf0]  ;;  %v14707_v11 = vld [vmem:[#allocation18 + $0x438] sm:$0xf] }
0x12df   :  { %v17512_v45 = vld [vmem:[#allocation18 + $0x474] sm:$0xf0]  ;;  %v17504_v54 = vld [vmem:[#allocation18 + $0x43c] sm:$0xf] }
0x12e0   :  { %v14709_v21 = vld [vmem:[#allocation18 + $0x478] sm:$0xf0]  ;;  %v14708_v30 = vor.u32 %v17512_v45, %v14707_v11  ;;  %v17683_v11 = vld [vmem:[#allocation21 + $0x5d0] sm:$0xff] }
0x12e1   :  { %7082 = vmatpush.bf16.msra.mxu1 %v14748_v33  ;;  %7096 = vmatpush.bf16.msra.mxu2 %v14752_v8  ;;  %v14960_v33 = vor.u32 %v17567_v26, %v14957_v19  ;;  %v14891_v8 = vld [vmem:[#allocation18 + $0x5b0] sm:$0xf]  ;;  %v14712_v12 = vor.u32 %v17504_v54, %v14709_v21  ;;  %v17640_v26 = vld [vmem:[#allocation21 + $0x478] sm:$0xff]  ;;  %v17667_v45 = vld [vmem:[#allocation21 + $0x550] sm:$0xff] }
0x12e2   :  { %7110 = vmatpush.bf16.msra.mxu3 %v14756_v31  ;;  %7124 = vmatpush.bf16.msra.mxu0 %v14760_v5  ;;  %v17551_v31 = vld [vmem:[#allocation18 + $0x5b4] sm:$0xf]  ;;  %v14892_v36 = vor.u32 %v17559_v51, %v14891_v8  ;;  %v17648_v19 = vld [vmem:[#allocation21 + $0x4b8] sm:$0xff]  ;;  %v17638_v8 = vld [vmem:[#allocation21 + $0x468] sm:$0xff] }
0x12e3   :  { %v14893_v5 = vld [vmem:[#allocation18 + $0x5f0] sm:$0xf0]  ;;  %v17646_v51 = vld [vmem:[#allocation21 + $0x4a8] sm:$0xff]  ;;  %v17675_v54 = vld [vmem:[#allocation21 + $0x590] sm:$0xff] }
0x12e4   :  { %v14896_v9 = vor.u32 %v17551_v31, %v14893_v5  ;;  %v17637_v31 = vld [vmem:[#allocation21 + $0x460] sm:$0xff]  ;;  %v17628_v5 = vld [vmem:[#allocation21 + $0x418] sm:$0xff]  ;;  %v17658_v21 = vld [vmem:[#allocation21 + $0x508] sm:$0xff] }
0x12e5   :  { %7083 = vmatpush.bf16.msra.mxu1 %v14684_v25  ;;  %7097 = vmatpush.bf16.msra.mxu2 %v14688_v43  ;;  %v14904_v25 = vor.u32 %v17552_v59, %v14901_v6  ;;  %v17535_v43 = vld [vmem:[#allocation18 + $0x534] sm:$0xf]  ;;  %v17644_v59 = vld [vmem:[#allocation21 + $0x498] sm:$0xff]  ;;  %v17627_v6 = vld [vmem:[#allocation21 + $0x410] sm:$0xff] }
0x12e6   :  { %7111 = vmatpush.bf16.msra.mxu3 %v14692_v52  ;;  %7125 = vmatpush.bf16.msra.mxu0 %v14696_v29  ;;  %v17536_v52 = vld [vmem:[#allocation18 + $0x53c] sm:$0xf] }
0x12e7   :  { %v14837_v29 = vld [vmem:[#allocation18 + $0x578] sm:$0xf0] }
0x12e8   :  { %7084 = vmatmul.bf16.vlgmr.msra.gmra.mxu1 %v19956_v62  ;;  %7098 = vmatmul.bf16.vlgmr.msra.gmra.mxu2 %v19956_v62 }
0x12e9   :  { %7132 = vmatpush.bf16.msrb.mxu1 %v15148_v37  ;;  %7146 = vmatpush.bf16.msrb.mxu2 %v15152_v50  ;;  %v14828_v37 = vor.u32 %v17543_v53, %v14827_v42  ;;  %v14832_v50 = vor.u32 %v17535_v43, %v14829_v44  ;;  %v17643_v42 = vld [vmem:[#allocation21 + $0x490] sm:$0xff]  ;;  %v17626_v53 = vld [vmem:[#allocation21 + $0x408] sm:$0xff]  ;;  %v17625_v44 = vld [vmem:[#allocation21 + $0x400] sm:$0xff] }
0x12ea   :  { %7160 = vmatpush.bf16.msrb.mxu3 %v15156_v48  ;;  %7174 = vmatpush.bf16.msrb.mxu0 %v15160_v55  ;;  %v14836_v48 = vor.u32 %v17544_v56, %v14835_v27  ;;  %v14840_v55 = vor.u32 %v17536_v52, %v14837_v29  ;;  %v17642_v43 = vld [vmem:[#allocation21 + $0x488] sm:$0xff]  ;;  %v17649_v27 = vld [vmem:[#allocation21 + $0x4c0] sm:$0xff]  ;;  %v17664_v56 = vld [vmem:[#allocation21 + $0x538] sm:$0xff] }
0x12eb   :  { %7112 = vmatmul.bf16.vlgmr.msra.gmra.mxu3 %v19956_v62  ;;  %7126 = vmatmul.bf16.vlgmr.msra.gmra.mxu0 %v19956_v62  ;;  %v17688_v52 = vld [vmem:[#allocation21 + $0x5f8] sm:$0xff]  ;;  %v17633_v29 = vld [vmem:[#allocation21 + $0x440] sm:$0xff] }
0x12ed   :  { %7133 = vmatpush.bf16.msrb.mxu1 %v15084_v3  ;;  %7147 = vmatpush.bf16.msrb.mxu2 %v15088_v39  ;;  %v14764_v3 = vor.u32 %v17527_v47, %v14763_v20  ;;  %v14768_v39 = vor.u32 %v17519_v34, %v14765_v61  ;;  %v17680_v20 = vld [vmem:[#allocation21 + $0x5b8] sm:$0xff]  ;;  %v17663_v47 = vld [vmem:[#allocation21 + $0x530] sm:$0xff]  ;;  %v17662_v61 = vld [vmem:[#allocation21 + $0x528] sm:$0xff] }
0x12ee   :  { %7161 = vmatpush.bf16.msrb.mxu3 %v15092_v0  ;;  %7175 = vmatpush.bf16.msrb.mxu0 %v15096_v10  ;;  %v14772_v0 = vor.u32 %v17528_v41, %v14771_v22  ;;  %v14776_v10 = vor.u32 %v17520_v49, %v14773_v63  ;;  %v17679_v34 = vld [vmem:[#allocation21 + $0x5b0] sm:$0xff]  ;;  %v17686_v22 = vld [vmem:[#allocation21 + $0x5e8] sm:$0xff]  ;;  %v17661_v63 = vld [vmem:[#allocation21 + $0x520] sm:$0xff] }
0x12ef   :  { %v17670_v41 = vld [vmem:[#allocation21 + $0x568] sm:$0xff] }
0x12f0   :  { %v17678_v49 = vld [vmem:[#allocation21 + $0x5a8] sm:$0xff] }
0x12f1   :  { %7134 = vmatpush.bf16.msrb.mxu1 %v15020_v4  ;;  %7148 = vmatpush.bf16.msrb.mxu2 %v15024_v16  ;;  %v14700_v4 = vor.u32 %v17511_v60, %v14699_v38  ;;  %v14704_v16 = vor.u32 %v17503_v32, %v14701_v46  ;;  %v17677_v38 = vld [vmem:[#allocation21 + $0x5a0] sm:$0xff]  ;;  %v17660_v60 = vld [vmem:[#allocation21 + $0x518] sm:$0xff]  ;;  %v17659_v46 = vld [vmem:[#allocation21 + $0x510] sm:$0xff] }
0x12f2   :  { %7162 = vmatpush.bf16.msrb.mxu3 %v15028_v2  ;;  %7176 = vmatpush.bf16.msrb.mxu0 %v15032_v57  ;;  %v17632_v2 = vld [vmem:[#allocation21 + $0x438] sm:$0xff] }
0x12f3   :  { %v17656_v57 = vld [vmem:[#allocation21 + $0x4f8] sm:$0xff] }
0x12f4   :  { %v17676_v32 = vld [vmem:[#allocation21 + $0x598] sm:$0xff] }
0x12f5   :  { %7135 = vmatpush.bf16.msrb.mxu1 %v14956_v28  ;;  %7149 = vmatpush.bf16.msrb.mxu2 %v14960_v33  ;;  %v17630_v28 = vld [vmem:[#allocation21 + $0x428] sm:$0xff] }
0x12f6   :  { %7163 = vmatpush.bf16.msrb.mxu3 %v14964_v23  ;;  %7177 = vmatpush.bf16.msrb.mxu0 %v14968_v24  ;;  %v17654_v33 = vld [vmem:[#allocation21 + $0x4e8] sm:$0xff]  ;;  %v17629_v23 = vld [vmem:[#allocation21 + $0x420] sm:$0xff] }
0x12f7   :  { %v17653_v24 = vld [vmem:[#allocation21 + $0x4e0] sm:$0xff] }
0x12f9   :  { %7136 = vmatpush.bf16.msrb.mxu1 %v14892_v36  ;;  %7150 = vmatpush.bf16.msrb.mxu2 %v14896_v9  ;;  %v17651_v36 = vld [vmem:[#allocation21 + $0x4d0] sm:$0xff] }
0x12fa   :  { %7164 = vmatpush.bf16.msrb.mxu3 %v14900_v18  ;;  %7178 = vmatpush.bf16.msrb.mxu0 %v14904_v25  ;;  %v17635_v9 = vld [vmem:[#allocation21 + $0x450] sm:$0xff]  ;;  %v17650_v18 = vld [vmem:[#allocation21 + $0x4c8] sm:$0xff] }
0x12fb   :  { %v17634_v25 = vld [vmem:[#allocation21 + $0x448] sm:$0xff] }
0x12fd   :  { %7137 = vmatpush.bf16.msrb.mxu1 %v14828_v37  ;;  %7151 = vmatpush.bf16.msrb.mxu2 %v14832_v50  ;;  %v17641_v37 = vld [vmem:[#allocation21 + $0x480] sm:$0xff]  ;;  %v17672_v50 = vld [vmem:[#allocation21 + $0x578] sm:$0xff] }
0x12fe   :  { %7165 = vmatpush.bf16.msrb.mxu3 %v14836_v48  ;;  %7179 = vmatpush.bf16.msrb.mxu0 %v14840_v55  ;;  %v17687_v48 = vld [vmem:[#allocation21 + $0x5f0] sm:$0xff] }
0x12ff   :  { %v17671_v55 = vld [vmem:[#allocation21 + $0x570] sm:$0xff] }
0x1301   :  { %7138 = vmatpush.bf16.msrb.mxu1 %v14764_v3  ;;  %7152 = vmatpush.bf16.msrb.mxu2 %v14768_v39  ;;  %v17685_v3 = vld [vmem:[#allocation21 + $0x5e0] sm:$0xff] }
0x1302   :  { %7166 = vmatpush.bf16.msrb.mxu3 %v14772_v0  ;;  %7180 = vmatpush.bf16.msrb.mxu0 %v14776_v10  ;;  %v17669_v39 = vld [vmem:[#allocation21 + $0x560] sm:$0xff]  ;;  %v17684_v0 = vld [vmem:[#allocation21 + $0x5d8] sm:$0xff] }
0x1303   :  { %v17668_v10 = vld [vmem:[#allocation21 + $0x558] sm:$0xff] }
0x1305   :  { %7139 = vmatpush.bf16.msrb.mxu1 %v14700_v4  ;;  %7153 = vmatpush.bf16.msrb.mxu2 %v14704_v16  ;;  %v17682_v4 = vld [vmem:[#allocation21 + $0x5c8] sm:$0xff] }
0x1306   :  { %7167 = vmatpush.bf16.msrb.mxu3 %v14708_v30  ;;  %7181 = vmatpush.bf16.msrb.mxu0 %v14712_v12  ;;  %v17666_v16 = vld [vmem:[#allocation21 + $0x548] sm:$0xff]  ;;  %v17657_v12 = vld [vmem:[#allocation21 + $0x500] sm:$0xff] }
0x1307   :  { %v17674_v30 = vld [vmem:[#allocation21 + $0x588] sm:$0xff] }
0x1308   :  { %7140 = vmatmul.bf16.vlgmr.msrb.gmra.mxu1 %v19956_v62  ;;  %7154 = vmatmul.bf16.vlgmr.msrb.gmra.mxu2 %v19956_v62 }
0x1309   :  { %8266 = vmatpush.bf16.msra.mxu1 %v17632_v2  ;;  %7168 = vmatmul.bf16.vlgmr.msrb.gmra.mxu3 %v19956_v62  ;;  %v17681_v2 = vld [vmem:[#allocation21 + $0x5c0] sm:$0xff] }
0x130a   :  { %8308 = vmatpush.bf16.msra.mxu0 %v17656_v57  ;;  %8280 = vmatpush.bf16.msra.mxu2 %v17640_v26  ;;  %v17665_v57 = vld [vmem:[#allocation21 + $0x540] sm:$0xff] }
0x130b   :  { %7182 = vmatmul.bf16.vlgmr.msrb.gmra.mxu0 %v19956_v62  ;;  %8294 = vmatpush.bf16.msra.mxu3 %v17648_v19  ;;  %v17645_v62 = vld [vmem:[#allocation21 + $0x4a0] sm:$0xff] }
0x130c   :  { %v17673_v26 = vld [vmem:[#allocation21 + $0x580] sm:$0xff] }
0x130d   :  { %8267 = vmatpush.bf16.msra.mxu1 %v17631_v14  ;;  %v19974_v19 = vld [vmem:[#allocation20 + $0x10] sm:$0xff] }
0x130e   :  { %8309 = vmatpush.bf16.msra.mxu0 %v17655_v17  ;;  %8281 = vmatpush.bf16.msra.mxu2 %v17639_v40  ;;  %v6292_v40 = vperm.slane %v19974_v19, 0 }
0x130f   :  { %8295 = vmatpush.bf16.msra.mxu3 %v17647_v58  ;;  %v6295_v58 = vperm.slane %v19974_v19, 3 }
0x1311   :  { %8268 = vmatpush.bf16.msra.mxu1 %v17630_v28 }
0x1312   :  { %8310 = vmatpush.bf16.msra.mxu0 %v17654_v33  ;;  %8282 = vmatpush.bf16.msra.mxu2 %v17638_v8 }
0x1313   :  { %8296 = vmatpush.bf16.msra.mxu3 %v17646_v51 }
0x1315   :  { %8269 = vmatpush.bf16.msra.mxu1 %v17629_v23 }
0x1316   :  { %8311 = vmatpush.bf16.msra.mxu0 %v17653_v24  ;;  %8283 = vmatpush.bf16.msra.mxu2 %v17637_v31  ;;  %v6293_v24 = vperm.slane %v19974_v19, 1 }
0x1317   :  { %8297 = vmatpush.bf16.msra.mxu3 %v17645_v62 }
0x1319   :  { %8270 = vmatpush.bf16.msra.mxu1 %v17628_v5  ;;  %v6294_v5 = vperm.slane %v19974_v19, 2 }
0x131a   :  { %8312 = vmatpush.bf16.msra.mxu0 %v17652_v35  ;;  %8284 = vmatpush.bf16.msra.mxu2 %v17636_v15 }
0x131b   :  { %8298 = vmatpush.bf16.msra.mxu3 %v17644_v59 }
0x131d   :  { %8271 = vmatpush.bf16.msra.mxu1 %v17627_v6 }
0x131e   :  { %8313 = vmatpush.bf16.msra.mxu0 %v17651_v36  ;;  %8285 = vmatpush.bf16.msra.mxu2 %v17635_v9  ;;  %v17696_v9 = vld [vmem:[#allocation21 + $0x638] sm:$0xff] }
0x131f   :  { %8299 = vmatpush.bf16.msra.mxu3 %v17643_v42 }
0x1321   :  { %8272 = vmatpush.bf16.msra.mxu1 %v17626_v53 }
0x1322   :  { %8314 = vmatpush.bf16.msra.mxu0 %v17650_v18  ;;  %8286 = vmatpush.bf16.msra.mxu2 %v17634_v25  ;;  %v17720_v18 = vld [vmem:[#allocation21 + $0x6f8] sm:$0xff] }
0x1323   :  { %8300 = vmatpush.bf16.msra.mxu3 %v17642_v43 }
0x1325   :  { %8273 = vmatpush.bf16.msra.mxu1 %v17625_v44 }
0x1326   :  { %8315 = vmatpush.bf16.msra.mxu0 %v17649_v27  ;;  %8287 = vmatpush.bf16.msra.mxu2 %v17633_v29 }
0x1327   :  { %8301 = vmatpush.bf16.msra.mxu3 %v17641_v37  ;;  %v17695_v37 = vld [vmem:[#allocation21 + $0x630] sm:$0xff] }
0x1329   :  { %8322 = vmatpush.bf16.msrb.mxu1 %v17664_v56 }
0x132a   :  { %8364 = vmatpush.bf16.msrb.mxu0 %v17688_v52  ;;  %8336 = vmatpush.bf16.msrb.mxu2 %v17672_v50 }
0x132b   :  { %8350 = vmatpush.bf16.msrb.mxu3 %v17680_v20 }
0x132d   :  { %8323 = vmatpush.bf16.msrb.mxu1 %v17663_v47 }
0x132e   :  { %8365 = vmatpush.bf16.msrb.mxu0 %v17687_v48  ;;  %8337 = vmatpush.bf16.msrb.mxu2 %v17671_v55  ;;  %v17719_v48 = vld [vmem:[#allocation21 + $0x6f0] sm:$0xff] }
0x132f   :  { %8351 = vmatpush.bf16.msrb.mxu3 %v17679_v34 }
0x1331   :  { %8324 = vmatpush.bf16.msrb.mxu1 %v17662_v61  ;;  %v17704_v61 = vld [vmem:[#allocation21 + $0x678] sm:$0xff] }
0x1332   :  { %8366 = vmatpush.bf16.msrb.mxu0 %v17686_v22  ;;  %8338 = vmatpush.bf16.msrb.mxu2 %v17670_v41  ;;  %v6296_v41 = vperm.slane %v19974_v19, 4 }
0x1333   :  { %8352 = vmatpush.bf16.msrb.mxu3 %v17678_v49  ;;  %v17712_v49 = vld [vmem:[#allocation21 + $0x6b8] sm:$0xff] }
0x1335   :  { %8325 = vmatpush.bf16.msrb.mxu1 %v17661_v63 }
0x1336   :  { %8367 = vmatpush.bf16.msrb.mxu0 %v17685_v3  ;;  %8339 = vmatpush.bf16.msrb.mxu2 %v17669_v39  ;;  %v6299_v3 = vperm.slane %v19974_v19, 7  ;;  %v17694_v39 = vld [vmem:[#allocation21 + $0x628] sm:$0xff] }
0x1337   :  { %8353 = vmatpush.bf16.msrb.mxu3 %v17677_v38  ;;  %v17718_v38 = vld [vmem:[#allocation21 + $0x6e8] sm:$0xff] }
0x1339   :  { %8326 = vmatpush.bf16.msrb.mxu1 %v17660_v60 }
0x133a   :  { %8368 = vmatpush.bf16.msrb.mxu0 %v17684_v0  ;;  %8340 = vmatpush.bf16.msrb.mxu2 %v17668_v10  ;;  %v17703_v0 = vld [vmem:[#allocation21 + $0x670] sm:$0xff] }
0x133b   :  { %8354 = vmatpush.bf16.msrb.mxu3 %v17676_v32 }
0x133d   :  { %8327 = vmatpush.bf16.msrb.mxu1 %v17659_v46  ;;  %v17711_v46 = vld [vmem:[#allocation21 + $0x6b0] sm:$0xff] }
0x133e   :  { %8369 = vmatpush.bf16.msrb.mxu0 %v17683_v11  ;;  %8341 = vmatpush.bf16.msrb.mxu2 %v17667_v45 }
0x133f   :  { %8355 = vmatpush.bf16.msrb.mxu3 %v17675_v54  ;;  %v17693_v54 = vld [vmem:[#allocation21 + $0x620] sm:$0xff] }
0x1341   :  { %8328 = vmatpush.bf16.msrb.mxu1 %v17658_v21  ;;  %v6297_v21 = vperm.slane %v19974_v19, 5 }
0x1342   :  { %8370 = vmatpush.bf16.msrb.mxu0 %v17682_v4  ;;  %8342 = vmatpush.bf16.msrb.mxu2 %v17666_v16 }
0x1343   :  { %8356 = vmatpush.bf16.msrb.mxu3 %v17674_v30  ;;  %v17717_v30 = vld [vmem:[#allocation21 + $0x6e0] sm:$0xff] }
0x1344   :  { %v6973_v14 = vpop.f32.mrf.mxu1 }
0x1345   :  { %8329 = vmatpush.bf16.msrb.mxu1 %v17657_v12  ;;  %v7015_v17 = vpop.f32.mrf.mxu0  ;;  %v6974_v33 = vadd.f32 %v6973_v14, %v6292_v40  ;;  %v6298_v12 = vperm.slane %v19974_v19, 6  ;;  %v17701_v19 = vld [vmem:[#allocation21 + $0x660] sm:$0xff] }
0x1346   :  { %8371 = vmatpush.bf16.msrb.mxu0 %v17681_v2  ;;  %8343 = vmatpush.bf16.msrb.mxu2 %v17665_v57  ;;  %v7016_v51 = vadd.f32 %v7015_v17, %v6295_v58  ;;  %v17702_v57 = vld [vmem:[#allocation21 + $0x668] sm:$0xff] }
0x1347   :  { %8357 = vmatpush.bf16.msrb.mxu3 %v17673_v26  ;;  %v7188_v15 = vmax.f32 %v6974_v33, 0.0  ;;  %v17710_v17 = vld [vmem:[#allocation21 + $0x6a8] sm:$0xff] }
0x1348   :  { %v7191_v6 = vmax.f32 %v7016_v51, 0.0  ;;  %v17716_v51 = vld [vmem:[#allocation21 + $0x6d8] sm:$0xff] }
0x134a   :  { %v6987_v28 = vpop.f32.mrf.mxu2 }
0x134b   :  { %v7001_v8 = vpop.f32.mrf.mxu3  ;;  %v6988_v42 = vadd.f32 %v6987_v28, %v6293_v24  ;;  %v17692_v28 = vld [vmem:[#allocation21 + $0x618] sm:$0xff] }
0x134c   :  { %v6975_v23 = vpop.f32.mrf.mxu1  ;;  %v7002_v25 = vadd.f32 %v7001_v8, %v6294_v5 }
0x134d   :  { %v6976_v31 = vadd.f32 %v6975_v23, %v6292_v40  ;;  %v7017_v62 = vpop.f32.mrf.mxu0  ;;  %v7189_v50 = vmax.f32 %v6988_v42, 0.0 }
0x134e   :  { %v7018_v35 = vadd.f32 %v7017_v62, %v6295_v58  ;;  %v7190_v55 = vmax.f32 %v7002_v25, 0.0 }
0x134f   :  { %v7204_v59 = vmax.f32 %v6976_v31, 0.0 }
0x1350   :  { %v7207_v36 = vmax.f32 %v7018_v35, 0.0  ;;  %v17709_v35 = vld [vmem:[#allocation21 + $0x6a0] sm:$0xff] }
0x1351   :  { %v7479_v53 = vpack.c.bf16 %v7204_v59, %v7188_v15  ;;  %v17691_v59 = vld [vmem:[#allocation21 + $0x610] sm:$0xff] }
0x1352   :  { %v7482_v43 = vpack.c.bf16 %v7207_v36, %v7191_v6  ;;  %v6989_v44 = vpop.f32.mrf.mxu2 }
0x1353   :  { %v6990_v27 = vadd.f32 %v6989_v44, %v6293_v24  ;;  %v7003_v56 = vpop.f32.mrf.mxu3  ;;  %8274 = vmatmul.bf16.vlgmr.msra.gmra.mxu1 %v7479_v53 }
0x1354   :  { %v7004_v52 = vadd.f32 %v7003_v56, %v6294_v5  ;;  %8316 = vmatmul.bf16.vlgmr.msra.gmra.mxu0 %v7482_v43  ;;  %8378 = vmatpush.bf16.msra.mxu1 %v17696_v9  ;;  %v7029_v29 = vpop.f32.mrf.mxu1  ;;  %v17715_v9 = vld [vmem:[#allocation21 + $0x6d0] sm:$0xff]  ;;  %v17700_v43 = vld [vmem:[#allocation21 + $0x658] sm:$0xff] }
0x1355   :  { %v7205_v20 = vmax.f32 %v6990_v27, 0.0  ;;  %8420 = vmatpush.bf16.msra.mxu0 %v17720_v18  ;;  %v7071_v47 = vpop.f32.mrf.mxu0  ;;  %v7030_v10 = vadd.f32 %v7029_v29, %v6296_v41  ;;  %v19984_v18 = vld [vmem:[#allocation20 + $0x18] sm:$0xff]  ;;  %v17708_v56 = vld [vmem:[#allocation21 + $0x698] sm:$0xff] }
0x1356   :  { %v7206_v34 = vmax.f32 %v7004_v52, 0.0  ;;  %v7072_v11 = vadd.f32 %v7071_v47, %v6299_v3  ;;  %v17690_v29 = vld [vmem:[#allocation21 + $0x608] sm:$0xff]  ;;  %v17699_v47 = vld [vmem:[#allocation21 + $0x650] sm:$0xff] }
0x1357   :  { %v7480_v22 = vpack.c.bf16 %v7205_v20, %v7189_v50  ;;  %v7192_v26 = vmax.f32 %v7030_v10, 0.0  ;;  %v17714_v50 = vld [vmem:[#allocation21 + $0x6c8] sm:$0xff]  ;;  %v6303_v20 = vperm.slane %v19984_v18, 3 }
0x1358   :  { %v7481_v63 = vpack.c.bf16 %v7206_v34, %v7190_v55  ;;  %8379 = vmatpush.bf16.msra.mxu1 %v17695_v37  ;;  %v7195_v40 = vmax.f32 %v7072_v11, 0.0  ;;  %v6300_v37 = vperm.slane %v19984_v18, 0  ;;  %v17689_v34 = vld [vmem:[#allocation21 + $0x600] sm:$0xff] }
0x1359   :  { %8421 = vmatpush.bf16.msra.mxu0 %v17719_v48  ;;  %8288 = vmatmul.bf16.vlgmr.msra.gmra.mxu2 %v7480_v22  ;;  %v17707_v48 = vld [vmem:[#allocation21 + $0x690] sm:$0xff] }
0x135a   :  { %8302 = vmatmul.bf16.vlgmr.msra.gmra.mxu3 %v7481_v63  ;;  %8392 = vmatpush.bf16.msra.mxu2 %v17704_v61  ;;  %v7043_v60 = vpop.f32.mrf.mxu2 }
0x135b   :  { %8406 = vmatpush.bf16.msra.mxu3 %v17712_v49  ;;  %v7057_v32 = vpop.f32.mrf.mxu3  ;;  %v7044_v33 = vadd.f32 %v7043_v60, %v6297_v21  ;;  %v17728_v49 = vld [vmem:[#allocation21 + $0x738] sm:$0xff]  ;;  %v6301_v60 = vperm.slane %v19984_v18, 1 }
0x135c   :  { %8380 = vmatpush.bf16.msra.mxu1 %v17694_v39  ;;  %v7031_v45 = vpop.f32.mrf.mxu1  ;;  %v7058_v23 = vadd.f32 %v7057_v32, %v6298_v12  ;;  %v17752_v39 = vld [vmem:[#allocation21 + $0x7f8] sm:$0xff]  ;;  %v17706_v32 = vld [vmem:[#allocation21 + $0x688] sm:$0xff] }
0x135d   :  { %8422 = vmatpush.bf16.msra.mxu0 %v17718_v38  ;;  %v7032_v4 = vadd.f32 %v7031_v45, %v6296_v41  ;;  %v7073_v16 = vpop.f32.mrf.mxu0  ;;  %v7193_v6 = vmax.f32 %v7044_v33, 0.0  ;;  %v17713_v41 = vld [vmem:[#allocation21 + $0x6c0] sm:$0xff]  ;;  %v17698_v38 = vld [vmem:[#allocation21 + $0x648] sm:$0xff] }
0x135e   :  { %v7074_v2 = vadd.f32 %v7073_v16, %v6299_v3  ;;  %8393 = vmatpush.bf16.msra.mxu2 %v17703_v0  ;;  %v7194_v42 = vmax.f32 %v7058_v23, 0.0  ;;  %v17727_v16 = vld [vmem:[#allocation21 + $0x730] sm:$0xff]  ;;  %v17726_v23 = vld [vmem:[#allocation21 + $0x728] sm:$0xff] }
0x135f   :  { %v7208_v14 = vmax.f32 %v7032_v4, 0.0  ;;  %8407 = vmatpush.bf16.msra.mxu3 %v17711_v46  ;;  %v6302_v46 = vperm.slane %v19984_v18, 2 }
0x1360   :  { %v7211_v58 = vmax.f32 %v7074_v2, 0.0  ;;  %8381 = vmatpush.bf16.msra.mxu1 %v17693_v54  ;;  %v17751_v2 = vld [vmem:[#allocation21 + $0x7f0] sm:$0xff] }
0x1361   :  { %v7483_v8 = vpack.c.bf16 %v7208_v14, %v7192_v26  ;;  %8423 = vmatpush.bf16.msra.mxu0 %v17717_v30 }
0x1362   :  { %v7486_v24 = vpack.c.bf16 %v7211_v58, %v7195_v40  ;;  %8394 = vmatpush.bf16.msra.mxu2 %v17702_v57  ;;  %v7045_v31 = vpop.f32.mrf.mxu2  ;;  %v17697_v57 = vld [vmem:[#allocation21 + $0x640] sm:$0xff]  ;;  %v17736_v58 = vld [vmem:[#allocation21 + $0x778] sm:$0xff] }
0x1363   :  { %8408 = vmatpush.bf16.msra.mxu3 %v17710_v17  ;;  %v7046_v62 = vadd.f32 %v7045_v31, %v6297_v21  ;;  %v7059_v5 = vpop.f32.mrf.mxu3  ;;  %8330 = vmatmul.bf16.vlgmr.msrb.gmra.mxu1 %v7483_v8  ;;  %v17705_v40 = vld [vmem:[#allocation21 + $0x680] sm:$0xff]  ;;  %v17744_v8 = vld [vmem:[#allocation21 + $0x7b8] sm:$0xff] }
0x1364   :  { %v7060_v15 = vadd.f32 %v7059_v5, %v6298_v12  ;;  %8372 = vmatmul.bf16.vlgmr.msrb.gmra.mxu0 %v7486_v24  ;;  %8382 = vmatpush.bf16.msra.mxu1 %v17692_v28 }
0x1365   :  { %v7209_v36 = vmax.f32 %v7046_v62, 0.0  ;;  %8424 = vmatpush.bf16.msra.mxu0 %v17716_v51  ;;  %v7085_v25 = vpop.f32.mrf.mxu1 }
0x1366   :  { %v7210_v53 = vmax.f32 %v7060_v15, 0.0  ;;  %8395 = vmatpush.bf16.msra.mxu2 %v17701_v19  ;;  %v7086_v61 = vadd.f32 %v7085_v25, %v6300_v37  ;;  %v17750_v19 = vld [vmem:[#allocation21 + $0x7e8] sm:$0xff]  ;;  %v17724_v25 = vld [vmem:[#allocation21 + $0x718] sm:$0xff] }
0x1367   :  { %v7484_v44 = vpack.c.bf16 %v7209_v36, %v7193_v6  ;;  %8409 = vmatpush.bf16.msra.mxu3 %v17709_v35  ;;  %v17735_v35 = vld [vmem:[#allocation21 + $0x770] sm:$0xff]  ;;  %v17725_v36 = vld [vmem:[#allocation21 + $0x720] sm:$0xff] }
0x1368   :  { %v7127_v27 = vpop.f32.mrf.mxu0  ;;  %v7485_v52 = vpack.c.bf16 %v7210_v53, %v7194_v42  ;;  %8383 = vmatpush.bf16.msra.mxu1 %v17691_v59  ;;  %v7196_v45 = vmax.f32 %v7086_v61, 0.0  ;;  %v17743_v59 = vld [vmem:[#allocation21 + $0x7b0] sm:$0xff]  ;;  %v17734_v42 = vld [vmem:[#allocation21 + $0x768] sm:$0xff] }
0x1369   :  { %8425 = vmatpush.bf16.msra.mxu0 %v17715_v9  ;;  %8344 = vmatmul.bf16.vlgmr.msrb.gmra.mxu2 %v7484_v44  ;;  %v7128_v63 = vadd.f32 %v7127_v27, %v6303_v20  ;;  %v17749_v9 = vld [vmem:[#allocation21 + $0x7e0] sm:$0xff]  ;;  %v17742_v53 = vld [vmem:[#allocation21 + $0x7a8] sm:$0xff]  ;;  %v17731_v61 = vld [vmem:[#allocation21 + $0x750] sm:$0xff] }
0x136a   :  { %8358 = vmatmul.bf16.vlgmr.msrb.gmra.mxu3 %v7485_v52  ;;  %8396 = vmatpush.bf16.msra.mxu2 %v17700_v43  ;;  %v17748_v43 = vld [vmem:[#allocation21 + $0x7d8] sm:$0xff]  ;;  %v17733_v44 = vld [vmem:[#allocation21 + $0x760] sm:$0xff] }
0x136b   :  { %8410 = vmatpush.bf16.msra.mxu3 %v17708_v56  ;;  %v7099_v55 = vpop.f32.mrf.mxu2  ;;  %v7199_v21 = vmax.f32 %v7128_v63, 0.0  ;;  %v17741_v27 = vld [vmem:[#allocation21 + $0x7a0] sm:$0xff]  ;;  %v17723_v56 = vld [vmem:[#allocation21 + $0x710] sm:$0xff] }
0x136c   :  { %8384 = vmatpush.bf16.msra.mxu1 %v17690_v29  ;;  %v7100_v30 = vadd.f32 %v7099_v55, %v6301_v60  ;;  %v17747_v29 = vld [vmem:[#allocation21 + $0x7d0] sm:$0xff]  ;;  %v6307_v55 = vperm.slane %v19984_v18, 7 }
0x136d   :  { %8426 = vmatpush.bf16.msra.mxu0 %v17714_v50  ;;  %v7087_v3 = vpop.f32.mrf.mxu1  ;;  %v17732_v50 = vld [vmem:[#allocation21 + $0x758] sm:$0xff] }
0x136e   :  { %v7113_v22 = vpop.f32.mrf.mxu3  ;;  %8397 = vmatpush.bf16.msra.mxu2 %v17699_v47  ;;  %v7088_v0 = vadd.f32 %v7087_v3, %v6300_v37  ;;  %v7197_v24 = vmax.f32 %v7100_v30, 0.0  ;;  %v6304_v47 = vperm.slane %v19984_v18, 4  ;;  %v17721_v3 = vld [vmem:[#allocation21 + $0x700] sm:$0xff] }
0x136f   :  { %8411 = vmatpush.bf16.msra.mxu3 %v17707_v48  ;;  %v7114_v26 = vadd.f32 %v7113_v22, %v6302_v46  ;;  %v17722_v48 = vld [vmem:[#allocation21 + $0x708] sm:$0xff] }
0x1370   :  { %v7129_v10 = vpop.f32.mrf.mxu0  ;;  %8385 = vmatpush.bf16.msra.mxu1 %v17689_v34  ;;  %v7212_v54 = vmax.f32 %v7088_v0, 0.0  ;;  %v17746_v34 = vld [vmem:[#allocation21 + $0x7c8] sm:$0xff]  ;;  %v6305_v0 = vperm.slane %v19984_v18, 5 }
0x1371   :  { %v7130_v11 = vadd.f32 %v7129_v10, %v6303_v20  ;;  %8427 = vmatpush.bf16.msra.mxu0 %v17713_v41  ;;  %v7198_v62 = vmax.f32 %v7114_v26, 0.0  ;;  %v17740_v20 = vld [vmem:[#allocation21 + $0x798] sm:$0xff]  ;;  %v17739_v41 = vld [vmem:[#allocation21 + $0x790] sm:$0xff] }
0x1372   :  { %8398 = vmatpush.bf16.msra.mxu2 %v17698_v38  ;;  %v7487_v12 = vpack.c.bf16 %v7212_v54, %v7196_v45  ;;  %v17738_v54 = vld [vmem:[#allocation21 + $0x788] sm:$0xff] }
0x1373   :  { %v7215_v4 = vmax.f32 %v7130_v11, 0.0  ;;  %8412 = vmatpush.bf16.msra.mxu3 %v17706_v32  ;;  %v7101_v17 = vpop.f32.mrf.mxu2  ;;  %v6306_v11 = vperm.slane %v19984_v18, 6 }
0x1374   :  { %8434 = vmatpush.bf16.msrb.mxu1 %v17728_v49  ;;  %v7102_v28 = vadd.f32 %v7101_v17, %v6301_v60  ;;  %v17745_v60 = vld [vmem:[#allocation21 + $0x7c0] sm:$0xff] }
0x1375   :  { %8476 = vmatpush.bf16.msrb.mxu0 %v17752_v39  ;;  %v7490_v14 = vpack.c.bf16 %v7215_v4, %v7199_v21  ;;  %8386 = vmatmul.bf16.vlgmr.msra.gmra.mxu1 %v7487_v12 }
0x1376   :  { %v7115_v33 = vpop.f32.mrf.mxu3  ;;  %v7213_v31 = vmax.f32 %v7102_v28, 0.0  ;;  %8399 = vmatpush.bf16.msra.mxu2 %v17697_v57  ;;  %v17729_v57 = vld [vmem:[#allocation21 + $0x740] sm:$0xff] }
0x1377   :  { %v7116_v51 = vadd.f32 %v7115_v33, %v6302_v46  ;;  %8428 = vmatmul.bf16.vlgmr.msra.gmra.mxu0 %v7490_v14  ;;  %8413 = vmatpush.bf16.msra.mxu3 %v17705_v40  ;;  %v17730_v46 = vld [vmem:[#allocation21 + $0x748] sm:$0xff]  ;;  %v17737_v40 = vld [vmem:[#allocation21 + $0x780] sm:$0xff] }
0x1378   :  { %8435 = vmatpush.bf16.msrb.mxu1 %v17727_v16  ;;  %v7488_v15 = vpack.c.bf16 %v7213_v31, %v7197_v24 }
0x1379   :  { %8477 = vmatpush.bf16.msrb.mxu0 %v17751_v2  ;;  %v7214_v5 = vmax.f32 %v7116_v51, 0.0 }
0x137a   :  { %8448 = vmatpush.bf16.msrb.mxu2 %v17736_v58 }
0x137b   :  { %8462 = vmatpush.bf16.msrb.mxu3 %v17744_v8  ;;  %v7489_v6 = vpack.c.bf16 %v7214_v5, %v7198_v62  ;;  %8400 = vmatmul.bf16.vlgmr.msra.gmra.mxu2 %v7488_v15 }
0x137c   :  { %8436 = vmatpush.bf16.msrb.mxu1 %v17726_v23 }
0x137d   :  { %8478 = vmatpush.bf16.msrb.mxu0 %v17750_v19  ;;  %8414 = vmatmul.bf16.vlgmr.msra.gmra.mxu3 %v7489_v6 }
0x137e   :  { %8449 = vmatpush.bf16.msrb.mxu2 %v17735_v35 }
0x137f   :  { %8463 = vmatpush.bf16.msrb.mxu3 %v17743_v59 }
0x1380   :  { %8437 = vmatpush.bf16.msrb.mxu1 %v17725_v36 }
0x1381   :  { %8479 = vmatpush.bf16.msrb.mxu0 %v17749_v9  ;;  %v18347_v9 = vld [vmem:[#allocation23 + $0x1] ss:$0 sm:$0xff] }
0x1382   :  { %8450 = vmatpush.bf16.msrb.mxu2 %v17734_v42 }
0x1383   :  { %8464 = vmatpush.bf16.msrb.mxu3 %v17742_v53 }
0x1384   :  { %8438 = vmatpush.bf16.msrb.mxu1 %v17724_v25 }
0x1385   :  { %v7141_v52 = vpop.f32.mrf.mxu1  ;;  %8480 = vmatpush.bf16.msrb.mxu0 %v17748_v43 }
0x1386   :  { %8451 = vmatpush.bf16.msrb.mxu2 %v17733_v44  ;;  %v7142_v49 = vadd.f32 %v7141_v52, %v6304_v47 }
0x1387   :  { %8465 = vmatpush.bf16.msrb.mxu3 %v17741_v27 }
0x1388   :  { %v7183_v37 = vpop.f32.mrf.mxu0  ;;  %8439 = vmatpush.bf16.msrb.mxu1 %v17723_v56  ;;  %v7200_v21 = vmax.f32 %v7142_v49, 0.0 }
0x1389   :  { %8481 = vmatpush.bf16.msrb.mxu0 %v17747_v29  ;;  %v7184_v39 = vadd.f32 %v7183_v37, %v6307_v55 }
0x138a   :  { %8452 = vmatpush.bf16.msrb.mxu2 %v17732_v50 }
0x138b   :  { %v7155_v22 = vpop.f32.mrf.mxu2  ;;  %8466 = vmatpush.bf16.msrb.mxu3 %v17740_v20  ;;  %v7203_v16 = vmax.f32 %v7184_v39, 0.0 }
0x138c   :  { %v7169_v63 = vpop.f32.mrf.mxu3  ;;  %8440 = vmatpush.bf16.msrb.mxu1 %v17722_v48  ;;  %v7156_v12 = vadd.f32 %v7155_v22, %v6305_v0 }
0x138d   :  { %v7143_v38 = vpop.f32.mrf.mxu1  ;;  %8482 = vmatpush.bf16.msrb.mxu0 %v17746_v34  ;;  %v7170_v26 = vadd.f32 %v7169_v63, %v6306_v11 }
0x138e   :  { %v7144_v10 = vadd.f32 %v7143_v38, %v6304_v47  ;;  %8453 = vmatpush.bf16.msrb.mxu2 %v17731_v61  ;;  %v7201_v33 = vmax.f32 %v7156_v12, 0.0 }
0x138f   :  { %8467 = vmatpush.bf16.msrb.mxu3 %v17739_v41  ;;  %v7202_v51 = vmax.f32 %v7170_v26, 0.0 }
0x1390   :  { %v7185_v32 = vpop.f32.mrf.mxu0  ;;  %v7216_v4 = vmax.f32 %v7144_v10, 0.0  ;;  %8441 = vmatpush.bf16.msrb.mxu1 %v17721_v3 }
0x1391   :  { %v7186_v45 = vadd.f32 %v7185_v32, %v6307_v55  ;;  %8483 = vmatpush.bf16.msrb.mxu0 %v17745_v60 }
0x1392   :  { %v7491_v2 = vpack.c.bf16 %v7216_v4, %v7200_v21  ;;  %8454 = vmatpush.bf16.msrb.mxu2 %v17730_v46 }
0x1393   :  { %v7219_v30 = vmax.f32 %v7186_v45, 0.0  ;;  %v7157_v17 = vpop.f32.mrf.mxu2  ;;  %8468 = vmatpush.bf16.msrb.mxu3 %v17738_v54 }
0x1394   :  { %v7158_v58 = vadd.f32 %v7157_v17, %v6305_v0  ;;  %v7171_v18 = vpop.f32.mrf.mxu3  ;;  %8442 = vmatmul.bf16.vlgmr.msrb.gmra.mxu1 %v7491_v2 }
0x1395   :  { %v7494_v14 = vpack.c.bf16 %v7219_v30, %v7203_v16  ;;  %v7172_v28 = vadd.f32 %v7171_v18, %v6306_v11 }
0x1396   :  { %v7217_v8 = vmax.f32 %v7158_v58, 0.0  ;;  %8455 = vmatpush.bf16.msrb.mxu2 %v17729_v57 }
0x1397   :  { %8484 = vmatmul.bf16.vlgmr.msrb.gmra.mxu0 %v7494_v14  ;;  %v7218_v23 = vmax.f32 %v7172_v28, 0.0  ;;  %8469 = vmatpush.bf16.msrb.mxu3 %v17737_v40 }
0x1398   :  { %v7492_v24 = vpack.c.bf16 %v7217_v8, %v7201_v33 }
0x1399   :  { %v7493_v31 = vpack.c.bf16 %v7218_v23, %v7202_v51 }
0x139a   :  { %8456 = vmatmul.bf16.vlgmr.msrb.gmra.mxu2 %v7492_v24 }
0x139b   :  { %8470 = vmatmul.bf16.vlgmr.msrb.gmra.mxu3 %v7493_v31 }
0x13d0   :  { %v8275_v19 = vpop.f32.mrf.mxu1 }
0x13d1   :  { %v8317_v35 = vpop.f32.mrf.mxu0  ;;  %v8276_v53 = vadd.f32 %v18347_v9, %v8275_v19 }
0x13d8   :  { %v8277_v15 = vpop.f32.mrf.mxu1 }
0x13d9   :  { %v8319_v36 = vpop.f32.mrf.mxu0  ;;  %v8278_v29 = vadd.f32 %v18347_v9, %v8277_v15 }
0x13dc   :  { %v8289_v62 = vpop.f32.mrf.mxu2 }
0x13dd   :  { %v8303_v5 = vpop.f32.mrf.mxu3  ;;  %v8290_v25 = vadd.f32 %v8289_v62, %v8276_v53 }
0x13df   :  { %v8304_v56 = vadd.f32 %v8303_v5, %v8290_v25 }
0x13e0   :  { %v8331_v42 = vpop.f32.mrf.mxu1 }
0x13e1   :  { %v8373_v27 = vpop.f32.mrf.mxu0  ;;  %v8318_v37 = vadd.f32 %v8317_v35, %v8304_v56 }
0x13e3   :  { %v8332_v47 = vadd.f32 %v8331_v42, %v8318_v37  ;;  %v17776_v37 = vld [vmem:[#allocation9 + $0x238] sm:$0xf0] }
0x13e4   :  { %v8291_v59 = vpop.f32.mrf.mxu2 }
0x13e5   :  { %v8305_v6 = vpop.f32.mrf.mxu3  ;;  %v8292_v50 = vadd.f32 %v8291_v59, %v8278_v29  ;;  %v15767_v29 = vld [vmem:[#allocation9 + $0x230] sm:$0xf] }
0x13e7   :  { %v8306_v48 = vadd.f32 %v8305_v6, %v8292_v50 }
0x13e8   :  { %v8333_v52 = vpop.f32.mrf.mxu1 }
0x13e9   :  { %v8375_v34 = vpop.f32.mrf.mxu0  ;;  %v8320_v41 = vadd.f32 %v8319_v36, %v8306_v48  ;;  %v17772_v48 = vld [vmem:[#allocation9 + $0x218] sm:$0xf0] }
0x13eb   :  { %v8334_v63 = vadd.f32 %v8333_v52, %v8320_v41  ;;  %v15761_v52 = vld [vmem:[#allocation9 + $0x234] sm:$0xf0]  ;;  %v17773_v41 = vld [vmem:[#allocation9 + $0x220] sm:$0xf0] }
0x13ec   :  { %v8345_v43 = vpop.f32.mrf.mxu2 }
0x13ed   :  { %v8359_v44 = vpop.f32.mrf.mxu3  ;;  %v8346_v61 = vadd.f32 %v8345_v43, %v8332_v47  ;;  %v15747_v47 = vld [vmem:[#allocation9 + $0x210] sm:$0xf] }
0x13ef   :  { %v8360_v49 = vadd.f32 %v8359_v44, %v8346_v61  ;;  %v17775_v44 = vld [vmem:[#allocation9 + $0x230] sm:$0xf0]  ;;  %v15749_v61 = vld [vmem:[#allocation9 + $0x21c] sm:$0xf0] }
0x13f1   :  { %v8374_v39 = vadd.f32 %v8373_v27, %v8360_v49  ;;  %v17774_v27 = vld [vmem:[#allocation9 + $0x22c] sm:$0xf] }
0x13f2   :  { %v8387_v22 = vpop.f32.mrf.mxu1  ;;  %v15764_v50 = vor.u32 %v17774_v27, %v15761_v52  ;;  %v15675_v52 = vld [vmem:[#allocation9 + $0x180] sm:$0xf] }
0x13f3   :  { %v8388_v32 = vadd.f32 %v8387_v22, %v8374_v39  ;;  %v15755_v22 = vld [vmem:[#allocation9 + $0x218] sm:$0xf]  ;;  %v17769_v39 = vld [vmem:[#allocation9 + $0x200] sm:$0xf0] }
0x13f4   :  { %v8347_v20 = vpop.f32.mrf.mxu2  ;;  %v8429_v0 = vpop.f32.mrf.mxu0  ;;  %8731 = vmatpush.bf16.msra.mxu2 %v15764_v50 }
0x13f5   :  { %v8361_v55 = vpop.f32.mrf.mxu3  ;;  %v8348_v38 = vadd.f32 %v8347_v20, %v8334_v63  ;;  %v15768_v20 = vor.u32 %v17776_v37, %v15767_v29  ;;  %v15756_v63 = vor.u32 %v17773_v41, %v15755_v22  ;;  %v17754_v29 = vld [vmem:[#allocation9 + $0x188] sm:$0xf0]  ;;  %v17753_v37 = vld [vmem:[#allocation9 + $0x184] sm:$0xf] }
0x13f7   :  { %v8362_v46 = vadd.f32 %v8361_v55, %v8348_v38  ;;  %8745 = vmatpush.bf16.msra.mxu3 %v15768_v20  ;;  %v17771_v55 = vld [vmem:[#allocation9 + $0x214] sm:$0xf]  ;;  %v17768_v38 = vld [vmem:[#allocation9 + $0x1fc] sm:$0xf]  ;;  %v15676_v20 = vor.u32 %v17754_v29, %v15675_v52 }
0x13f8   :  { %v15752_v49 = vor.u32 %v17771_v55, %v15749_v61 }
0x13f9   :  { %v8376_v45 = vadd.f32 %v8375_v34, %v8362_v46  ;;  %v15748_v34 = vor.u32 %v17772_v48, %v15747_v47  ;;  %v15677_v47 = vld [vmem:[#allocation9 + $0x18c] sm:$0xf0]  ;;  %v15683_v48 = vld [vmem:[#allocation9 + $0x188] sm:$0xf] }
0x13fa   :  { %v8389_v10 = vpop.f32.mrf.mxu1  ;;  %8732 = vmatpush.bf16.msra.mxu2 %v15752_v49  ;;  %v15680_v55 = vor.u32 %v17753_v37, %v15677_v47 }
0x13fb   :  { %v8390_v12 = vadd.f32 %v8389_v10, %v8376_v45  ;;  %8746 = vmatpush.bf16.msra.mxu3 %v15756_v63  ;;  %v15743_v10 = vld [vmem:[#allocation9 + $0x200] sm:$0xf] }
0x13fc   :  { %v8431_v16 = vpop.f32.mrf.mxu0  ;;  %v15723_v45 = vld [vmem:[#allocation9 + $0x1e0] sm:$0xf] }
0x13fe   :  { %v8401_v3 = vpop.f32.mrf.mxu2 }
0x13ff   :  { %v8402_v11 = vadd.f32 %v8401_v3, %v8388_v32  ;;  %v15735_v3 = vld [vmem:[#allocation9 + $0x1f8] sm:$0xf]  ;;  %v17770_v32 = vld [vmem:[#allocation9 + $0x208] sm:$0xf0] }
0x1400   :  { %v8415_v60 = vpop.f32.mrf.mxu3 }
0x1401   :  { %v8416_v21 = vadd.f32 %v8415_v60, %v8402_v11  ;;  %v15736_v60 = vor.u32 %v17769_v39, %v15735_v3  ;;  %v15744_v11 = vor.u32 %v17770_v32, %v15743_v10 }
0x1403   :  { %v8430_v57 = vadd.f32 %v8429_v0, %v8416_v21  ;;  %v15737_v0 = vld [vmem:[#allocation9 + $0x204] sm:$0xf0]  ;;  %8747 = vmatpush.bf16.msra.mxu3 %v15744_v11  ;;  %v17765_v21 = vld [vmem:[#allocation9 + $0x1e4] sm:$0xf] }
0x1404   :  { %v15740_v46 = vor.u32 %v17768_v38, %v15737_v0 }
0x1406   :  { %v8403_v54 = vpop.f32.mrf.mxu2  ;;  %8733 = vmatpush.bf16.msra.mxu2 %v15740_v46 }
0x1407   :  { %v8404_v2 = vadd.f32 %v8403_v54, %v8390_v12  ;;  %v17766_v54 = vld [vmem:[#allocation9 + $0x1e8] sm:$0xf0]  ;;  %v17767_v12 = vld [vmem:[#allocation9 + $0x1f0] sm:$0xf0] }
0x1408   :  { %v8417_v4 = vpop.f32.mrf.mxu3 }
0x1409   :  { %v8418_v17 = vadd.f32 %v8417_v4, %v8404_v2  ;;  %v15724_v4 = vor.u32 %v17766_v54, %v15723_v45 }
0x140b   :  { %v8432_v8 = vadd.f32 %v8431_v16, %v8418_v17  ;;  %v15725_v16 = vld [vmem:[#allocation9 + $0x1ec] sm:$0xf0]  ;;  %v17762_v17 = vld [vmem:[#allocation9 + $0x1cc] sm:$0xf] }
0x140c   :  { %v15728_v2 = vor.u32 %v17765_v21, %v15725_v16  ;;  %v18348_v21 = vld [vmem:[#allocation24 + $0x1] ss:$0 sm:$0xff] }
0x140e   :  { %8734 = vmatpush.bf16.msra.mxu2 %v15728_v2 }
0x1411   :  { %v8443_v30 = vpop.f32.mrf.mxu1 }
0x1412   :  { %v8444_v26 = vadd.f32 %v8443_v30, %v8430_v57  ;;  %v15731_v30 = vld [vmem:[#allocation9 + $0x1e8] sm:$0xf] }
0x1413   :  { %v15732_v57 = vor.u32 %v17767_v12, %v15731_v30  ;;  %v18349_v12 = vld [vmem:[#allocation26 + $0x1] ss:$0 sm:$0xff] }
0x1414   :  { %v8485_v18 = vpop.f32.mrf.mxu0 }
0x1415   :  { %8748 = vmatpush.bf16.msra.mxu3 %v15732_v57 }
0x1419   :  { %v8445_v33 = vpop.f32.mrf.mxu1 }
0x141a   :  { %v8446_v23 = vadd.f32 %v8445_v33, %v8432_v8 }
0x141c   :  { %v8487_v35 = vpop.f32.mrf.mxu0 }
0x141d   :  { %v8457_v14 = vpop.f32.mrf.mxu2 }
0x141e   :  { %v8458_v40 = vadd.f32 %v8457_v14, %v8444_v26  ;;  %v8471_v58 = vpop.f32.mrf.mxu3  ;;  %v15711_v26 = vld [vmem:[#allocation9 + $0x1c8] sm:$0xf]  ;;  %v17763_v14 = vld [vmem:[#allocation9 + $0x1d0] sm:$0xf0] }
0x1420   :  { %v8472_v28 = vadd.f32 %v8471_v58, %v8458_v40  ;;  %v15712_v40 = vor.u32 %v17763_v14, %v15711_v26  ;;  %v15713_v58 = vld [vmem:[#allocation9 + $0x1d4] sm:$0xf0] }
0x1421   :  { %v15716_v33 = vor.u32 %v17762_v17, %v15713_v58 }
0x1422   :  { %v8486_v51 = vadd.f32 %v8485_v18, %v8472_v28  ;;  %v15719_v18 = vld [vmem:[#allocation9 + $0x1d0] sm:$0xf]  ;;  %v17764_v28 = vld [vmem:[#allocation9 + $0x1d8] sm:$0xf0] }
0x1423   :  { %v15720_v8 = vor.u32 %v17764_v28, %v15719_v18  ;;  %8735 = vmatpush.bf16.msra.mxu2 %v15716_v33 }
0x1424   :  { %v8490_v24 = vadd.f32 %v8486_v51, %v19950_v13  ;;  %v15699_v51 = vld [vmem:[#allocation9 + $0x1b0] sm:$0xf] }
0x1425   :  { %v8459_v31 = vpop.f32.mrf.mxu2  ;;  %8749 = vmatpush.bf16.msra.mxu3 %v15720_v8 }
0x1426   :  { %v8460_v19 = vadd.f32 %v8459_v31, %v8446_v23  ;;  %8496 = vadd.xlane.f32.xlu2 %v8490_v24  ;;  %v8473_v62 = vpop.f32.mrf.mxu3  ;;  %v17760_v23 = vld [vmem:[#allocation9 + $0x1b8] sm:$0xf0] }
0x1427   :  { %v15700_v31 = vor.u32 %v17760_v23, %v15699_v51 }
0x1428   :  { %v8474_v5 = vadd.f32 %v8473_v62, %v8460_v19  ;;  %v15701_v19 = vld [vmem:[#allocation9 + $0x1bc] sm:$0xf0]  ;;  %v15707_v62 = vld [vmem:[#allocation9 + $0x1b8] sm:$0xf] }
0x142a   :  { %v8488_v15 = vadd.f32 %v8487_v35, %v8474_v5  ;;  %v17761_v5 = vld [vmem:[#allocation9 + $0x1c0] sm:$0xf0] }
0x142c   :  { %v8491_v59 = vadd.f32 %v8488_v15, %v19952_v7  ;;  %v15759_v7 = vld [vmem:[#allocation9 + $0x228] sm:$0xf]  ;;  %v15708_v15 = vor.u32 %v17761_v5, %v15707_v62 }
0x142d   :  { %v15760_v56 = vor.u32 %v17775_v44, %v15759_v7 }
0x142e   :  { %8498 = vadd.xlane.f32.xlu1 %v8491_v59  ;;  %8750 = vmatpush.bf16.msra.mxu3 %v15708_v15 }
0x142f   :  { %8717 = vmatpush.bf16.msra.mxu1 %v15760_v56 }
0x1433   :  { %8718 = vmatpush.bf16.msra.mxu1 %v15748_v34  ;;  %v17755_v34 = vld [vmem:[#allocation9 + $0x190] sm:$0xf0] }
0x1434   :  { %v15684_v61 = vor.u32 %v17755_v34, %v15683_v48 }
0x1437   :  { %8719 = vmatpush.bf16.msra.mxu1 %v15736_v60 }
0x143b   :  { %8720 = vmatpush.bf16.msra.mxu1 %v15724_v4 }
0x143f   :  { %8721 = vmatpush.bf16.msra.mxu1 %v15712_v40 }
0x1443   :  { %8722 = vmatpush.bf16.msra.mxu1 %v15700_v31 }
0x1499   :  { %v8497_v6 = vpop.xlane.xlu2 %8496 }
0x149a   :  { %v8500_v36 = vmul.f32 %v8497_v6, %v19569_v1  ;;  %v17757_v6 = vld [vmem:[#allocation9 + $0x1a0] sm:$0xf0] }
0x149c   :  { %v19997_v9 = vsub.f32 %v8490_v24, %v8500_v36  ;;  %v17759_v24 = vld [vmem:[#allocation9 + $0x1b4] sm:$0xf]  ;;  %v17756_v36 = vld [vmem:[#allocation9 + $0x19c] sm:$0xf] }
0x149d   :  { %v15704_v35 = vor.u32 %v17759_v24, %v15701_v19 }
0x149e   :  { %v8504_v42 = vmul.f32 %v19997_v9, %v19997_v9 }
0x149f   :  { %8736 = vmatpush.bf16.msra.mxu2 %v15704_v35 }
0x14a0   :  { %8506 = vadd.xlane.f32.xlu0 %v8504_v42 }
0x14a1   :  { %v8499_v13 = vpop.xlane.xlu1 %8498 }
0x14a2   :  { %v8501_v53 = vmul.f32 %v8499_v13, %v19569_v1  ;;  %v15689_v13 = vld [vmem:[#allocation9 + $0x1a4] sm:$0xf0] }
0x14a3   :  { %v15692_v44 = vor.u32 %v17756_v36, %v15689_v13 }
0x14a4   :  { %v20002_v25 = vsub.f32 %v8491_v59, %v8501_v53  ;;  %v15687_v59 = vld [vmem:[#allocation9 + $0x198] sm:$0xf]  ;;  %v15695_v53 = vld [vmem:[#allocation9 + $0x1a0] sm:$0xf] }
0x14a5   :  { %v15688_v42 = vor.u32 %v17757_v6, %v15687_v59  ;;  %8737 = vmatpush.bf16.msra.mxu2 %v15692_v44 }
0x14a6   :  { %v8505_v43 = vmul.f32 %v20002_v25, %v20002_v25 }
0x14a7   :  { %8723 = vmatpush.bf16.msra.mxu1 %v15688_v42 }
0x14a8   :  { %8508 = vadd.xlane.f32.xlu2 %v8505_v43  ;;  %v17758_v43 = vld [vmem:[#allocation9 + $0x1a8] sm:$0xf0] }
0x14a9   :  { %v15696_v27 = vor.u32 %v17758_v43, %v15695_v53  ;;  %8738 = vmatpush.bf16.msra.mxu2 %v15680_v55 }
0x14ab   :  { %8751 = vmatpush.bf16.msra.mxu3 %v15696_v27  ;;  %8724 = vmatpush.bf16.msra.mxu1 %v15676_v20 }
0x14af   :  { %8752 = vmatpush.bf16.msra.mxu3 %v15684_v61 }
0x1513   :  { %v8507_v7 = vpop.xlane.xlu0 %8506 }
0x1514   :  { %v8510_v56 = vmul.f32 %v8507_v7, %v19569_v1 }
0x1516   :  { %v8512_v50 = vadd.f32 1e-05, %v8510_v56 }
0x1518   :  { %18499 = vrsqrt.f32 %v8512_v50  ;;  %vm8520_vm12 = vweird.f32 %v8512_v50 }
0x151b   :  { %v8509_v22 = vpop.xlane.xlu2 %8508 }
0x151c   :  { %v8511_v41 = vmul.f32 %v8509_v22, %v19569_v1 }
0x151e   :  { %v18500_v49 = vpop.eup %18499  ;;  %v8513_v63 = vadd.f32 1e-05, %v8511_v41 }
0x151f   :  { %v8515_v3 = vmul.f32 %v18500_v49, %v8512_v50  ;;  %vm8521_vm11 = vweird.f32 %v18500_v49 }
0x1520   :  { %18501 = vrsqrt.f32 %v8513_v63  ;;  %vm8522_vm13 = vmor %vm8520_vm12, %vm8521_vm11  ;;  %vm8530_vm15 = vweird.f32 %v8513_v63 }
0x1521   :  { %v8516_v39 = vmul.f32 %v18500_v49, %v8515_v3 }
0x1523   :  { %v8517_v38 = vmul.f32 0.5, %v8516_v39 }
0x1525   :  { %v8518_v60 = vsub.f32 1.5, %v8517_v38 }
0x1526   :  { %v18502_v0 = vpop.eup %18501 }
0x1527   :  { %v8519_v10 = vmul.f32 %v18500_v49, %v8518_v60  ;;  %v8525_v32 = vmul.f32 %v18502_v0, %v8513_v63  ;;  %vm8531_vm14 = vweird.f32 %v18502_v0 }
0x1528   :  { %vm8532_vm8 = vmor %vm8530_vm15, %vm8531_vm14  ;;  %vm12601_vm14 = vcmask 1041409   ;;  %vm13045_vm15 = vcmask 1045508  }
0x1529   :  { %v8526_v46 = vmul.f32 %v18502_v0, %v8525_v32  ;;  %v8523_v11 = vsel %vm8522_vm13, %v18500_v49, %v8519_v10  ;;  %vm12450_vm13 = vcmask 7168  }
0x152a   :  { %v8534_v4 = vmul.f32 %v8523_v11, %v19997_v9  ;;  %v8580_v9 = vld [vmem:[#allocation11 + $0x6] sm:$0x7] }
0x152b   :  { %v8527_v45 = vmul.f32 0.5, %v8526_v46  ;;  %v8583_v58 = vperm.slane %v8580_v9, 0  ;;  %v8585_v33 = vperm.slane %v8580_v9, 2 }
0x152c   :  { %v8539_v2 = vmul.f32 %v18348_v21, %v8534_v4 }
0x152d   :  { %v8528_v54 = vsub.f32 1.5, %v8527_v45 }
0x152e   :  { %v20010_v14 = vadd.f32 %v18349_v12, %v8539_v2 }
0x152f   :  { %v8529_v16 = vmul.f32 %v18502_v0, %v8528_v54 }
0x1531   :  { %v8533_v30 = vsel %vm8532_vm8, %v18502_v0, %v8529_v16  ;;  %vm13043_vm8 = vcmask 1041408  }
0x1532   :  { %v8535_v57 = vmul.f32 %v8533_v30, %v20002_v25  ;;  %v8584_v25 = vperm.slane %v8580_v9, 1 }
0x1534   :  { %v8540_v26 = vmul.f32 %v18348_v21, %v8535_v57 }
0x1536   :  { %v20012_v17 = vadd.f32 %v18349_v12, %v8540_v26 }
0x1538   :  { %v8581_v40 = vpack.c.bf16 %v20012_v17, %v20010_v14 }
0x153a   :  { %8725 = vmatmul.bf16.vlgmr.msra.gmra.mxu1 %v8581_v40  ;;  %8739 = vmatmul.bf16.vlgmr.msra.gmra.mxu2 %v8581_v40 }
0x153b   :  { %8753 = vmatmul.bf16.vlgmr.msra.gmra.mxu3 %v8581_v40 }
0x15b7   :  { %v8726_v18 = vpop.f32.mrf.mxu1 }
0x15b8   :  { %v8727_v28 = vadd.f32 %v8726_v18, %v8583_v58 }
0x15ba   :  { %9015 = vrot.lane.b32.xlu1 %v8727_v28, %s19065_s22  ;;  %8881 = vrot.lane.b32.xlu2 %v8727_v28, %s19064_s19 }
0x15bd   :  { %v8740_v8 = vpop.f32.mrf.mxu2 }
0x15be   :  { %v8741_v51 = vadd.f32 %v8740_v8, %v8584_v25  ;;  %v8754_v23 = vpop.f32.mrf.mxu3 }
0x15bf   :  { %v8755_v24 = vadd.f32 %v8754_v23, %v8585_v33  ;;  %v8728_v31 = vpop.f32.mrf.mxu1 }
0x15c0   :  { %9017 = vrot.lane.b32.xlu0 %v8741_v51, %s19065_s22  ;;  %15769 = vmatpush.xpose.msk.msra.mxu0 %vm1032_vm0, %v8741_v51  ;;  %v8729_v62 = vadd.f32 %v8728_v31, %v8583_v58 }
0x15c1   :  { %8853 = vmatpush.msrb.mxu2 %v8755_v24 }
0x15c2   :  { %8883 = vrot.lane.b32.xlu1 %v8741_v51, %s19064_s19  ;;  %9149 = vrot.lane.b32.xlu2 %v8741_v51, %s19066_s4 }
0x15c3   :  { %15770 = vmatmul.msk.f32.vlgmr.msra.gmra.mxu0 %vm1032_vm0, %v8727_v28 }
0x15c5   :  { %v8742_v19 = vpop.f32.mrf.mxu2 }
0x15c6   :  { %v8743_v5 = vadd.f32 %v8742_v19, %v8584_v25  ;;  %v8756_v35 = vpop.f32.mrf.mxu3 }
0x15c7   :  { %v8757_v15 = vadd.f32 %v8756_v35, %v8585_v33 }
0x15c8   :  { %15771 = vmatpush.xpose.msk.msrb.mxu1 %vm1032_vm0, %v8743_v5  ;;  %9043 = vrot.lane.b32.xlu0 %v8729_v62, %s19065_s22 }
0x15c9   :  { %8876 = vmatpush.msrb.mxu3 %v8757_v15  ;;  %v20025_v59 = vpack.i.bf16 %v8757_v15, %v8755_v24 }
0x15ca   :  { %8909 = vrot.lane.b32.xlu1 %v8729_v62, %s19064_s19  ;;  %9045 = vrot.lane.b32.xlu2 %v8743_v5, %s19065_s22 }
0x15cb   :  { %15772 = vmatmul.msk.f32.vlgmr.msrb.gmra.mxu1 %vm1032_vm0, %v8729_v62 }
0x15d0   :  { %8911 = vrot.lane.b32.xlu0 %v8743_v5, %s19064_s19 }
0x15d2   :  { %9281 = vrot.lane.b32.xlu1 %v8741_v51, %s19036_s29  ;;  %9175 = vrot.lane.b32.xlu2 %v8729_v62, %s19066_s4 }
0x15d8   :  { %9147 = vrot.lane.b32.xlu0 %v8727_v28, %s19066_s4 }
0x15da   :  { %9177 = vrot.lane.b32.xlu1 %v8743_v5, %s19066_s4  ;;  %9279 = vrot.lane.b32.xlu2 %v8727_v28, %s19036_s29 }
0x15e0   :  { %9413 = vrot.lane.b32.xlu0 %v8741_v51, %s19055_s24 }
0x15e2   :  { %9307 = vrot.lane.b32.xlu1 %v8729_v62, %s19036_s29  ;;  %9441 = vrot.lane.b32.xlu2 %v8743_v5, %s19055_s24 }
0x15e8   :  { %9309 = vrot.lane.b32.xlu0 %v8743_v5, %s19036_s29 }
0x15ea   :  { %9411 = vrot.lane.b32.xlu1 %v8727_v28, %s19055_s24  ;;  %9545 = vrot.lane.b32.xlu2 %v8741_v51, %s19051_s8 }
0x15f0   :  { %9439 = vrot.lane.b32.xlu0 %v8729_v62, %s19055_s24 }
0x15f2   :  { %9573 = vrot.lane.b32.xlu1 %v8743_v5, %s19051_s8  ;;  %9571 = vrot.lane.b32.xlu2 %v8729_v62, %s19051_s8 }
0x15f8   :  { %9543 = vrot.lane.b32.xlu0 %v8727_v28, %s19051_s8 }
0x15fa   :  { %9677 = vrot.lane.b32.xlu1 %v8741_v51, %s19043_s6  ;;  %9675 = vrot.lane.b32.xlu2 %v8727_v28, %s19043_s6 }
0x1600   :  { %9705 = vrot.lane.b32.xlu0 %v8743_v5, %s19043_s6 }
0x1602   :  { %9703 = vrot.lane.b32.xlu1 %v8729_v62, %s19043_s6  ;;  %18266 = vrot.lane.b32.xlu2 %v20025_v59, %s19064_s19 }
0x160a   :  { %18271 = vrot.lane.b32.xlu1 %v20025_v59, %s19065_s22 }
0x1614   :  { %v8882_v6 = vpop.permute.xlu2 %8881 }
0x161c   :  { %v9150_v36 = vpop.permute.xlu2 %9149 }
0x1624   :  { %v9046_v42 = vpop.permute.xlu2 %9045 }
0x162c   :  { %v9016_v13 = vpop.permute.xlu1 %9015  ;;  %v9176_v53 = vpop.permute.xlu2 %9175 }
0x1632   :  { %v9018_v43 = vpop.permute.xlu0 %9017 }
0x1634   :  { %v8884_v7 = vpop.permute.xlu1 %8883  ;;  %v9280_v44 = vpop.permute.xlu2 %9279 }
0x1635   :  { %15775 = vmatpush.xpose.msk.msrb.mxu0 %vm1032_vm0, %v8884_v7 }
0x1638   :  { %15776 = vmatmul.msk.f32.vlgmr.msrb.gmra.mxu0 %vm1032_vm0, %v8882_v6 }
0x1639   :  { %15781 = vmatpush.xpose.msk.msra.mxu0 %vm1032_vm0, %v9018_v43 }
0x163a   :  { %v9044_v27 = vpop.permute.xlu0 %9043 }
0x163c   :  { %v8910_v56 = vpop.permute.xlu1 %8909  ;;  %v9442_v52 = vpop.permute.xlu2 %9441 }
0x163d   :  { %15787 = vmatpush.xpose.msk.msrb.mxu0 %vm1032_vm0, %v9150_v36 }
0x1640   :  { %v8782_v29 = vpop.f32.mrf.mxu0  ;;  %15782 = vmatmul.msk.f32.vlgmr.msra.gmra.mxu0 %vm1032_vm0, %v9016_v13 }
0x1641   :  { %v8811_v37 = vmul.f32 0.25, %v8782_v29 }
0x1642   :  { %v8912_v50 = vpop.permute.xlu0 %8911 }
0x1643   :  { %15777 = vmatpush.xpose.msk.msra.mxu1 %vm1032_vm0, %v8912_v50  ;;  %v8813_v20 = vsel %vm1087_vm1, %v8811_v37, -inf }
0x1644   :  { %v9282_v47 = vpop.permute.xlu1 %9281  ;;  %v9546_v48 = vpop.permute.xlu2 %9545  ;;  %8814 = vmax.xlane.f32.xlu0 %v8813_v20 }
0x1645   :  { %15793 = vmatpush.xpose.msk.msra.mxu0 %vm1032_vm0, %v9282_v47 }
0x1646   :  { %15778 = vmatmul.msk.f32.vlgmr.msra.gmra.mxu1 %vm1032_vm0, %v8910_v56 }
0x1647   :  { %15783 = vmatpush.xpose.msk.msrb.mxu1 %vm1032_vm0, %v9046_v42 }
0x1648   :  { %v8808_v55 = vpop.f32.mrf.mxu1 }
0x1649   :  { %v20064_v34 = vmul.f32 0.25, %v8808_v55 }
0x164a   :  { %v9148_v61 = vpop.permute.xlu0 %9147 }
0x164b   :  { %15788 = vmatmul.msk.f32.vlgmr.msrb.gmra.mxu0 %vm1032_vm0, %v9148_v61  ;;  %v8816_v22 = vsel %vm1087_vm1, %v20064_v34, -inf }
0x164c   :  { %v9178_v41 = vpop.permute.xlu1 %9177  ;;  %8817 = vmax.xlane.f32.xlu2 %v8816_v22  ;;  %v9572_v49 = vpop.permute.xlu2 %9571 }
0x164d   :  { %15789 = vmatpush.xpose.msk.msra.mxu1 %vm1032_vm0, %v9178_v41 }
0x164e   :  { %15784 = vmatmul.msk.f32.vlgmr.msrb.gmra.mxu1 %vm1032_vm0, %v9044_v27 }
0x1652   :  { %v9414_v63 = vpop.permute.xlu0 %9413 }
0x1653   :  { %15794 = vmatmul.msk.f32.vlgmr.msra.gmra.mxu0 %vm1032_vm0, %v9280_v44 }
0x1654   :  { %15799 = vmatpush.xpose.msk.msrb.mxu0 %vm1032_vm0, %v9414_v63  ;;  %v9308_v3 = vpop.permute.xlu1 %9307  ;;  %v9676_v39 = vpop.permute.xlu2 %9675 }
0x1656   :  { %15790 = vmatmul.msk.f32.vlgmr.msra.gmra.mxu1 %vm1032_vm0, %v9176_v53 }
0x1658   :  { %15805 = vmatpush.xpose.msk.msra.mxu0 %vm1032_vm0, %v9546_v48 }
0x165a   :  { %v9310_v38 = vpop.permute.xlu0 %9309 }
0x165b   :  { %15795 = vmatpush.xpose.msk.msrb.mxu1 %vm1032_vm0, %v9310_v38 }
0x165c   :  { %v9412_v60 = vpop.permute.xlu1 %9411  ;;  %v18267_v0 = vpop.permute.xlu2 %18266 }
0x165d   :  { %v18269_v10 = vunpack.i.h.bf16 %v18267_v0  ;;  %v18268_v32 = vunpack.i.l.bf16 %v18267_v0  ;;  %15800 = vmatmul.msk.f32.vlgmr.msrb.gmra.mxu0 %vm1032_vm0, %v9412_v60 }
0x165e   :  { %15796 = vmatmul.msk.f32.vlgmr.msrb.gmra.mxu1 %vm1032_vm0, %v9308_v3 }
0x165f   :  { %15801 = vmatpush.xpose.msk.msra.mxu1 %vm1032_vm0, %v9442_v52  ;;  %8983 = vmatpush.msra.mxu2 %v18268_v32 }
0x1660   :  { %9010 = vmatpush.msra.mxu3 %v18269_v10 }
0x1662   :  { %v9440_v46 = vpop.permute.xlu0 %9439 }
0x1664   :  { %v9574_v11 = vpop.permute.xlu1 %9573  ;;  %18276 = vrot.lane.b32.xlu2 %v20025_v59, %s19066_s4 }
0x1665   :  { %15807 = vmatpush.xpose.msk.msrb.mxu1 %vm1032_vm0, %v9574_v11 }
0x1666   :  { %15802 = vmatmul.msk.f32.vlgmr.msra.gmra.mxu1 %vm1032_vm0, %v9440_v46 }
0x166a   :  { %v9544_v45 = vpop.permute.xlu0 %9543 }
0x166b   :  { %15806 = vmatmul.msk.f32.vlgmr.msra.gmra.mxu0 %vm1032_vm0, %v9544_v45 }
0x166c   :  { %v9678_v54 = vpop.permute.xlu1 %9677 }
0x166d   :  { %15811 = vmatpush.xpose.msk.msrb.mxu0 %vm1032_vm0, %v9678_v54 }
0x166e   :  { %15808 = vmatmul.msk.f32.vlgmr.msrb.gmra.mxu1 %vm1032_vm0, %v9572_v49 }
0x1672   :  { %v9706_v21 = vpop.permute.xlu0 %9705 }
0x1673   :  { %15812 = vmatmul.msk.f32.vlgmr.msrb.gmra.mxu0 %vm1032_vm0, %v9676_v39  ;;  %15813 = vmatpush.xpose.msk.msra.mxu1 %vm1032_vm0, %v9706_v21 }
0x1674   :  { %v9704_v4 = vpop.permute.xlu1 %9703 }
0x1676   :  { %15814 = vmatmul.msk.f32.vlgmr.msra.gmra.mxu1 %vm1032_vm0, %v9704_v4 }
0x167c   :  { %v18272_v10 = vpop.permute.xlu1 %18271 }
0x16b5   :  { %v8906_v16 = vpop.f32.mrf.mxu0 }
0x16b6   :  { %v20089_v30 = vmul.f32 0.25, %v8906_v16 }
0x16b7   :  { %v8815_v12 = vpop.xlane.xlu0 %8814 }
0x16b8   :  { %v8819_v2 = vsub.f32 %v8811_v37, %v8815_v12  ;;  %v8939_v57 = vsel %vm1087_vm1, %v20089_v30, -inf }
0x16b9   :  { %8940 = vmax.xlane.f32.xlu1 %v8939_v57 }
0x16ba   :  { %v8821_v26 = vmul.f32 1.442695, %v8819_v2 }
0x16bc   :  { %18503 = vpow2.f32 %v8821_v26 }
0x16bd   :  { %v9040_v40 = vpop.f32.mrf.mxu0 }
0x16be   :  { %v20093_v9 = vmul.f32 0.25, %v9040_v40 }
0x16bf   :  { %v8818_v28 = vpop.xlane.xlu2 %8817 }
0x16c0   :  { %v9073_v58 = vsel %vm1087_vm1, %v20093_v9, -inf  ;;  %v8820_v51 = vsub.f32 %v20064_v34, %v8818_v28 }
0x16c1   :  { %9074 = vmax.xlane.f32.xlu2 %v9073_v58 }
0x16c2   :  { %v20097_v18 = vpop.eup %18503  ;;  %v8823_v31 = vmul.f32 1.442695, %v8820_v51 }
0x16c3   :  { %v8934_v25 = vpop.f32.mrf.mxu1  ;;  %v8825_v33 = vsel %vm1087_vm1, %v20097_v18, 0.0 }
0x16c4   :  { %v20101_v8 = vmul.f32 0.25, %v8934_v25  ;;  %8826 = vadd.xlane.f32.xlu1 %v8825_v33  ;;  %18505 = vpow2.f32 %v8823_v31 }
0x16c6   :  { %v8942_v23 = vsel %vm1087_vm1, %v20101_v8, -inf }
0x16c7   :  { %8943 = vmax.xlane.f32.xlu0 %v8942_v23  ;;  %v20156_v32 = vpop.permute.xlu2 %18276 }
0x16c8   :  { %v9172_v24 = vpop.f32.mrf.mxu0 }
0x16c9   :  { %v20106_v19 = vmul.f32 0.25, %v9172_v24 }
0x16ca   :  { %v20114_v36 = vpop.eup %18505 }
0x16cb   :  { %v9068_v62 = vpop.f32.mrf.mxu1  ;;  %v9205_v35 = vsel %vm1087_vm1, %v20106_v19, -inf  ;;  %v8828_v7 = vsel %vm1087_vm1, %v20114_v36, 0.0 }
0x16cc   :  { %v20108_v5 = vmul.f32 0.25, %v9068_v62 }
0x16ce   :  { %v9076_v15 = vsel %vm1087_vm1, %v20108_v5, -inf }
0x16cf   :  { %9206 = vmax.xlane.f32.xlu0 %v9205_v35  ;;  %9077 = vmax.xlane.f32.xlu1 %v9076_v15 }
0x16d0   :  { %v9304_v6 = vpop.f32.mrf.mxu0 }
0x16d1   :  { %v20116_v42 = vmul.f32 0.25, %v9304_v6 }
0x16d3   :  { %v9200_v13 = vpop.f32.mrf.mxu1  ;;  %v9337_v44 = vsel %vm1087_vm1, %v20116_v42, -inf }
0x16d4   :  { %v20118_v53 = vmul.f32 0.25, %v9200_v13 }
0x16d6   :  { %v9208_v43 = vsel %vm1087_vm1, %v20118_v53, -inf }
0x16d7   :  { %9209 = vmax.xlane.f32.xlu2 %v9208_v43  ;;  %8829 = vadd.xlane.f32.xlu0 %v8828_v7 }
0x16d8   :  { %9338 = vmax.xlane.f32.xlu1 %v9337_v44 }
0x16da   :  { %v9436_v27 = vpop.f32.mrf.mxu0 }
0x16db   :  { %v20126_v56 = vmul.f32 0.25, %v9436_v27  ;;  %v9332_v52 = vpop.f32.mrf.mxu1 }
0x16dc   :  { %v20128_v29 = vmul.f32 0.25, %v9332_v52 }
0x16dd   :  { %v9469_v37 = vsel %vm1087_vm1, %v20126_v56, -inf }
0x16de   :  { %v9340_v50 = vsel %vm1087_vm1, %v20128_v29, -inf }
0x16df   :  { %9470 = vmax.xlane.f32.xlu2 %v9469_v37  ;;  %9341 = vmax.xlane.f32.xlu0 %v9340_v50 }
0x16e3   :  { %v9464_v20 = vpop.f32.mrf.mxu1 }
0x16e4   :  { %v20134_v47 = vmul.f32 0.25, %v9464_v20  ;;  %v18274_v20 = vunpack.i.h.bf16 %v18272_v10 }
0x16e6   :  { %v9472_v48 = vsel %vm1087_vm1, %v20134_v47, -inf }
0x16e7   :  { %9473 = vmax.xlane.f32.xlu1 %v9472_v48 }
0x16e8   :  { %v9568_v55 = vpop.f32.mrf.mxu0 }
0x16e9   :  { %v20152_v60 = vmul.f32 0.25, %v9568_v55 }
0x16eb   :  { %v9596_v34 = vpop.f32.mrf.mxu1  ;;  %v9601_v0 = vsel %vm1087_vm1, %v20152_v60, -inf }
0x16ec   :  { %v20138_v61 = vmul.f32 0.25, %v9596_v34 }
0x16ee   :  { %v9604_v22 = vsel %vm1087_vm1, %v20138_v61, -inf }
0x16ef   :  { %9605 = vmax.xlane.f32.xlu2 %v9604_v22 }
0x16f0   :  { %v9700_v41 = vpop.f32.mrf.mxu0 }
0x16f1   :  { %v20142_v49 = vmul.f32 0.25, %v9700_v41 }
0x16f3   :  { %v9728_v63 = vpop.f32.mrf.mxu1  ;;  %18281 = vrot.lane.b32.xlu0 %v20025_v59, %s19036_s29  ;;  %v9733_v39 = vsel %vm1087_vm1, %v20142_v49, -inf }
0x16f4   :  { %v20146_v3 = vmul.f32 0.25, %v9728_v63 }
0x16f6   :  { %v9736_v38 = vsel %vm1087_vm1, %v20146_v3, -inf }
0x16f7   :  { %9734 = vmax.xlane.f32.xlu2 %v9733_v39  ;;  %9737 = vmax.xlane.f32.xlu1 %v9736_v38 }
0x171d   :  { %9602 = vmax.xlane.f32.xlu0 %v9601_v0 }
0x172c   :  { %v8941_v46 = vpop.xlane.xlu1 %8940 }
0x172d   :  { %v8945_v11 = vsub.f32 %v20089_v30, %v8941_v46 }
0x172f   :  { %v8947_v45 = vmul.f32 1.442695, %v8945_v11 }
0x1731   :  { %18507 = vpow2.f32 %v8947_v45 }
0x1734   :  { %v9075_v54 = vpop.xlane.xlu2 %9074 }
0x1735   :  { %v9079_v21 = vsub.f32 %v20093_v9, %v9075_v54  ;;  %v18273_v9 = vunpack.i.l.bf16 %v18272_v10 }
0x1737   :  { %v20160_v4 = vpop.eup %18507  ;;  %v9081_v16 = vmul.f32 1.442695, %v9079_v21  ;;  %v8827_v12 = vpop.xlane.xlu1 %8826 }
0x1738   :  { %18509 = vrcp.f32 %v8827_v12  ;;  %v8951_v2 = vsel %vm1087_vm1, %v20160_v4, 0.0 }
0x1739   :  { %18511 = vpow2.f32 %v9081_v16  ;;  %8952 = vadd.xlane.f32.xlu0 %v8951_v2 }
0x173a   :  { %v8944_v57 = vpop.xlane.xlu0 %8943 }
0x173b   :  { %v8946_v26 = vsub.f32 %v20101_v8, %v8944_v57 }
0x173d   :  { %v8949_v40 = vmul.f32 1.442695, %v8946_v26 }
0x173e   :  { %v18510_v30 = vpop.eup %18509 }
0x173f   :  { %v20165_v58 = vpop.eup %18511  ;;  %v8833_v28 = vmul.f32 %v18510_v30, %v20097_v18  ;;  %18513 = vpow2.f32 %v8949_v40 }
0x1740   :  { %v9085_v25 = vsel %vm1087_vm1, %v20165_v58, 0.0 }
0x1741   :  { %9086 = vadd.xlane.f32.xlu1 %v9085_v25  ;;  %15773 = vmatmul.msk.f32.vlgmr.msrb.gmra.mxu2 %vm1087_vm1, %v8833_v28 }
0x1742   :  { %9116 = vmatpush.msrb.mxu2 %v18273_v9  ;;  %v9078_v33 = vpop.xlane.xlu1 %9077  ;;  %v9207_v51 = vpop.xlane.xlu0 %9206 }
0x1743   :  { %v9080_v23 = vsub.f32 %v20108_v5, %v9078_v33  ;;  %v9211_v8 = vsub.f32 %v20106_v19, %v9207_v51 }
0x1745   :  { %v20173_v24 = vpop.eup %18513  ;;  %v9083_v31 = vmul.f32 1.442695, %v9080_v23  ;;  %v9213_v62 = vmul.f32 1.442695, %v9211_v8 }
0x1746   :  { %v8954_v18 = vsel %vm1087_vm1, %v20173_v24, 0.0 }
0x1747   :  { %18515 = vpow2.f32 %v9083_v31  ;;  %8955 = vadd.xlane.f32.xlu2 %v8954_v18 }
0x1748   :  { %18517 = vpow2.f32 %v9213_v62 }
0x174a   :  { %v9210_v35 = vpop.xlane.xlu2 %9209  ;;  %v8830_v15 = vpop.xlane.xlu0 %8829 }
0x174b   :  { %v9212_v6 = vsub.f32 %v20118_v53, %v9210_v35  ;;  %v9339_v13 = vpop.xlane.xlu1 %9338  ;;  %18519 = vrcp.f32 %v8830_v15 }
0x174c   :  { %v9343_v19 = vsub.f32 %v20116_v42, %v9339_v13 }
0x174d   :  { %v20178_v43 = vpop.eup %18515  ;;  %v9215_v5 = vmul.f32 1.442695, %v9212_v6  ;;  %v18278_v6 = vunpack.i.l.bf16 %v20156_v32 }
0x174e   :  { %v20181_v7 = vpop.eup %18517  ;;  %v9088_v44 = vsel %vm1087_vm1, %v20178_v43, 0.0  ;;  %v9345_v53 = vmul.f32 1.442695, %v9343_v19 }
0x174f   :  { %18521 = vpow2.f32 %v9215_v5  ;;  %9089 = vadd.xlane.f32.xlu0 %v9088_v44  ;;  %v9217_v27 = vsel %vm1087_vm1, %v20181_v7, 0.0 }
0x1750   :  { %9218 = vadd.xlane.f32.xlu1 %v9217_v27  ;;  %18523 = vpow2.f32 %v9345_v53  ;;  %v18279_v53 = vunpack.i.h.bf16 %v20156_v32 }
0x1751   :  { %v18520_v52 = vpop.eup %18519 }
0x1752   :  { %v8834_v37 = vmul.f32 %v18520_v52, %v20114_v36  ;;  %v9342_v50 = vpop.xlane.xlu0 %9341  ;;  %v9471_v22 = vpop.xlane.xlu2 %9470 }
0x1753   :  { %v9344_v48 = vsub.f32 %v20128_v29, %v9342_v50  ;;  %v9475_v39 = vsub.f32 %v20126_v56, %v9471_v22 }
0x1754   :  { %15774 = vmatmul.msk.f32.vlgmr.msrb.gmra.mxu3 %vm1087_vm1, %v8834_v37 }
0x1755   :  { %v20189_v42 = vpop.eup %18521  ;;  %9142 = vmatpush.msrb.mxu3 %v18274_v20  ;;  %v9347_v34 = vmul.f32 1.442695, %v9344_v48  ;;  %v9477_v29 = vmul.f32 1.442695, %v9475_v39 }
0x1756   :  { %v9220_v55 = vsel %vm1087_vm1, %v20189_v42, 0.0  ;;  %v20194_v63 = vpop.eup %18523 }
0x1757   :  { %9221 = vadd.xlane.f32.xlu0 %v9220_v55  ;;  %18525 = vpow2.f32 %v9347_v34  ;;  %v9349_v0 = vsel %vm1087_vm1, %v20194_v63, 0.0 }
0x175a   :  { %v9474_v41 = vpop.xlane.xlu1 %9473 }
0x175b   :  { %v9476_v36 = vsub.f32 %v20134_v47, %v9474_v41 }
0x175d   :  { %v9479_v38 = vmul.f32 1.442695, %v9476_v36  ;;  %v20200_v46 = vpop.eup %18525 }
0x175e   :  { %v9352_v56 = vsel %vm1087_vm1, %v20200_v46, 0.0 }
0x175f   :  { %18527 = vpow2.f32 %v9479_v38  ;;  %9350 = vadd.xlane.f32.xlu0 %v9349_v0 }
0x1760   :  { %18529 = vpow2.f32 %v9477_v29 }
0x1762   :  { %v9606_v10 = vpop.xlane.xlu2 %9605 }
0x1763   :  { %v9608_v45 = vsub.f32 %v20138_v61, %v9606_v10 }
0x1765   :  { %v20202_v11 = vpop.eup %18527  ;;  %v9611_v54 = vmul.f32 1.442695, %v9608_v45  ;;  %v18282_v2 = vpop.permute.xlu0 %18281 }
0x1766   :  { %v9484_v47 = vsel %vm1087_vm1, %v20202_v11, 0.0  ;;  %v20209_v21 = vpop.eup %18529  ;;  %v18283_v44 = vunpack.i.l.bf16 %v18282_v2  ;;  %v18284_v55 = vunpack.i.h.bf16 %v18282_v2 }
0x1767   :  { %9485 = vadd.xlane.f32.xlu2 %v9484_v47  ;;  %9353 = vadd.xlane.f32.xlu0 %v9352_v56  ;;  %18531 = vpow2.f32 %v9611_v54  ;;  %v9481_v16 = vsel %vm1087_vm1, %v20209_v21, 0.0 }
0x176a   :  { %v9735_v57 = vpop.xlane.xlu2 %9734  ;;  %v9738_v25 = vpop.xlane.xlu1 %9737 }
0x176b   :  { %v9739_v30 = vsub.f32 %v20142_v49, %v9735_v57  ;;  %v9740_v51 = vsub.f32 %v20146_v3, %v9738_v25 }
0x176d   :  { %v20213_v12 = vpop.eup %18531  ;;  %v9741_v9 = vmul.f32 1.442695, %v9739_v30  ;;  %v9743_v8 = vmul.f32 1.442695, %v9740_v51 }
0x176e   :  { %v9616_v61 = vsel %vm1087_vm1, %v20213_v12, 0.0 }
0x176f   :  { %9482 = vadd.xlane.f32.xlu0 %v9481_v16 }
0x1777   :  { %9617 = vadd.xlane.f32.xlu0 %v9616_v61 }
0x177f   :  { %18286 = vrot.lane.b32.xlu2 %v20025_v59, %s19055_s24 }
0x1787   :  { %18296 = vrot.lane.b32.xlu2 %v20025_v59, %s19043_s6 }
0x1790   :  { %v9603_v26 = vpop.xlane.xlu0 %9602 }
0x1791   :  { %v9607_v40 = vsub.f32 %v20152_v60, %v9603_v26 }
0x1793   :  { %v9609_v28 = vmul.f32 1.442695, %v9607_v40 }
0x1795   :  { %18533 = vpow2.f32 %v9609_v28 }
0x1796   :  { %18535 = vpow2.f32 %v9741_v9 }
0x1797   :  { %18537 = vpow2.f32 %v9743_v8 }
0x179b   :  { %v20223_v33 = vpop.eup %18533 }
0x179c   :  { %v9613_v23 = vsel %vm1087_vm1, %v20223_v33, 0.0  ;;  %v20228_v31 = vpop.eup %18535 }
0x179d   :  { %9614 = vadd.xlane.f32.xlu1 %v9613_v23  ;;  %v9745_v49 = vsel %vm1087_vm1, %v20228_v31, 0.0  ;;  %v20232_v60 = vpop.eup %18537 }
0x179e   :  { %v9748_v18 = vsel %vm1087_vm1, %v20232_v60, 0.0 }
0x17a5   :  { %9746 = vadd.xlane.f32.xlu1 %v9745_v49 }
0x17ac   :  { %v8953_v62 = vpop.xlane.xlu0 %8952 }
0x17ad   :  { %18539 = vrcp.f32 %v8953_v62  ;;  %9749 = vadd.xlane.f32.xlu1 %v9748_v18 }
0x17b3   :  { %v18540_v3 = vpop.eup %18539 }
0x17b4   :  { %v8959_v35 = vmul.f32 %v18540_v3, %v20160_v4  ;;  %v9087_v15 = vpop.xlane.xlu1 %9086 }
0x17b5   :  { %18541 = vrcp.f32 %v9087_v15 }
0x17b6   :  { %15779 = vmatmul.msk.f32.vlgmr.msra.gmra.mxu2 %vm1087_vm1, %v8959_v35 }
0x17b7   :  { %9248 = vmatpush.msra.mxu2 %v18278_v6 }
0x17ba   :  { %v8956_v13 = vpop.xlane.xlu2 %8955 }
0x17bb   :  { %v18542_v5 = vpop.eup %18541  ;;  %18543 = vrcp.f32 %v8956_v13 }
0x17bc   :  { %v9093_v19 = vmul.f32 %v18542_v5, %v20165_v58 }
0x17be   :  { %15785 = vmatmul.msk.f32.vlgmr.msrb.gmra.mxu2 %vm1087_vm1, %v9093_v19 }
0x17bf   :  { %9380 = vmatpush.msrb.mxu2 %v18283_v44 }
0x17c1   :  { %v18544_v27 = vpop.eup %18543 }
0x17c2   :  { %v8960_v52 = vmul.f32 %v18544_v27, %v20173_v24  ;;  %v9090_v4 = vpop.xlane.xlu0 %9089 }
0x17c3   :  { %v9219_v37 = vpop.xlane.xlu1 %9218  ;;  %18545 = vrcp.f32 %v9090_v4 }
0x17c4   :  { %18547 = vrcp.f32 %v9219_v37  ;;  %15780 = vmatmul.msk.f32.vlgmr.msra.gmra.mxu3 %vm1087_vm1, %v8960_v52  ;;  %v8855_v25 = vpop.f32.mrf.mxu2 }
0x17c5   :  { %9274 = vmatpush.msra.mxu3 %v18279_v53 }
0x17c6   :  { %18291 = vrot.lane.b32.xlu1 %v20025_v59, %s19051_s8 }
0x17c9   :  { %v18546_v58 = vpop.eup %18545 }
0x17ca   :  { %v18548_v50 = vpop.eup %18547  ;;  %v9094_v20 = vmul.f32 %v18546_v58, %v20178_v43  ;;  %v9222_v48 = vpop.xlane.xlu0 %9221 }
0x17cb   :  { %v9225_v24 = vmul.f32 %v18548_v50, %v20181_v7  ;;  %18549 = vrcp.f32 %v9222_v48  ;;  %v17784_v48 = vld [vmem:[#allocation12 + $0xb8] sm:$0xff] }
0x17cc   :  { %15786 = vmatmul.msk.f32.vlgmr.msrb.gmra.mxu3 %vm1087_vm1, %v9094_v20  ;;  %9948 = vmatpush.bf16.msra.mxu0 %v17784_v48  ;;  %v16235_v48 = vld [vmem:[#allocation18 + $0xb00] sm:$0xf] }
0x17cd   :  { %15791 = vmatmul.msk.f32.vlgmr.msra.gmra.mxu2 %vm1087_vm1, %v9225_v24  ;;  %9406 = vmatpush.msrb.mxu3 %v18284_v55  ;;  %v17783_v55 = vld [vmem:[#allocation12 + $0xb0] sm:$0xff]  ;;  %v17782_v24 = vld [vmem:[#allocation12 + $0xa8] sm:$0xff] }
0x17d0   :  { %9949 = vmatpush.bf16.msra.mxu0 %v17783_v55 }
0x17d1   :  { %v18550_v32 = vpop.eup %18549 }
0x17d2   :  { %v9226_v34 = vmul.f32 %v18550_v32, %v20189_v42  ;;  %v9351_v22 = vpop.xlane.xlu0 %9350  ;;  %v17781_v32 = vld [vmem:[#allocation12 + $0xa0] sm:$0xff] }
0x17d3   :  { %18551 = vrcp.f32 %v9351_v22  ;;  %v17779_v22 = vld [vmem:[#allocation12 + $0x90] sm:$0xff] }
0x17d4   :  { %15792 = vmatmul.msk.f32.vlgmr.msra.gmra.mxu3 %vm1087_vm1, %v9226_v34  ;;  %9950 = vmatpush.bf16.msra.mxu0 %v17782_v24  ;;  %v17780_v34 = vld [vmem:[#allocation12 + $0x98] sm:$0xff]  ;;  %v17889_v24 = vld [vmem:[#allocation18 + $0xb3c] sm:$0xf0] }
0x17d7   :  { %v8878_v8 = vpop.f32.mrf.mxu3 }
0x17d8   :  { %9951 = vmatpush.bf16.msra.mxu0 %v17781_v32  ;;  %v17881_v32 = vld [vmem:[#allocation18 + $0xb04] sm:$0xf] }
0x17d9   :  { %v18552_v59 = vpop.eup %18551 }
0x17da   :  { %v9357_v43 = vmul.f32 %v18552_v59, %v20194_v63  ;;  %v9486_v41 = vpop.xlane.xlu2 %9485  ;;  %v9354_v36 = vpop.xlane.xlu0 %9353  ;;  %v17778_v59 = vld [vmem:[#allocation12 + $0x88] sm:$0xff] }
0x17db   :  { %18553 = vrcp.f32 %v9354_v36 }
0x17dc   :  { %15797 = vmatmul.msk.f32.vlgmr.msrb.gmra.mxu2 %vm1087_vm1, %v9357_v43  ;;  %18555 = vrcp.f32 %v9486_v41  ;;  %9952 = vmatpush.bf16.msra.mxu0 %v17780_v34  ;;  %v17777_v43 = vld [vmem:[#allocation12 + $0x80] sm:$0xff]  ;;  %v16236_v34 = vor.u32 %v17889_v24, %v16235_v48  ;;  %v15987_v48 = vld [vmem:[#allocation18 + $0x908] sm:$0xf] }
0x17e0   :  { %9953 = vmatpush.bf16.msra.mxu0 %v17779_v22 }
0x17e1   :  { %v18554_v7 = vpop.eup %18553 }
0x17e2   :  { %v18287_v39 = vpop.permute.xlu2 %18286  ;;  %v9483_v38 = vpop.xlane.xlu0 %9482  ;;  %v9358_v0 = vmul.f32 %v18554_v7, %v20200_v46 }
0x17e3   :  { %v18289_v29 = vunpack.i.h.bf16 %v18287_v39  ;;  %v18288_v42 = vunpack.i.l.bf16 %v18287_v39  ;;  %18557 = vrcp.f32 %v9483_v38  ;;  %v18556_v10 = vpop.eup %18555 }
0x17e4   :  { %15798 = vmatmul.msk.f32.vlgmr.msrb.gmra.mxu3 %vm1087_vm1, %v9358_v0  ;;  %v9490_v47 = vmul.f32 %v18556_v10, %v20202_v11  ;;  %9954 = vmatpush.bf16.msra.mxu0 %v17778_v59  ;;  %v16243_v59 = vld [vmem:[#allocation18 + $0xb08] sm:$0xf] }
0x17e5   :  { %9512 = vmatpush.msra.mxu2 %v18288_v42  ;;  %9538 = vmatpush.msra.mxu3 %v18289_v29 }
0x17e8   :  { %9955 = vmatpush.bf16.msra.mxu0 %v17777_v43  ;;  %v17890_v43 = vld [vmem:[#allocation18 + $0xb44] sm:$0xf0] }
0x17e9   :  { %v18558_v63 = vpop.eup %18557 }
0x17ea   :  { %v9489_v45 = vmul.f32 %v18558_v63, %v20209_v21  ;;  %v9618_v46 = vpop.xlane.xlu0 %9617  ;;  %v18297_v57 = vpop.permute.xlu2 %18296 }
0x17eb   :  { %18559 = vrcp.f32 %v9618_v46  ;;  %v18299_v28 = vunpack.i.h.bf16 %v18297_v57  ;;  %v18298_v9 = vunpack.i.l.bf16 %v18297_v57 }
0x17ec   :  { %15803 = vmatmul.msk.f32.vlgmr.msra.gmra.mxu2 %vm1087_vm1, %v9489_v45  ;;  %15804 = vmatmul.msk.f32.vlgmr.msra.gmra.mxu3 %vm1087_vm1, %v9490_v47 }
0x17f1   :  { %v18560_v61 = vpop.eup %18559 }
0x17f2   :  { %v9622_v11 = vmul.f32 %v18560_v61, %v20213_v12 }
0x1810   :  { %v9615_v56 = vpop.xlane.xlu1 %9614 }
0x1811   :  { %18561 = vrcp.f32 %v9615_v56 }
0x1817   :  { %v18562_v2 = vpop.eup %18561 }
0x1818   :  { %v9747_v54 = vpop.xlane.xlu1 %9746  ;;  %v9621_v30 = vmul.f32 %v18562_v2, %v20223_v33 }
0x1819   :  { %18563 = vrcp.f32 %v9747_v54 }
0x181f   :  { %v18564_v51 = vpop.eup %18563 }
0x1820   :  { %v9750_v16 = vpop.xlane.xlu1 %9749  ;;  %v9753_v49 = vmul.f32 %v18564_v51, %v20228_v31 }
0x1821   :  { %18565 = vrcp.f32 %v9750_v16 }
0x1827   :  { %v18566_v23 = vpop.eup %18565 }
0x1828   :  { %v9754_v12 = vmul.f32 %v18566_v23, %v20232_v60 }
0x1838   :  { %v18292_v26 = vpop.permute.xlu1 %18291 }
0x1839   :  { %v18294_v40 = vunpack.i.h.bf16 %v18292_v26  ;;  %v18293_v21 = vunpack.i.l.bf16 %v18292_v26  ;;  %v8985_v33 = vpop.f32.mrf.mxu2 }
0x183b   :  { %9644 = vmatpush.msrb.mxu2 %v18293_v21  ;;  %9670 = vmatpush.msrb.mxu3 %v18294_v40 }
0x183c   :  { %15809 = vmatmul.msk.f32.vlgmr.msrb.gmra.mxu2 %vm1087_vm1, %v9621_v30  ;;  %15810 = vmatmul.msk.f32.vlgmr.msrb.gmra.mxu3 %vm1087_vm1, %v9622_v11 }
0x183d   :  { %9776 = vmatpush.msra.mxu2 %v18298_v9  ;;  %9802 = vmatpush.msra.mxu3 %v18299_v28 }
0x1841   :  { %v9118_v3 = vpop.f32.mrf.mxu2 }
0x1844   :  { %15815 = vmatmul.msk.f32.vlgmr.msra.gmra.mxu2 %vm1087_vm1, %v9753_v49  ;;  %15816 = vmatmul.msk.f32.vlgmr.msra.gmra.mxu3 %vm1087_vm1, %v9754_v12 }
0x1847   :  { %v9012_v62 = vpop.f32.mrf.mxu3 }
0x1848   :  { %v18300_v18 = vpack.i.bf16 %v9012_v62, %v8985_v33 }
0x184a   :  { %18301 = vrot.lane.b32.xlu0 %v18300_v18, %s19043_s6 }
0x184f   :  { %v9144_v35 = vpop.f32.mrf.mxu3 }
0x1850   :  { %v18305_v15 = vpack.i.bf16 %v9144_v35, %v9118_v3  ;;  %v9250_v6 = vpop.f32.mrf.mxu2  ;;  %v18350_v35 = vld [vmem:[#allocation14 + $0x2] ss:$0 sm:$0xff] }
0x1852   :  { %18306 = vrot.lane.b32.xlu2 %v18305_v15, %s19051_s8 }
0x1857   :  { %v9276_v13 = vpop.f32.mrf.mxu3 }
0x1858   :  { %v18310_v5 = vpack.i.bf16 %v9276_v13, %v9250_v6 }
0x185a   :  { %18311 = vrot.lane.b32.xlu2 %v18310_v5, %s19055_s24 }
0x185f   :  { %v9382_v31 = vpop.f32.mrf.mxu2 }
0x1867   :  { %v9408_v60 = vpop.f32.mrf.mxu3 }
0x1868   :  { %v18315_v19 = vpack.i.bf16 %v9408_v60, %v9382_v31 }
0x186a   :  { %18316 = vrot.lane.b32.xlu0 %v18315_v19, %s19036_s29  ;;  %v16299_v19 = vld [vmem:[#allocation18 + $0xb80] sm:$0xf] }
0x186f   :  { %v9514_v44 = vpop.f32.mrf.mxu2  ;;  %v9540_v27 = vpop.f32.mrf.mxu3 }
0x1870   :  { %v18320_v52 = vpack.i.bf16 %v9540_v27, %v9514_v44  ;;  %v17905_v44 = vld [vmem:[#allocation18 + $0xbbc] sm:$0xf0]  ;;  %v17897_v27 = vld [vmem:[#allocation18 + $0xb84] sm:$0xf] }
0x1872   :  { %18321 = vrot.lane.b32.xlu1 %v18320_v52, %s19066_s4  ;;  %v16300_v52 = vor.u32 %v17905_v44, %v16299_v19 }
0x1874   :  { %10825 = vmatpush.bf16.msrb.mxu1 %v16300_v52 }
0x1878   :  { %10826 = vmatpush.bf16.msrb.mxu1 %v16236_v34  ;;  %v15989_v34 = vld [vmem:[#allocation18 + $0x948] sm:$0xf0] }
0x18ac   :  { %v18307_v41 = vpop.permute.xlu2 %18306 }
0x18ad   :  { %v18309_v10 = vunpack.i.h.bf16 %v18307_v41  ;;  %v18308_v63 = vunpack.i.l.bf16 %v18307_v41  ;;  %v17882_v41 = vld [vmem:[#allocation18 + $0xb0c] sm:$0xf] }
0x18b4   :  { %v18312_v7 = vpop.permute.xlu2 %18311 }
0x18b5   :  { %v18314_v61 = vunpack.i.h.bf16 %v18312_v7  ;;  %v18313_v2 = vunpack.i.l.bf16 %v18312_v7  ;;  %v16245_v7 = vld [vmem:[#allocation18 + $0xb48] sm:$0xf0] }
0x18bc   :  { %v18302_v36 = vpop.permute.xlu0 %18301 }
0x18bd   :  { %v18304_v39 = vunpack.i.h.bf16 %v18302_v36  ;;  %v18303_v38 = vunpack.i.l.bf16 %v18302_v36  ;;  %v16244_v36 = vor.u32 %v17890_v43, %v16243_v59  ;;  %v17809_v59 = vld [vmem:[#allocation18 + $0x8bc] sm:$0xf0]  ;;  %v17801_v43 = vld [vmem:[#allocation18 + $0x884] sm:$0xf] }
0x18bf   :  { %v9646_v4 = vpop.f32.mrf.mxu2  ;;  %v9672_v53 = vpop.f32.mrf.mxu3  ;;  %v9864_v29 = vsel %vm1032_vm0, %v8878_v8, %v18304_v39  ;;  %v9863_v42 = vsel %vm1032_vm0, %v8855_v25, %v18303_v38  ;;  %v16171_v39 = vld [vmem:[#allocation18 + $0xa80] sm:$0xf] }
0x18c0   :  { %v18325_v37 = vpack.i.bf16 %v9672_v53, %v9646_v4  ;;  %v9866_v56 = vsel %vm2140_vm2, %v9864_v29, %v18309_v10  ;;  %v9865_v54 = vsel %vm2140_vm2, %v9863_v42, %v18308_v63  ;;  %v16301_v4 = vld [vmem:[#allocation18 + $0xbc0] sm:$0xf0]  ;;  %v16307_v53 = vld [vmem:[#allocation18 + $0xb88] sm:$0xf]  ;;  %v17873_v38 = vld [vmem:[#allocation18 + $0xabc] sm:$0xf0] }
0x18c1   :  { %v9867_v11 = vsel %vm2143_vm3, %v9865_v54, %v18313_v2  ;;  %v9868_v30 = vsel %vm2143_vm3, %v9866_v56, %v18314_v61  ;;  %v17865_v29 = vld [vmem:[#allocation18 + $0xa84] sm:$0xf]  ;;  %v16179_v10 = vld [vmem:[#allocation18 + $0xa88] sm:$0xf]  ;;  %v16172_v63 = vor.u32 %v17873_v38, %v16171_v39  ;;  %v16181_v56 = vld [vmem:[#allocation18 + $0xac8] sm:$0xf0] }
0x18c2   :  { %18326 = vrot.lane.b32.xlu2 %v18325_v37, %s19065_s22  ;;  %v17906_v37 = vld [vmem:[#allocation18 + $0xbc4] sm:$0xf0]  ;;  %v16173_v42 = vld [vmem:[#allocation18 + $0xac0] sm:$0xf0]  ;;  %v17857_v61 = vld [vmem:[#allocation18 + $0xa3c] sm:$0xf0] }
0x18c3   :  { %v16176_v54 = vor.u32 %v17865_v29, %v16173_v42  ;;  %v17849_v2 = vld [vmem:[#allocation18 + $0xa04] sm:$0xf]  ;;  %10827 = vmatpush.bf16.msrb.mxu1 %v16172_v63  ;;  %v17810_v39 = vld [vmem:[#allocation18 + $0x8c4] sm:$0xf0]  ;;  %v17802_v29 = vld [vmem:[#allocation18 + $0x88c] sm:$0xf] }
0x18c4   :  { %v15925_v42 = vld [vmem:[#allocation18 + $0x8c8] sm:$0xf0]  ;;  %v15851_v63 = vld [vmem:[#allocation18 + $0x800] sm:$0xf] }
0x18c7   :  { %v9778_v58 = vpop.f32.mrf.mxu2  ;;  %v9804_v50 = vpop.f32.mrf.mxu3 }
0x18c8   :  { %v18330_v20 = vpack.i.bf16 %v9804_v50, %v9778_v58  ;;  %v16304_v58 = vor.u32 %v17897_v27, %v16301_v4  ;;  %v16308_v50 = vor.u32 %v17906_v37, %v16307_v53 }
0x18ca   :  { %18331 = vrot.lane.b32.xlu0 %v18330_v20, %s19064_s19  ;;  %v16309_v20 = vld [vmem:[#allocation18 + $0xbc8] sm:$0xf0]  ;;  %10839 = vmatpush.bf16.msrb.mxu2 %v16304_v58  ;;  %v15979_v58 = vld [vmem:[#allocation18 + $0x900] sm:$0xf] }
0x18cb   :  { %10853 = vmatpush.bf16.msrb.mxu3 %v16308_v50  ;;  %v17817_v50 = vld [vmem:[#allocation18 + $0x904] sm:$0xf] }
0x18cf   :  { %10854 = vmatpush.bf16.msrb.mxu3 %v16244_v36  ;;  %v15917_v36 = vld [vmem:[#allocation18 + $0x8c0] sm:$0xf0] }
0x18d0   :  { %v15920_v38 = vor.u32 %v17801_v43, %v15917_v36  ;;  %v16131_v36 = vld [vmem:[#allocation18 + $0xa18] sm:$0xf] }
0x18dc   :  { %v18317_v0 = vpop.permute.xlu0 %18316 }
0x18dd   :  { %v18319_v46 = vunpack.i.h.bf16 %v18317_v0  ;;  %v18318_v16 = vunpack.i.l.bf16 %v18317_v0  ;;  %v16248_v0 = vor.u32 %v17882_v41, %v16245_v7  ;;  %v15923_v7 = vld [vmem:[#allocation18 + $0x888] sm:$0xf] }
0x18df   :  { %v9870_v28 = vsel %vm2146_vm4, %v9868_v30, %v18319_v46  ;;  %v9869_v9 = vsel %vm2146_vm4, %v9867_v11, %v18318_v16  ;;  %v16107_v16 = vld [vmem:[#allocation18 + $0xa00] sm:$0xf]  ;;  %v17850_v11 = vld [vmem:[#allocation18 + $0xa0c] sm:$0xf] }
0x18e0   :  { %v16117_v30 = vld [vmem:[#allocation18 + $0xa48] sm:$0xf0] }
0x18e4   :  { %v18322_v45 = vpop.permute.xlu1 %18321 }
0x18e5   :  { %v18324_v57 = vunpack.i.h.bf16 %v18322_v45  ;;  %v18323_v26 = vunpack.i.l.bf16 %v18322_v45  ;;  %v17874_v45 = vld [vmem:[#allocation18 + $0xac4] sm:$0xf0] }
0x18e6   :  { %v16180_v46 = vor.u32 %v17874_v45, %v16179_v10  ;;  %v15928_v10 = vor.u32 %v17802_v29, %v15925_v42  ;;  %v17793_v45 = vld [vmem:[#allocation18 + $0x83c] sm:$0xf0]  ;;  %v16133_v29 = vld [vmem:[#allocation18 + $0xa58] sm:$0xf0] }
0x18e7   :  { %v9872_v51 = vsel %vm2149_vm5, %v9870_v28, %v18324_v57  ;;  %v9871_v23 = vsel %vm2149_vm5, %v9869_v9, %v18323_v26  ;;  %v16109_v26 = vld [vmem:[#allocation18 + $0xa40] sm:$0xf0]  ;;  %v16108_v28 = vor.u32 %v17857_v61, %v16107_v16  ;;  %v17794_v16 = vld [vmem:[#allocation18 + $0x844] sm:$0xf0] }
0x18e8   :  { %10855 = vmatpush.bf16.msrb.mxu3 %v16180_v46  ;;  %v16112_v9 = vor.u32 %v17849_v2, %v16109_v26  ;;  %v15859_v46 = vld [vmem:[#allocation18 + $0x808] sm:$0xf]  ;;  %v15861_v26 = vld [vmem:[#allocation18 + $0x848] sm:$0xf0] }
0x18e9   :  { %10828 = vmatpush.bf16.msrb.mxu1 %v16108_v28  ;;  %v15860_v2 = vor.u32 %v17794_v16, %v15859_v46  ;;  %v16317_v28 = vld [vmem:[#allocation18 + $0xbd0] sm:$0xf0]  ;;  %v17844_v46 = vld [vmem:[#allocation18 + $0x9d4] sm:$0xf0] }
0x191c   :  { %v18327_v47 = vpop.permute.xlu2 %18326 }
0x191d   :  { %v18329_v40 = vunpack.i.h.bf16 %v18327_v47  ;;  %v18328_v21 = vunpack.i.l.bf16 %v18327_v47  ;;  %v17866_v47 = vld [vmem:[#allocation18 + $0xa8c] sm:$0xf] }
0x191e   :  { %v16184_v57 = vor.u32 %v17866_v47, %v16181_v56  ;;  %v17785_v47 = vld [vmem:[#allocation18 + $0x804] sm:$0xf]  ;;  %v15852_v56 = vor.u32 %v17793_v45, %v15851_v63  ;;  %v17843_v63 = vld [vmem:[#allocation18 + $0x9cc] sm:$0xf0]  ;;  %v17835_v45 = vld [vmem:[#allocation18 + $0x994] sm:$0xf] }
0x191f   :  { %v9874_v12 = vsel %vm2152_vm6, %v9872_v51, %v18329_v40  ;;  %v9873_v33 = vsel %vm2152_vm6, %v9871_v23, %v18328_v21  ;;  %v16115_v40 = vld [vmem:[#allocation18 + $0xa08] sm:$0xf]  ;;  %v16043_v51 = vld [vmem:[#allocation18 + $0x980] sm:$0xf] }
0x1920   :  { %v17858_v21 = vld [vmem:[#allocation18 + $0xa44] sm:$0xf0]  ;;  %v17841_v23 = vld [vmem:[#allocation18 + $0x9bc] sm:$0xf0] }
0x193c   :  { %v18332_v25 = vpop.permute.xlu0 %18331 }
0x193d   :  { %v18334_v8 = vunpack.i.h.bf16 %v18332_v25  ;;  %v18333_v49 = vunpack.i.l.bf16 %v18332_v25  ;;  %v16116_v25 = vor.u32 %v17858_v21, %v16115_v40  ;;  %v16315_v40 = vld [vmem:[#allocation18 + $0xb90] sm:$0xf] }
0x193f   :  { %v9876_v62 = vsel %vm2155_vm7, %v9874_v12, %v18334_v8  ;;  %v9875_v18 = vsel %vm2155_vm7, %v9873_v33, %v18333_v49  ;;  %v17833_v8 = vld [vmem:[#allocation18 + $0x984] sm:$0xf]  ;;  %v16120_v49 = vor.u32 %v17850_v11, %v16117_v30  ;;  %v16051_v33 = vld [vmem:[#allocation18 + $0x988] sm:$0xf]  ;;  %10856 = vmatpush.bf16.msrb.mxu3 %v16116_v25  ;;  %v17907_v11 = vld [vmem:[#allocation18 + $0xbcc] sm:$0xf0] }
0x1940   :  { %v9896_v3 = vpack.c.bf16 %v9876_v62, %v9875_v18  ;;  %v16045_v12 = vld [vmem:[#allocation18 + $0x9c0] sm:$0xf0]  ;;  %v17842_v62 = vld [vmem:[#allocation18 + $0x9c4] sm:$0xf0]  ;;  %v17834_v18 = vld [vmem:[#allocation18 + $0x98c] sm:$0xf] }
0x1941   :  { %v17899_v30 = vld [vmem:[#allocation18 + $0xb94] sm:$0xf] }
0x1942   :  { %9956 = vmatmul.bf16.vlgmr.msra.gmra.mxu0 %v9896_v3  ;;  %v16053_v3 = vld [vmem:[#allocation18 + $0x9c8] sm:$0xf0]  ;;  %v16320_v25 = vor.u32 %v17899_v30, %v16317_v28  ;;  %v15997_v28 = vld [vmem:[#allocation18 + $0x950] sm:$0xf0] }
0x19bf   :  { %v9957_v15 = vpop.f32.mrf.mxu0 }
0x19c0   :  { %v9958_v6 = vadd.f32 %v18350_v35, %v9957_v15  ;;  %v16048_v15 = vor.u32 %v17833_v8, %v16045_v12  ;;  %v17900_v8 = vld [vmem:[#allocation18 + $0xb9c] sm:$0xf] }
0x19c1   :  { %v16325_v12 = vld [vmem:[#allocation18 + $0xbd8] sm:$0xf0] }
0x19c2   :  { %v20290_v13 = vadd.f32 %v9958_v6, %v20010_v14  ;;  %v17898_v14 = vld [vmem:[#allocation18 + $0xb8c] sm:$0xf]  ;;  %v16052_v6 = vor.u32 %v17842_v62, %v16051_v33  ;;  %v16251_v33 = vld [vmem:[#allocation18 + $0xb10] sm:$0xf] }
0x19c3   :  { %v16312_v55 = vor.u32 %v17898_v14, %v16309_v20  ;;  %v15981_v20 = vld [vmem:[#allocation18 + $0x940] sm:$0xf0]  ;;  %v17891_v62 = vld [vmem:[#allocation18 + $0xb4c] sm:$0xf0] }
0x19c4   :  { %9968 = vadd.xlane.f32.xlu1 %v20290_v13  ;;  %10857 = vmatpush.bf16.msrb.mxu3 %v16052_v6  ;;  %v15984_v24 = vor.u32 %v17817_v50, %v15981_v20  ;;  %v16259_v6 = vld [vmem:[#allocation18 + $0xb18] sm:$0xf] }
0x19c5   :  { %10867 = vmatpush.bf16.msrb.mxu0 %v16312_v55  ;;  %v17826_v55 = vld [vmem:[#allocation18 + $0x944] sm:$0xf0]  ;;  %v16195_v20 = vld [vmem:[#allocation18 + $0xa98] sm:$0xf] }
0x19c7   :  { %v9959_v5 = vpop.f32.mrf.mxu0 }
0x19c8   :  { %v9960_v31 = vadd.f32 %v18350_v35, %v9959_v5  ;;  %v16044_v35 = vor.u32 %v17841_v23, %v16043_v51  ;;  %v16323_v51 = vld [vmem:[#allocation18 + $0xb98] sm:$0xf] }
0x19c9   :  { %10868 = vmatpush.bf16.msrb.mxu0 %v16248_v0  ;;  %v15924_v0 = vor.u32 %v17810_v39, %v15923_v7  ;;  %v17908_v23 = vld [vmem:[#allocation18 + $0xbd4] sm:$0xf0] }
0x19ca   :  { %v20294_v60 = vadd.f32 %v9960_v31, %v20012_v17  ;;  %v16237_v17 = vld [vmem:[#allocation18 + $0xb40] sm:$0xf0]  ;;  %v16056_v31 = vor.u32 %v17834_v18, %v16053_v3  ;;  %10829 = vmatpush.bf16.msrb.mxu1 %v16044_v35  ;;  %v16328_v18 = vor.u32 %v17900_v8, %v16325_v12  ;;  %v16252_v3 = vor.u32 %v17891_v62, %v16251_v33  ;;  %v17883_v35 = vld [vmem:[#allocation18 + $0xb14] sm:$0xf]  ;;  %v17860_v7 = vld [vmem:[#allocation18 + $0xa54] sm:$0xf0] }
0x19cb   :  { %v16240_v22 = vor.u32 %v17881_v32, %v16237_v17  ;;  %v15988_v32 = vor.u32 %v17826_v55, %v15987_v48  ;;  %v17818_v17 = vld [vmem:[#allocation18 + $0x90c] sm:$0xf]  ;;  %v17876_v48 = vld [vmem:[#allocation18 + $0xad4] sm:$0xf0]  ;;  %v17820_v8 = vld [vmem:[#allocation18 + $0x91c] sm:$0xf] }
0x19cc   :  { %9970 = vadd.xlane.f32.xlu2 %v20294_v60 }
0x19cd   :  { %10840 = vmatpush.bf16.msrb.mxu2 %v16240_v22  ;;  %10869 = vmatpush.bf16.msrb.mxu0 %v16184_v57  ;;  %v15992_v22 = vor.u32 %v17818_v17, %v15989_v34  ;;  %v17786_v57 = vld [vmem:[#allocation18 + $0x80c] sm:$0xf]  ;;  %v16197_v17 = vld [vmem:[#allocation18 + $0xad8] sm:$0xf0] }
0x19ce   :  { %10858 = vmatpush.bf16.msrb.mxu3 %v15988_v32  ;;  %v15864_v21 = vor.u32 %v17786_v57, %v15861_v26  ;;  %v17868_v32 = vld [vmem:[#allocation18 + $0xa9c] sm:$0xf] }
0x19cf   :  { %v16200_v34 = vor.u32 %v17868_v32, %v16197_v17  ;;  %v16069_v57 = vld [vmem:[#allocation18 + $0x9d8] sm:$0xf0] }
0x19d1   :  { %10841 = vmatpush.bf16.msrb.mxu2 %v16176_v54  ;;  %10870 = vmatpush.bf16.msrb.mxu0 %v16120_v49  ;;  %v15853_v54 = vld [vmem:[#allocation18 + $0x840] sm:$0xf0]  ;;  %v16324_v49 = vor.u32 %v17908_v23, %v16323_v51 }
0x19d2   :  { %10859 = vmatpush.bf16.msrb.mxu3 %v15924_v0  ;;  %v15856_v61 = vor.u32 %v17785_v47, %v15853_v54  ;;  %v17852_v0 = vld [vmem:[#allocation18 + $0xa1c] sm:$0xf]  ;;  %v16067_v54 = vld [vmem:[#allocation18 + $0x998] sm:$0xf] }
0x19d3   :  { %v16136_v42 = vor.u32 %v17852_v0, %v16133_v29 }
0x19d5   :  { %10842 = vmatpush.bf16.msrb.mxu2 %v16112_v9  ;;  %10871 = vmatpush.bf16.msrb.mxu0 %v16056_v31  ;;  %v16316_v9 = vor.u32 %v17907_v11, %v16315_v40  ;;  %v17892_v31 = vld [vmem:[#allocation18 + $0xb54] sm:$0xf0]  ;;  %v15995_v40 = vld [vmem:[#allocation18 + $0x910] sm:$0xf]  ;;  %v17819_v11 = vld [vmem:[#allocation18 + $0x914] sm:$0xf] }
0x19d6   :  { %10860 = vmatpush.bf16.msrb.mxu3 %v15860_v2  ;;  %v17836_v2 = vld [vmem:[#allocation18 + $0x99c] sm:$0xf]  ;;  %v16000_v51 = vor.u32 %v17819_v11, %v15997_v28  ;;  %v17909_v11 = vld [vmem:[#allocation18 + $0xbdc] sm:$0xf0]  ;;  %v16333_v28 = vld [vmem:[#allocation18 + $0xbe0] sm:$0xf0] }
0x19d7   :  { %v16072_v26 = vor.u32 %v17836_v2, %v16069_v57  ;;  %v18352_v2 = vld [vmem:[#allocation17 + $0x2] ss:$0 sm:$0xff] }
0x19d9   :  { %10843 = vmatpush.bf16.msrb.mxu2 %v16048_v15  ;;  %10872 = vmatpush.bf16.msrb.mxu0 %v15992_v22  ;;  %v16253_v15 = vld [vmem:[#allocation18 + $0xb50] sm:$0xf0]  ;;  %v16123_v22 = vld [vmem:[#allocation18 + $0xa10] sm:$0xf] }
0x19da   :  { %10909 = vmatpush.bf16.msra.mxu3 %v16324_v49  ;;  %v16005_v49 = vld [vmem:[#allocation18 + $0x958] sm:$0xf0] }
0x19db   :  { %v16008_v33 = vor.u32 %v17820_v8, %v16005_v49  ;;  %v16341_v8 = vld [vmem:[#allocation18 + $0xbe8] sm:$0xf0] }
0x19dd   :  { %10844 = vmatpush.bf16.msrb.mxu2 %v15984_v24  ;;  %10873 = vmatpush.bf16.msrb.mxu0 %v15928_v10  ;;  %v16196_v24 = vor.u32 %v17876_v48, %v16195_v20  ;;  %v16059_v10 = vld [vmem:[#allocation18 + $0x990] sm:$0xf]  ;;  %v15869_v48 = vld [vmem:[#allocation18 + $0x850] sm:$0xf0] }
0x19de   :  { %v16060_v47 = vor.u32 %v17843_v63, %v16059_v10 }
0x19e1   :  { %10845 = vmatpush.bf16.msrb.mxu2 %v15920_v38  ;;  %10874 = vmatpush.bf16.msrb.mxu0 %v15864_v21  ;;  %v16132_v38 = vor.u32 %v17860_v7, %v16131_v36  ;;  %v17827_v21 = vld [vmem:[#allocation18 + $0x94c] sm:$0xf0] }
0x19e2   :  { %v15996_v30 = vor.u32 %v17827_v21, %v15995_v40  ;;  %v16331_v21 = vld [vmem:[#allocation18 + $0xba0] sm:$0xf] }
0x19e5   :  { %10846 = vmatpush.bf16.msrb.mxu2 %v15856_v61  ;;  %10923 = vmatpush.bf16.msra.mxu0 %v16328_v18  ;;  %v16068_v61 = vor.u32 %v17844_v46, %v16067_v54  ;;  %v15931_v18 = vld [vmem:[#allocation18 + $0x890] sm:$0xf]  ;;  %v18351_v54 = vld [vmem:[#allocation15 + $0x2] ss:$0 sm:$0xff] }
0x19e9   :  { %10895 = vmatpush.bf16.msra.mxu2 %v16320_v25  ;;  %v17828_v25 = vld [vmem:[#allocation18 + $0x954] sm:$0xf0] }
0x1a37   :  { %v9969_v5 = vpop.xlane.xlu1 %9968 }
0x1a38   :  { %v9972_v19 = vmul.f32 %v9969_v5, %v19569_v1  ;;  %v16256_v5 = vor.u32 %v17883_v35, %v16253_v15  ;;  %v17803_v35 = vld [vmem:[#allocation18 + $0x894] sm:$0xf] }
0x1a3a   :  { %v20299_v44 = vsub.f32 %v20290_v13, %v9972_v19  ;;  %v17825_v13 = vld [vmem:[#allocation18 + $0x93c] sm:$0xf0]  ;;  %v17884_v19 = vld [vmem:[#allocation18 + $0xb1c] sm:$0xf]  ;;  %10896 = vmatpush.bf16.msra.mxu2 %v16256_v5  ;;  %v15939_v5 = vld [vmem:[#allocation18 + $0x898] sm:$0xf] }
0x1a3b   :  { %v15980_v14 = vor.u32 %v17825_v13, %v15979_v58  ;;  %v17875_v58 = vld [vmem:[#allocation18 + $0xacc] sm:$0xf0]  ;;  %v17867_v13 = vld [vmem:[#allocation18 + $0xa94] sm:$0xf] }
0x1a3c   :  { %v9976_v27 = vmul.f32 %v20299_v44, %v20299_v44 }
0x1a3d   :  { %10830 = vmatpush.bf16.msrb.mxu1 %v15980_v14  ;;  %v16189_v14 = vld [vmem:[#allocation18 + $0xad0] sm:$0xf0] }
0x1a3e   :  { %9978 = vadd.xlane.f32.xlu0 %v9976_v27  ;;  %v16261_v27 = vld [vmem:[#allocation18 + $0xb58] sm:$0xf0]  ;;  %v16192_v55 = vor.u32 %v17867_v13, %v16189_v14  ;;  %v15867_v13 = vld [vmem:[#allocation18 + $0x810] sm:$0xf]  ;;  %v17787_v14 = vld [vmem:[#allocation18 + $0x814] sm:$0xf] }
0x1a3f   :  { %v9971_v52 = vpop.xlane.xlu2 %9970  ;;  %v15872_v32 = vor.u32 %v17787_v14, %v15869_v48  ;;  %v16205_v14 = vld [vmem:[#allocation18 + $0xae0] sm:$0xf0]  ;;  %v17878_v48 = vld [vmem:[#allocation18 + $0xae4] sm:$0xf0] }
0x1a40   :  { %v9973_v4 = vmul.f32 %v9971_v52, %v19569_v1  ;;  %v16260_v52 = vor.u32 %v17892_v31, %v16259_v6  ;;  %10897 = vmatpush.bf16.msra.mxu2 %v16192_v55  ;;  %v15933_v6 = vld [vmem:[#allocation18 + $0x8d0] sm:$0xf0]  ;;  %v17812_v31 = vld [vmem:[#allocation18 + $0x8d4] sm:$0xf0] }
0x1a41   :  { %v15875_v55 = vld [vmem:[#allocation18 + $0x818] sm:$0xf] }
0x1a42   :  { %v20305_v53 = vsub.f32 %v20294_v60, %v9973_v4  ;;  %v15915_v60 = vld [vmem:[#allocation18 + $0x880] sm:$0xf]  ;;  %v16264_v4 = vor.u32 %v17884_v19, %v16261_v27  ;;  %10910 = vmatpush.bf16.msra.mxu3 %v16260_v52  ;;  %v15936_v27 = vor.u32 %v17803_v35, %v15933_v6  ;;  %v15940_v52 = vor.u32 %v17812_v31, %v15939_v5  ;;  %v17885_v35 = vld [vmem:[#allocation18 + $0xb24] sm:$0xf]  ;;  %v16275_v6 = vld [vmem:[#allocation18 + $0xb28] sm:$0xf] }
0x1a43   :  { %v15916_v41 = vor.u32 %v17809_v59, %v15915_v60  ;;  %v17859_v60 = vld [vmem:[#allocation18 + $0xa4c] sm:$0xf0]  ;;  %v17851_v59 = vld [vmem:[#allocation18 + $0xa14] sm:$0xf]  ;;  %v17894_v5 = vld [vmem:[#allocation18 + $0xb64] sm:$0xf0] }
0x1a44   :  { %v9977_v37 = vmul.f32 %v20305_v53, %v20305_v53  ;;  %10924 = vmatpush.bf16.msra.mxu0 %v16264_v4  ;;  %v16124_v43 = vor.u32 %v17859_v60, %v16123_v22  ;;  %v17804_v4 = vld [vmem:[#allocation18 + $0x89c] sm:$0xf]  ;;  %v17886_v31 = vld [vmem:[#allocation18 + $0xb2c] sm:$0xf] }
0x1a45   :  { %10831 = vmatpush.bf16.msrb.mxu1 %v15916_v41  ;;  %v16125_v41 = vld [vmem:[#allocation18 + $0xa50] sm:$0xf0]  ;;  %v15877_v22 = vld [vmem:[#allocation18 + $0x858] sm:$0xf0] }
0x1a46   :  { %9980 = vadd.xlane.f32.xlu1 %v9977_v37  ;;  %v16187_v37 = vld [vmem:[#allocation18 + $0xa90] sm:$0xf]  ;;  %10911 = vmatpush.bf16.msra.mxu3 %v16196_v24  ;;  %v16128_v39 = vor.u32 %v17851_v59, %v16125_v41  ;;  %v17796_v24 = vld [vmem:[#allocation18 + $0x854] sm:$0xf0] }
0x1a47   :  { %v16188_v50 = vor.u32 %v17875_v58, %v16187_v37  ;;  %v15941_v37 = vld [vmem:[#allocation18 + $0x8d8] sm:$0xf0]  ;;  %v15876_v17 = vor.u32 %v17796_v24, %v15875_v55  ;;  %v17870_v55 = vld [vmem:[#allocation18 + $0xaac] sm:$0xf] }
0x1a48   :  { %10925 = vmatpush.bf16.msra.mxu0 %v16200_v34  ;;  %10898 = vmatpush.bf16.msra.mxu2 %v16128_v39  ;;  %v15944_v58 = vor.u32 %v17804_v4, %v15941_v37  ;;  %v17788_v34 = vld [vmem:[#allocation18 + $0x81c] sm:$0xf]  ;;  %v16203_v4 = vld [vmem:[#allocation18 + $0xaa0] sm:$0xf]  ;;  %v16213_v24 = vld [vmem:[#allocation18 + $0xae8] sm:$0xf0] }
0x1a49   :  { %10832 = vmatpush.bf16.msrb.mxu1 %v15852_v56  ;;  %v16061_v56 = vld [vmem:[#allocation18 + $0x9d0] sm:$0xf0]  ;;  %v15880_v59 = vor.u32 %v17788_v34, %v15877_v22  ;;  %v17877_v37 = vld [vmem:[#allocation18 + $0xadc] sm:$0xf0] }
0x1a4a   :  { %10912 = vmatpush.bf16.msra.mxu3 %v16132_v38  ;;  %v16064_v16 = vor.u32 %v17835_v45, %v16061_v56  ;;  %v16139_v34 = vld [vmem:[#allocation18 + $0xa20] sm:$0xf] }
0x1a4b   :  { %v17861_v22 = vld [vmem:[#allocation18 + $0xa5c] sm:$0xf0] }
0x1a4c   :  { %10926 = vmatpush.bf16.msra.mxu0 %v16136_v42  ;;  %10899 = vmatpush.bf16.msra.mxu2 %v16064_v16 }
0x1a4d   :  { %10881 = vmatpush.bf16.msra.mxu1 %v16316_v9  ;;  %v16003_v9 = vld [vmem:[#allocation18 + $0x918] sm:$0xf] }
0x1a4e   :  { %10913 = vmatpush.bf16.msra.mxu3 %v16068_v61  ;;  %v16004_v23 = vor.u32 %v17828_v25, %v16003_v9  ;;  %v16339_v9 = vld [vmem:[#allocation18 + $0xba8] sm:$0xf] }
0x1a50   :  { %10927 = vmatpush.bf16.msra.mxu0 %v16072_v26  ;;  %10900 = vmatpush.bf16.msra.mxu2 %v16000_v51 }
0x1a51   :  { %10882 = vmatpush.bf16.msra.mxu1 %v16252_v3  ;;  %v17811_v3 = vld [vmem:[#allocation18 + $0x8cc] sm:$0xf0] }
0x1a52   :  { %v15932_v15 = vor.u32 %v17811_v3, %v15931_v18  ;;  %10914 = vmatpush.bf16.msra.mxu3 %v16004_v23  ;;  %v17910_v23 = vld [vmem:[#allocation18 + $0xbe4] sm:$0xf0] }
0x1a53   :  { %v16340_v18 = vor.u32 %v17910_v23, %v16339_v9  ;;  %v16019_v9 = vld [vmem:[#allocation18 + $0x928] sm:$0xf] }
0x1a54   :  { %10928 = vmatpush.bf16.msra.mxu0 %v16008_v33  ;;  %10901 = vmatpush.bf16.msra.mxu2 %v15936_v27  ;;  %v17830_v23 = vld [vmem:[#allocation18 + $0x964] sm:$0xf0] }
0x1a55   :  { %10883 = vmatpush.bf16.msra.mxu1 %v16188_v50  ;;  %v17795_v50 = vld [vmem:[#allocation18 + $0x84c] sm:$0xf0] }
0x1a56   :  { %v15868_v20 = vor.u32 %v17795_v50, %v15867_v13  ;;  %10915 = vmatpush.bf16.msra.mxu3 %v15940_v52  ;;  %v17869_v50 = vld [vmem:[#allocation18 + $0xaa4] sm:$0xf] }
0x1a58   :  { %10929 = vmatpush.bf16.msra.mxu0 %v15944_v58  ;;  %10902 = vmatpush.bf16.msra.mxu2 %v15872_v32  ;;  %v16276_v58 = vor.u32 %v17894_v5, %v16275_v6  ;;  %v16204_v32 = vor.u32 %v17877_v37, %v16203_v4  ;;  %v15955_v6 = vld [vmem:[#allocation18 + $0x8a8] sm:$0xf]  ;;  %v17797_v37 = vld [vmem:[#allocation18 + $0x85c] sm:$0xf0] }
0x1a59   :  { %10884 = vmatpush.bf16.msra.mxu1 %v16124_v43  ;;  %v17814_v5 = vld [vmem:[#allocation18 + $0x8e4] sm:$0xf0] }
0x1a5a   :  { %10916 = vmatpush.bf16.msra.mxu3 %v15876_v17  ;;  %v16208_v17 = vor.u32 %v17869_v50, %v16205_v14  ;;  %v15956_v50 = vor.u32 %v17814_v5, %v15955_v6  ;;  %v16163_v6 = vld [vmem:[#allocation18 + $0xa38] sm:$0xf] }
0x1a5b   :  { %v17864_v5 = vld [vmem:[#allocation18 + $0xa74] sm:$0xf0] }
0x1a5c   :  { %10930 = vmatpush.bf16.msra.mxu0 %v15880_v59  ;;  %v16216_v59 = vor.u32 %v17870_v55, %v16213_v24  ;;  %v17790_v55 = vld [vmem:[#allocation18 + $0x82c] sm:$0xf] }
0x1a5d   :  { %10885 = vmatpush.bf16.msra.mxu1 %v16060_v47  ;;  %v15893_v24 = vld [vmem:[#allocation18 + $0x868] sm:$0xf0] }
0x1a61   :  { %10886 = vmatpush.bf16.msra.mxu1 %v15996_v30  ;;  %v17901_v30 = vld [vmem:[#allocation18 + $0xba4] sm:$0xf] }
0x1a62   :  { %v16336_v33 = vor.u32 %v17901_v30, %v16333_v28  ;;  %v17821_v30 = vld [vmem:[#allocation18 + $0x924] sm:$0xf] }
0x1a63   :  { %v16013_v28 = vld [vmem:[#allocation18 + $0x960] sm:$0xf0] }
0x1a65   :  { %10887 = vmatpush.bf16.msra.mxu1 %v15932_v15  ;;  %v16269_v15 = vld [vmem:[#allocation18 + $0xb60] sm:$0xf0] }
0x1a66   :  { %v16272_v52 = vor.u32 %v17885_v35, %v16269_v15  ;;  %v17805_v35 = vld [vmem:[#allocation18 + $0x8a4] sm:$0xf] }
0x1a67   :  { %v15949_v15 = vld [vmem:[#allocation18 + $0x8e0] sm:$0xf0] }
0x1a68   :  { %v15952_v4 = vor.u32 %v17805_v35, %v15949_v15  ;;  %v17855_v35 = vld [vmem:[#allocation18 + $0xa34] sm:$0xf] }
0x1a69   :  { %10888 = vmatpush.bf16.msra.mxu1 %v15868_v20  ;;  %v16211_v20 = vld [vmem:[#allocation18 + $0xaa8] sm:$0xf]  ;;  %v16157_v15 = vld [vmem:[#allocation18 + $0xa70] sm:$0xf0] }
0x1ab1   :  { %v9979_v12 = vpop.xlane.xlu0 %9978 }
0x1ab2   :  { %v9982_v62 = vmul.f32 %v9979_v12, %v19569_v1  ;;  %v16332_v12 = vor.u32 %v17909_v11, %v16331_v21 }
0x1ab4   :  { %v9984_v19 = vadd.f32 1e-05, %v9982_v62  ;;  %v17893_v62 = vld [vmem:[#allocation18 + $0xb5c] sm:$0xf0] }
0x1ab6   :  { %18567 = vrsqrt.f32 %v9984_v19  ;;  %vm9992_vm1 = vweird.f32 %v9984_v19 }
0x1ab9   :  { %v9981_v60 = vpop.xlane.xlu1 %9980 }
0x1aba   :  { %v9983_v43 = vmul.f32 %v9981_v60, %v19569_v1  ;;  %v16212_v60 = vor.u32 %v17878_v48, %v16211_v20  ;;  %v15891_v20 = vld [vmem:[#allocation18 + $0x828] sm:$0xf] }
0x1abb   :  { %v17798_v48 = vld [vmem:[#allocation18 + $0x864] sm:$0xf0] }
0x1abc   :  { %v18568_v41 = vpop.eup %18567  ;;  %v9985_v36 = vadd.f32 1e-05, %v9983_v43  ;;  %v17853_v43 = vld [vmem:[#allocation18 + $0xa24] sm:$0xf] }
0x1abd   :  { %v9987_v7 = vmul.f32 %v18568_v41, %v9984_v19  ;;  %vm9993_vm0 = vweird.f32 %v18568_v41  ;;  %v16277_v19 = vld [vmem:[#allocation18 + $0xb68] sm:$0xf0] }
0x1abe   :  { %18569 = vrsqrt.f32 %v9985_v36  ;;  %vm9994_vm2 = vmor %vm9992_vm1, %vm9993_vm0  ;;  %vm10002_vm4 = vweird.f32 %v9985_v36  ;;  %v16280_v13 = vor.u32 %v17886_v31, %v16277_v19  ;;  %v17806_v31 = vld [vmem:[#allocation18 + $0x8ac] sm:$0xf]  ;;  %vm13047_vm0 = vcmask 1043456  }
0x1abf   :  { %v9988_v39 = vmul.f32 %v18568_v41, %v9987_v7  ;;  %v17862_v7 = vld [vmem:[#allocation18 + $0xa64] sm:$0xf0]  ;;  %v15957_v19 = vld [vmem:[#allocation18 + $0x8e8] sm:$0xf0] }
0x1ac0   :  { %v15960_v14 = vor.u32 %v17806_v31, %v15957_v19  ;;  %v17856_v31 = vld [vmem:[#allocation18 + $0xa3c] sm:$0xf] }
0x1ac1   :  { %v9989_v38 = vmul.f32 0.5, %v9988_v39  ;;  %v17854_v39 = vld [vmem:[#allocation18 + $0xa2c] sm:$0xf]  ;;  %v16165_v19 = vld [vmem:[#allocation18 + $0xa78] sm:$0xf0] }
0x1ac3   :  { %v9990_v0 = vsub.f32 1.5, %v9989_v38  ;;  %v16149_v38 = vld [vmem:[#allocation18 + $0xa68] sm:$0xf0] }
0x1ac4   :  { %v18570_v29 = vpop.eup %18569 }
0x1ac5   :  { %v9991_v42 = vmul.f32 %v18568_v41, %v9990_v0  ;;  %v9997_v10 = vmul.f32 %v18570_v29, %v9985_v36  ;;  %vm10003_vm3 = vweird.f32 %v18570_v29  ;;  %v16147_v36 = vld [vmem:[#allocation18 + $0xa28] sm:$0xf]  ;;  %v16140_v0 = vor.u32 %v17861_v22, %v16139_v34  ;;  %v17903_v34 = vld [vmem:[#allocation18 + $0xbb4] sm:$0xf] }
0x1ac6   :  { %vm10004_vm5 = vmor %vm10002_vm4, %vm10003_vm3  ;;  %v16349_v22 = vld [vmem:[#allocation18 + $0xbf0] sm:$0xf0] }
0x1ac7   :  { %v9998_v63 = vmul.f32 %v18570_v29, %v9997_v10  ;;  %v9995_v45 = vsel %vm9994_vm2, %v18568_v41, %v9991_v42  ;;  %v16141_v41 = vld [vmem:[#allocation18 + $0xa60] sm:$0xf0]  ;;  %v16075_v42 = vld [vmem:[#allocation18 + $0x9a0] sm:$0xf] }
0x1ac8   :  { %v10006_v46 = vmul.f32 %v9995_v45, %v20299_v44  ;;  %v17902_v44 = vld [vmem:[#allocation18 + $0xbac] sm:$0xf]  ;;  %v17845_v10 = vld [vmem:[#allocation18 + $0x9dc] sm:$0xf0]  ;;  %v16152_v45 = vor.u32 %v17854_v39, %v16149_v38  ;;  %v15892_v39 = vor.u32 %v17798_v48, %v15891_v20  ;;  %v15896_v38 = vor.u32 %v17790_v55, %v15893_v24  ;;  %v16099_v20 = vld [vmem:[#allocation18 + $0x9b8] sm:$0xf] }
0x1ac9   :  { %v9999_v47 = vmul.f32 0.5, %v9998_v63  ;;  %v16344_v3 = vor.u32 %v17902_v44, %v16341_v8  ;;  %v16148_v63 = vor.u32 %v17862_v7, %v16147_v36  ;;  %v17822_v44 = vld [vmem:[#allocation18 + $0x92c] sm:$0xf]  ;;  %v17904_v36 = vld [vmem:[#allocation18 + $0xbbc] sm:$0xf] }
0x1aca   :  { %v10011_v57 = vmul.f32 %v18351_v54, %v10006_v46  ;;  %v17846_v46 = vld [vmem:[#allocation18 + $0x9e4] sm:$0xf0]  ;;  %v16021_v8 = vld [vmem:[#allocation18 + $0x968] sm:$0xf0]  ;;  %v16357_v7 = vld [vmem:[#allocation18 + $0xbf8] sm:$0xf0] }
0x1acb   :  { %v10000_v56 = vsub.f32 1.5, %v9999_v47  ;;  %v17837_v47 = vld [vmem:[#allocation18 + $0x9a4] sm:$0xf]  ;;  %v17848_v48 = vld [vmem:[#allocation18 + $0x9f4] sm:$0xf0] }
0x1acc   :  { %v20313_v25 = vadd.f32 %v18352_v2, %v10011_v57  ;;  %v17840_v55 = vld [vmem:[#allocation18 + $0x9bc] sm:$0xf] }
0x1acd   :  { %v10001_v16 = vmul.f32 %v18570_v29, %v10000_v56  ;;  %v16077_v56 = vld [vmem:[#allocation18 + $0x9e0] sm:$0xf0]  ;;  %v16101_v24 = vld [vmem:[#allocation18 + $0x9f8] sm:$0xf0] }
0x1ace   :  { %v16080_v57 = vor.u32 %v17837_v47, %v16077_v56  ;;  %v17887_v47 = vld [vmem:[#allocation18 + $0xb34] sm:$0xf] }
0x1acf   :  { %v10005_v61 = vsel %vm10004_vm5, %v18570_v29, %v10001_v16  ;;  %v16144_v29 = vor.u32 %v17853_v43, %v16141_v41  ;;  %v17838_v16 = vld [vmem:[#allocation18 + $0x9ac] sm:$0xf]  ;;  %v17912_v41 = vld [vmem:[#allocation18 + $0xbf4] sm:$0xf0]  ;;  %v16285_v56 = vld [vmem:[#allocation18 + $0xb70] sm:$0xf0] }
0x1ad0   :  { %v10007_v26 = vmul.f32 %v10005_v61, %v20305_v53  ;;  %v16267_v53 = vld [vmem:[#allocation18 + $0xb20] sm:$0xf]  ;;  %v16085_v61 = vld [vmem:[#allocation18 + $0x9e8] sm:$0xf0] }
0x1ad1   :  { %v16268_v27 = vor.u32 %v17893_v62, %v16267_v53  ;;  %v16088_v11 = vor.u32 %v17838_v16, %v16085_v61  ;;  %v15947_v53 = vld [vmem:[#allocation18 + $0x8a0] sm:$0xf]  ;;  %v17888_v16 = vld [vmem:[#allocation18 + $0xb3c] sm:$0xf] }
0x1ad2   :  { %v10012_v40 = vmul.f32 %v18351_v54, %v10007_v26  ;;  %v16083_v54 = vld [vmem:[#allocation18 + $0x9a8] sm:$0xf]  ;;  %v16011_v26 = vld [vmem:[#allocation18 + $0x920] sm:$0xf]  ;;  %v16293_v61 = vld [vmem:[#allocation18 + $0xb78] sm:$0xf0] }
0x1ad3   :  { %v16084_v21 = vor.u32 %v17846_v46, %v16083_v54  ;;  %v17813_v62 = vld [vmem:[#allocation18 + $0x8dc] sm:$0xf0]  ;;  %v16291_v54 = vld [vmem:[#allocation18 + $0xb38] sm:$0xf] }
0x1ad4   :  { %v20315_v51 = vadd.f32 %v18352_v2, %v10012_v40  ;;  %v16076_v2 = vor.u32 %v17845_v10, %v16075_v42  ;;  %v17829_v40 = vld [vmem:[#allocation18 + $0x95c] sm:$0xf0]  ;;  %v16283_v42 = vld [vmem:[#allocation18 + $0xb30] sm:$0xf]  ;;  %v17896_v46 = vld [vmem:[#allocation18 + $0xb74] sm:$0xf0] }
0x1ad5   :  { %v17895_v10 = vld [vmem:[#allocation18 + $0xb6c] sm:$0xf0] }
0x1ad6   :  { %v20319_v49 = vpack.c.bf16 %v20315_v51, %v20313_v25 }
0x1ad8   :  { %10833 = vmatmul.bf16.vlgmr.msrb.gmra.mxu1 %v20319_v49  ;;  %10847 = vmatmul.bf16.vlgmr.msrb.gmra.mxu2 %v20319_v49 }
0x1ad9   :  { %10861 = vmatmul.bf16.vlgmr.msrb.gmra.mxu3 %v20319_v49  ;;  %10875 = vmatmul.bf16.vlgmr.msrb.gmra.mxu0 %v20319_v49 }
0x1ada   :  { %10937 = vmatpush.bf16.msrb.mxu1 %v16332_v12  ;;  %10951 = vmatpush.bf16.msrb.mxu2 %v16336_v33  ;;  %v16012_v12 = vor.u32 %v17829_v40, %v16011_v26  ;;  %v16016_v33 = vor.u32 %v17821_v30, %v16013_v28  ;;  %v16219_v26 = vld [vmem:[#allocation18 + $0xab0] sm:$0xf]  ;;  %v17871_v30 = vld [vmem:[#allocation18 + $0xab4] sm:$0xf] }
0x1adb   :  { %10965 = vmatpush.bf16.msrb.mxu3 %v16340_v18  ;;  %10979 = vmatpush.bf16.msrb.mxu0 %v16344_v3  ;;  %v16020_v18 = vor.u32 %v17830_v23, %v16019_v9  ;;  %v16024_v3 = vor.u32 %v17822_v44, %v16021_v8  ;;  %v17879_v40 = vld [vmem:[#allocation18 + $0xaec] sm:$0xf0]  ;;  %v16221_v28 = vld [vmem:[#allocation18 + $0xaf0] sm:$0xf0]  ;;  %v16227_v9 = vld [vmem:[#allocation18 + $0xab8] sm:$0xf] }
0x1adc   :  { %v17880_v23 = vld [vmem:[#allocation18 + $0xaf4] sm:$0xf0]  ;;  %v17872_v44 = vld [vmem:[#allocation18 + $0xabc] sm:$0xf] }
0x1add   :  { %v16229_v8 = vld [vmem:[#allocation18 + $0xaf8] sm:$0xf0] }
0x1ade   :  { %10938 = vmatpush.bf16.msrb.mxu1 %v16268_v27  ;;  %10952 = vmatpush.bf16.msrb.mxu2 %v16272_v52  ;;  %v15883_v27 = vld [vmem:[#allocation18 + $0x820] sm:$0xf]  ;;  %v15948_v52 = vor.u32 %v17813_v62, %v15947_v53  ;;  %v16155_v53 = vld [vmem:[#allocation18 + $0xa30] sm:$0xf] }
0x1adf   :  { %10966 = vmatpush.bf16.msrb.mxu3 %v16276_v58  ;;  %10980 = vmatpush.bf16.msrb.mxu0 %v16280_v13  ;;  %v17789_v58 = vld [vmem:[#allocation18 + $0x824] sm:$0xf]  ;;  %v17863_v62 = vld [vmem:[#allocation18 + $0xa6c] sm:$0xf0] }
0x1ae0   :  { %v15885_v13 = vld [vmem:[#allocation18 + $0x860] sm:$0xf0] }
0x1ae1   :  { %v15888_v43 = vor.u32 %v17789_v58, %v15885_v13  ;;  %v16164_v58 = vor.u32 %v17864_v5, %v16163_v6  ;;  %v16168_v13 = vor.u32 %v17856_v31, %v16165_v19  ;;  %v17919_v6 = vld [vmem:[#allocation21 + $0x830] sm:$0xff] }
0x1ae2   :  { %10939 = vmatpush.bf16.msrb.mxu1 %v16204_v32  ;;  %10953 = vmatpush.bf16.msrb.mxu2 %v16208_v17  ;;  %v16347_v32 = vld [vmem:[#allocation18 + $0xbb0] sm:$0xf]  ;;  %v17943_v5 = vld [vmem:[#allocation21 + $0x8f0] sm:$0xff] }
0x1ae3   :  { %10967 = vmatpush.bf16.msrb.mxu3 %v16212_v60  ;;  %10981 = vmatpush.bf16.msrb.mxu0 %v16216_v59  ;;  %v17911_v17 = vld [vmem:[#allocation18 + $0xbec] sm:$0xf0]  ;;  %v16355_v60 = vld [vmem:[#allocation18 + $0xbb8] sm:$0xf]  ;;  %v15884_v59 = vor.u32 %v17797_v37, %v15883_v27  ;;  %v16156_v27 = vor.u32 %v17863_v62, %v16155_v53  ;;  %v17927_v31 = vld [vmem:[#allocation21 + $0x870] sm:$0xff] }
0x1ae4   :  { %v17847_v37 = vld [vmem:[#allocation18 + $0x9ec] sm:$0xf0]  ;;  %v17935_v19 = vld [vmem:[#allocation21 + $0x8b0] sm:$0xff] }
0x1ae6   :  { %10940 = vmatpush.bf16.msrb.mxu1 %v16140_v0  ;;  %10954 = vmatpush.bf16.msrb.mxu2 %v16144_v29  ;;  %v16348_v0 = vor.u32 %v17911_v17, %v16347_v32  ;;  %v16352_v29 = vor.u32 %v17903_v34, %v16349_v22  ;;  %v16027_v34 = vld [vmem:[#allocation18 + $0x930] sm:$0xf] }
0x1ae7   :  { %10968 = vmatpush.bf16.msrb.mxu3 %v16148_v63  ;;  %10982 = vmatpush.bf16.msrb.mxu0 %v16152_v45  ;;  %v16356_v63 = vor.u32 %v17912_v41, %v16355_v60  ;;  %v16360_v45 = vor.u32 %v17904_v36, %v16357_v7  ;;  %v17831_v22 = vld [vmem:[#allocation18 + $0x96c] sm:$0xf0]  ;;  %v16100_v60 = vor.u32 %v17848_v48, %v16099_v20  ;;  %v16029_v41 = vld [vmem:[#allocation18 + $0x970] sm:$0xf0]  ;;  %v16035_v36 = vld [vmem:[#allocation18 + $0x938] sm:$0xf] }
0x1ae8   :  { %10889 = vmatmul.bf16.vlgmr.msra.gmra.mxu1 %v20319_v49  ;;  %10903 = vmatmul.bf16.vlgmr.msra.gmra.mxu2 %v20319_v49  ;;  %v17832_v7 = vld [vmem:[#allocation18 + $0x974] sm:$0xf0]  ;;  %v17940_v20 = vld [vmem:[#allocation21 + $0x8d8] sm:$0xff] }
0x1ae9   :  { %10917 = vmatmul.bf16.vlgmr.msra.gmra.mxu3 %v20319_v49  ;;  %10931 = vmatmul.bf16.vlgmr.msra.gmra.mxu0 %v20319_v49  ;;  %v17924_v48 = vld [vmem:[#allocation21 + $0x858] sm:$0xff] }
0x1aea   :  { %10941 = vmatpush.bf16.msrb.mxu1 %v16076_v2  ;;  %10955 = vmatpush.bf16.msrb.mxu2 %v16080_v57  ;;  %v16284_v2 = vor.u32 %v17895_v10, %v16283_v42  ;;  %v16288_v57 = vor.u32 %v17887_v47, %v16285_v56  ;;  %v15963_v42 = vld [vmem:[#allocation18 + $0x8b0] sm:$0xf]  ;;  %v17807_v47 = vld [vmem:[#allocation18 + $0x8b4] sm:$0xf] }
0x1aeb   :  { %10969 = vmatpush.bf16.msrb.mxu3 %v16084_v21  ;;  %10983 = vmatpush.bf16.msrb.mxu0 %v16088_v11  ;;  %v16292_v21 = vor.u32 %v17896_v46, %v16291_v54  ;;  %v16296_v11 = vor.u32 %v17888_v16, %v16293_v61  ;;  %v17815_v10 = vld [vmem:[#allocation18 + $0x8ec] sm:$0xf0]  ;;  %v15965_v56 = vld [vmem:[#allocation18 + $0x8f0] sm:$0xf0]  ;;  %v15971_v54 = vld [vmem:[#allocation18 + $0x8b8] sm:$0xf] }
0x1aec   :  { %v17816_v46 = vld [vmem:[#allocation18 + $0x8f4] sm:$0xf0]  ;;  %v17808_v16 = vld [vmem:[#allocation18 + $0x8bc] sm:$0xf] }
0x1aed   :  { %v15973_v61 = vld [vmem:[#allocation18 + $0x8f8] sm:$0xf0] }
0x1aee   :  { %10942 = vmatpush.bf16.msrb.mxu1 %v16012_v12  ;;  %10956 = vmatpush.bf16.msrb.mxu2 %v16016_v33  ;;  %v16220_v12 = vor.u32 %v17879_v40, %v16219_v26  ;;  %v16224_v33 = vor.u32 %v17871_v30, %v16221_v28  ;;  %v15899_v26 = vld [vmem:[#allocation18 + $0x830] sm:$0xf]  ;;  %v17791_v30 = vld [vmem:[#allocation18 + $0x834] sm:$0xf] }
0x1aef   :  { %10970 = vmatpush.bf16.msrb.mxu3 %v16020_v18  ;;  %10984 = vmatpush.bf16.msrb.mxu0 %v16024_v3  ;;  %v16228_v18 = vor.u32 %v17880_v23, %v16227_v9  ;;  %v16232_v3 = vor.u32 %v17872_v44, %v16229_v8  ;;  %v17799_v40 = vld [vmem:[#allocation18 + $0x86c] sm:$0xf0]  ;;  %v15901_v28 = vld [vmem:[#allocation18 + $0x870] sm:$0xf0]  ;;  %v15907_v9 = vld [vmem:[#allocation18 + $0x838] sm:$0xf] }
0x1af0   :  { %v17800_v23 = vld [vmem:[#allocation18 + $0x874] sm:$0xf0]  ;;  %v17792_v44 = vld [vmem:[#allocation18 + $0x83c] sm:$0xf] }
0x1af1   :  { %v15909_v8 = vld [vmem:[#allocation18 + $0x878] sm:$0xf0]  ;;  %v15908_v53 = vor.u32 %v17800_v23, %v15907_v9  ;;  %v17971_v9 = vld [vmem:[#allocation21 + $0x9d0] sm:$0xff] }
0x1af2   :  { %10943 = vmatpush.bf16.msrb.mxu1 %v15948_v52  ;;  %10957 = vmatpush.bf16.msrb.mxu2 %v15952_v4  ;;  %v16160_v52 = vor.u32 %v17855_v35, %v16157_v15  ;;  %v16091_v4 = vld [vmem:[#allocation18 + $0x9b0] sm:$0xf]  ;;  %v15912_v62 = vor.u32 %v17792_v44, %v15909_v8  ;;  %v17928_v35 = vld [vmem:[#allocation21 + $0x878] sm:$0xff]  ;;  %v17955_v23 = vld [vmem:[#allocation21 + $0x950] sm:$0xff] }
0x1af3   :  { %10971 = vmatpush.bf16.msrb.mxu3 %v15956_v50  ;;  %10985 = vmatpush.bf16.msrb.mxu0 %v15960_v14  ;;  %v17839_v50 = vld [vmem:[#allocation18 + $0x9b4] sm:$0xf]  ;;  %v16092_v32 = vor.u32 %v17847_v37, %v16091_v4  ;;  %v17936_v15 = vld [vmem:[#allocation21 + $0x8b8] sm:$0xff]  ;;  %v17926_v4 = vld [vmem:[#allocation21 + $0x868] sm:$0xff] }
0x1af4   :  { %v16093_v14 = vld [vmem:[#allocation18 + $0x9f0] sm:$0xf0]  ;;  %v17934_v37 = vld [vmem:[#allocation21 + $0x8a8] sm:$0xff]  ;;  %v17963_v44 = vld [vmem:[#allocation21 + $0x990] sm:$0xff] }
0x1af5   :  { %v16096_v17 = vor.u32 %v17839_v50, %v16093_v14  ;;  %v17925_v50 = vld [vmem:[#allocation21 + $0x860] sm:$0xff]  ;;  %v17916_v14 = vld [vmem:[#allocation21 + $0x818] sm:$0xff]  ;;  %v17946_v8 = vld [vmem:[#allocation21 + $0x908] sm:$0xff] }
0x1af6   :  { %10944 = vmatpush.bf16.msrb.mxu1 %v15884_v59  ;;  %10958 = vmatpush.bf16.msrb.mxu2 %v15888_v43  ;;  %v16104_v59 = vor.u32 %v17840_v55, %v16101_v24  ;;  %v17823_v43 = vld [vmem:[#allocation18 + $0x934] sm:$0xf]  ;;  %v17932_v55 = vld [vmem:[#allocation21 + $0x898] sm:$0xff]  ;;  %v17915_v24 = vld [vmem:[#allocation21 + $0x810] sm:$0xff] }
0x1af7   :  { %10972 = vmatpush.bf16.msrb.mxu3 %v15892_v39  ;;  %10986 = vmatpush.bf16.msrb.mxu0 %v15896_v38  ;;  %v17824_v39 = vld [vmem:[#allocation18 + $0x93c] sm:$0xf] }
0x1af8   :  { %v16037_v38 = vld [vmem:[#allocation18 + $0x978] sm:$0xf0] }
0x1af9   :  { %10945 = vmatmul.bf16.vlgmr.msrb.gmra.mxu1 %v20319_v49  ;;  %10959 = vmatmul.bf16.vlgmr.msrb.gmra.mxu2 %v20319_v49 }
0x1afa   :  { %10993 = vmatpush.bf16.msra.mxu1 %v16348_v0  ;;  %11007 = vmatpush.bf16.msra.mxu2 %v16352_v29  ;;  %v16028_v0 = vor.u32 %v17831_v22, %v16027_v34  ;;  %v16032_v29 = vor.u32 %v17823_v43, %v16029_v41  ;;  %v17931_v34 = vld [vmem:[#allocation21 + $0x890] sm:$0xff]  ;;  %v17914_v22 = vld [vmem:[#allocation21 + $0x808] sm:$0xff]  ;;  %v17913_v41 = vld [vmem:[#allocation21 + $0x800] sm:$0xff] }
0x1afb   :  { %11021 = vmatpush.bf16.msra.mxu3 %v16356_v63  ;;  %11035 = vmatpush.bf16.msra.mxu0 %v16360_v45  ;;  %v16036_v63 = vor.u32 %v17832_v7, %v16035_v36  ;;  %v16040_v45 = vor.u32 %v17824_v39, %v16037_v38  ;;  %v17930_v43 = vld [vmem:[#allocation21 + $0x888] sm:$0xff]  ;;  %v17937_v36 = vld [vmem:[#allocation21 + $0x8c0] sm:$0xff]  ;;  %v17952_v7 = vld [vmem:[#allocation21 + $0x938] sm:$0xff] }
0x1afc   :  { %10973 = vmatmul.bf16.vlgmr.msrb.gmra.mxu3 %v20319_v49  ;;  %10987 = vmatmul.bf16.vlgmr.msrb.gmra.mxu0 %v20319_v49  ;;  %v17976_v39 = vld [vmem:[#allocation21 + $0x9f8] sm:$0xff]  ;;  %v17921_v38 = vld [vmem:[#allocation21 + $0x840] sm:$0xff] }
0x1afe   :  { %10994 = vmatpush.bf16.msra.mxu1 %v16284_v2  ;;  %11008 = vmatpush.bf16.msra.mxu2 %v16288_v57  ;;  %v15964_v2 = vor.u32 %v17815_v10, %v15963_v42  ;;  %v15968_v57 = vor.u32 %v17807_v47, %v15965_v56  ;;  %v17968_v42 = vld [vmem:[#allocation21 + $0x9b8] sm:$0xff]  ;;  %v17951_v10 = vld [vmem:[#allocation21 + $0x930] sm:$0xff]  ;;  %v17950_v56 = vld [vmem:[#allocation21 + $0x928] sm:$0xff] }
0x1aff   :  { %11022 = vmatpush.bf16.msra.mxu3 %v16292_v21  ;;  %11036 = vmatpush.bf16.msra.mxu0 %v16296_v11  ;;  %v15972_v21 = vor.u32 %v17816_v46, %v15971_v54  ;;  %v15976_v11 = vor.u32 %v17808_v16, %v15973_v61  ;;  %v17967_v47 = vld [vmem:[#allocation21 + $0x9b0] sm:$0xff]  ;;  %v17974_v54 = vld [vmem:[#allocation21 + $0x9e8] sm:$0xff]  ;;  %v17949_v61 = vld [vmem:[#allocation21 + $0x920] sm:$0xff] }
0x1b00   :  { %v17958_v46 = vld [vmem:[#allocation21 + $0x968] sm:$0xff] }
0x1b01   :  { %v17966_v16 = vld [vmem:[#allocation21 + $0x9a8] sm:$0xff] }
0x1b02   :  { %10995 = vmatpush.bf16.msra.mxu1 %v16220_v12  ;;  %11009 = vmatpush.bf16.msra.mxu2 %v16224_v33  ;;  %v15900_v12 = vor.u32 %v17799_v40, %v15899_v26  ;;  %v15904_v33 = vor.u32 %v17791_v30, %v15901_v28  ;;  %v17965_v26 = vld [vmem:[#allocation21 + $0x9a0] sm:$0xff]  ;;  %v17948_v40 = vld [vmem:[#allocation21 + $0x918] sm:$0xff]  ;;  %v17947_v28 = vld [vmem:[#allocation21 + $0x910] sm:$0xff] }
0x1b03   :  { %11023 = vmatpush.bf16.msra.mxu3 %v16228_v18  ;;  %11037 = vmatpush.bf16.msra.mxu0 %v16232_v3  ;;  %v17920_v18 = vld [vmem:[#allocation21 + $0x838] sm:$0xff] }
0x1b04   :  { %v17944_v3 = vld [vmem:[#allocation21 + $0x8f8] sm:$0xff] }
0x1b05   :  { %v17964_v30 = vld [vmem:[#allocation21 + $0x998] sm:$0xff] }
0x1b06   :  { %10996 = vmatpush.bf16.msra.mxu1 %v16156_v27  ;;  %11010 = vmatpush.bf16.msra.mxu2 %v16160_v52  ;;  %v17918_v27 = vld [vmem:[#allocation21 + $0x828] sm:$0xff] }
0x1b07   :  { %11024 = vmatpush.bf16.msra.mxu3 %v16164_v58  ;;  %11038 = vmatpush.bf16.msra.mxu0 %v16168_v13  ;;  %v17942_v52 = vld [vmem:[#allocation21 + $0x8e8] sm:$0xff]  ;;  %v17917_v58 = vld [vmem:[#allocation21 + $0x820] sm:$0xff] }
0x1b08   :  { %v17941_v13 = vld [vmem:[#allocation21 + $0x8e0] sm:$0xff] }
0x1b0a   :  { %10997 = vmatpush.bf16.msra.mxu1 %v16092_v32  ;;  %11011 = vmatpush.bf16.msra.mxu2 %v16096_v17  ;;  %v17939_v32 = vld [vmem:[#allocation21 + $0x8d0] sm:$0xff] }
0x1b0b   :  { %11025 = vmatpush.bf16.msra.mxu3 %v16100_v60  ;;  %11039 = vmatpush.bf16.msra.mxu0 %v16104_v59  ;;  %v17923_v17 = vld [vmem:[#allocation21 + $0x850] sm:$0xff]  ;;  %v17938_v60 = vld [vmem:[#allocation21 + $0x8c8] sm:$0xff] }
0x1b0c   :  { %v17922_v59 = vld [vmem:[#allocation21 + $0x848] sm:$0xff] }
0x1b0e   :  { %10998 = vmatpush.bf16.msra.mxu1 %v16028_v0  ;;  %11012 = vmatpush.bf16.msra.mxu2 %v16032_v29  ;;  %v17929_v0 = vld [vmem:[#allocation21 + $0x880] sm:$0xff]  ;;  %v17960_v29 = vld [vmem:[#allocation21 + $0x978] sm:$0xff] }
0x1b0f   :  { %11026 = vmatpush.bf16.msra.mxu3 %v16036_v63  ;;  %11040 = vmatpush.bf16.msra.mxu0 %v16040_v45  ;;  %v17975_v63 = vld [vmem:[#allocation21 + $0x9f0] sm:$0xff] }
0x1b10   :  { %v17959_v45 = vld [vmem:[#allocation21 + $0x970] sm:$0xff] }
0x1b12   :  { %10999 = vmatpush.bf16.msra.mxu1 %v15964_v2  ;;  %11013 = vmatpush.bf16.msra.mxu2 %v15968_v57  ;;  %v17973_v2 = vld [vmem:[#allocation21 + $0x9e0] sm:$0xff] }
0x1b13   :  { %11027 = vmatpush.bf16.msra.mxu3 %v15972_v21  ;;  %11041 = vmatpush.bf16.msra.mxu0 %v15976_v11  ;;  %v17957_v57 = vld [vmem:[#allocation21 + $0x960] sm:$0xff]  ;;  %v17972_v21 = vld [vmem:[#allocation21 + $0x9d8] sm:$0xff] }
0x1b14   :  { %v17956_v11 = vld [vmem:[#allocation21 + $0x958] sm:$0xff] }
0x1b16   :  { %11000 = vmatpush.bf16.msra.mxu1 %v15900_v12  ;;  %11014 = vmatpush.bf16.msra.mxu2 %v15904_v33  ;;  %v17970_v12 = vld [vmem:[#allocation21 + $0x9c8] sm:$0xff] }
0x1b17   :  { %11028 = vmatpush.bf16.msra.mxu3 %v15908_v53  ;;  %11042 = vmatpush.bf16.msra.mxu0 %v15912_v62  ;;  %v17954_v33 = vld [vmem:[#allocation21 + $0x948] sm:$0xff]  ;;  %v17945_v62 = vld [vmem:[#allocation21 + $0x900] sm:$0xff] }
0x1b18   :  { %v17962_v53 = vld [vmem:[#allocation21 + $0x988] sm:$0xff] }
0x1b19   :  { %11001 = vmatmul.bf16.vlgmr.msra.gmra.mxu1 %v20319_v49  ;;  %11015 = vmatmul.bf16.vlgmr.msra.gmra.mxu2 %v20319_v49 }
0x1b1a   :  { %12127 = vmatpush.bf16.msrb.mxu1 %v17920_v18  ;;  %11029 = vmatmul.bf16.vlgmr.msra.gmra.mxu3 %v20319_v49  ;;  %v17969_v18 = vld [vmem:[#allocation21 + $0x9c0] sm:$0xff] }
0x1b1b   :  { %12169 = vmatpush.bf16.msrb.mxu0 %v17944_v3  ;;  %12141 = vmatpush.bf16.msrb.mxu2 %v17928_v35  ;;  %v17953_v3 = vld [vmem:[#allocation21 + $0x940] sm:$0xff] }
0x1b1c   :  { %11043 = vmatmul.bf16.vlgmr.msra.gmra.mxu0 %v20319_v49  ;;  %12155 = vmatpush.bf16.msrb.mxu3 %v17936_v15  ;;  %v17933_v49 = vld [vmem:[#allocation21 + $0x8a0] sm:$0xff]  ;;  %v20337_v15 = vld [vmem:[#allocation20 + $0x20] sm:$0xff] }
0x1b1d   :  { %v17961_v35 = vld [vmem:[#allocation21 + $0x980] sm:$0xff] }
0x1b1e   :  { %12128 = vmatpush.bf16.msrb.mxu1 %v17919_v6 }
0x1b1f   :  { %12170 = vmatpush.bf16.msrb.mxu0 %v17943_v5  ;;  %12142 = vmatpush.bf16.msrb.mxu2 %v17927_v31  ;;  %v10153_v31 = vperm.slane %v20337_v15, 0 }
0x1b20   :  { %12156 = vmatpush.bf16.msrb.mxu3 %v17935_v19  ;;  %v10156_v19 = vperm.slane %v20337_v15, 3 }
0x1b22   :  { %12129 = vmatpush.bf16.msrb.mxu1 %v17918_v27 }
0x1b23   :  { %12171 = vmatpush.bf16.msrb.mxu0 %v17942_v52  ;;  %12143 = vmatpush.bf16.msrb.mxu2 %v17926_v4 }
0x1b24   :  { %12157 = vmatpush.bf16.msrb.mxu3 %v17934_v37 }
0x1b26   :  { %12130 = vmatpush.bf16.msrb.mxu1 %v17917_v58 }
0x1b27   :  { %12172 = vmatpush.bf16.msrb.mxu0 %v17941_v13  ;;  %12144 = vmatpush.bf16.msrb.mxu2 %v17925_v50  ;;  %v10154_v13 = vperm.slane %v20337_v15, 1 }
0x1b28   :  { %12158 = vmatpush.bf16.msrb.mxu3 %v17933_v49 }
0x1b2a   :  { %12131 = vmatpush.bf16.msrb.mxu1 %v17916_v14  ;;  %v10155_v14 = vperm.slane %v20337_v15, 2 }
0x1b2b   :  { %12173 = vmatpush.bf16.msrb.mxu0 %v17940_v20  ;;  %12145 = vmatpush.bf16.msrb.mxu2 %v17924_v48 }
0x1b2c   :  { %12159 = vmatpush.bf16.msrb.mxu3 %v17932_v55 }
0x1b2e   :  { %12132 = vmatpush.bf16.msrb.mxu1 %v17915_v24 }
0x1b2f   :  { %12174 = vmatpush.bf16.msrb.mxu0 %v17939_v32  ;;  %12146 = vmatpush.bf16.msrb.mxu2 %v17923_v17  ;;  %v17984_v17 = vld [vmem:[#allocation21 + $0xa38] sm:$0xff] }
0x1b30   :  { %12160 = vmatpush.bf16.msrb.mxu3 %v17931_v34 }
0x1b32   :  { %12133 = vmatpush.bf16.msrb.mxu1 %v17914_v22 }
0x1b33   :  { %12175 = vmatpush.bf16.msrb.mxu0 %v17938_v60  ;;  %12147 = vmatpush.bf16.msrb.mxu2 %v17922_v59  ;;  %v18008_v60 = vld [vmem:[#allocation21 + $0xaf8] sm:$0xff] }
0x1b34   :  { %12161 = vmatpush.bf16.msrb.mxu3 %v17930_v43 }
0x1b36   :  { %12134 = vmatpush.bf16.msrb.mxu1 %v17913_v41 }
0x1b37   :  { %12176 = vmatpush.bf16.msrb.mxu0 %v17937_v36  ;;  %12148 = vmatpush.bf16.msrb.mxu2 %v17921_v38 }
0x1b38   :  { %12162 = vmatpush.bf16.msrb.mxu3 %v17929_v0  ;;  %v17983_v0 = vld [vmem:[#allocation21 + $0xa30] sm:$0xff] }
0x1b3a   :  { %12183 = vmatpush.bf16.msra.mxu1 %v17952_v7 }
0x1b3b   :  { %12225 = vmatpush.bf16.msra.mxu0 %v17976_v39  ;;  %12197 = vmatpush.bf16.msra.mxu2 %v17960_v29 }
0x1b3c   :  { %12211 = vmatpush.bf16.msra.mxu3 %v17968_v42 }
0x1b3e   :  { %12184 = vmatpush.bf16.msra.mxu1 %v17951_v10 }
0x1b3f   :  { %12226 = vmatpush.bf16.msra.mxu0 %v17975_v63  ;;  %12198 = vmatpush.bf16.msra.mxu2 %v17959_v45  ;;  %v18007_v63 = vld [vmem:[#allocation21 + $0xaf0] sm:$0xff] }
0x1b40   :  { %12212 = vmatpush.bf16.msra.mxu3 %v17967_v47 }
0x1b42   :  { %12185 = vmatpush.bf16.msra.mxu1 %v17950_v56  ;;  %v17992_v56 = vld [vmem:[#allocation21 + $0xa78] sm:$0xff] }
0x1b43   :  { %12227 = vmatpush.bf16.msra.mxu0 %v17974_v54  ;;  %12199 = vmatpush.bf16.msra.mxu2 %v17958_v46  ;;  %v10157_v46 = vperm.slane %v20337_v15, 4 }
0x1b44   :  { %12213 = vmatpush.bf16.msra.mxu3 %v17966_v16  ;;  %v18000_v16 = vld [vmem:[#allocation21 + $0xab8] sm:$0xff] }
0x1b46   :  { %12186 = vmatpush.bf16.msra.mxu1 %v17949_v61 }
0x1b47   :  { %12228 = vmatpush.bf16.msra.mxu0 %v17973_v2  ;;  %12200 = vmatpush.bf16.msra.mxu2 %v17957_v57  ;;  %v10160_v2 = vperm.slane %v20337_v15, 7  ;;  %v17982_v57 = vld [vmem:[#allocation21 + $0xa28] sm:$0xff] }
0x1b48   :  { %12214 = vmatpush.bf16.msra.mxu3 %v17965_v26  ;;  %v18006_v26 = vld [vmem:[#allocation21 + $0xae8] sm:$0xff] }
0x1b4a   :  { %12187 = vmatpush.bf16.msra.mxu1 %v17948_v40 }
0x1b4b   :  { %12229 = vmatpush.bf16.msra.mxu0 %v17972_v21  ;;  %12201 = vmatpush.bf16.msra.mxu2 %v17956_v11  ;;  %v17991_v21 = vld [vmem:[#allocation21 + $0xa70] sm:$0xff] }
0x1b4c   :  { %12215 = vmatpush.bf16.msra.mxu3 %v17964_v30 }
0x1b4e   :  { %12188 = vmatpush.bf16.msra.mxu1 %v17947_v28  ;;  %v17999_v28 = vld [vmem:[#allocation21 + $0xab0] sm:$0xff] }
0x1b4f   :  { %12230 = vmatpush.bf16.msra.mxu0 %v17971_v9  ;;  %12202 = vmatpush.bf16.msra.mxu2 %v17955_v23 }
0x1b50   :  { %12216 = vmatpush.bf16.msra.mxu3 %v17963_v44  ;;  %v17981_v44 = vld [vmem:[#allocation21 + $0xa20] sm:$0xff] }
0x1b52   :  { %12189 = vmatpush.bf16.msra.mxu1 %v17946_v8  ;;  %v10158_v8 = vperm.slane %v20337_v15, 5 }
0x1b53   :  { %12231 = vmatpush.bf16.msra.mxu0 %v17970_v12  ;;  %12203 = vmatpush.bf16.msra.mxu2 %v17954_v33 }
0x1b54   :  { %12217 = vmatpush.bf16.msra.mxu3 %v17962_v53  ;;  %v18005_v53 = vld [vmem:[#allocation21 + $0xae0] sm:$0xff] }
0x1b55   :  { %v10834_v6 = vpop.f32.mrf.mxu1 }
0x1b56   :  { %12190 = vmatpush.bf16.msra.mxu1 %v17945_v62  ;;  %v10876_v5 = vpop.f32.mrf.mxu0  ;;  %v10835_v52 = vadd.f32 %v10834_v6, %v10153_v31  ;;  %v10159_v62 = vperm.slane %v20337_v15, 6  ;;  %v17989_v15 = vld [vmem:[#allocation21 + $0xa60] sm:$0xff] }
0x1b57   :  { %12232 = vmatpush.bf16.msra.mxu0 %v17969_v18  ;;  %12204 = vmatpush.bf16.msra.mxu2 %v17953_v3  ;;  %v10877_v37 = vadd.f32 %v10876_v5, %v10156_v19  ;;  %v17990_v3 = vld [vmem:[#allocation21 + $0xa68] sm:$0xff] }
0x1b58   :  { %12218 = vmatpush.bf16.msra.mxu3 %v17961_v35  ;;  %v11049_v48 = vmax.f32 %v10835_v52, 0.0  ;;  %v17998_v5 = vld [vmem:[#allocation21 + $0xaa8] sm:$0xff] }
0x1b59   :  { %v11052_v24 = vmax.f32 %v10877_v37, 0.0  ;;  %v18004_v37 = vld [vmem:[#allocation21 + $0xad8] sm:$0xff] }
0x1b5b   :  { %v10848_v27 = vpop.f32.mrf.mxu2 }
0x1b5c   :  { %v10862_v4 = vpop.f32.mrf.mxu3  ;;  %v10849_v34 = vadd.f32 %v10848_v27, %v10154_v13  ;;  %v17980_v27 = vld [vmem:[#allocation21 + $0xa18] sm:$0xff] }
0x1b5d   :  { %v10836_v58 = vpop.f32.mrf.mxu1  ;;  %v10863_v59 = vadd.f32 %v10862_v4, %v10155_v14 }
0x1b5e   :  { %v10837_v50 = vadd.f32 %v10836_v58, %v10153_v31  ;;  %v10878_v49 = vpop.f32.mrf.mxu0  ;;  %v11050_v29 = vmax.f32 %v10849_v34, 0.0 }
0x1b5f   :  { %v10879_v20 = vadd.f32 %v10878_v49, %v10156_v19  ;;  %v11051_v45 = vmax.f32 %v10863_v59, 0.0 }
0x1b60   :  { %v11065_v55 = vmax.f32 %v10837_v50, 0.0 }
0x1b61   :  { %v11068_v32 = vmax.f32 %v10879_v20, 0.0  ;;  %v17997_v20 = vld [vmem:[#allocation21 + $0xaa0] sm:$0xff] }
0x1b62   :  { %v11340_v22 = vpack.c.bf16 %v11065_v55, %v11049_v48  ;;  %v17979_v55 = vld [vmem:[#allocation21 + $0xa10] sm:$0xff] }
0x1b63   :  { %v11343_v43 = vpack.c.bf16 %v11068_v32, %v11052_v24  ;;  %v10850_v41 = vpop.f32.mrf.mxu2 }
0x1b64   :  { %v10851_v36 = vadd.f32 %v10850_v41, %v10154_v13  ;;  %v10864_v7 = vpop.f32.mrf.mxu3  ;;  %12135 = vmatmul.bf16.vlgmr.msrb.gmra.mxu1 %v11340_v22 }
0x1b65   :  { %v10865_v39 = vadd.f32 %v10864_v7, %v10155_v14  ;;  %12177 = vmatmul.bf16.vlgmr.msrb.gmra.mxu0 %v11343_v43  ;;  %12239 = vmatpush.bf16.msrb.mxu1 %v17984_v17  ;;  %v10890_v38 = vpop.f32.mrf.mxu1  ;;  %v18003_v17 = vld [vmem:[#allocation21 + $0xad0] sm:$0xff]  ;;  %v17988_v43 = vld [vmem:[#allocation21 + $0xa58] sm:$0xff] }
0x1b66   :  { %v11066_v42 = vmax.f32 %v10851_v36, 0.0  ;;  %12281 = vmatpush.bf16.msrb.mxu0 %v18008_v60  ;;  %v10932_v10 = vpop.f32.mrf.mxu0  ;;  %v10891_v11 = vadd.f32 %v10890_v38, %v10157_v46  ;;  %v20347_v60 = vld [vmem:[#allocation20 + $0x28] sm:$0xff]  ;;  %v17978_v38 = vld [vmem:[#allocation21 + $0xa08] sm:$0xff] }
0x1b67   :  { %v11067_v47 = vmax.f32 %v10865_v39, 0.0  ;;  %v10933_v9 = vadd.f32 %v10932_v10, %v10160_v2  ;;  %v17996_v7 = vld [vmem:[#allocation21 + $0xa98] sm:$0xff]  ;;  %v17987_v10 = vld [vmem:[#allocation21 + $0xa50] sm:$0xff] }
0x1b68   :  { %v11341_v54 = vpack.c.bf16 %v11066_v42, %v11050_v29  ;;  %v11053_v35 = vmax.f32 %v10891_v11, 0.0  ;;  %v18002_v29 = vld [vmem:[#allocation21 + $0xac8] sm:$0xff]  ;;  %v10164_v42 = vperm.slane %v20347_v60, 3 }
0x1b69   :  { %v11342_v61 = vpack.c.bf16 %v11067_v47, %v11051_v45  ;;  %12240 = vmatpush.bf16.msrb.mxu1 %v17983_v0  ;;  %v11056_v31 = vmax.f32 %v10933_v9, 0.0  ;;  %v10161_v0 = vperm.slane %v20347_v60, 0  ;;  %v17977_v47 = vld [vmem:[#allocation21 + $0xa00] sm:$0xff] }
0x1b6a   :  { %12282 = vmatpush.bf16.msrb.mxu0 %v18007_v63  ;;  %12149 = vmatmul.bf16.vlgmr.msrb.gmra.mxu2 %v11341_v54  ;;  %v17995_v63 = vld [vmem:[#allocation21 + $0xa90] sm:$0xff] }
0x1b6b   :  { %12163 = vmatmul.bf16.vlgmr.msrb.gmra.mxu3 %v11342_v61  ;;  %12253 = vmatpush.bf16.msrb.mxu2 %v17992_v56  ;;  %v10904_v40 = vpop.f32.mrf.mxu2 }
0x1b6c   :  { %12267 = vmatpush.bf16.msrb.mxu3 %v18000_v16  ;;  %v10918_v30 = vpop.f32.mrf.mxu3  ;;  %v10905_v52 = vadd.f32 %v10904_v40, %v10158_v8  ;;  %v18016_v16 = vld [vmem:[#allocation21 + $0xb38] sm:$0xff]  ;;  %v10162_v40 = vperm.slane %v20347_v60, 1 }
0x1b6d   :  { %12241 = vmatpush.bf16.msrb.mxu1 %v17982_v57  ;;  %v10892_v23 = vpop.f32.mrf.mxu1  ;;  %v10919_v58 = vadd.f32 %v10918_v30, %v10159_v62  ;;  %v18040_v57 = vld [vmem:[#allocation21 + $0xbf8] sm:$0xff]  ;;  %v17994_v30 = vld [vmem:[#allocation21 + $0xa88] sm:$0xff] }
0x1b6e   :  { %12283 = vmatpush.bf16.msrb.mxu0 %v18006_v26  ;;  %v10893_v12 = vadd.f32 %v10892_v23, %v10157_v46  ;;  %v10934_v33 = vpop.f32.mrf.mxu0  ;;  %v11054_v24 = vmax.f32 %v10905_v52, 0.0  ;;  %v18001_v46 = vld [vmem:[#allocation21 + $0xac0] sm:$0xff]  ;;  %v17986_v26 = vld [vmem:[#allocation21 + $0xa48] sm:$0xff] }
0x1b6f   :  { %v10935_v18 = vadd.f32 %v10934_v33, %v10160_v2  ;;  %12254 = vmatpush.bf16.msrb.mxu2 %v17991_v21  ;;  %v11055_v34 = vmax.f32 %v10919_v58, 0.0  ;;  %v18015_v33 = vld [vmem:[#allocation21 + $0xb30] sm:$0xff]  ;;  %v18014_v58 = vld [vmem:[#allocation21 + $0xb28] sm:$0xff] }
0x1b70   :  { %v11069_v6 = vmax.f32 %v10893_v12, 0.0  ;;  %12268 = vmatpush.bf16.msrb.mxu3 %v17999_v28  ;;  %v10163_v28 = vperm.slane %v20347_v60, 2 }
0x1b71   :  { %v11072_v19 = vmax.f32 %v10935_v18, 0.0  ;;  %12242 = vmatpush.bf16.msrb.mxu1 %v17981_v44  ;;  %v18039_v18 = vld [vmem:[#allocation21 + $0xbf0] sm:$0xff] }
0x1b72   :  { %v11344_v4 = vpack.c.bf16 %v11069_v6, %v11053_v35  ;;  %12284 = vmatpush.bf16.msrb.mxu0 %v18005_v53 }
0x1b73   :  { %v11347_v13 = vpack.c.bf16 %v11072_v19, %v11056_v31  ;;  %12255 = vmatpush.bf16.msrb.mxu2 %v17990_v3  ;;  %v10906_v50 = vpop.f32.mrf.mxu2  ;;  %v17985_v3 = vld [vmem:[#allocation21 + $0xa40] sm:$0xff]  ;;  %v18024_v19 = vld [vmem:[#allocation21 + $0xb78] sm:$0xff] }
0x1b74   :  { %12269 = vmatpush.bf16.msrb.mxu3 %v17998_v5  ;;  %v10907_v49 = vadd.f32 %v10906_v50, %v10158_v8  ;;  %v10920_v14 = vpop.f32.mrf.mxu3  ;;  %12191 = vmatmul.bf16.vlgmr.msra.gmra.mxu1 %v11344_v4  ;;  %v17993_v31 = vld [vmem:[#allocation21 + $0xa80] sm:$0xff]  ;;  %v18032_v4 = vld [vmem:[#allocation21 + $0xbb8] sm:$0xff] }
0x1b75   :  { %v10921_v48 = vadd.f32 %v10920_v14, %v10159_v62  ;;  %12233 = vmatmul.bf16.vlgmr.msra.gmra.mxu0 %v11347_v13  ;;  %12243 = vmatpush.bf16.msrb.mxu1 %v17980_v27 }
0x1b76   :  { %v11070_v32 = vmax.f32 %v10907_v49, 0.0  ;;  %12285 = vmatpush.bf16.msrb.mxu0 %v18004_v37  ;;  %v10946_v59 = vpop.f32.mrf.mxu1 }
0x1b77   :  { %v11071_v22 = vmax.f32 %v10921_v48, 0.0  ;;  %12256 = vmatpush.bf16.msrb.mxu2 %v17989_v15  ;;  %v10947_v56 = vadd.f32 %v10946_v59, %v10161_v0  ;;  %v18038_v15 = vld [vmem:[#allocation21 + $0xbe8] sm:$0xff]  ;;  %v18012_v59 = vld [vmem:[#allocation21 + $0xb18] sm:$0xff] }
0x1b78   :  { %v11345_v41 = vpack.c.bf16 %v11070_v32, %v11054_v24  ;;  %12270 = vmatpush.bf16.msrb.mxu3 %v17997_v20  ;;  %v18023_v20 = vld [vmem:[#allocation21 + $0xb70] sm:$0xff]  ;;  %v18013_v32 = vld [vmem:[#allocation21 + $0xb20] sm:$0xff] }
0x1b79   :  { %v10988_v36 = vpop.f32.mrf.mxu0  ;;  %v11346_v39 = vpack.c.bf16 %v11071_v22, %v11055_v34  ;;  %12244 = vmatpush.bf16.msrb.mxu1 %v17979_v55  ;;  %v11057_v23 = vmax.f32 %v10947_v56, 0.0  ;;  %v18031_v55 = vld [vmem:[#allocation21 + $0xbb0] sm:$0xff]  ;;  %v18022_v34 = vld [vmem:[#allocation21 + $0xb68] sm:$0xff] }
0x1b7a   :  { %12286 = vmatpush.bf16.msrb.mxu0 %v18003_v17  ;;  %12205 = vmatmul.bf16.vlgmr.msra.gmra.mxu2 %v11345_v41  ;;  %v10989_v61 = vadd.f32 %v10988_v36, %v10164_v42  ;;  %v18037_v17 = vld [vmem:[#allocation21 + $0xbe0] sm:$0xff]  ;;  %v18030_v22 = vld [vmem:[#allocation21 + $0xba8] sm:$0xff]  ;;  %v18019_v56 = vld [vmem:[#allocation21 + $0xb50] sm:$0xff] }
0x1b7b   :  { %12219 = vmatmul.bf16.vlgmr.msra.gmra.mxu3 %v11346_v39  ;;  %12257 = vmatpush.bf16.msrb.mxu2 %v17988_v43  ;;  %v18036_v43 = vld [vmem:[#allocation21 + $0xbd8] sm:$0xff]  ;;  %v18021_v41 = vld [vmem:[#allocation21 + $0xb60] sm:$0xff] }
0x1b7c   :  { %12271 = vmatpush.bf16.msrb.mxu3 %v17996_v7  ;;  %v10960_v45 = vpop.f32.mrf.mxu2  ;;  %v11060_v8 = vmax.f32 %v10989_v61, 0.0  ;;  %v18029_v36 = vld [vmem:[#allocation21 + $0xba0] sm:$0xff]  ;;  %v18011_v7 = vld [vmem:[#allocation21 + $0xb10] sm:$0xff] }
0x1b7d   :  { %12245 = vmatpush.bf16.msrb.mxu1 %v17978_v38  ;;  %v10961_v53 = vadd.f32 %v10960_v45, %v10162_v40  ;;  %v18035_v38 = vld [vmem:[#allocation21 + $0xbd0] sm:$0xff]  ;;  %v10168_v45 = vperm.slane %v20347_v60, 7 }
0x1b7e   :  { %12287 = vmatpush.bf16.msrb.mxu0 %v18002_v29  ;;  %v10948_v2 = vpop.f32.mrf.mxu1  ;;  %v18020_v29 = vld [vmem:[#allocation21 + $0xb58] sm:$0xff] }
0x1b7f   :  { %v10974_v54 = vpop.f32.mrf.mxu3  ;;  %12258 = vmatpush.bf16.msrb.mxu2 %v17987_v10  ;;  %v10949_v21 = vadd.f32 %v10948_v2, %v10161_v0  ;;  %v11058_v13 = vmax.f32 %v10961_v53, 0.0  ;;  %v10165_v10 = vperm.slane %v20347_v60, 4  ;;  %v18009_v2 = vld [vmem:[#allocation21 + $0xb00] sm:$0xff] }
0x1b80   :  { %12272 = vmatpush.bf16.msrb.mxu3 %v17995_v63  ;;  %v10975_v35 = vadd.f32 %v10974_v54, %v10163_v28  ;;  %v18010_v63 = vld [vmem:[#allocation21 + $0xb08] sm:$0xff] }
0x1b81   :  { %v10990_v11 = vpop.f32.mrf.mxu0  ;;  %12246 = vmatpush.bf16.msrb.mxu1 %v17977_v47  ;;  %v11073_v44 = vmax.f32 %v10949_v21, 0.0  ;;  %v18034_v47 = vld [vmem:[#allocation21 + $0xbc8] sm:$0xff]  ;;  %v10166_v21 = vperm.slane %v20347_v60, 5 }
0x1b82   :  { %v10991_v9 = vadd.f32 %v10990_v11, %v10164_v42  ;;  %12288 = vmatpush.bf16.msrb.mxu0 %v18001_v46  ;;  %v11059_v49 = vmax.f32 %v10975_v35, 0.0  ;;  %v18028_v42 = vld [vmem:[#allocation21 + $0xb98] sm:$0xff]  ;;  %v18027_v46 = vld [vmem:[#allocation21 + $0xb90] sm:$0xff] }
0x1b83   :  { %12259 = vmatpush.bf16.msrb.mxu2 %v17986_v26  ;;  %v11348_v62 = vpack.c.bf16 %v11073_v44, %v11057_v23  ;;  %v18026_v44 = vld [vmem:[#allocation21 + $0xb88] sm:$0xff] }
0x1b84   :  { %v11076_v12 = vmax.f32 %v10991_v9, 0.0  ;;  %12273 = vmatpush.bf16.msrb.mxu3 %v17994_v30  ;;  %v10962_v5 = vpop.f32.mrf.mxu2  ;;  %v10167_v9 = vperm.slane %v20347_v60, 6 }
0x1b85   :  { %12295 = vmatpush.bf16.msra.mxu1 %v18016_v16  ;;  %v10963_v27 = vadd.f32 %v10962_v5, %v10162_v40  ;;  %v18033_v40 = vld [vmem:[#allocation21 + $0xbc0] sm:$0xff] }
0x1b86   :  { %12337 = vmatpush.bf16.msra.mxu0 %v18040_v57  ;;  %v11351_v6 = vpack.c.bf16 %v11076_v12, %v11060_v8  ;;  %12247 = vmatmul.bf16.vlgmr.msrb.gmra.mxu1 %v11348_v62 }
0x1b87   :  { %v10976_v52 = vpop.f32.mrf.mxu3  ;;  %v11074_v50 = vmax.f32 %v10963_v27, 0.0  ;;  %12260 = vmatpush.bf16.msrb.mxu2 %v17985_v3  ;;  %v18017_v3 = vld [vmem:[#allocation21 + $0xb40] sm:$0xff] }
0x1b88   :  { %v10977_v37 = vadd.f32 %v10976_v52, %v10163_v28  ;;  %12289 = vmatmul.bf16.vlgmr.msrb.gmra.mxu0 %v11351_v6  ;;  %12274 = vmatpush.bf16.msrb.mxu3 %v17993_v31  ;;  %v18018_v28 = vld [vmem:[#allocation21 + $0xb48] sm:$0xff]  ;;  %v18025_v31 = vld [vmem:[#allocation21 + $0xb80] sm:$0xff] }
0x1b89   :  { %12296 = vmatpush.bf16.msra.mxu1 %v18015_v33  ;;  %v11349_v48 = vpack.c.bf16 %v11074_v50, %v11058_v13 }
0x1b8a   :  { %12338 = vmatpush.bf16.msra.mxu0 %v18039_v18  ;;  %v11075_v14 = vmax.f32 %v10977_v37, 0.0 }
0x1b8b   :  { %12309 = vmatpush.bf16.msra.mxu2 %v18024_v19 }
0x1b8c   :  { %12323 = vmatpush.bf16.msra.mxu3 %v18032_v4  ;;  %v11350_v24 = vpack.c.bf16 %v11075_v14, %v11059_v49  ;;  %12261 = vmatmul.bf16.vlgmr.msrb.gmra.mxu2 %v11349_v48 }
0x1b8d   :  { %12297 = vmatpush.bf16.msra.mxu1 %v18014_v58 }
0x1b8e   :  { %12339 = vmatpush.bf16.msra.mxu0 %v18038_v15  ;;  %12275 = vmatmul.bf16.vlgmr.msrb.gmra.mxu3 %v11350_v24 }
0x1b8f   :  { %12310 = vmatpush.bf16.msra.mxu2 %v18023_v20 }
0x1b90   :  { %12324 = vmatpush.bf16.msra.mxu3 %v18031_v55 }
0x1b91   :  { %12298 = vmatpush.bf16.msra.mxu1 %v18013_v32 }
0x1b92   :  { %12340 = vmatpush.bf16.msra.mxu0 %v18037_v17  ;;  %v18353_v17 = vld [vmem:[#allocation23 + $0x2] ss:$0 sm:$0xff] }
0x1b93   :  { %12311 = vmatpush.bf16.msra.mxu2 %v18022_v34 }
0x1b94   :  { %12325 = vmatpush.bf16.msra.mxu3 %v18030_v22 }
0x1b95   :  { %12299 = vmatpush.bf16.msra.mxu1 %v18012_v59 }
0x1b96   :  { %v11002_v39 = vpop.f32.mrf.mxu1  ;;  %12341 = vmatpush.bf16.msra.mxu0 %v18036_v43 }
0x1b97   :  { %12312 = vmatpush.bf16.msra.mxu2 %v18021_v41  ;;  %v11003_v16 = vadd.f32 %v11002_v39, %v10165_v10 }
0x1b98   :  { %12326 = vmatpush.bf16.msra.mxu3 %v18029_v36 }
0x1b99   :  { %v11044_v0 = vpop.f32.mrf.mxu0  ;;  %12300 = vmatpush.bf16.msra.mxu1 %v18011_v7  ;;  %v11061_v8 = vmax.f32 %v11003_v16, 0.0 }
0x1b9a   :  { %12342 = vmatpush.bf16.msra.mxu0 %v18035_v38  ;;  %v11045_v57 = vadd.f32 %v11044_v0, %v10168_v45 }
0x1b9b   :  { %12313 = vmatpush.bf16.msra.mxu2 %v18020_v29 }
0x1b9c   :  { %v11016_v54 = vpop.f32.mrf.mxu2  ;;  %12327 = vmatpush.bf16.msra.mxu3 %v18028_v42  ;;  %v11064_v33 = vmax.f32 %v11045_v57, 0.0 }
0x1b9d   :  { %v11030_v61 = vpop.f32.mrf.mxu3  ;;  %12301 = vmatpush.bf16.msra.mxu1 %v18010_v63  ;;  %v11017_v62 = vadd.f32 %v11016_v54, %v10166_v21 }
0x1b9e   :  { %v11004_v26 = vpop.f32.mrf.mxu1  ;;  %12343 = vmatpush.bf16.msra.mxu0 %v18034_v47  ;;  %v11031_v35 = vadd.f32 %v11030_v61, %v10167_v9 }
0x1b9f   :  { %v11005_v11 = vadd.f32 %v11004_v26, %v10165_v10  ;;  %12314 = vmatpush.bf16.msra.mxu2 %v18019_v56  ;;  %v11062_v52 = vmax.f32 %v11017_v62, 0.0 }
0x1ba0   :  { %12328 = vmatpush.bf16.msra.mxu3 %v18027_v46  ;;  %v11063_v37 = vmax.f32 %v11031_v35, 0.0 }
0x1ba1   :  { %v11046_v30 = vpop.f32.mrf.mxu0  ;;  %v11077_v12 = vmax.f32 %v11005_v11, 0.0  ;;  %12302 = vmatpush.bf16.msra.mxu1 %v18009_v2 }
0x1ba2   :  { %v11047_v23 = vadd.f32 %v11046_v30, %v10168_v45  ;;  %12344 = vmatpush.bf16.msra.mxu0 %v18033_v40 }
0x1ba3   :  { %v11352_v18 = vpack.c.bf16 %v11077_v12, %v11061_v8  ;;  %12315 = vmatpush.bf16.msra.mxu2 %v18018_v28 }
0x1ba4   :  { %v11080_v53 = vmax.f32 %v11047_v23, 0.0  ;;  %v11018_v5 = vpop.f32.mrf.mxu2  ;;  %12329 = vmatpush.bf16.msra.mxu3 %v18026_v44 }
0x1ba5   :  { %v11019_v19 = vadd.f32 %v11018_v5, %v10166_v21  ;;  %v11032_v60 = vpop.f32.mrf.mxu3  ;;  %12303 = vmatmul.bf16.vlgmr.msra.gmra.mxu1 %v11352_v18 }
0x1ba6   :  { %v11355_v6 = vpack.c.bf16 %v11080_v53, %v11064_v33  ;;  %v11033_v27 = vadd.f32 %v11032_v60, %v10167_v9 }
0x1ba7   :  { %v11078_v4 = vmax.f32 %v11019_v19, 0.0  ;;  %12316 = vmatpush.bf16.msra.mxu2 %v18017_v3 }
0x1ba8   :  { %12345 = vmatmul.bf16.vlgmr.msra.gmra.mxu0 %v11355_v6  ;;  %v11079_v58 = vmax.f32 %v11033_v27, 0.0  ;;  %12330 = vmatpush.bf16.msra.mxu3 %v18025_v31 }
0x1ba9   :  { %v11353_v13 = vpack.c.bf16 %v11078_v4, %v11062_v52 }
0x1baa   :  { %v11354_v50 = vpack.c.bf16 %v11079_v58, %v11063_v37 }
0x1bab   :  { %12317 = vmatmul.bf16.vlgmr.msra.gmra.mxu2 %v11353_v13 }
0x1bac   :  { %12331 = vmatmul.bf16.vlgmr.msra.gmra.mxu3 %v11354_v50 }
0x1be1   :  { %v12136_v15 = vpop.f32.mrf.mxu1 }
0x1be2   :  { %v12178_v20 = vpop.f32.mrf.mxu0  ;;  %v12137_v22 = vadd.f32 %v18353_v17, %v12136_v15 }
0x1be9   :  { %v12138_v48 = vpop.f32.mrf.mxu1 }
0x1bea   :  { %v12180_v32 = vpop.f32.mrf.mxu0  ;;  %v12139_v38 = vadd.f32 %v18353_v17, %v12138_v48 }
0x1bed   :  { %v12150_v49 = vpop.f32.mrf.mxu2 }
0x1bee   :  { %v12164_v14 = vpop.f32.mrf.mxu3  ;;  %v12151_v59 = vadd.f32 %v12150_v49, %v12137_v22 }
0x1bf0   :  { %v12165_v7 = vadd.f32 %v12164_v14, %v12151_v59 }
0x1bf1   :  { %v12192_v34 = vpop.f32.mrf.mxu1 }
0x1bf2   :  { %v12234_v36 = vpop.f32.mrf.mxu0  ;;  %v12179_v0 = vadd.f32 %v12178_v20, %v12165_v7  ;;  %v12419_v7 = vld [vmem:[%s20457_s16 + $0x60] sm:$0xff] }
0x1bf4   :  { %v12193_v10 = vadd.f32 %v12192_v34, %v12179_v0  ;;  %v12416_v0 = vld [vmem:[%s20457_s16 + $0x48] sm:$0xff] }
0x1bf5   :  { %v12152_v55 = vpop.f32.mrf.mxu2 }
0x1bf6   :  { %v12166_v24 = vpop.f32.mrf.mxu3  ;;  %v12153_v29 = vadd.f32 %v12152_v55, %v12139_v38  ;;  %v12417_v38 = vld [vmem:[%s20457_s16 + $0x50] sm:$0xff] }
0x1bf8   :  { %v12167_v63 = vadd.f32 %v12166_v24, %v12153_v29  ;;  %v12422_v24 = vld [vmem:[%s20457_s16 + $0x78] sm:$0xff]  ;;  %v12415_v29 = vld [vmem:[%s20457_s16 + $0x40] sm:$0xff] }
0x1bf9   :  { %v12194_v39 = vpop.f32.mrf.mxu1  ;;  %12427 = vmatpush.msrb.mxu1 %v12422_v24 }
0x1bfa   :  { %v12236_v47 = vpop.f32.mrf.mxu0  ;;  %v12181_v46 = vadd.f32 %v12180_v32, %v12167_v63  ;;  %v12421_v32 = vld [vmem:[%s20457_s16 + $0x70] sm:$0xff]  ;;  %v12412_v63 = vld [vmem:[%s20457_s16 + $0x28] sm:$0xff] }
0x1bfb   :  { %12428 = vmatpush.msrb.mxu1 %v12421_v32  ;;  %v19068_v32 = vmov 0  }
0x1bfc   :  { %v12195_v61 = vadd.f32 %v12194_v39, %v12181_v46  ;;  %v12418_v39 = vld [vmem:[%s20457_s16 + $0x58] sm:$0xff]  ;;  %v12407_v46 = vld [vmem:[%s20457_s16] sm:$0xff]  ;;  %18335 = vset.pattern.permute.xlu0 %v19068_v32  ;;  %18336 = vset.pattern.permute.xlu1 %v19068_v32 }
0x1bfd   :  { %v12206_v43 = vpop.f32.mrf.mxu2  ;;  %v17011_v32 = vld [vmem:[#allocation27 + $0x108] sm:$0xf] }
0x1bfe   :  { %v12220_v41 = vpop.f32.mrf.mxu3  ;;  %v12207_v56 = vadd.f32 %v12206_v43, %v12193_v10  ;;  %v12413_v10 = vld [vmem:[%s20457_s16 + $0x30] sm:$0xff] }
0x1c00   :  { %v12221_v16 = vadd.f32 %v12220_v41, %v12207_v56  ;;  %v12409_v56 = vld [vmem:[%s20457_s16 + $0x10] sm:$0xff] }
0x1c02   :  { %v12235_v57 = vadd.f32 %v12234_v36, %v12221_v16  ;;  %v12420_v36 = vld [vmem:[%s20457_s16 + $0x68] sm:$0xff] }
0x1c03   :  { %v12248_v54 = vpop.f32.mrf.mxu1  ;;  %12429 = vmatpush.msrb.mxu1 %v12420_v36 }
0x1c04   :  { %v12249_v30 = vadd.f32 %v12248_v54, %v12235_v57  ;;  %v12408_v54 = vld [vmem:[%s20457_s16 + $0x8] sm:$0xff] }
0x1c05   :  { %v12208_v42 = vpop.f32.mrf.mxu2  ;;  %v12290_v21 = vpop.f32.mrf.mxu0  ;;  %12430 = vmatpush.msrb.mxu1 %v12419_v7  ;;  %v17099_v7 = vld [vmem:[#allocation27 + $0x1c0] sm:$0xf] }
0x1c06   :  { %v12222_v45 = vpop.f32.mrf.mxu3  ;;  %v12209_v26 = vadd.f32 %v12208_v42, %v12195_v61  ;;  %v12414_v42 = vld [vmem:[%s20457_s16 + $0x38] sm:$0xff] }
0x1c07   :  { %12431 = vmatpush.msrb.mxu1 %v12418_v39  ;;  %v18101_v39 = vld [vmem:[#allocation27 + $0x1dc] sm:$0xf0] }
0x1c08   :  { %v12223_v28 = vadd.f32 %v12222_v45, %v12209_v26  ;;  %v12411_v45 = vld [vmem:[%s20457_s16 + $0x20] sm:$0xff] }
0x1c09   :  { %12432 = vmatpush.msrb.mxu1 %v12417_v38  ;;  %v18097_v38 = vld [vmem:[#allocation27 + $0x1c4] sm:$0xf] }
0x1c0a   :  { %v12237_v23 = vadd.f32 %v12236_v47, %v12223_v28  ;;  %v12410_v47 = vld [vmem:[%s20457_s16 + $0x18] sm:$0xff]  ;;  %s19069_s16 = smov [#allocation30]  }
0x1c0b   :  { %v12250_v11 = vpop.f32.mrf.mxu1  ;;  %12433 = vmatpush.msrb.mxu1 %v12416_v0  ;;  %s13061_s24 = sshll.u32 %s19069_s16, 4  ;;  %s13062_s24 = int_to_ptr.vmem [resolvable:$true] %s13061_s24 }
0x1c0c   :  { %v12251_v62 = vadd.f32 %v12250_v11, %v12237_v23 }
0x1c0d   :  { %v12292_v33 = vpop.f32.mrf.mxu0  ;;  %12434 = vmatpush.msrb.mxu1 %v12415_v29 }
0x1c0f   :  { %v12262_v2 = vpop.f32.mrf.mxu2  ;;  %12435 = vmatpush.msrb.mxu1 %v12414_v42  ;;  %v17100_v42 = vor.u32 %v18101_v39, %v17099_v7 }
0x1c10   :  { %v12263_v9 = vadd.f32 %v12262_v2, %v12249_v30 }
0x1c11   :  { %v12276_v40 = vpop.f32.mrf.mxu3  ;;  %12436 = vmatpush.msrb.mxu1 %v12413_v10  ;;  %v17101_v10 = vld [vmem:[#allocation27 + $0x1e0] sm:$0xf0]  ;;  %12925 = vmatpush.bf16.msrb.mxu2 %v17100_v42 }
0x1c12   :  { %v12277_v8 = vadd.f32 %v12276_v40, %v12263_v9 }
0x1c13   :  { %12437 = vmatpush.msrb.mxu1 %v12412_v63  ;;  %v17107_v63 = vld [vmem:[#allocation27 + $0x1c8] sm:$0xf] }
0x1c14   :  { %v12291_v3 = vadd.f32 %v12290_v21, %v12277_v8 }
0x1c15   :  { %12438 = vmatpush.msrb.mxu1 %v12411_v45 }
0x1c17   :  { %v12264_v44 = vpop.f32.mrf.mxu2  ;;  %12439 = vmatpush.msrb.mxu1 %v12410_v47  ;;  %v17104_v47 = vor.u32 %v18097_v38, %v17101_v10 }
0x1c18   :  { %v12265_v18 = vadd.f32 %v12264_v44, %v12251_v62 }
0x1c19   :  { %v12278_v12 = vpop.f32.mrf.mxu3  ;;  %12440 = vmatpush.msrb.mxu1 %v12409_v56  ;;  %v18102_v56 = vld [vmem:[#allocation27 + $0x1e4] sm:$0xf0]  ;;  %12938 = vmatpush.bf16.msrb.mxu3 %v17104_v47  ;;  %v18069_v47 = vld [vmem:[#allocation27 + $0xdc] sm:$0xf0] }
0x1c1a   :  { %v12279_v5 = vadd.f32 %v12278_v12, %v12265_v18  ;;  %v18354_v12 = vld [vmem:[#allocation24 + $0x2] ss:$0 sm:$0xff]  ;;  %v18355_v18 = vld [vmem:[#allocation26 + $0x2] ss:$0 sm:$0xff] }
0x1c1b   :  { %12441 = vmatpush.msrb.mxu1 %v12408_v54  ;;  %v18098_v54 = vld [vmem:[#allocation27 + $0x1cc] sm:$0xf] }
0x1c1c   :  { %v12293_v4 = vadd.f32 %v12292_v33, %v12279_v5 }
0x1c1d   :  { %12442 = vmatpush.msrb.mxu1 %v12407_v46 }
0x1c22   :  { %v12304_v53 = vpop.f32.mrf.mxu1 }
0x1c23   :  { %v12305_v35 = vadd.f32 %v12304_v53, %v12291_v3 }
0x1c25   :  { %v12346_v60 = vpop.f32.mrf.mxu0 }
0x1c2a   :  { %v12306_v52 = vpop.f32.mrf.mxu1 }
0x1c2b   :  { %v12307_v58 = vadd.f32 %v12306_v52, %v12293_v4  ;;  %v18356_v52 = vld [vmem:[#allocation2] ss:$0 sm:$0xff] }
0x1c2d   :  { %v12348_v20 = vpop.f32.mrf.mxu0 }
0x1c2e   :  { %v12318_v6 = vpop.f32.mrf.mxu2 }
0x1c2f   :  { %v12319_v31 = vadd.f32 %v12318_v6, %v12305_v35  ;;  %v12332_v19 = vpop.f32.mrf.mxu3 }
0x1c31   :  { %v12333_v27 = vadd.f32 %v12332_v19, %v12319_v31 }
0x1c33   :  { %v12347_v37 = vadd.f32 %v12346_v60, %v12333_v27 }
0x1c35   :  { %v12351_v13 = vadd.f32 %v12347_v37, %v20313_v25 }
0x1c36   :  { %v12320_v50 = vpop.f32.mrf.mxu2 }
0x1c37   :  { %v12321_v15 = vadd.f32 %v12320_v50, %v12307_v58  ;;  %12357 = vadd.xlane.f32.xlu2 %v12351_v13  ;;  %v12334_v49 = vpop.f32.mrf.mxu3 }
0x1c39   :  { %v12335_v14 = vadd.f32 %v12334_v49, %v12321_v15 }
0x1c3b   :  { %v12349_v48 = vadd.f32 %v12348_v20, %v12335_v14 }
0x1c3d   :  { %v12352_v55 = vadd.f32 %v12349_v48, %v20315_v51 }
0x1c3f   :  { %12359 = vadd.xlane.f32.xlu0 %v12352_v55 }
0x1caa   :  { %v12358_v25 = vpop.xlane.xlu2 %12357 }
0x1cab   :  { %v12361_v17 = vmul.f32 %v12358_v25, %v19569_v1 }
0x1cad   :  { %v12363_v34 = vsub.f32 %v12351_v13, %v12361_v17 }
0x1caf   :  { %v12365_v22 = vmul.f32 %v12363_v34, %v12363_v34 }
0x1cb1   :  { %12367 = vadd.xlane.f32.xlu1 %v12365_v22 }
0x1cb2   :  { %v12360_v59 = vpop.xlane.xlu0 %12359 }
0x1cb3   :  { %v12362_v51 = vmul.f32 %v12360_v59, %v19569_v1 }
0x1cb5   :  { %v20367_v43 = vsub.f32 %v12352_v55, %v12362_v51 }
0x1cb7   :  { %v12366_v41 = vmul.f32 %v20367_v43, %v20367_v43 }
0x1cb9   :  { %12369 = vadd.xlane.f32.xlu2 %v12366_v41 }
0x1d24   :  { %v12368_v16 = vpop.xlane.xlu1 %12367 }
0x1d25   :  { %v12371_v61 = vmul.f32 %v12368_v16, %v19569_v1  ;;  %v17108_v16 = vor.u32 %v18102_v56, %v17107_v63  ;;  %v18065_v56 = vld [vmem:[#allocation27 + $0xc4] sm:$0xf] }
0x1d27   :  { %v12373_v2 = vadd.f32 1e-05, %v12371_v61  ;;  %v17109_v61 = vld [vmem:[#allocation27 + $0x1e8] sm:$0xf0]  ;;  %12951 = vmatpush.bf16.msrb.mxu0 %v17108_v16  ;;  %v16979_v16 = vld [vmem:[#allocation27 + $0xc8] sm:$0xf] }
0x1d29   :  { %18571 = vrsqrt.f32 %v12373_v2  ;;  %vm12381_vm7 = vweird.f32 %v12373_v2 }
0x1d2c   :  { %v12370_v57 = vpop.xlane.xlu2 %12369 }
0x1d2d   :  { %v12372_v26 = vmul.f32 %v12370_v57, %v19569_v1  ;;  %v17112_v57 = vor.u32 %v18098_v54, %v17109_v61  ;;  %v18070_v61 = vld [vmem:[#allocation27 + $0xe4] sm:$0xf0] }
0x1d2f   :  { %v18572_v40 = vpop.eup %18571  ;;  %v12374_v21 = vadd.f32 1e-05, %v12372_v26  ;;  %v18093_v26 = vld [vmem:[#allocation27 + $0x19c] sm:$0xf0]  ;;  %12964 = vmatpush.bf16.msra.mxu1 %v17112_v57  ;;  %v16980_v57 = vor.u32 %v18070_v61, %v16979_v16  ;;  %v18096_v16 = vld [vmem:[#allocation27 + $0x1b4] sm:$0xf0] }
0x1d30   :  { %v12376_v11 = vmul.f32 %v18572_v40, %v12373_v2  ;;  %vm12382_vm6 = vweird.f32 %v18572_v40  ;;  %v17067_v2 = vld [vmem:[#allocation27 + $0x180] sm:$0xf]  ;;  %v18092_v61 = vld [vmem:[#allocation27 + $0x19c] sm:$0xf] }
0x1d31   :  { %18573 = vrsqrt.f32 %v12374_v21  ;;  %vm12383_vm9 = vmor %vm12381_vm7, %vm12382_vm6  ;;  %vm12391_vm11 = vweird.f32 %v12374_v21 }
0x1d32   :  { %v12377_v30 = vmul.f32 %v18572_v40, %v12376_v11 }
0x1d34   :  { %v12378_v28 = vmul.f32 0.5, %v12377_v30  ;;  %v17068_v30 = vor.u32 %v18093_v26, %v17067_v2  ;;  %v18066_v26 = vld [vmem:[#allocation27 + $0xcc] sm:$0xf] }
0x1d36   :  { %v12379_v9 = vsub.f32 1.5, %v12378_v28  ;;  %12926 = vmatpush.bf16.msrb.mxu2 %v17068_v30  ;;  %v18057_v30 = vld [vmem:[#allocation27 + $0x84] sm:$0xf] }
0x1d37   :  { %v18574_v23 = vpop.eup %18573 }
0x1d38   :  { %v12380_v44 = vmul.f32 %v18572_v40, %v12379_v9  ;;  %v12386_v8 = vmul.f32 %v18574_v23, %v12374_v21  ;;  %vm12392_vm10 = vweird.f32 %v18574_v23  ;;  %v17069_v21 = vld [vmem:[#allocation27 + $0x1a0] sm:$0xf0]  ;;  %v17075_v9 = vld [vmem:[#allocation27 + $0x188] sm:$0xf] }
0x1d39   :  { %vm12393_vm12 = vmor %vm12391_vm11, %vm12392_vm10 }
0x1d3a   :  { %v12384_v33 = vsel %vm12383_vm9, %v18572_v40, %v12380_v44  ;;  %v12387_v53 = vmul.f32 %v18574_v23, %v12386_v8  ;;  %v18089_v40 = vld [vmem:[#allocation27 + $0x184] sm:$0xf]  ;;  %v18090_v44 = vld [vmem:[#allocation27 + $0x18c] sm:$0xf] }
0x1d3b   :  { %v12395_v62 = vmul.f32 %v12384_v33, %v12363_v34  ;;  %v17072_v28 = vor.u32 %v18089_v40, %v17069_v21  ;;  %v17035_v33 = vld [vmem:[#allocation27 + $0x140] sm:$0xf]  ;;  %v16981_v40 = vld [vmem:[#allocation27 + $0xe8] sm:$0xf0] }
0x1d3c   :  { %v12388_v3 = vmul.f32 0.5, %v12387_v53  ;;  %v18085_v53 = vld [vmem:[#allocation27 + $0x15c] sm:$0xf0]  ;;  %v16984_v21 = vor.u32 %v18066_v26, %v16981_v40  ;;  %v17051_v40 = vld [vmem:[#allocation27 + $0x150] sm:$0xf] }
0x1d3d   :  { %v12400_v1 = vmul.f32 %v18354_v12, %v12395_v62  ;;  %12939 = vmatpush.bf16.msrb.mxu3 %v17072_v28 }
0x1d3e   :  { %v12389_v35 = vsub.f32 1.5, %v12388_v3  ;;  %v17036_v3 = vor.u32 %v18085_v53, %v17035_v33  ;;  %v18058_v33 = vld [vmem:[#allocation27 + $0x8c] sm:$0xf] }
0x1d3f   :  { %v20415_v6 = vadd.f32 %v18355_v18, %v12400_v1  ;;  %v18081_v1 = vld [vmem:[#allocation27 + $0x144] sm:$0xf]  ;;  %v16949_v53 = vld [vmem:[#allocation27 + $0xa8] sm:$0xf0] }
0x1d40   :  { %v12390_v5 = vmul.f32 %v18574_v23, %v12389_v35  ;;  %v17037_v35 = vld [vmem:[#allocation27 + $0x160] sm:$0xf0]  ;;  %12927 = vmatpush.bf16.msrb.mxu2 %v17036_v3  ;;  %v18053_v3 = vld [vmem:[#allocation27 + $0x5c] sm:$0xf0] }
0x1d41   :  { %12443 = vmatmul.f32.vlgmr.msrb.gmra.mxu1 %v20415_v6 }
0x1d42   :  { %v12394_v31 = vsel %vm12393_vm12, %v18574_v23, %v12390_v5  ;;  %v18094_v23 = vld [vmem:[#allocation27 + $0x1a4] sm:$0xf0]  ;;  %v17040_v5 = vor.u32 %v18081_v1, %v17037_v35  ;;  %v18049_v1 = vld [vmem:[#allocation27 + $0x44] sm:$0xf] }
0x1d43   :  { %v12396_v19 = vmul.f32 %v12394_v31, %v20367_v43  ;;  %v17076_v8 = vor.u32 %v18094_v23, %v17075_v9  ;;  %v17043_v31 = vld [vmem:[#allocation27 + $0x148] sm:$0xf]  ;;  %v16941_v9 = vld [vmem:[#allocation27 + $0xa0] sm:$0xf0] }
0x1d44   :  { %12940 = vmatpush.bf16.msrb.mxu3 %v17040_v5  ;;  %v16947_v23 = vld [vmem:[#allocation27 + $0x88] sm:$0xf]  ;;  %v16909_v5 = vld [vmem:[#allocation27 + $0x60] sm:$0xf0] }
0x1d45   :  { %v12401_v60 = vmul.f32 %v18354_v12, %v12396_v19  ;;  %v17077_v12 = vld [vmem:[#allocation27 + $0x1a8] sm:$0xf0]  ;;  %v18086_v19 = vld [vmem:[#allocation27 + $0x164] sm:$0xf0]  ;;  %12952 = vmatpush.bf16.msrb.mxu0 %v17076_v8  ;;  %v16944_v8 = vor.u32 %v18057_v30, %v16941_v9  ;;  %v17053_v30 = vld [vmem:[#allocation27 + $0x170] sm:$0xf0] }
0x1d46   :  { %v18088_v9 = vld [vmem:[#allocation27 + $0x174] sm:$0xf0] }
0x1d47   :  { %v20419_v27 = vadd.f32 %v18355_v18, %v12401_v60  ;;  %v17080_v18 = vor.u32 %v18090_v44, %v17077_v12  ;;  %v18082_v60 = vld [vmem:[#allocation27 + $0x14c] sm:$0xf]  ;;  %v18062_v44 = vld [vmem:[#allocation27 + $0xa4] sm:$0xf0] }
0x1d48   :  { %v16948_v12 = vor.u32 %v18062_v44, %v16947_v23 }
0x1d49   :  { %12446 = vmatmul.f32.gmra.mxu1 %v20419_v27 }
0x1d4a   :  { %12965 = vmatpush.bf16.msra.mxu1 %v17080_v18  ;;  %v16907_v18 = vld [vmem:[#allocation27 + $0x40] sm:$0xf] }
0x1d4b   :  { %v16908_v35 = vor.u32 %v18053_v3, %v16907_v18  ;;  %v18075_v18 = vld [vmem:[#allocation27 + $0x114] sm:$0xf] }
0x1dbe   :  { %v12444_v4 = vpop.f32.mrf.mxu1 }
0x1dbf   :  { %v12445_v37 = vadd.f32 %v18356_v52, %v12444_v4 }
0x1dc1   :  { %v12451_v58 = vsel %vm12450_vm13, %v12445_v37, -inf }
0x1dc2   :  { %v12452_v13 = vrot.slane %v12451_v58, 4 }
0x1dc4   :  { %v12453_v50 = vmax.f32 %v12451_v58, %v12452_v13  ;;  %v17045_v58 = vld [vmem:[#allocation27 + $0x168] sm:$0xf0]  ;;  %v17003_v13 = vld [vmem:[#allocation27 + $0x100] sm:$0xf] }
0x1dc6   :  { %v12454_v15 = vrot.slane %v12453_v50, 2  ;;  %v12447_v49 = vpop.f32.mrf.mxu1 }
0x1dc7   :  { %v12448_v14 = vadd.f32 %v18356_v52, %v12447_v49  ;;  %v17048_v49 = vor.u32 %v18082_v60, %v17045_v58  ;;  %v16912_v60 = vor.u32 %v18049_v1, %v16909_v5  ;;  %v17021_v1 = vld [vmem:[#allocation27 + $0x130] sm:$0xf0]  ;;  %v18080_v5 = vld [vmem:[#allocation27 + $0x134] sm:$0xf0] }
0x1dc8   :  { %v12455_v20 = vmax.f32 %v12453_v50, %v12454_v15  ;;  %v18077_v50 = vld [vmem:[#allocation27 + $0x11c] sm:$0xf0] }
0x1dc9   :  { %v12458_v48 = vsel %vm12450_vm13, %v12448_v14, -inf  ;;  %12966 = vmatpush.bf16.msra.mxu1 %v17048_v49 }
0x1dca   :  { %v12456_v55 = vrot.slane %v12455_v20, 1  ;;  %v12459_v24 = vrot.slane %v12458_v48, 4 }
0x1dcc   :  { %v12457_v25 = vmax.f32 %v12455_v20, %v12456_v55  ;;  %v12460_v17 = vmax.f32 %v12458_v48, %v12459_v24  ;;  %v17005_v20 = vld [vmem:[#allocation27 + $0x120] sm:$0xf0]  ;;  %v17004_v24 = vor.u32 %v18077_v50, %v17003_v13  ;;  %v16875_v13 = vld [vmem:[#allocation27] sm:$0xf] }
0x1dcd   :  { %v18045_v50 = vld [vmem:[#allocation27 + $0x1c] sm:$0xf0] }
0x1dce   :  { %v12465_v34 = vsub.f32 %v12445_v37, %v12457_v25  ;;  %v12461_v22 = vrot.slane %v12460_v17, 2  ;;  %v17044_v37 = vor.u32 %v18086_v19, %v17043_v31  ;;  %v18078_v25 = vld [vmem:[#allocation27 + $0x124] sm:$0xf0]  ;;  %12928 = vmatpush.bf16.msrb.mxu2 %v17004_v24  ;;  %v16876_v49 = vor.u32 %v18045_v50, %v16875_v13  ;;  %v18067_v13 = vld [vmem:[#allocation27 + $0xd4] sm:$0xf] }
0x1dcf   :  { %v16915_v31 = vld [vmem:[#allocation27 + $0x48] sm:$0xf] }
0x1dd0   :  { %v12467_v59 = vmul.f32 1.442695, %v12465_v34  ;;  %v12462_v51 = vmax.f32 %v12460_v17, %v12461_v22  ;;  %v18074_v34 = vld [vmem:[#allocation27 + $0x10c] sm:$0xf]  ;;  %12953 = vmatpush.bf16.msrb.mxu0 %v17044_v37  ;;  %v18054_v19 = vld [vmem:[#allocation27 + $0x64] sm:$0xf0] }
0x1dd1   :  { %v17013_v22 = vld [vmem:[#allocation27 + $0x128] sm:$0xf0] }
0x1dd2   :  { %18575 = vpow2.f32 %v12467_v59  ;;  %v12463_v43 = vrot.slane %v12462_v51, 1  ;;  %v16917_v37 = vld [vmem:[#allocation27 + $0x68] sm:$0xf0] }
0x1dd4   :  { %v12464_v41 = vmax.f32 %v12462_v51, %v12463_v43  ;;  %v17012_v43 = vor.u32 %v18078_v25, %v17011_v32  ;;  %v18042_v32 = vld [vmem:[#allocation27 + $0xc] sm:$0xf] }
0x1dd5   :  { %v16885_v25 = vld [vmem:[#allocation27 + $0x28] sm:$0xf0] }
0x1dd6   :  { %v12466_v36 = vsub.f32 %v12448_v14, %v12464_v41  ;;  %v18073_v14 = vld [vmem:[#allocation27 + $0x104] sm:$0xf]  ;;  %v17016_v41 = vor.u32 %v18074_v34, %v17013_v22  ;;  %12954 = vmatpush.bf16.msrb.mxu0 %v17012_v43  ;;  %v16888_v34 = vor.u32 %v18042_v32, %v16885_v25  ;;  %v18103_v22 = vld [vmem:[#allocation27 + $0x1ec] sm:$0xf0] }
0x1dd7   :  { %v17008_v17 = vor.u32 %v18073_v14, %v17005_v20  ;;  %v16877_v14 = vld [vmem:[#allocation27 + $0x20] sm:$0xf0]  ;;  %v16883_v20 = vld [vmem:[#allocation27 + $0x8] sm:$0xf]  ;;  %v16955_v32 = vld [vmem:[#allocation27 + $0x90] sm:$0xf] }
0x1dd8   :  { %v20424_v0 = vpop.eup %18575  ;;  %v12469_v29 = vmul.f32 1.442695, %v12466_v36  ;;  %12967 = vmatpush.bf16.msra.mxu1 %v17016_v41 }
0x1dd9   :  { %v12471_v45 = vsel %vm12450_vm13, %v20424_v0, 0.0  ;;  %12941 = vmatpush.bf16.msrb.mxu3 %v17008_v17  ;;  %v17115_v17 = vld [vmem:[#allocation27 + $0x1d0] sm:$0xf] }
0x1dda   :  { %v12472_v46 = vrot.slane %v12471_v45, 4  ;;  %18577 = vpow2.f32 %v12469_v29  ;;  %12955 = vmatpush.bf16.msrb.mxu0 %v16980_v57  ;;  %v17116_v43 = vor.u32 %v18103_v22, %v17115_v17  ;;  %v17093_v57 = vld [vmem:[#allocation27 + $0x1b8] sm:$0xf0]  ;;  %v18059_v22 = vld [vmem:[#allocation27 + $0x94] sm:$0xf] }
0x1ddb   :  { %v17096_v26 = vor.u32 %v18092_v61, %v17093_v57  ;;  %v16933_v61 = vld [vmem:[#allocation27 + $0x78] sm:$0xf0] }
0x1ddc   :  { %v12473_v11 = vadd.f32 %v12472_v46, %v12471_v45  ;;  %v16971_v45 = vld [vmem:[#allocation27 + $0xc0] sm:$0xf]  ;;  %v16973_v46 = vld [vmem:[#allocation27 + $0xe0] sm:$0xf0]  ;;  %12968 = vmatpush.bf16.msra.mxu1 %v16984_v21  ;;  %v18087_v21 = vld [vmem:[#allocation27 + $0x16c] sm:$0xf0] }
0x1ddd   :  { %v16972_v54 = vor.u32 %v18069_v47, %v16971_v45  ;;  %v16976_v2 = vor.u32 %v18065_v56, %v16973_v46  ;;  %v18091_v45 = vld [vmem:[#allocation27 + $0x194] sm:$0xf]  ;;  %v17091_v46 = vld [vmem:[#allocation27 + $0x198] sm:$0xf] }
0x1dde   :  { %v12474_v62 = vrot.slane %v12473_v11, 2  ;;  %12956 = vmatpush.bf16.msrb.mxu0 %v16948_v12  ;;  %v17085_v47 = vld [vmem:[#allocation27 + $0x1b0] sm:$0xf0]  ;;  %v17061_v12 = vld [vmem:[#allocation27 + $0x178] sm:$0xf0] }
0x1ddf   :  { %12929 = vmatpush.bf16.msrb.mxu2 %v16972_v54  ;;  %12942 = vmatpush.bf16.msrb.mxu3 %v16976_v2  ;;  %v17088_v54 = vor.u32 %v18091_v45, %v17085_v47  ;;  %v17092_v2 = vor.u32 %v18096_v16, %v17091_v46  ;;  %v18051_v45 = vld [vmem:[#allocation27 + $0x54] sm:$0xf]  ;;  %v18056_v46 = vld [vmem:[#allocation27 + $0x74] sm:$0xf0]  ;;  %v18052_v16 = vld [vmem:[#allocation27 + $0x5c] sm:$0xf] }
0x1de0   :  { %v18578_v52 = vpop.eup %18577  ;;  %v12475_v4 = vadd.f32 %v12474_v62, %v12473_v11  ;;  %v18061_v11 = vld [vmem:[#allocation27 + $0x9c] sm:$0xf0]  ;;  %v16952_v62 = vor.u32 %v18058_v33, %v16949_v53  ;;  %v17019_v53 = vld [vmem:[#allocation27 + $0x110] sm:$0xf]  ;;  %v16925_v47 = vld [vmem:[#allocation27 + $0x70] sm:$0xf0] }
0x1de1   :  { %v12478_v15 = vsel %vm12450_vm13, %v18578_v52, 0.0  ;;  %v16928_v57 = vor.u32 %v18051_v45, %v16925_v47 }
0x1de2   :  { %v12476_v48 = vrot.slane %v12475_v4, 1  ;;  %v12479_v55 = vrot.slane %v12478_v15, 4  ;;  %12969 = vmatpush.bf16.msra.mxu1 %v16952_v62  ;;  %v18079_v62 = vld [vmem:[#allocation27 + $0x12c] sm:$0xf0] }
0x1de3   :  { %12943 = vmatpush.bf16.msrb.mxu3 %v16944_v8  ;;  %v18084_v8 = vld [vmem:[#allocation27 + $0x15c] sm:$0xf]  ;;  %v17020_v3 = vor.u32 %v18079_v62, %v17019_v53 }
0x1de4   :  { %v12480_v59 = vadd.f32 %v12479_v55, %v12478_v15  ;;  %v12477_v51 = vadd.f32 %v12476_v48, %v12475_v4  ;;  %v18050_v4 = vld [vmem:[#allocation27 + $0x4c] sm:$0xf]  ;;  %v18041_v15 = vld [vmem:[#allocation27 + $0x4] sm:$0xf]  ;;  %v18046_v48 = vld [vmem:[#allocation27 + $0x24] sm:$0xf0]  ;;  %v17064_v33 = vor.u32 %v18084_v8, %v17061_v12 }
0x1de5   :  { %v16920_v58 = vor.u32 %v18050_v4, %v16917_v37  ;;  %v16880_v55 = vor.u32 %v18041_v15, %v16877_v14  ;;  %v16884_v24 = vor.u32 %v18046_v48, %v16883_v20  ;;  %v16987_v37 = vld [vmem:[#allocation27 + $0xd0] sm:$0xf]  ;;  %v16989_v15 = vld [vmem:[#allocation27 + $0xf0] sm:$0xf0]  ;;  %v18072_v14 = vld [vmem:[#allocation27 + $0xf4] sm:$0xf0] }
0x1de6   :  { %v12481_v36 = vrot.slane %v12480_v59, 2  ;;  %18579 = vrcp.f32 %v12477_v51  ;;  %v17117_v51 = vld [vmem:[#allocation27 + $0x1f0] sm:$0xf0]  ;;  %v16992_v20 = vor.u32 %v18067_v13, %v16989_v15  ;;  %v16901_v53 = vld [vmem:[#allocation27 + $0x38] sm:$0xf0] }
0x1de7   :  { %12944 = vmatpush.bf16.msrb.mxu3 %v16912_v60  ;;  %12970 = vmatpush.bf16.msra.mxu1 %v16920_v58  ;;  %v18076_v60 = vld [vmem:[#allocation27 + $0x11c] sm:$0xf]  ;;  %v18071_v58 = vld [vmem:[#allocation27 + $0xec] sm:$0xf0] }
0x1de8   :  { %v12482_v7 = vadd.f32 %v12481_v36, %v12480_v59  ;;  %v18099_v59 = vld [vmem:[#allocation27 + $0x1d4] sm:$0xf]  ;;  %v17123_v36 = vld [vmem:[#allocation27 + $0x1d8] sm:$0xf]  ;;  %v16988_v50 = vor.u32 %v18071_v58, %v16987_v37 }
0x1de9   :  { %v17120_v41 = vor.u32 %v18099_v59, %v17117_v51  ;;  %v16957_v59 = vld [vmem:[#allocation27 + $0xb0] sm:$0xf0] }
0x1dea   :  { %v12483_v39 = vrot.slane %v12482_v7, 1 }
0x1deb   :  { %12945 = vmatpush.bf16.msrb.mxu3 %v16880_v55  ;;  %12971 = vmatpush.bf16.msra.mxu1 %v16888_v34  ;;  %v18068_v55 = vld [vmem:[#allocation27 + $0xdc] sm:$0xf]  ;;  %v18063_v34 = vld [vmem:[#allocation27 + $0xac] sm:$0xf0] }
0x1dec   :  { %v18580_v38 = vpop.eup %18579  ;;  %v12484_v29 = vadd.f32 %v12483_v39, %v12482_v7  ;;  %v18104_v7 = vld [vmem:[#allocation27 + $0x1f4] sm:$0xf0]  ;;  %v18100_v39 = vld [vmem:[#allocation27 + $0x1dc] sm:$0xf] }
0x1ded   :  { %v12487_v42 = vmul.f32 %v18580_v38, %v20424_v0  ;;  %v16939_v0 = vld [vmem:[#allocation27 + $0x80] sm:$0xf]  ;;  %v17124_v38 = vor.u32 %v18104_v7, %v17123_v36  ;;  %v18060_v36 = vld [vmem:[#allocation27 + $0x9c] sm:$0xf]  ;;  %v16956_v7 = vor.u32 %v18063_v34, %v16955_v32 }
0x1dee   :  { %18581 = vrcp.f32 %v12484_v29  ;;  %v16940_v28 = vor.u32 %v18061_v11, %v16939_v0  ;;  %v17125_v29 = vld [vmem:[#allocation27 + $0x1f8] sm:$0xf0]  ;;  %v18083_v0 = vld [vmem:[#allocation27 + $0x154] sm:$0xf]  ;;  %v17052_v11 = vor.u32 %v18087_v21, %v17051_v40  ;;  %v18047_v40 = vld [vmem:[#allocation27 + $0x2c] sm:$0xf0] }
0x1def   :  { %12491 = vperm.xlu0 %18335, %v12487_v42   ;;  %v17083_v42 = vld [vmem:[#allocation27 + $0x190] sm:$0xf]  ;;  %12990 = vmatpush.bf16.msra.mxu3 %v17120_v41  ;;  %v17056_v23 = vor.u32 %v18083_v0, %v17053_v30  ;;  %v18064_v41 = vld [vmem:[#allocation27 + $0xb4] sm:$0xf0]  ;;  %v16893_v30 = vld [vmem:[#allocation27 + $0x30] sm:$0xf0] }
0x1df0   :  { %12930 = vmatpush.bf16.msrb.mxu2 %v16940_v28  ;;  %v17059_v28 = vld [vmem:[#allocation27 + $0x158] sm:$0xf] }
0x1df1   :  { %v17060_v44 = vor.u32 %v18088_v9, %v17059_v28  ;;  %v16936_v9 = vor.u32 %v18052_v16, %v16933_v61 }
0x1df3   :  { %12991 = vmatpush.bf16.msra.mxu3 %v17088_v54  ;;  %v16931_v54 = vld [vmem:[#allocation27 + $0x58] sm:$0xf] }
0x1df4   :  { %v18582_v10 = vpop.eup %18581  ;;  %12931 = vmatpush.bf16.msrb.mxu2 %v16908_v35  ;;  %v17027_v35 = vld [vmem:[#allocation27 + $0x118] sm:$0xf]  ;;  %v16932_v0 = vor.u32 %v18056_v46, %v16931_v54 }
0x1df5   :  { %v12488_v63 = vmul.f32 %v18582_v10, %v18578_v52  ;;  %v16916_v52 = vor.u32 %v18054_v19, %v16915_v31  ;;  %v17128_v10 = vor.u32 %v18100_v39, %v17125_v29  ;;  %v17024_v31 = vor.u32 %v18075_v18, %v17021_v1  ;;  %v16923_v29 = vld [vmem:[#allocation27 + $0x50] sm:$0xf] }
0x1df6   :  { %v17028_v19 = vor.u32 %v18080_v5, %v17027_v35  ;;  %v16960_v39 = vor.u32 %v18059_v22, %v16957_v59 }
0x1df7   :  { %12496 = vperm.xlu1 %18336, %v12488_v63   ;;  %12957 = vmatpush.bf16.msrb.mxu0 %v16916_v52  ;;  %v18095_v63 = vld [vmem:[#allocation27 + $0x1ac] sm:$0xf0]  ;;  %v17029_v52 = vld [vmem:[#allocation27 + $0x138] sm:$0xf0] }
0x1df8   :  { %12932 = vmatpush.bf16.msrb.mxu2 %v16876_v49  ;;  %v17084_v56 = vor.u32 %v18095_v63, %v17083_v42  ;;  %13016 = vmatpush.bf16.msrb.mxu1 %v17128_v10  ;;  %v17032_v4 = vor.u32 %v18076_v60, %v17029_v52  ;;  %v16995_v49 = vld [vmem:[#allocation27 + $0xd8] sm:$0xf]  ;;  %v18055_v42 = vld [vmem:[#allocation27 + $0x6c] sm:$0xf0] }
0x1df9   :  { %12992 = vmatpush.bf16.msra.mxu3 %v17056_v23  ;;  %v16996_v48 = vor.u32 %v18072_v14, %v16995_v49  ;;  %v16899_v23 = vld [vmem:[#allocation27 + $0x18] sm:$0xf]  ;;  %v12577_v14 = vld [vmem:[#allocation29] sm:$0xff] }
0x1dfa   :  { %v12581_v34 = vperm.slane %v12577_v14, 0  ;;  %v12587_v47 = vperm.slane %v12577_v14, 6  ;;  %v12586_v61 = vperm.slane %v12577_v14, 5 }
0x1dfb   :  { %12958 = vmatpush.bf16.msrb.mxu0 %v16884_v24  ;;  %v16997_v24 = vld [vmem:[#allocation27 + $0xf8] sm:$0xf0] }
0x1dfc   :  { %12977 = vmatpush.bf16.msra.mxu2 %v17116_v43  ;;  %13017 = vmatpush.bf16.msrb.mxu1 %v17096_v26  ;;  %v17000_v17 = vor.u32 %v18068_v55, %v16997_v24  ;;  %v16963_v43 = vld [vmem:[#allocation27 + $0x98] sm:$0xf]  ;;  %v16891_v26 = vld [vmem:[#allocation27 + $0x10] sm:$0xf] }
0x1dfd   :  { %12993 = vmatpush.bf16.msra.mxu3 %v17024_v31  ;;  %v16964_v63 = vor.u32 %v18064_v41, %v16963_v43  ;;  %v16892_v62 = vor.u32 %v18047_v40, %v16891_v26 }
0x1dff   :  { %13003 = vmatpush.bf16.msra.mxu0 %v17124_v38  ;;  %v16965_v38 = vld [vmem:[#allocation27 + $0xb8] sm:$0xf0] }
0x1e00   :  { %12978 = vmatpush.bf16.msra.mxu2 %v17084_v56  ;;  %13018 = vmatpush.bf16.msrb.mxu1 %v17064_v33  ;;  %v16968_v56 = vor.u32 %v18060_v36, %v16965_v38  ;;  %v18044_v33 = vld [vmem:[#allocation27 + $0x1c] sm:$0xf] }
0x1e01   :  { %12994 = vmatpush.bf16.msra.mxu3 %v16992_v20  ;;  %v16904_v35 = vor.u32 %v18044_v33, %v16901_v53  ;;  %v12583_v20 = vperm.slane %v12577_v14, 2 }
0x1e03   :  { %13004 = vmatpush.bf16.msra.mxu0 %v17092_v2  ;;  %v16924_v2 = vor.u32 %v18055_v42, %v16923_v29 }
0x1e04   :  { %12979 = vmatpush.bf16.msra.mxu2 %v17052_v11  ;;  %13019 = vmatpush.bf16.msrb.mxu1 %v17032_v4  ;;  %v18043_v11 = vld [vmem:[#allocation27 + $0x14] sm:$0xf] }
0x1e05   :  { %12995 = vmatpush.bf16.msra.mxu3 %v16960_v39  ;;  %v16896_v18 = vor.u32 %v18043_v11, %v16893_v30 }
0x1e07   :  { %13005 = vmatpush.bf16.msra.mxu0 %v17060_v44  ;;  %v18048_v44 = vld [vmem:[#allocation27 + $0x34] sm:$0xf0] }
0x1e08   :  { %12980 = vmatpush.bf16.msra.mxu2 %v17020_v3  ;;  %13020 = vmatpush.bf16.msrb.mxu1 %v17000_v17  ;;  %v16900_v1 = vor.u32 %v18048_v44, %v16899_v23  ;;  %v12582_v17 = vperm.slane %v12577_v14, 1 }
0x1e09   :  { %12996 = vmatpush.bf16.msra.mxu3 %v16928_v57 }
0x1e0b   :  { %13006 = vmatpush.bf16.msra.mxu0 %v17028_v19 }
0x1e0c   :  { %12981 = vmatpush.bf16.msra.mxu2 %v16988_v50  ;;  %13021 = vmatpush.bf16.msrb.mxu1 %v16968_v56  ;;  %v12588_v56 = vperm.slane %v12577_v14, 7 }
0x1e0d   :  { %12997 = vmatpush.bf16.msra.mxu3 %v16896_v18 }
0x1e0f   :  { %13007 = vmatpush.bf16.msra.mxu0 %v16996_v48  ;;  %v12584_v48 = vperm.slane %v12577_v14, 3 }
0x1e10   :  { %12982 = vmatpush.bf16.msra.mxu2 %v16956_v7  ;;  %13022 = vmatpush.bf16.msrb.mxu1 %v16936_v9 }
0x1e13   :  { %13008 = vmatpush.bf16.msra.mxu0 %v16964_v63 }
0x1e14   :  { %12983 = vmatpush.bf16.msra.mxu2 %v16924_v2  ;;  %13023 = vmatpush.bf16.msrb.mxu1 %v16904_v35  ;;  %v12585_v2 = vperm.slane %v12577_v14, 4 }
0x1e17   :  { %13009 = vmatpush.bf16.msra.mxu0 %v16932_v0 }
0x1e18   :  { %12984 = vmatpush.bf16.msra.mxu2 %v16892_v62 }
0x1e1b   :  { %13010 = vmatpush.bf16.msra.mxu0 %v16900_v1 }
0x1e61   :  { %v12492_v25 = vpop.permute.xlu0 %12491 }
0x1e62   :  { %v12499_v51 = vmul.f32 %v12492_v25, %v20415_v6 }
0x1e64   :  { %v12501_v10 = vrot.slane %v12499_v51, 4 }
0x1e66   :  { %v12502_v6 = vadd.f32 %v12501_v10, %v12499_v51 }
0x1e68   :  { %v12503_v21 = vrot.slane %v12502_v6, 2 }
0x1e69   :  { %v12497_v28 = vpop.permute.xlu1 %12496 }
0x1e6a   :  { %v12504_v8 = vadd.f32 %v12503_v21, %v12502_v6  ;;  %v12500_v12 = vmul.f32 %v12497_v28, %v20419_v27 }
0x1e6c   :  { %v12507_v3 = vrot.slane %v12500_v12, 4  ;;  %v12505_v5 = vrot.slane %v12504_v8, 1 }
0x1e6e   :  { %v12508_v31 = vadd.f32 %v12507_v3, %v12500_v12  ;;  %v12506_v60 = vadd.f32 %v12505_v5, %v12504_v8 }
0x1e70   :  { %v12509_v19 = vrot.slane %v12508_v31, 2  ;;  %v12578_v4 = vpack.c.bf16 %v12506_v60, %v12506_v60 }
0x1e72   :  { %v12510_v27 = vadd.f32 %v12509_v19, %v12508_v31  ;;  %v12599_v13 = vunpack.c.l.b16 %v12578_v4 }
0x1e74   :  { %v12511_v52 = vrot.slane %v12510_v27, 1 }
0x1e76   :  { %v12512_v37 = vadd.f32 %v12511_v52, %v12510_v27 }
0x1e78   :  { %v12579_v58 = vpack.c.bf16 %v12512_v37, %v12512_v37 }
0x1e7a   :  { %v12600_v50 = vunpack.c.l.b16 %v12579_v58 }
0x1e7c   :  { %v12602_v15 = vsel %vm12601_vm14, %v12600_v50, %v12599_v13 }
0x1e7d   :  { %v12603_v49 = vpack.c.b16 %v12602_v15, %v12602_v15 }
0x1e7f   :  { %12933 = vmatmul.bf16.vlgmr.msrb.gmra.mxu2 %v12603_v49  ;;  %12946 = vmatmul.bf16.vlgmr.msrb.gmra.mxu3 %v12603_v49 }
0x1e80   :  { %12959 = vmatmul.bf16.vlgmr.msrb.gmra.mxu0 %v12603_v49  ;;  %12972 = vmatmul.bf16.vlgmr.msra.gmra.mxu1 %v12603_v49 }
0x1e8f   :  { %12985 = vmatmul.bf16.vlgmr.msra.gmra.mxu2 %v12603_v49  ;;  %12998 = vmatmul.bf16.vlgmr.msra.gmra.mxu3 %v12603_v49 }
0x1e90   :  { %13011 = vmatmul.bf16.vlgmr.msra.gmra.mxu0 %v12603_v49  ;;  %13024 = vmatmul.bf16.vlgmr.msrb.gmra.mxu1 %v12603_v49 }
0x1efd   :  { %v12960_v55 = vpop.f32.mrf.mxu0  ;;  %v12973_v24 = vpop.f32.mrf.mxu1 }
0x1efe   :  { %v12961_v32 = vadd.f32 %v12960_v55, %v12583_v20  ;;  %v12974_v25 = vadd.f32 %v12973_v24, %v12584_v48 }
0x1f00   :  { %v13038_v51 = vrot.slane %v12961_v32, 4  ;;  %v13039_v43 = vrot.slane %v12974_v25, 2 }
0x1f02   :  { %v12934_v22 = vpop.f32.mrf.mxu2  ;;  %v12947_v59 = vpop.f32.mrf.mxu3  ;;  %v13046_v29 = vsel %vm13045_vm15, %v13038_v51, %v13039_v43 }
0x1f03   :  { %v12948_v41 = vadd.f32 %v12947_v59, %v12582_v17  ;;  %v12935_v36 = vadd.f32 %v12934_v22, %v12581_v34 }
0x1f05   :  { %v13037_v7 = vrot.slane %v12948_v41, 6  ;;  %v12962_v39 = vpop.f32.mrf.mxu0  ;;  %v12975_v38 = vpop.f32.mrf.mxu1 }
0x1f07   :  { %v13044_v42 = vsel %vm13043_vm8, %v12935_v36, %v13037_v7 }
0x1f08   :  { %v13048_v10 = vsel %vm13047_vm0, %v13044_v42, %v13046_v29 }
0x1f09   :  { %13054 = vst [vmem:[#allocation30] sm:$0xff] %v13048_v10 }
0x1f0a   :  { %v12936_v63 = vpop.f32.mrf.mxu2  ;;  %v12949_v45 = vpop.f32.mrf.mxu3 }
0x1f0d   :  { %v13012_v54 = vpop.f32.mrf.mxu0  ;;  %v13025_v46 = vpop.f32.mrf.mxu1 }
0x1f0e   :  { %v13013_v6 = vadd.f32 %v13012_v54, %v12587_v47  ;;  %v13026_v16 = vadd.f32 %v13025_v46, %v12588_v56 }
0x1f10   :  { %v13041_v40 = vrot.slane %v13013_v6, 4  ;;  %v13042_v21 = vrot.slane %v13026_v16, 2 }
0x1f12   :  { %v12986_v57 = vpop.f32.mrf.mxu2  ;;  %v12999_v26 = vpop.f32.mrf.mxu3  ;;  %v13050_v23 = vsel %vm13045_vm15, %v13041_v40, %v13042_v21 }
0x1f13   :  { %v13000_v0 = vadd.f32 %v12999_v26, %v12586_v61  ;;  %v12987_v11 = vadd.f32 %v12986_v57, %v12585_v2 }
0x1f15   :  { %v13040_v30 = vrot.slane %v13000_v0, 6  ;;  %v13014_v28 = vpop.f32.mrf.mxu0  ;;  %v13027_v9 = vpop.f32.mrf.mxu1 }
0x1f17   :  { %v13049_v44 = vsel %vm13043_vm8, %v12987_v11, %v13040_v30 }
0x1f18   :  { %v13051_v8 = vsel %vm13047_vm0, %v13049_v44, %v13050_v23 }
0x1f19   :  { %13055 = vst [vmem:[#allocation30 + $0x8] sm:$0xff] %v13051_v8 }
0x1f1a   :  { %v12988_v12 = vpop.f32.mrf.mxu2  ;;  %v13001_v33 = vpop.f32.mrf.mxu3  ;;  %13066 = dma.vmem_to_hbm [thread:$0]  %s13062_s24, 256, %s13064_s0, [#allocation5]  }
0x1f1b   :  { %19033 = dma.done.wait [#allocation5], 256  }
0x1f1c   :  { %19034 = vsyncadd [#allocation5], 4294967040 }
0x1f1d   :  { %13071 = vsyncpa [#allocation4], 1 }
0x1f1e   :  { %13072 = vsyncpa [#allocation7], 1 }
0x1f1f   :  { %13073 = vsyncpa [#allocation10], 1 }
0x1f20   :  { %13074 = vsyncpa [#allocation13], 1 }
0x1f21   :  { %13075 = vsyncpa [#allocation16], 1 }
0x1f22   :  { %13076 = vsyncpa [#allocation19], 1 }
0x1f23   :  { %13077 = vsyncpa [#allocation22], 1 }
0x1f24   :  { %13078 = vsyncpa [#allocation25], 1 }
0x1f25   :  { %13079 = vsyncpa [#allocation28], 1 }
0x1f26   :  { %13080 = vsyncpa [#allocation5], 1 }

</bundles_post_ra>
